<compile_context>
chip_gen: v6e
topology: v6e:2x2x1
jax: 0.10.0
libtpu: 0.0.40
codegen_flags: <defaults>
</compile_context>

<pallas_src>
import functools

import jax
import jax.numpy as jnp
from jax.experimental import pallas as pl
from jax.experimental.pallas import tpu as pltpu


def _enc_scale_kernel(*refs, H, W, C, has_nin, has_down, neg_slope):
    """Fused EncUp scale: [1x1 nin] -> RNB -> RNB -> [3x3 stride-2 downsample].

    One batch element per grid step; the activation stays in VMEM for the whole scale.

    refs (in order):
      x_ref:  (1, C_in, H*W)   channel-major input (flattened NCHW)
      [wn_ref (C_in, C) bf16, bn_ref (1, C) f32]        if has_nin
      w1_ref (9C, C) bf16, b1_ref (1, C) f32            RNB block 1 (affine pre-folded)
      w2_ref (9C, C) bf16, b2_ref (1, C) f32            RNB block 2
      [wd_ref (9C, Cd) bf16, bd_ref (1, Cd) f32]        if has_down
      h1_ref (1, C, H*W), h2_ref (1, C, H*W)            hs outputs (channel-major)
      [hd_ref (1, Cd, H*W//4)]                          carry to the next scale
      pad_ref (H+2, W+2, C) f32 VMEM scratch            zero-padded activation tile
    """
    it = iter(refs)
    x_ref = next(it)
    if has_nin:
        wn_ref, bn_ref = next(it), next(it)
    w1_ref, b1_ref = next(it), next(it)
    w2_ref, b2_ref = next(it), next(it)
    if has_down:
        wd_ref, bd_ref = next(it), next(it)
    h1_ref, h2_ref = next(it), next(it)
    if has_down:
        hd_ref = next(it)
    pad_ref = next(it)

    HW = H * W

    # Channel-major input (C_in, HW) -> pixel-major (HW, C_in) for the matmuls.
    h = x_ref[0].astype(jnp.float32).T                                  # (HW, C_in)
    if has_nin:
        # nin: 1x1 NormConv2d (affine pre-folded into wn/bn)
        h = jnp.dot(h.astype(jnp.bfloat16), wn_ref[...],
                    preferred_element_type=jnp.float32) + bn_ref[...]   # (HW, C)

    # Zero the halo once per grid step; every conv below only rewrites the interior.
    pad_ref[...] = jnp.zeros_like(pad_ref)

    def conv3x3(a_hwc, w_ref, b_ref):
        """'same' 3x3 conv (affine prefolded) as ONE im2col matmul, stride 1."""
        pad_ref[1:H + 1, 1:W + 1, :] = a_hwc
        padv = pad_ref[...]                                             # (H+2, W+2, C)
        taps = [padv[dy:dy + H, dx:dx + W, :].reshape(HW, C)
                for dy in range(3) for dx in range(3)]
        patches = jnp.concatenate(taps, axis=-1)                        # (HW, 9C)
        return jnp.dot(patches.astype(jnp.bfloat16), w_ref[...],
                       preferred_element_type=jnp.float32) + b_ref[...]

    def rnb(h_flat, w_ref, b_ref):
        # VunetRNB: h + conv3x3(LeakyReLU(h)); the residual uses the pre-activation value.
        a = jnp.where(h_flat > 0, h_flat, neg_slope * h_flat)
        return h_flat + conv3x3(a.reshape(H, W, C), w_ref, b_ref)

    h1 = rnb(h, w1_ref, b1_ref)
    h1_ref[0] = h1.T                      # (C, HW): lane-dense store, already NCHW layout
    h2 = rnb(h1, w2_ref, b2_ref)
    h2_ref[0] = h2.T

    if has_down:
        # 3x3 stride-2 'same' conv evaluated only at the kept (even) output positions:
        # split the padded tile into 4 row/col parity planes with static unit-stride slices,
        # then every tap is a plain window of one plane -> one (Ho*Wo, 9C) im2col matmul.
        Ho, Wo = H // 2, W // 2
        Hq, Wq = (H + 2) // 2, (W + 2) // 2
        pad_ref[1:H + 1, 1:W + 1, :] = h2.reshape(H, W, C)              # no pre-activation
        padv = pad_ref[...]
        cols = [jnp.concatenate(
                    [padv[:, 2 * q + px:2 * q + px + 1, :] for q in range(Wq)], axis=1)
                for px in range(2)]                                      # (H+2, Wq, C)
        planes = [[jnp.concatenate(
                       [cols[px][2 * r + py:2 * r + py + 1] for r in range(Hq)], axis=0)
                   for px in range(2)] for py in range(2)]               # (Hq, Wq, C)
        taps = []
        for dy in range(3):
            for dx in range(3):
                win = planes[dy % 2][dx % 2][dy // 2:dy // 2 + Ho,
                                             dx // 2:dx // 2 + Wo, :]    # (Ho, Wo, C)
                taps.append(win.reshape(Ho * Wo, C))
        patches = jnp.concatenate(taps, axis=-1)                         # (Ho*Wo, 9C)
        hd = jnp.dot(patches.astype(jnp.bfloat16), wd_ref[...],
                     preferred_element_type=jnp.float32) + bd_ref[...]
        hd_ref[0] = hd.T                                                 # (Cd, Ho*Wo)


def enc_up_scale(h_flat, H, W, *, nin_f, blk1_f, blk2_f, down_f, neg_slope=0.01):
    """Run one fused EncUp scale over a channel-major activation (N, C_in, H*W)."""
    N, C_in, HW = h_flat.shape
    assert HW == H * W
    has_nin = nin_f is not None
    has_down = down_f is not None
    C = blk1_f[0].shape[-1]
    if has_down:
        assert H % 2 == 0 and W % 2 == 0

    args = [h_flat]
    in_specs = [pl.BlockSpec((1, C_in, HW), lambda n: (n, 0, 0))]

    def add_conv(wb):
        w, b = wb
        args.extend([w, b])
        # constant index_map -> weights/biases stay VMEM-resident across grid steps
        in_specs.append(pl.BlockSpec(w.shape, lambda n: (0, 0)))
        in_specs.append(pl.BlockSpec(b.shape, lambda n: (0, 0)))

    if has_nin:
        add_conv(nin_f)
    add_conv(blk1_f)
    add_conv(blk2_f)
    if has_down:
        add_conv(down_f)
        C_down = down_f[0].shape[-1]

    out_shapes = [jax.ShapeDtypeStruct((N, C, HW), jnp.float32),
                  jax.ShapeDtypeStruct((N, C, HW), jnp.float32)]
    out_specs = [pl.BlockSpec((1, C, HW), lambda n: (n, 0, 0)),
                 pl.BlockSpec((1, C, HW), lambda n: (n, 0, 0))]
    if has_down:
        out_shapes.append(jax.ShapeDtypeStruct((N, C_down, HW // 4), jnp.float32))
        out_specs.append(pl.BlockSpec((1, C_down, HW // 4), lambda n: (n, 0, 0)))

    kern = functools.partial(_enc_scale_kernel, H=H, W=W, C=C,
                             has_nin=has_nin, has_down=has_down, neg_slope=neg_slope)

    # TODO(synk): at realistic VUnet resolutions add a halo'd spatial row-tile grid axis and
    # set vmem_limit_bytes explicitly (v7x has only 64 MiB VMEM and 2 TensorCores to feed).
    return pl.pallas_call(
        kern,
        out_shape=tuple(out_shapes),
        grid_spec=pltpu.PrefetchScalarGridSpec(
            num_scalar_prefetch=0,
            grid=(N,),                    # fused multi-layer work per step amortizes the
            in_specs=in_specs,            # fixed per-step cost; batch axis stays "parallel"
            out_specs=tuple(out_specs),   # so both v7x TensorCores get work.
            scratch_shapes=[pltpu.VMEM((H + 2, W + 2, C), jnp.float32)],
        ),
        compiler_params=pltpu.CompilerParams(dimension_semantics=("parallel",)),
    )(*args)


def _init_norm_conv(key, cin, cout, k):
    """Deterministic NormConv2d params (HWIO). weight_norm at init == raw weight (g=||v||)."""
    kw, kb = jax.random.split(key)
    fan_in = cin * k * k
    bound = 1.0 / (fan_in ** 0.5)                     # PyTorch Conv2d default init range
    w = jax.random.uniform(kw, (k, k, cin, cout), jnp.float32, -bound, bound)
    b = jax.random.uniform(kb, (1, cout), jnp.float32, -bound, bound)
    return {"w": w, "b": b,
            "gamma": jnp.ones((1, cout), jnp.float32),
            "beta": jnp.zeros((1, cout), jnp.float32)}


def _fold_norm_conv(p):
    """Fold NormConv2d affine into the conv: W' = W*gamma (bf16, im2col (K*K*Cin, Cout)),
    b' = gamma*b + beta (f32). One-time host-side precompute."""
    g, be, b = p["gamma"][0], p["beta"][0], p["b"][0]
    w = (p["w"] * g).reshape(-1, p["w"].shape[-1]).astype(jnp.bfloat16)
    bias = (g * b + be).reshape(1, -1).astype(jnp.float32)
    return w, bias


class EncUpPallas:
    """JAX/Pallas equivalent of EncUp (n_rnb = 2). Consumes/produces NCHW directly."""

    N_RNB = 2

    def __init__(self, key, n_scales, n_filters, max_filters, nf_in=3, dropout_prob=0.0):
        assert dropout_prob == 0.0    # dropout with p=0 is the identity (eval semantics)
        self.n_scales = n_scales
        n_keys = 1 + self.N_RNB * n_scales + max(n_scales - 1, 0)
        keys = iter(jax.random.split(key, n_keys))
        self.nin = _init_norm_conv(next(keys), nf_in, n_filters, 1)
        self.blocks, self.downs, self.channels = [], [], []
        nf = n_filters
        for i in range(n_scales):
            self.channels.append(nf)
            for _ in range(self.N_RNB):
                self.blocks.append(_init_norm_conv(next(keys), nf, nf, 3))
            if i + 1 < n_scales:
                out_c = min(2 * nf, max_filters)
                self.downs.append(_init_norm_conv(next(keys), nf, out_c, 3))
                nf = out_c
        # one-time fold of the NormConv2d affine + im2col weight layout (bf16 MXU operands)
        self.nin_f = _fold_norm_conv(self.nin)
        self.blocks_f = [_fold_norm_conv(p) for p in self.blocks]
        self.downs_f = [_fold_norm_conv(p) for p in self.downs]

    def __call__(self, x_nchw):
        N, C, H, W = x_nchw.shape
        h = x_nchw.reshape(N, C, H * W)      # flattened NCHW == channel-major kernel layout
        hs = []
        for i in range(self.n_scales):
            nf = self.channels[i]
            has_down = i + 1 < self.n_scales
            outs = enc_up_scale(
                h, H, W,
                nin_f=self.nin_f if i == 0 else None,
                blk1_f=self.blocks_f[2 * i], blk2_f=self.blocks_f[2 * i + 1],
                down_f=self.downs_f[i] if has_down else None)
            hs.append(outs[0].reshape(N, nf, H, W))      # metadata-only reshape back to NCHW
            hs.append(outs[1].reshape(N, nf, H, W))
            if has_down:
                H, W = H // 2, W // 2
                h = outs[2]
        return hs


# ----------------------------- pure-JAX f32 reference ---------------------------------------
def _norm_conv_ref(x, p, stride):
    k = p["w"].shape[0]
    w_oihw = jnp.transpose(p["w"], (3, 2, 0, 1))
    y = jax.lax.conv_general_dilated(
        x, w_oihw, window_strides=(stride, stride),
        padding=[(k // 2, k // 2)] * 2,
        dimension_numbers=("NCHW", "OIHW", "NCHW"),
        precision=jax.lax.Precision.HIGHEST)
    cshape = (1, -1, 1, 1)
    return (p["gamma"][0].reshape(cshape) * (y + p["b"][0].reshape(cshape))
            + p["beta"][0].reshape(cshape))


def enc_up_ref(model, x, neg_slope=0.01):
    hs = []
    h = _norm_conv_ref(x, model.nin, 1)
    for i in range(model.n_scales):
        for n in range(model.N_RNB):
            a = jnp.where(h > 0, h, neg_slope * h)
            h = h + _norm_conv_ref(a, model.blocks[2 * i + n], 1)
            hs.append(h)
        if i + 1 < model.n_scales:
            h = _norm_conv_ref(h, model.downs[i], 2)
    return hs


if __name__ == "__main__":
    key = jax.random.PRNGKey(0)
    kx, kp = jax.random.split(key)

    # PyTorch-equivalent NCHW input: (batch=2, nf_in=3, 16, 16)
    x = jax.random.normal(kx, (2, 3, 16, 16), jnp.float32)
    model = EncUpPallas(kp, n_scales=2, n_filters=4, max_filters=8, nf_in=3)

    hs = model(x)
    jax.block_until_ready(hs)

    expected = [(2, 4, 16, 16), (2, 4, 16, 16), (2, 8, 8, 8), (2, 8, 8, 8)]
    assert [tuple(h.shape) for h in hs] == expected, [tuple(h.shape) for h in hs]
    assert all(h.dtype == jnp.float32 for h in hs)

    # numerical sanity check vs. a pure-JAX f32 reference
    # (kernel matmuls run bf16 on the MXU -> loose tolerance)
    hs_ref = enc_up_ref(model, x)
    for got, ref in zip(hs, hs_ref):
        err = float(jnp.max(jnp.abs(got - ref)))
        assert jnp.allclose(got, ref, rtol=1e-1, atol=1e-1), err

    print("KERNEL_OK")
</pallas_src>

<mosaic_0001>
module attributes {stable_mosaic.version = 11 : i64} {
  func.func @_enc_scale_kernel(%arg0: i32, %arg1: memref<1x3x256xf32, #tpu.memory_space<vmem>>, %arg2: memref<3x4xbf16, #tpu.memory_space<vmem>>, %arg3: memref<1x4xf32, #tpu.memory_space<vmem>>, %arg4: memref<36x4xbf16, #tpu.memory_space<vmem>>, %arg5: memref<1x4xf32, #tpu.memory_space<vmem>>, %arg6: memref<36x4xbf16, #tpu.memory_space<vmem>>, %arg7: memref<1x4xf32, #tpu.memory_space<vmem>>, %arg8: memref<36x8xbf16, #tpu.memory_space<vmem>>, %arg9: memref<1x8xf32, #tpu.memory_space<vmem>>, %arg10: memref<1x4x256xf32, #tpu.memory_space<vmem>>, %arg11: memref<1x4x256xf32, #tpu.memory_space<vmem>>, %arg12: memref<1x8x64xf32, #tpu.memory_space<vmem>>, %arg13: memref<18x18x4xf32, #tpu.memory_space<vmem>>) attributes {dimension_semantics = [#tpu.dimension_semantics<parallel>], iteration_bounds = array<i64: 2>, scalar_prefetch = 0 : i64, scratch_operands = 1 : i64, tpu.core_type = #tpu.core_type<tc>, window_params = [{transform_indices = @transform_0, window_bounds = array<i64: 1, 3, 256>}, {pipeline_mode = #tpu.pipeline_mode<synchronous>, transform_indices = @transform_1, window_bounds = array<i64: 3, 4>}, {pipeline_mode = #tpu.pipeline_mode<synchronous>, transform_indices = @transform_2, window_bounds = array<i64: 1, 4>}, {pipeline_mode = #tpu.pipeline_mode<synchronous>, transform_indices = @transform_3, window_bounds = array<i64: 36, 4>}, {pipeline_mode = #tpu.pipeline_mode<synchronous>, transform_indices = @transform_4, window_bounds = array<i64: 1, 4>}, {pipeline_mode = #tpu.pipeline_mode<synchronous>, transform_indices = @transform_5, window_bounds = array<i64: 36, 4>}, {pipeline_mode = #tpu.pipeline_mode<synchronous>, transform_indices = @transform_6, window_bounds = array<i64: 1, 4>}, {pipeline_mode = #tpu.pipeline_mode<synchronous>, transform_indices = @transform_7, window_bounds = array<i64: 36, 8>}, {pipeline_mode = #tpu.pipeline_mode<synchronous>, transform_indices = @transform_8, window_bounds = array<i64: 1, 8>}, {transform_indices = @transform_9, window_bounds = array<i64: 1, 4, 256>}, {transform_indices = @transform_10, window_bounds = array<i64: 1, 4, 256>}, {transform_indices = @transform_11, window_bounds = array<i64: 1, 8, 64>}]} {
    %c0 = arith.constant 0 : index
    %c0_0 = arith.constant 0 : index
    %c0_1 = arith.constant 0 : index
    %0 = vector.load %arg1[%c0, %c0_0, %c0_1] : memref<1x3x256xf32, #tpu.memory_space<vmem>>, vector<1x3x256xf32>
    %1 = vector.shape_cast %0 : vector<1x3x256xf32> to vector<3x256xf32>
    %2 = tpu.transpose %1, [1, 0] : vector<3x256xf32> -> vector<256x3xf32>
    %3 = arith.truncf %2 : vector<256x3xf32> to vector<256x3xbf16>
    %c0_2 = arith.constant 0 : index
    %c0_3 = arith.constant 0 : index
    %4 = vector.load %arg2[%c0_2, %c0_3] : memref<3x4xbf16, #tpu.memory_space<vmem>>, vector<3x4xbf16>
    %cst = arith.constant dense<0.000000e+00> : vector<256x4xf32>
    %5 = tpu.matmul %3, %4, %cst {dimension_numbers = #tpu.dot_dimension_numbers<[1], [0], [0], [1], [0, 0, 1, 1], [], []>} : vector<256x3xbf16>, vector<3x4xbf16>, vector<256x4xf32> -> vector<256x4xf32>
    %c0_4 = arith.constant 0 : index
    %c0_5 = arith.constant 0 : index
    %6 = vector.load %arg3[%c0_4, %c0_5] : memref<1x4xf32, #tpu.memory_space<vmem>>, vector<1x4xf32>
    %7 = vector.broadcast %6 : vector<1x4xf32> to vector<256x4xf32>
    %8 = arith.addf %5, %7 : vector<256x4xf32>
    %cst_6 = arith.constant 0.000000e+00 : f32
    %9 = vector.broadcast %cst_6 : f32 to vector<18x18x4xf32>
    %c0_7 = arith.constant 0 : index
    %c0_8 = arith.constant 0 : index
    %c0_9 = arith.constant 0 : index
    %10 = vector.load %arg13[%c0_7, %c0_8, %c0_9] : memref<18x18x4xf32, #tpu.memory_space<vmem>>, vector<18x18x4xf32>
    tpu.vector_store %arg13[%c0_7, %c0_8, %c0_9], %9 {strides = array<i32>} : memref<18x18x4xf32, #tpu.memory_space<vmem>>, vector<18x18x4xf32>,
    %cst_10 = arith.constant 0.000000e+00 : f32
    %11 = vector.broadcast %cst_10 : f32 to vector<256x4xf32>
    %12 = arith.cmpf ogt, %8, %11 : vector<256x4xf32>
    %cst_11 = arith.constant 0.00999999977 : f32
    %13 = vector.broadcast %cst_11 : f32 to vector<256x4xf32>
    %14 = arith.mulf %13, %8 : vector<256x4xf32>
    %15 = arith.select %12, %8, %14 : vector<256x4xi1>, vector<256x4xf32>
    %16 = vector.shape_cast %15 : vector<256x4xf32> to vector<16x16x4xf32>
    %c1 = arith.constant 1 : index
    %c1_12 = arith.constant 1 : index
    %c0_13 = arith.constant 0 : index
    %17 = vector.load %arg13[%c1, %c1_12, %c0_13] : memref<18x18x4xf32, #tpu.memory_space<vmem>>, vector<16x16x4xf32>
    tpu.vector_store %arg13[%c1, %c1_12, %c0_13], %16 {strides = array<i32>} : memref<18x18x4xf32, #tpu.memory_space<vmem>>, vector<16x16x4xf32>,
    %c0_14 = arith.constant 0 : index
    %c0_15 = arith.constant 0 : index
    %c0_16 = arith.constant 0 : index
    %18 = vector.load %arg13[%c0_14, %c0_15, %c0_16] : memref<18x18x4xf32, #tpu.memory_space<vmem>>, vector<18x18x4xf32>
    %19 = vector.extract_strided_slice %18 {offsets = [0, 0, 0], sizes = [16, 16, 4], strides = [1, 1, 1]} : vector<18x18x4xf32> to vector<16x16x4xf32>
    %20 = vector.shape_cast %19 : vector<16x16x4xf32> to vector<256x4xf32>
    %21 = vector.extract_strided_slice %18 {offsets = [0, 1, 0], sizes = [16, 16, 4], strides = [1, 1, 1]} : vector<18x18x4xf32> to vector<16x16x4xf32>
    %22 = vector.shape_cast %21 : vector<16x16x4xf32> to vector<256x4xf32>
    %23 = vector.extract_strided_slice %18 {offsets = [0, 2, 0], sizes = [16, 16, 4], strides = [1, 1, 1]} : vector<18x18x4xf32> to vector<16x16x4xf32>
    %24 = vector.shape_cast %23 : vector<16x16x4xf32> to vector<256x4xf32>
    %25 = vector.extract_strided_slice %18 {offsets = [1, 0, 0], sizes = [16, 16, 4], strides = [1, 1, 1]} : vector<18x18x4xf32> to vector<16x16x4xf32>
    %26 = vector.shape_cast %25 : vector<16x16x4xf32> to vector<256x4xf32>
    %27 = vector.extract_strided_slice %18 {offsets = [1, 1, 0], sizes = [16, 16, 4], strides = [1, 1, 1]} : vector<18x18x4xf32> to vector<16x16x4xf32>
    %28 = vector.shape_cast %27 : vector<16x16x4xf32> to vector<256x4xf32>
    %29 = vector.extract_strided_slice %18 {offsets = [1, 2, 0], sizes = [16, 16, 4], strides = [1, 1, 1]} : vector<18x18x4xf32> to vector<16x16x4xf32>
    %30 = vector.shape_cast %29 : vector<16x16x4xf32> to vector<256x4xf32>
    %31 = vector.extract_strided_slice %18 {offsets = [2, 0, 0], sizes = [16, 16, 4], strides = [1, 1, 1]} : vector<18x18x4xf32> to vector<16x16x4xf32>
    %32 = vector.shape_cast %31 : vector<16x16x4xf32> to vector<256x4xf32>
    %33 = vector.extract_strided_slice %18 {offsets = [2, 1, 0], sizes = [16, 16, 4], strides = [1, 1, 1]} : vector<18x18x4xf32> to vector<16x16x4xf32>
    %34 = vector.shape_cast %33 : vector<16x16x4xf32> to vector<256x4xf32>
    %35 = vector.extract_strided_slice %18 {offsets = [2, 2, 0], sizes = [16, 16, 4], strides = [1, 1, 1]} : vector<18x18x4xf32> to vector<16x16x4xf32>
    %36 = vector.shape_cast %35 : vector<16x16x4xf32> to vector<256x4xf32>
    %37 = tpu.concatenate %20, %22, %24, %26, %28, %30, %32, %34, %36 in 1 : vector<256x4xf32>, vector<256x4xf32>, vector<256x4xf32>, vector<256x4xf32>, vector<256x4xf32>, vector<256x4xf32>, vector<256x4xf32>, vector<256x4xf32>, vector<256x4xf32> -> vector<256x36xf32>
    %38 = arith.truncf %37 : vector<256x36xf32> to vector<256x36xbf16>
    %c0_17 = arith.constant 0 : index
    %c0_18 = arith.constant 0 : index
    %39 = vector.load %arg4[%c0_17, %c0_18] : memref<36x4xbf16, #tpu.memory_space<vmem>>, vector<36x4xbf16>
    %cst_19 = arith.constant dense<0.000000e+00> : vector<256x4xf32>
    %40 = tpu.matmul %38, %39, %cst_19 {dimension_numbers = #tpu.dot_dimension_numbers<[1], [0], [0], [1], [0, 0, 1, 1], [], []>} : vector<256x36xbf16>, vector<36x4xbf16>, vector<256x4xf32> -> vector<256x4xf32>
    %c0_20 = arith.constant 0 : index
    %c0_21 = arith.constant 0 : index
    %41 = vector.load %arg5[%c0_20, %c0_21] : memref<1x4xf32, #tpu.memory_space<vmem>>, vector<1x4xf32>
    %42 = vector.broadcast %41 : vector<1x4xf32> to vector<256x4xf32>
    %43 = arith.addf %40, %42 : vector<256x4xf32>
    %44 = arith.addf %8, %43 : vector<256x4xf32>
    %45 = tpu.transpose %44, [1, 0] : vector<256x4xf32> -> vector<4x256xf32>
    %c0_22 = arith.constant 0 : index
    %c0_23 = arith.constant 0 : index
    %c0_24 = arith.constant 0 : index
    %46 = vector.load %arg10[%c0_22, %c0_23, %c0_24] : memref<1x4x256xf32, #tpu.memory_space<vmem>>, vector<1x4x256xf32>
    %47 = vector.shape_cast %46 : vector<1x4x256xf32> to vector<4x256xf32>
    %48 = vector.shape_cast %45 : vector<4x256xf32> to vector<1x4x256xf32>
    tpu.vector_store %arg10[%c0_22, %c0_23, %c0_24], %48 {strides = array<i32>} : memref<1x4x256xf32, #tpu.memory_space<vmem>>, vector<1x4x256xf32>,
    %cst_25 = arith.constant 0.000000e+00 : f32
    %49 = vector.broadcast %cst_25 : f32 to vector<256x4xf32>
    %50 = arith.cmpf ogt, %44, %49 : vector<256x4xf32>
    %cst_26 = arith.constant 0.00999999977 : f32
    %51 = vector.broadcast %cst_26 : f32 to vector<256x4xf32>
    %52 = arith.mulf %51, %44 : vector<256x4xf32>
    %53 = arith.select %50, %44, %52 : vector<256x4xi1>, vector<256x4xf32>
    %54 = vector.shape_cast %53 : vector<256x4xf32> to vector<16x16x4xf32>
    %c1_27 = arith.constant 1 : index
    %c1_28 = arith.constant 1 : index
    %c0_29 = arith.constant 0 : index
    %55 = vector.load %arg13[%c1_27, %c1_28, %c0_29] : memref<18x18x4xf32, #tpu.memory_space<vmem>>, vector<16x16x4xf32>
    tpu.vector_store %arg13[%c1_27, %c1_28, %c0_29], %54 {strides = array<i32>} : memref<18x18x4xf32, #tpu.memory_space<vmem>>, vector<16x16x4xf32>,
    %c0_30 = arith.constant 0 : index
    %c0_31 = arith.constant 0 : index
    %c0_32 = arith.constant 0 : index
    %56 = vector.load %arg13[%c0_30, %c0_31, %c0_32] : memref<18x18x4xf32, #tpu.memory_space<vmem>>, vector<18x18x4xf32>
    %57 = vector.extract_strided_slice %56 {offsets = [0, 0, 0], sizes = [16, 16, 4], strides = [1, 1, 1]} : vector<18x18x4xf32> to vector<16x16x4xf32>
    %58 = vector.shape_cast %57 : vector<16x16x4xf32> to vector<256x4xf32>
    %59 = vector.extract_strided_slice %56 {offsets = [0, 1, 0], sizes = [16, 16, 4], strides = [1, 1, 1]} : vector<18x18x4xf32> to vector<16x16x4xf32>
    %60 = vector.shape_cast %59 : vector<16x16x4xf32> to vector<256x4xf32>
    %61 = vector.extract_strided_slice %56 {offsets = [0, 2, 0], sizes = [16, 16, 4], strides = [1, 1, 1]} : vector<18x18x4xf32> to vector<16x16x4xf32>
    %62 = vector.shape_cast %61 : vector<16x16x4xf32> to vector<256x4xf32>
    %63 = vector.extract_strided_slice %56 {offsets = [1, 0, 0], sizes = [16, 16, 4], strides = [1, 1, 1]} : vector<18x18x4xf32> to vector<16x16x4xf32>
    %64 = vector.shape_cast %63 : vector<16x16x4xf32> to vector<256x4xf32>
    %65 = vector.extract_strided_slice %56 {offsets = [1, 1, 0], sizes = [16, 16, 4], strides = [1, 1, 1]} : vector<18x18x4xf32> to vector<16x16x4xf32>
    %66 = vector.shape_cast %65 : vector<16x16x4xf32> to vector<256x4xf32>
    %67 = vector.extract_strided_slice %56 {offsets = [1, 2, 0], sizes = [16, 16, 4], strides = [1, 1, 1]} : vector<18x18x4xf32> to vector<16x16x4xf32>
    %68 = vector.shape_cast %67 : vector<16x16x4xf32> to vector<256x4xf32>
    %69 = vector.extract_strided_slice %56 {offsets = [2, 0, 0], sizes = [16, 16, 4], strides = [1, 1, 1]} : vector<18x18x4xf32> to vector<16x16x4xf32>
    %70 = vector.shape_cast %69 : vector<16x16x4xf32> to vector<256x4xf32>
    %71 = vector.extract_strided_slice %56 {offsets = [2, 1, 0], sizes = [16, 16, 4], strides = [1, 1, 1]} : vector<18x18x4xf32> to vector<16x16x4xf32>
    %72 = vector.shape_cast %71 : vector<16x16x4xf32> to vector<256x4xf32>
    %73 = vector.extract_strided_slice %56 {offsets = [2, 2, 0], sizes = [16, 16, 4], strides = [1, 1, 1]} : vector<18x18x4xf32> to vector<16x16x4xf32>
    %74 = vector.shape_cast %73 : vector<16x16x4xf32> to vector<256x4xf32>
    %75 = tpu.concatenate %58, %60, %62, %64, %66, %68, %70, %72, %74 in 1 : vector<256x4xf32>, vector<256x4xf32>, vector<256x4xf32>, vector<256x4xf32>, vector<256x4xf32>, vector<256x4xf32>, vector<256x4xf32>, vector<256x4xf32>, vector<256x4xf32> -> vector<256x36xf32>
    %76 = arith.truncf %75 : vector<256x36xf32> to vector<256x36xbf16>
    %c0_33 = arith.constant 0 : index
    %c0_34 = arith.constant 0 : index
    %77 = vector.load %arg6[%c0_33, %c0_34] : memref<36x4xbf16, #tpu.memory_space<vmem>>, vector<36x4xbf16>
    %cst_35 = arith.constant dense<0.000000e+00> : vector<256x4xf32>
    %78 = tpu.matmul %76, %77, %cst_35 {dimension_numbers = #tpu.dot_dimension_numbers<[1], [0], [0], [1], [0, 0, 1, 1], [], []>} : vector<256x36xbf16>, vector<36x4xbf16>, vector<256x4xf32> -> vector<256x4xf32>
    %c0_36 = arith.constant 0 : index
    %c0_37 = arith.constant 0 : index
    %79 = vector.load %arg7[%c0_36, %c0_37] : memref<1x4xf32, #tpu.memory_space<vmem>>, vector<1x4xf32>
    %80 = vector.broadcast %79 : vector<1x4xf32> to vector<256x4xf32>
    %81 = arith.addf %78, %80 : vector<256x4xf32>
    %82 = arith.addf %44, %81 : vector<256x4xf32>
    %83 = tpu.transpose %82, [1, 0] : vector<256x4xf32> -> vector<4x256xf32>
    %c0_38 = arith.constant 0 : index
    %c0_39 = arith.constant 0 : index
    %c0_40 = arith.constant 0 : index
    %84 = vector.load %arg11[%c0_38, %c0_39, %c0_40] : memref<1x4x256xf32, #tpu.memory_space<vmem>>, vector<1x4x256xf32>
    %85 = vector.shape_cast %84 : vector<1x4x256xf32> to vector<4x256xf32>
    %86 = vector.shape_cast %83 : vector<4x256xf32> to vector<1x4x256xf32>
    tpu.vector_store %arg11[%c0_38, %c0_39, %c0_40], %86 {strides = array<i32>} : memref<1x4x256xf32, #tpu.memory_space<vmem>>, vector<1x4x256xf32>,
    %87 = vector.shape_cast %82 : vector<256x4xf32> to vector<16x16x4xf32>
    %c1_41 = arith.constant 1 : index
    %c1_42 = arith.constant 1 : index
    %c0_43 = arith.constant 0 : index
    %88 = vector.load %arg13[%c1_41, %c1_42, %c0_43] : memref<18x18x4xf32, #tpu.memory_space<vmem>>, vector<16x16x4xf32>
    tpu.vector_store %arg13[%c1_41, %c1_42, %c0_43], %87 {strides = array<i32>} : memref<18x18x4xf32, #tpu.memory_space<vmem>>, vector<16x16x4xf32>,
    %c0_44 = arith.constant 0 : index
    %c0_45 = arith.constant 0 : index
    %c0_46 = arith.constant 0 : index
    %89 = vector.load %arg13[%c0_44, %c0_45, %c0_46] : memref<18x18x4xf32, #tpu.memory_space<vmem>>, vector<18x18x4xf32>
    %90 = vector.extract_strided_slice %89 {offsets = [0, 0, 0], sizes = [18, 1, 4], strides = [1, 1, 1]} : vector<18x18x4xf32> to vector<18x1x4xf32>
    %91 = vector.extract_strided_slice %89 {offsets = [0, 2, 0], sizes = [18, 1, 4], strides = [1, 1, 1]} : vector<18x18x4xf32> to vector<18x1x4xf32>
    %92 = vector.extract_strided_slice %89 {offsets = [0, 4, 0], sizes = [18, 1, 4], strides = [1, 1, 1]} : vector<18x18x4xf32> to vector<18x1x4xf32>
    %93 = vector.extract_strided_slice %89 {offsets = [0, 6, 0], sizes = [18, 1, 4], strides = [1, 1, 1]} : vector<18x18x4xf32> to vector<18x1x4xf32>
    %94 = vector.extract_strided_slice %89 {offsets = [0, 8, 0], sizes = [18, 1, 4], strides = [1, 1, 1]} : vector<18x18x4xf32> to vector<18x1x4xf32>
    %95 = vector.extract_strided_slice %89 {offsets = [0, 10, 0], sizes = [18, 1, 4], strides = [1, 1, 1]} : vector<18x18x4xf32> to vector<18x1x4xf32>
    %96 = vector.extract_strided_slice %89 {offsets = [0, 12, 0], sizes = [18, 1, 4], strides = [1, 1, 1]} : vector<18x18x4xf32> to vector<18x1x4xf32>
    %97 = vector.extract_strided_slice %89 {offsets = [0, 14, 0], sizes = [18, 1, 4], strides = [1, 1, 1]} : vector<18x18x4xf32> to vector<18x1x4xf32>
    %98 = vector.extract_strided_slice %89 {offsets = [0, 16, 0], sizes = [18, 1, 4], strides = [1, 1, 1]} : vector<18x18x4xf32> to vector<18x1x4xf32>
    %99 = tpu.concatenate %90, %91, %92, %93, %94, %95, %96, %97, %98 in 1 : vector<18x1x4xf32>, vector<18x1x4xf32>, vector<18x1x4xf32>, vector<18x1x4xf32>, vector<18x1x4xf32>, vector<18x1x4xf32>, vector<18x1x4xf32>, vector<18x1x4xf32>, vector<18x1x4xf32> -> vector<18x9x4xf32>
    %100 = vector.extract_strided_slice %89 {offsets = [0, 1, 0], sizes = [18, 1, 4], strides = [1, 1, 1]} : vector<18x18x4xf32> to vector<18x1x4xf32>
    %101 = vector.extract_strided_slice %89 {offsets = [0, 3, 0], sizes = [18, 1, 4], strides = [1, 1, 1]} : vector<18x18x4xf32> to vector<18x1x4xf32>
    %102 = vector.extract_strided_slice %89 {offsets = [0, 5, 0], sizes = [18, 1, 4], strides = [1, 1, 1]} : vector<18x18x4xf32> to vector<18x1x4xf32>
    %103 = vector.extract_strided_slice %89 {offsets = [0, 7, 0], sizes = [18, 1, 4], strides = [1, 1, 1]} : vector<18x18x4xf32> to vector<18x1x4xf32>
    %104 = vector.extract_strided_slice %89 {offsets = [0, 9, 0], sizes = [18, 1, 4], strides = [1, 1, 1]} : vector<18x18x4xf32> to vector<18x1x4xf32>
    %105 = vector.extract_strided_slice %89 {offsets = [0, 11, 0], sizes = [18, 1, 4], strides = [1, 1, 1]} : vector<18x18x4xf32> to vector<18x1x4xf32>
    %106 = vector.extract_strided_slice %89 {offsets = [0, 13, 0], sizes = [18, 1, 4], strides = [1, 1, 1]} : vector<18x18x4xf32> to vector<18x1x4xf32>
    %107 = vector.extract_strided_slice %89 {offsets = [0, 15, 0], sizes = [18, 1, 4], strides = [1, 1, 1]} : vector<18x18x4xf32> to vector<18x1x4xf32>
    %108 = vector.extract_strided_slice %89 {offsets = [0, 17, 0], sizes = [18, 1, 4], strides = [1, 1, 1]} : vector<18x18x4xf32> to vector<18x1x4xf32>
    %109 = tpu.concatenate %100, %101, %102, %103, %104, %105, %106, %107, %108 in 1 : vector<18x1x4xf32>, vector<18x1x4xf32>, vector<18x1x4xf32>, vector<18x1x4xf32>, vector<18x1x4xf32>, vector<18x1x4xf32>, vector<18x1x4xf32>, vector<18x1x4xf32>, vector<18x1x4xf32> -> vector<18x9x4xf32>
    %110 = vector.extract_strided_slice %99 {offsets = [0, 0, 0], sizes = [1, 9, 4], strides = [1, 1, 1]} : vector<18x9x4xf32> to vector<1x9x4xf32>
    %111 = vector.extract_strided_slice %99 {offsets = [2, 0, 0], sizes = [1, 9, 4], strides = [1, 1, 1]} : vector<18x9x4xf32> to vector<1x9x4xf32>
    %112 = vector.extract_strided_slice %99 {offsets = [4, 0, 0], sizes = [1, 9, 4], strides = [1, 1, 1]} : vector<18x9x4xf32> to vector<1x9x4xf32>
    %113 = vector.extract_strided_slice %99 {offsets = [6, 0, 0], sizes = [1, 9, 4], strides = [1, 1, 1]} : vector<18x9x4xf32> to vector<1x9x4xf32>
    %114 = vector.extract_strided_slice %99 {offsets = [8, 0, 0], sizes = [1, 9, 4], strides = [1, 1, 1]} : vector<18x9x4xf32> to vector<1x9x4xf32>
    %115 = vector.extract_strided_slice %99 {offsets = [10, 0, 0], sizes = [1, 9, 4], strides = [1, 1, 1]} : vector<18x9x4xf32> to vector<1x9x4xf32>
    %116 = vector.extract_strided_slice %99 {offsets = [12, 0, 0], sizes = [1, 9, 4], strides = [1, 1, 1]} : vector<18x9x4xf32> to vector<1x9x4xf32>
    %117 = vector.extract_strided_slice %99 {offsets = [14, 0, 0], sizes = [1, 9, 4], strides = [1, 1, 1]} : vector<18x9x4xf32> to vector<1x9x4xf32>
    %118 = vector.extract_strided_slice %99 {offsets = [16, 0, 0], sizes = [1, 9, 4], strides = [1, 1, 1]} : vector<18x9x4xf32> to vector<1x9x4xf32>
    %119 = tpu.concatenate %110, %111, %112, %113, %114, %115, %116, %117, %118 in 0 : vector<1x9x4xf32>, vector<1x9x4xf32>, vector<1x9x4xf32>, vector<1x9x4xf32>, vector<1x9x4xf32>, vector<1x9x4xf32>, vector<1x9x4xf32>, vector<1x9x4xf32>, vector<1x9x4xf32> -> vector<9x9x4xf32>
    %120 = vector.extract_strided_slice %109 {offsets = [0, 0, 0], sizes = [1, 9, 4], strides = [1, 1, 1]} : vector<18x9x4xf32> to vector<1x9x4xf32>
    %121 = vector.extract_strided_slice %109 {offsets = [2, 0, 0], sizes = [1, 9, 4], strides = [1, 1, 1]} : vector<18x9x4xf32> to vector<1x9x4xf32>
    %122 = vector.extract_strided_slice %109 {offsets = [4, 0, 0], sizes = [1, 9, 4], strides = [1, 1, 1]} : vector<18x9x4xf32> to vector<1x9x4xf32>
    %123 = vector.extract_strided_slice %109 {offsets = [6, 0, 0], sizes = [1, 9, 4], strides = [1, 1, 1]} : vector<18x9x4xf32> to vector<1x9x4xf32>
    %124 = vector.extract_strided_slice %109 {offsets = [8, 0, 0], sizes = [1, 9, 4], strides = [1, 1, 1]} : vector<18x9x4xf32> to vector<1x9x4xf32>
    %125 = vector.extract_strided_slice %109 {offsets = [10, 0, 0], sizes = [1, 9, 4], strides = [1, 1, 1]} : vector<18x9x4xf32> to vector<1x9x4xf32>
    %126 = vector.extract_strided_slice %109 {offsets = [12, 0, 0], sizes = [1, 9, 4], strides = [1, 1, 1]} : vector<18x9x4xf32> to vector<1x9x4xf32>
    %127 = vector.extract_strided_slice %109 {offsets = [14, 0, 0], sizes = [1, 9, 4], strides = [1, 1, 1]} : vector<18x9x4xf32> to vector<1x9x4xf32>
    %128 = vector.extract_strided_slice %109 {offsets = [16, 0, 0], sizes = [1, 9, 4], strides = [1, 1, 1]} : vector<18x9x4xf32> to vector<1x9x4xf32>
    %129 = tpu.concatenate %120, %121, %122, %123, %124, %125, %126, %127, %128 in 0 : vector<1x9x4xf32>, vector<1x9x4xf32>, vector<1x9x4xf32>, vector<1x9x4xf32>, vector<1x9x4xf32>, vector<1x9x4xf32>, vector<1x9x4xf32>, vector<1x9x4xf32>, vector<1x9x4xf32> -> vector<9x9x4xf32>
    %130 = vector.extract_strided_slice %99 {offsets = [1, 0, 0], sizes = [1, 9, 4], strides = [1, 1, 1]} : vector<18x9x4xf32> to vector<1x9x4xf32>
    %131 = vector.extract_strided_slice %99 {offsets = [3, 0, 0], sizes = [1, 9, 4], strides = [1, 1, 1]} : vector<18x9x4xf32> to vector<1x9x4xf32>
    %132 = vector.extract_strided_slice %99 {offsets = [5, 0, 0], sizes = [1, 9, 4], strides = [1, 1, 1]} : vector<18x9x4xf32> to vector<1x9x4xf32>
    %133 = vector.extract_strided_slice %99 {offsets = [7, 0, 0], sizes = [1, 9, 4], strides = [1, 1, 1]} : vector<18x9x4xf32> to vector<1x9x4xf32>
    %134 = vector.extract_strided_slice %99 {offsets = [9, 0, 0], sizes = [1, 9, 4], strides = [1, 1, 1]} : vector<18x9x4xf32> to vector<1x9x4xf32>
    %135 = vector.extract_strided_slice %99 {offsets = [11, 0, 0], sizes = [1, 9, 4], strides = [1, 1, 1]} : vector<18x9x4xf32> to vector<1x9x4xf32>
    %136 = vector.extract_strided_slice %99 {offsets = [13, 0, 0], sizes = [1, 9, 4], strides = [1, 1, 1]} : vector<18x9x4xf32> to vector<1x9x4xf32>
    %137 = vector.extract_strided_slice %99 {offsets = [15, 0, 0], sizes = [1, 9, 4], strides = [1, 1, 1]} : vector<18x9x4xf32> to vector<1x9x4xf32>
    %138 = vector.extract_strided_slice %99 {offsets = [17, 0, 0], sizes = [1, 9, 4], strides = [1, 1, 1]} : vector<18x9x4xf32> to vector<1x9x4xf32>
    %139 = tpu.concatenate %130, %131, %132, %133, %134, %135, %136, %137, %138 in 0 : vector<1x9x4xf32>, vector<1x9x4xf32>, vector<1x9x4xf32>, vector<1x9x4xf32>, vector<1x9x4xf32>, vector<1x9x4xf32>, vector<1x9x4xf32>, vector<1x9x4xf32>, vector<1x9x4xf32> -> vector<9x9x4xf32>
    %140 = vector.extract_strided_slice %109 {offsets = [1, 0, 0], sizes = [1, 9, 4], strides = [1, 1, 1]} : vector<18x9x4xf32> to vector<1x9x4xf32>
    %141 = vector.extract_strided_slice %109 {offsets = [3, 0, 0], sizes = [1, 9, 4], strides = [1, 1, 1]} : vector<18x9x4xf32> to vector<1x9x4xf32>
    %142 = vector.extract_strided_slice %109 {offsets = [5, 0, 0], sizes = [1, 9, 4], strides = [1, 1, 1]} : vector<18x9x4xf32> to vector<1x9x4xf32>
    %143 = vector.extract_strided_slice %109 {offsets = [7, 0, 0], sizes = [1, 9, 4], strides = [1, 1, 1]} : vector<18x9x4xf32> to vector<1x9x4xf32>
    %144 = vector.extract_strided_slice %109 {offsets = [9, 0, 0], sizes = [1, 9, 4], strides = [1, 1, 1]} : vector<18x9x4xf32> to vector<1x9x4xf32>
    %145 = vector.extract_strided_slice %109 {offsets = [11, 0, 0], sizes = [1, 9, 4], strides = [1, 1, 1]} : vector<18x9x4xf32> to vector<1x9x4xf32>
    %146 = vector.extract_strided_slice %109 {offsets = [13, 0, 0], sizes = [1, 9, 4], strides = [1, 1, 1]} : vector<18x9x4xf32> to vector<1x9x4xf32>
    %147 = vector.extract_strided_slice %109 {offsets = [15, 0, 0], sizes = [1, 9, 4], strides = [1, 1, 1]} : vector<18x9x4xf32> to vector<1x9x4xf32>
    %148 = vector.extract_strided_slice %109 {offsets = [17, 0, 0], sizes = [1, 9, 4], strides = [1, 1, 1]} : vector<18x9x4xf32> to vector<1x9x4xf32>
    %149 = tpu.concatenate %140, %141, %142, %143, %144, %145, %146, %147, %148 in 0 : vector<1x9x4xf32>, vector<1x9x4xf32>, vector<1x9x4xf32>, vector<1x9x4xf32>, vector<1x9x4xf32>, vector<1x9x4xf32>, vector<1x9x4xf32>, vector<1x9x4xf32>, vector<1x9x4xf32> -> vector<9x9x4xf32>
    %150 = vector.extract_strided_slice %119 {offsets = [0, 0, 0], sizes = [8, 8, 4], strides = [1, 1, 1]} : vector<9x9x4xf32> to vector<8x8x4xf32>
    %151 = vector.shape_cast %150 : vector<8x8x4xf32> to vector<64x4xf32>
    %152 = vector.extract_strided_slice %129 {offsets = [0, 0, 0], sizes = [8, 8, 4], strides = [1, 1, 1]} : vector<9x9x4xf32> to vector<8x8x4xf32>
    %153 = vector.shape_cast %152 : vector<8x8x4xf32> to vector<64x4xf32>
    %154 = vector.extract_strided_slice %119 {offsets = [0, 1, 0], sizes = [8, 8, 4], strides = [1, 1, 1]} : vector<9x9x4xf32> to vector<8x8x4xf32>
    %155 = vector.shape_cast %154 : vector<8x8x4xf32> to vector<64x4xf32>
    %156 = vector.extract_strided_slice %139 {offsets = [0, 0, 0], sizes = [8, 8, 4], strides = [1, 1, 1]} : vector<9x9x4xf32> to vector<8x8x4xf32>
    %157 = vector.shape_cast %156 : vector<8x8x4xf32> to vector<64x4xf32>
    %158 = vector.extract_strided_slice %149 {offsets = [0, 0, 0], sizes = [8, 8, 4], strides = [1, 1, 1]} : vector<9x9x4xf32> to vector<8x8x4xf32>
    %159 = vector.shape_cast %158 : vector<8x8x4xf32> to vector<64x4xf32>
    %160 = vector.extract_strided_slice %139 {offsets = [0, 1, 0], sizes = [8, 8, 4], strides = [1, 1, 1]} : vector<9x9x4xf32> to vector<8x8x4xf32>
    %161 = vector.shape_cast %160 : vector<8x8x4xf32> to vector<64x4xf32>
    %162 = vector.extract_strided_slice %119 {offsets = [1, 0, 0], sizes = [8, 8, 4], strides = [1, 1, 1]} : vector<9x9x4xf32> to vector<8x8x4xf32>
    %163 = vector.shape_cast %162 : vector<8x8x4xf32> to vector<64x4xf32>
    %164 = vector.extract_strided_slice %129 {offsets = [1, 0, 0], sizes = [8, 8, 4], strides = [1, 1, 1]} : vector<9x9x4xf32> to vector<8x8x4xf32>
    %165 = vector.shape_cast %164 : vector<8x8x4xf32> to vector<64x4xf32>
    %166 = vector.extract_strided_slice %119 {offsets = [1, 1, 0], sizes = [8, 8, 4], strides = [1, 1, 1]} : vector<9x9x4xf32> to vector<8x8x4xf32>
    %167 = vector.shape_cast %166 : vector<8x8x4xf32> to vector<64x4xf32>
    %168 = tpu.concatenate %151, %153, %155, %157, %159, %161, %163, %165, %167 in 1 : vector<64x4xf32>, vector<64x4xf32>, vector<64x4xf32>, vector<64x4xf32>, vector<64x4xf32>, vector<64x4xf32>, vector<64x4xf32>, vector<64x4xf32>, vector<64x4xf32> -> vector<64x36xf32>
    %169 = arith.truncf %168 : vector<64x36xf32> to vector<64x36xbf16>
    %c0_47 = arith.constant 0 : index
    %c0_48 = arith.constant 0 : index
    %170 = vector.load %arg8[%c0_47, %c0_48] : memref<36x8xbf16, #tpu.memory_space<vmem>>, vector<36x8xbf16>
    %cst_49 = arith.constant dense<0.000000e+00> : vector<64x8xf32>
    %171 = tpu.matmul %169, %170, %cst_49 {dimension_numbers = #tpu.dot_dimension_numbers<[1], [0], [0], [1], [0, 0, 1, 1], [], []>} : vector<64x36xbf16>, vector<36x8xbf16>, vector<64x8xf32> -> vector<64x8xf32>
    %c0_50 = arith.constant 0 : index
    %c0_51 = arith.constant 0 : index
    %172 = vector.load %arg9[%c0_50, %c0_51] : memref<1x8xf32, #tpu.memory_space<vmem>>, vector<1x8xf32>
    %173 = vector.broadcast %172 : vector<1x8xf32> to vector<64x8xf32>
    %174 = arith.addf %171, %173 : vector<64x8xf32>
    %175 = tpu.transpose %174, [1, 0] : vector<64x8xf32> -> vector<8x64xf32>
    %c0_52 = arith.constant 0 : index
    %c0_53 = arith.constant 0 : index
    %c0_54 = arith.constant 0 : index
    %176 = vector.load %arg12[%c0_52, %c0_53, %c0_54] : memref<1x8x64xf32, #tpu.memory_space<vmem>>, vector<1x8x64xf32>
    %177 = vector.shape_cast %176 : vector<1x8x64xf32> to vector<8x64xf32>
    %178 = vector.shape_cast %175 : vector<8x64xf32> to vector<1x8x64xf32>
    tpu.vector_store %arg12[%c0_52, %c0_53, %c0_54], %178 {strides = array<i32>} : memref<1x8x64xf32, #tpu.memory_space<vmem>>, vector<1x8x64xf32>,
    return
  }
  func.func @transform_0(%arg0: i32) -> (i32, i32, i32) {
    %c0_i32 = arith.constant 0 : i32
    %c0_i32_0 = arith.constant 0 : i32
    %c0_i32_1 = arith.constant 0 : i32
    return %arg0, %c0_i32, %c0_i32_0 : i32, i32, i32
  }
  func.func @transform_1(%arg0: i32) -> (i32, i32) {
    %c0_i32 = arith.constant 0 : i32
    %c0_i32_0 = arith.constant 0 : i32
    %c0_i32_1 = arith.constant 0 : i32
    return %c0_i32, %c0_i32_0 : i32, i32
  }
  func.func @transform_2(%arg0: i32) -> (i32, i32) {
    %c0_i32 = arith.constant 0 : i32
    %c0_i32_0 = arith.constant 0 : i32
    %c0_i32_1 = arith.constant 0 : i32
    return %c0_i32, %c0_i32_0 : i32, i32
  }
  func.func @transform_3(%arg0: i32) -> (i32, i32) {
    %c0_i32 = arith.constant 0 : i32
    %c0_i32_0 = arith.constant 0 : i32
    %c0_i32_1 = arith.constant 0 : i32
    return %c0_i32, %c0_i32_0 : i32, i32
  }
  func.func @transform_4(%arg0: i32) -> (i32, i32) {
    %c0_i32 = arith.constant 0 : i32
    %c0_i32_0 = arith.constant 0 : i32
    %c0_i32_1 = arith.constant 0 : i32
    return %c0_i32, %c0_i32_0 : i32, i32
  }
  func.func @transform_5(%arg0: i32) -> (i32, i32) {
    %c0_i32 = arith.constant 0 : i32
    %c0_i32_0 = arith.constant 0 : i32
    %c0_i32_1 = arith.constant 0 : i32
    return %c0_i32, %c0_i32_0 : i32, i32
  }
  func.func @transform_6(%arg0: i32) -> (i32, i32) {
    %c0_i32 = arith.constant 0 : i32
    %c0_i32_0 = arith.constant 0 : i32
    %c0_i32_1 = arith.constant 0 : i32
    return %c0_i32, %c0_i32_0 : i32, i32
  }
  func.func @transform_7(%arg0: i32) -> (i32, i32) {
    %c0_i32 = arith.constant 0 : i32
    %c0_i32_0 = arith.constant 0 : i32
    %c0_i32_1 = arith.constant 0 : i32
    return %c0_i32, %c0_i32_0 : i32, i32
  }
  func.func @transform_8(%arg0: i32) -> (i32, i32) {
    %c0_i32 = arith.constant 0 : i32
    %c0_i32_0 = arith.constant 0 : i32
    %c0_i32_1 = arith.constant 0 : i32
    return %c0_i32, %c0_i32_0 : i32, i32
  }
  func.func @transform_9(%arg0: i32) -> (i32, i32, i32) {
    %c0_i32 = arith.constant 0 : i32
    %c0_i32_0 = arith.constant 0 : i32
    %c0_i32_1 = arith.constant 0 : i32
    return %arg0, %c0_i32, %c0_i32_0 : i32, i32, i32
  }
  func.func @transform_10(%arg0: i32) -> (i32, i32, i32) {
    %c0_i32 = arith.constant 0 : i32
    %c0_i32_0 = arith.constant 0 : i32
    %c0_i32_1 = arith.constant 0 : i32
    return %arg0, %c0_i32, %c0_i32_0 : i32, i32, i32
  }
  func.func @transform_11(%arg0: i32) -> (i32, i32, i32) {
    %c0_i32 = arith.constant 0 : i32
    %c0_i32_0 = arith.constant 0 : i32
    %c0_i32_1 = arith.constant 0 : i32
    return %arg0, %c0_i32, %c0_i32_0 : i32, i32, i32
  }
}

</mosaic_0001>

<bundles_post_ra>
// kernel: tpu_custom_call.1
= control target key start
LH: loop header
LB: loop body
LE: loop exit
PB: predicated region body
PF: predicated region fallthrough
CT: control target
= control target key end

     0   :  { %s11648_s0 = inlined_call_operand.vmem [shape: f32[2,3,256], index: 0, kind: input, shape index: {}]   ;;  %s11649_s1 = inlined_call_operand.vmem [shape: bf16[3,4], index: 1, kind: input, shape index: {}]   ;;  %s11650_s2 = inlined_call_operand.vmem [shape: f32[1,4], index: 2, kind: input, shape index: {}]   ;;  %s11651_s3 = inlined_call_operand.vmem [shape: bf16[36,4], index: 3, kind: input, shape index: {}]   ;;  %s11652_s4 = inlined_call_operand.vmem [shape: f32[1,4], index: 4, kind: input, shape index: {}]   ;;  %s11653_s5 = inlined_call_operand.vmem [shape: bf16[36,4], index: 5, kind: input, shape index: {}]   ;;  %s11654_s6 = inlined_call_operand.vmem [shape: f32[1,4], index: 6, kind: input, shape index: {}]   ;;  %s11655_s7 = inlined_call_operand.vmem [shape: bf16[36,8], index: 7, kind: input, shape index: {}]   ;;  %s11656_s8 = inlined_call_operand.vmem [shape: f32[1,8], index: 8, kind: input, shape index: {}]   ;;  %s11657_s9 = inlined_call_operand.hbm [shape: f32[2,4,256], index: 9, kind: output, shape index: {0}]   ;;  %s11658_s10 = inlined_call_operand.hbm [shape: f32[2,4,256], index: 10, kind: output, shape index: {1}]   ;;  %s11659_s11 = inlined_call_operand.hbm [shape: f32[2,8,64], index: 11, kind: output, shape index: {2}]  }
   0x1   :  { %11796 = sst [smem:[#allocation55_spill]] %s11648_s0 }
   0x2   :  { %11797 = sst [smem:[#allocation56_spill]] %s11649_s1 }
   0x3   :  { %11798 = sst [smem:[#allocation57_spill]] %s11650_s2 }
   0x4   :  { %11799 = sst [smem:[#allocation58_spill]] %s11651_s3 }
   0x5   :  { %11800 = sst [smem:[#allocation59_spill]] %s11652_s4 }
   0x6   :  { %17 = vsyncpa [#allocation4], 0 }
   0x7   :  { %19 = vsyncpa [#allocation4 + $0x1], 0 }
   0x8   :  { %20 = vsyncpa [#allocation6], 0 }
   0x9   :  { %22 = vsyncpa [#allocation6 + $0x1], 0  ;;  %s7802_s17 = smov 0   ;;  %s7804_s18 = smov 0  }
   0xa   :  { %s7806_s19 = smov 0   ;;  %s7808_s20 = smov 0  }
   0xb LB: > { %s7823_s21 = sadd.s32 4294967295, %s7727_s20   ;;  %s11660_s22 = sadd.s32 4294967294, %s7727_s20   ;;  %s7727_s20 = sphi %s7808_s20, %s12047_s20   ;;  %s7723_s19 = sphi %s7806_s19, %s12046_s19   ;;  %s7719_s18 = sphi %s7804_s18, %s12045_s18   ;;  %s7715_s17 = sphi %s7802_s17, %s12044_s17  }
   0xc   : > { %s7827_s23 = sadd.s32 1, %s7727_s20   ;;  %s229_s24 = sadd.s32 1, %s7723_s19 }
   0xd   : > { %s226_s25 = ssub.s32 %s7727_s20, %s7827_s23  ;;  %p239_p0 = scmp.ne.s32.totalorder %s7723_s19, %s7719_s18 }
   0xe   : > { %p227_p1 = scmp.eq.s32.totalorder %s226_s25, 0  ;;  %p240_p2 = scmp.eq.s32.totalorder %s7823_s21, 1 }
   0xf   : > { %p245_p3 = scmp.ne.s32.totalorder %s7719_s18, %s7715_s17  ;;  %p246_p4 = scmp.eq.s32.totalorder %s11660_s22, 1 }
  0x10   : > { %s7840_s26 = scalar_select %p227_p1, %s7723_s19, %s229_s24  }
  0x11   : > { %p7842_p5 = por %p240_p2, %p239_p0  ;;  %p7846_p6 = por %p246_p4, %p245_p3 }
  0x12   : > { %p5680_p7 = scmp.ge.s32.totalorder %s7727_s20, 1  ;;  %p348_p8 = scmp.lt.s32.totalorder %s7727_s20, 3 }
  0x14   : > { %p349_p9 = pnand %p5680_p7, %p348_p8 }
  0x16   : > { %352 = sbr.rel (%p349_p9) target bundleno = 1980 (0x7bc), region = 56 }
  0x1b   : > { %p398_p10 = scmp.lt.s32.totalorder %s7823_s21, 1  ;;  %s11803_s0 = sld [smem:[#allocation55_spill]]  ;;  %vm545_vm0 = vcmask 1040384   ;;  %vm546_vm1 = vcmask 1041408   ;;  %v7729_v3 = vmov 65535   ;;  %vm496_vm2 = vcmask 23552  }
  0x1c   : > { %v547_v4 = vsel %vm545_vm0, 4294967295, %v7729_v3  ;;  %s11804_s1 = sld [smem:[#allocation56_spill]]  ;;  %vm713_vm3 = vcmask 31744   ;;  %vm716_vm4 = vcmask 25600   ;;  %vm1000_vm5 = vcmask 1046528   ;;  %s11709_s24 = smov 24  }
  0x1d   : > { %s399_s29 = scalar_select %p398_p10, %s7823_s21, 1  ;;  %v548_v6 = vsel %vm546_vm1, %v547_v4, 0  ;;  %vm1081_vm6 = vcmask 1045504  }
  0x1e   : > { %s11711_s25 = smov 4   ;;  %s11805_s2 = sld [smem:[#allocation57_spill]] }
  0x1f   : > { %s5761_s30 = sshll.u32 %s399_s29, 3  ;;  %s11713_s29 = smov 8  }
  0x20   : > { %s11759_s15 = smov 32   ;;  %s11765_s16 = smov 16  }
  0x21   : > { %s402_s14 = scalar_lea.vmem %s11803_s0, %s5761_s30  ;;  %s11761_s30 = smov 28  }
  0x22   : > { %v404_v0 = vld [vmem:[%s402_s14] sm:$0x77]  ;;  %s11707_s14 = smov 12   ;;  %s11763_s12 = smov 20  }
  0x23   : > { %v406_v1 = vcombine.high %v404_v0, %v404_v0  ;;  %v488_v5 = vld [vmem:[%s11804_s1] sm:$0x3]  ;;  %s11838_s3 = sld [smem:[#allocation58_spill]]  ;;  %s7739_s0 = smov [#allocation5]  }
  0x24   : > { %v550_v7 = vand.u32 %v548_v6, %v488_v5  ;;  %s11869_s4 = sld [smem:[#allocation59_spill]]  ;;  %s7615_s1 = sshll.u32 %s7739_s0, 4  ;;  %s7616_s1 = int_to_ptr.vmem [resolvable:$false] %s7615_s1 }
  0x25   : > { %v6014_v2 = vpack.i.bf16 %v406_v1, %v404_v0 }
  0x26   : > { %5826 = vmatprep.subr.bf16.mxu0 %v550_v7  ;;  %5950 = vmatprep.subr.bf16.mxu1 %v550_v7 }
  0x27   : > { %6015 = vxpose.xlu0.b32.start.end [1/1] (short) %v6014_v2, 128  ;;  %5827 = vmatpush3.bf16.msra.mxu0 %v550_v7 }
  0x28   : > { %5951 = vmatpush3.bf16.msra.mxu1 %v550_v7 }
  0xa3   : > { %v7862_v8 = vpop.trf.xlu0 }
  0xa4   : > { %v6017_v11 = vunpack.i.l.bf16 %v7862_v8  ;;  %v6020_v1 = vunpack.i.h.bf16 %v7862_v8 }
  0xa7   : > { %v7864_v9 = vpop.trf.xlu0 }
  0xa8   : > { %v6022_v10 = vunpack.i.l.bf16 %v7864_v9  ;;  %v6025_v61 = vunpack.i.h.bf16 %v7864_v9  ;;  %v7730_v9 = vmov 0.0  }
  0xa9   : > { %721 = vst.msk [vmem:[#allocation2 + $0x30] sm:$0xff] %vm713_vm3, %v7730_v9  ;;  %722 = vst.msk [vmem:[#allocation2 + $0x38] sm:$0xff] %vm713_vm3, %v7730_v9 }
  0xaa   : > { %v472_v12 = vpack.c.bf16 %v6022_v10, %v6017_v11  ;;  %v480_v4 = vpack.c.bf16 %v6025_v61, %v6020_v1  ;;  %714 = vst.msk [vmem:[#allocation2] sm:$0xff] %vm713_vm3, %v7730_v9  ;;  %715 = vst.msk [vmem:[#allocation2 + $0x8] sm:$0xff] %vm713_vm3, %v7730_v9 }
  0xab   : > { %v7868_v13 = vpop.trf.xlu0  ;;  %718 = vst.msk [vmem:[#allocation2 + $0x18] sm:$0xff] %vm713_vm3, %v7730_v9  ;;  %719 = vst.msk [vmem:[#allocation2 + $0x20] sm:$0xff] %vm713_vm3, %v7730_v9 }
  0xac   : > { %5828 = vmatprep.mubr.msk.bf16.mxu0 %vm496_vm2, %v472_v12  ;;  %v6027_v15 = vunpack.i.l.bf16 %v7868_v13  ;;  %v6030_v6 = vunpack.i.h.bf16 %v7868_v13  ;;  %724 = vst.msk [vmem:[#allocation2 + $0x48] sm:$0xff] %vm713_vm3, %v7730_v9  ;;  %725 = vst.msk [vmem:[#allocation2 + $0x50] sm:$0xff] %vm713_vm3, %v7730_v9 }
  0xad   : > { %727 = vst.msk [vmem:[#allocation2 + $0x60] sm:$0xff] %vm713_vm3, %v7730_v9  ;;  %728 = vst.msk [vmem:[#allocation2 + $0x68] sm:$0xff] %vm713_vm3, %v7730_v9 }
  0xae   : > { %730 = vst.msk [vmem:[#allocation2 + $0x78] sm:$0xff] %vm713_vm3, %v7730_v9  ;;  %731 = vst.msk [vmem:[#allocation2 + $0x80] sm:$0xff] %vm713_vm3, %v7730_v9 }
  0xaf   : > { %v7871_v14 = vpop.trf.xlu0  ;;  %733 = vst.msk [vmem:[#allocation2 + $0x90] sm:$0xff] %vm713_vm3, %v7730_v9  ;;  %734 = vst.msk [vmem:[#allocation2 + $0x98] sm:$0xff] %vm713_vm3, %v7730_v9 }
  0xb0   : > { %v6032_v16 = vunpack.i.l.bf16 %v7871_v14  ;;  %v6035_v5 = vunpack.i.h.bf16 %v7871_v14  ;;  %736 = vst.msk [vmem:[#allocation2 + $0xa8] sm:$0xff] %vm713_vm3, %v7730_v9  ;;  %737 = vst.msk [vmem:[#allocation2 + $0xb0] sm:$0xff] %vm713_vm3, %v7730_v9 }
  0xb1   : > { %739 = vst.msk [vmem:[#allocation2 + $0xc0] sm:$0xff] %vm713_vm3, %v7730_v9  ;;  %740 = vst.msk [vmem:[#allocation2 + $0xc8] sm:$0xff] %vm713_vm3, %v7730_v9  ;;  %v898_v11 = vld [vmem:[#allocation2] sm:$0xff]  ;;  %v899_v13 = vld [vmem:[#allocation2 + $0x8] sm:$0xff] }
  0xb2   : > { %v473_v17 = vpack.c.bf16 %v6032_v16, %v6027_v15  ;;  %v481_v7 = vpack.c.bf16 %v6035_v5, %v6030_v6  ;;  %742 = vst.msk [vmem:[#allocation2 + $0xd8] sm:$0xff] %vm713_vm3, %v7730_v9  ;;  %743 = vst.msk [vmem:[#allocation2 + $0xe0] sm:$0xff] %vm713_vm3, %v7730_v9  ;;  %v1001_v15 = vrot.slane %v898_v11, 1  ;;  %v1002_v16 = vrot.slane %v899_v13, 1 }
  0xb3   : > { %v6036_v18 = vpop.trf.xlu0  ;;  %745 = vst.msk [vmem:[#allocation2 + $0xf0] sm:$0xff] %vm713_vm3, %v7730_v9  ;;  %746 = vst.msk [vmem:[#allocation2 + $0xf8] sm:$0xff] %vm713_vm3, %v7730_v9 }
  0xb4   : > { %5829 = vmatmul.mubr.msk.bf16.vlgmr.msra.gmra.mxu0 %vm496_vm2, %v473_v17  ;;  %v6037_v19 = vunpack.i.l.bf16 %v6036_v18  ;;  %v6040_v20 = vunpack.i.h.bf16 %v6036_v18  ;;  %748 = vst.msk [vmem:[#allocation2 + $0x108] sm:$0xff] %vm713_vm3, %v7730_v9  ;;  %749 = vst.msk [vmem:[#allocation2 + $0x110] sm:$0xff] %vm713_vm3, %v7730_v9  ;;  %v1082_v18 = vrot.slane %v898_v11, 2 }
  0xb5   : > { %751 = vst.msk [vmem:[#allocation2 + $0x120] sm:$0xff] %vm713_vm3, %v7730_v9  ;;  %752 = vst.msk [vmem:[#allocation2 + $0x128] sm:$0xff] %vm713_vm3, %v7730_v9 }
  0xb6   : > { %754 = vst.msk [vmem:[#allocation2 + $0x138] sm:$0xff] %vm713_vm3, %v7730_v9  ;;  %755 = vst.msk [vmem:[#allocation2 + $0x140] sm:$0xff] %vm713_vm3, %v7730_v9 }
  0xb7   : > { %v6041_v21 = vpop.trf.xlu0  ;;  %757 = vst.msk [vmem:[#allocation2 + $0x150] sm:$0xff] %vm713_vm3, %v7730_v9  ;;  %758 = vst.msk [vmem:[#allocation2 + $0x158] sm:$0xff] %vm713_vm3, %v7730_v9 }
  0xb8   : > { %v6042_v22 = vunpack.i.l.bf16 %v6041_v21  ;;  %v6045_v23 = vunpack.i.h.bf16 %v6041_v21  ;;  %760 = vst.msk [vmem:[#allocation2 + $0x168] sm:$0xff] %vm713_vm3, %v7730_v9  ;;  %761 = vst.msk [vmem:[#allocation2 + $0x170] sm:$0xff] %vm713_vm3, %v7730_v9  ;;  %v1003_v21 = vsel %vm1000_vm5, %v1001_v15, %v1002_v16 }
  0xb9   : > { %763 = vst.msk [vmem:[#allocation2 + $0x180] sm:$0xff] %vm713_vm3, %v7730_v9  ;;  %764 = vst.msk [vmem:[#allocation2 + $0x188] sm:$0xff] %vm713_vm3, %v7730_v9 }
  0xba   : > { %v474_v24 = vpack.c.bf16 %v6042_v22, %v6037_v19  ;;  %v482_v25 = vpack.c.bf16 %v6045_v23, %v6040_v20  ;;  %766 = vst.msk [vmem:[#allocation2 + $0x198] sm:$0xff] %vm713_vm3, %v7730_v9  ;;  %767 = vst.msk [vmem:[#allocation2 + $0x1a0] sm:$0xff] %vm713_vm3, %v7730_v9  ;;  %v1083_v19 = vrot.slane %v899_v13, 2 }
  0xbb   : > { %v6046_v26 = vpop.trf.xlu0  ;;  %723 = vst.msk [vmem:[#allocation2 + $0x40] sm:$0x3] %vm716_vm4, %v7730_v9  ;;  %717 = vst.msk [vmem:[#allocation2 + $0x10] sm:$0x3] %vm716_vm4, %v7730_v9 }
  0xbc   : > { %5832 = vmatprep.mubr.msk.bf16.mxu0 %vm496_vm2, %v474_v24  ;;  %5848 = vmatprep.mubr.msk.bf16.mxu1 %vm496_vm2, %v482_v25  ;;  %v6050_v27 = vunpack.i.h.bf16 %v6046_v26  ;;  %v6047_v28 = vunpack.i.l.bf16 %v6046_v26  ;;  %720 = vst.msk [vmem:[#allocation2 + $0x28] sm:$0x3] %vm716_vm4, %v7730_v9  ;;  %726 = vst.msk [vmem:[#allocation2 + $0x58] sm:$0x3] %vm716_vm4, %v7730_v9  ;;  %v1084_v24 = vsel %vm1081_vm6, %v1082_v18, %v1083_v19 }
  0xbd   : > { %729 = vst.msk [vmem:[#allocation2 + $0x70] sm:$0x3] %vm716_vm4, %v7730_v9  ;;  %732 = vst.msk [vmem:[#allocation2 + $0x88] sm:$0x3] %vm716_vm4, %v7730_v9 }
  0xbe   : > { %735 = vst.msk [vmem:[#allocation2 + $0xa0] sm:$0x3] %vm716_vm4, %v7730_v9  ;;  %738 = vst.msk [vmem:[#allocation2 + $0xb8] sm:$0x3] %vm716_vm4, %v7730_v9 }
  0xbf   : > { %v6051_v29 = vpop.trf.xlu0  ;;  %741 = vst.msk [vmem:[#allocation2 + $0xd0] sm:$0x3] %vm716_vm4, %v7730_v9  ;;  %744 = vst.msk [vmem:[#allocation2 + $0xe8] sm:$0x3] %vm716_vm4, %v7730_v9 }
  0xc0   : > { %v6055_v30 = vunpack.i.h.bf16 %v6051_v29  ;;  %v6052_v31 = vunpack.i.l.bf16 %v6051_v29  ;;  %747 = vst.msk [vmem:[#allocation2 + $0x100] sm:$0x3] %vm716_vm4, %v7730_v9  ;;  %750 = vst.msk [vmem:[#allocation2 + $0x118] sm:$0x3] %vm716_vm4, %v7730_v9 }
  0xc1   : > { %753 = vst.msk [vmem:[#allocation2 + $0x130] sm:$0x3] %vm716_vm4, %v7730_v9  ;;  %756 = vst.msk [vmem:[#allocation2 + $0x148] sm:$0x3] %vm716_vm4, %v7730_v9  ;;  %v949_v8 = vld [vmem:[#allocation2 + $0x198] sm:$0xff]  ;;  %v950_v10 = vld [vmem:[#allocation2 + $0x1a0] sm:$0xff] }
  0xc2   : > { %v475_v32 = vpack.c.bf16 %v6052_v31, %v6047_v28  ;;  %v483_v33 = vpack.c.bf16 %v6055_v30, %v6050_v27  ;;  %759 = vst.msk [vmem:[#allocation2 + $0x160] sm:$0x3] %vm716_vm4, %v7730_v9  ;;  %762 = vst.msk [vmem:[#allocation2 + $0x178] sm:$0x3] %vm716_vm4, %v7730_v9  ;;  %v6101_v12 = vpack.i.bf16 %v950_v10, %v949_v8  ;;  %v900_v14 = vld [vmem:[#allocation2 + $0x10] sm:$0x3] }
  0xc3   : > { %v6056_v34 = vpop.trf.xlu0  ;;  %765 = vst.msk [vmem:[#allocation2 + $0x190] sm:$0x3] %vm716_vm4, %v7730_v9  ;;  %768 = vst.msk [vmem:[#allocation2 + $0x1a8] sm:$0x3] %vm716_vm4, %v7730_v9  ;;  %v1004_v17 = vrot.slane %v900_v14, 1  ;;  %v1085_v20 = vrot.slane %v900_v14, 2 }
  0xc4   : > { %5833 = vmatmul.mubr.msk.bf16.gmra.mxu0 %vm496_vm2, %v475_v32  ;;  %5849 = vmatmul.mubr.msk.bf16.vlgmr.msra.gmra.mxu1 %vm496_vm2, %v483_v33  ;;  %v6060_v35 = vunpack.i.h.bf16 %v6056_v34  ;;  %v6057_v36 = vunpack.i.l.bf16 %v6056_v34  ;;  %v1179_v27 = vrot.slane %v950_v10, 1  ;;  %v1178_v28 = vrot.slane %v949_v8, 1  ;;  %v7961_v34 = vld [vmem:[%s11805_s2] ss:$0 sm:$0xff]  ;;  %s7617_s2 = scalar_lea.vmem %s7616_s1, 256 }
  0xc5   : > { %6102 = vrot.lane.b32.xlu1 %v6101_v12, %s11709_s24  ;;  %v1005_v22 = vsel %vm1000_vm5, %v1002_v16, %v1004_v17  ;;  %v1086_v25 = vsel %vm1081_vm6, %v1083_v19, %v1085_v20 }
  0xc6   : > { %v6096_v23 = vpack.i.bf16 %v1005_v22, %v1003_v21  ;;  %v6106_v29 = vpack.i.bf16 %v1086_v25, %v1084_v24  ;;  %v1180_v31 = vsel %vm1000_vm5, %v1178_v28, %v1179_v27 }
  0xc7   : > { %v6061_v37 = vpop.trf.xlu0 }
  0xc8   : > { %v6065_v38 = vunpack.i.h.bf16 %v6061_v37  ;;  %v6062_v39 = vunpack.i.l.bf16 %v6061_v37  ;;  %6097 = vrot.lane.b32.xlu0 %v6096_v23, %s11711_s25 }
  0xc9   : > { %6107 = vrot.lane.b32.xlu1 %v6106_v29, %s11713_s29 }
  0xca   : > { %v476_v40 = vpack.c.bf16 %v6062_v39, %v6057_v36  ;;  %v484_v41 = vpack.c.bf16 %v6065_v38, %v6060_v35  ;;  %v951_v26 = vld [vmem:[#allocation2 + $0x1a8] sm:$0x3] }
  0xcb   : > { %v6066_v42 = vpop.trf.xlu0  ;;  %v1181_v30 = vrot.slane %v951_v26, 1 }
  0xcc   : > { %5836 = vmatprep.mubr.msk.bf16.mxu0 %vm496_vm2, %v476_v40  ;;  %5852 = vmatprep.mubr.msk.bf16.mxu1 %vm496_vm2, %v484_v41  ;;  %v6070_v43 = vunpack.i.h.bf16 %v6066_v42  ;;  %v6067_v44 = vunpack.i.l.bf16 %v6066_v42 }
  0xcd   : > { %v1182_v32 = vsel %vm1000_vm5, %v1179_v27, %v1181_v30 }
  0xce   : > { %v6111_v33 = vpack.i.bf16 %v1182_v32, %v1180_v31 }
  0xcf   : > { %v6071_v45 = vpop.trf.xlu0 }
  0xd0   : > { %v6075_v46 = vunpack.i.h.bf16 %v6071_v45  ;;  %v6072_v47 = vunpack.i.l.bf16 %v6071_v45  ;;  %6112 = vrot.lane.b32.xlu1 %v6111_v33, %s11761_s30 }
  0xd2   : > { %v477_v48 = vpack.c.bf16 %v6072_v47, %v6067_v44  ;;  %v485_v49 = vpack.c.bf16 %v6075_v46, %v6070_v43 }
  0xd3   : > { %v6076_v50 = vpop.trf.xlu0 }
  0xd4   : > { %5837 = vmatmul.mubr.msk.bf16.gmra.mxu0 %vm496_vm2, %v477_v48  ;;  %5853 = vmatmul.mubr.msk.bf16.gmra.mxu1 %vm496_vm2, %v485_v49  ;;  %v6080_v51 = vunpack.i.h.bf16 %v6076_v50  ;;  %v6077_v52 = vunpack.i.l.bf16 %v6076_v50 }
  0xd7   : > { %v6081_v53 = vpop.trf.xlu0 }
  0xd8   : > { %v6085_v54 = vunpack.i.h.bf16 %v6081_v53  ;;  %v6082_v55 = vunpack.i.l.bf16 %v6081_v53 }
  0xda   : > { %v478_v56 = vpack.c.bf16 %v6082_v55, %v6077_v52  ;;  %v486_v57 = vpack.c.bf16 %v6085_v54, %v6080_v51 }
  0xdb   : > { %v6086_v58 = vpop.trf.xlu0 }
  0xdc   : > { %5840 = vmatprep.mubr.msk.bf16.mxu0 %vm496_vm2, %v478_v56  ;;  %5856 = vmatprep.mubr.msk.bf16.mxu1 %vm496_vm2, %v486_v57  ;;  %v6090_v59 = vunpack.i.h.bf16 %v6086_v58  ;;  %v6087_v60 = vunpack.i.l.bf16 %v6086_v58 }
  0xdf   : > { %v6091_v62 = vpop.trf.xlu0 }
  0xe0   : > { %v6095_v63 = vunpack.i.h.bf16 %v6091_v62  ;;  %v6092_v0 = vunpack.i.l.bf16 %v6091_v62 }
  0xe2   : > { %v479_v2 = vpack.c.bf16 %v6092_v0, %v6087_v60  ;;  %v487_v3 = vpack.c.bf16 %v6095_v63, %v6090_v59 }
  0xe4   : > { %5841 = vmatmul.mubr.msk.bf16.gmra.mxu0 %vm496_vm2, %v479_v2  ;;  %5857 = vmatmul.mubr.msk.bf16.gmra.mxu1 %vm496_vm2, %v487_v3 }
  0xe5   : > { %5844 = vmatprep.mubr.msk.bf16.mxu0 %vm496_vm2, %v480_v4 }
  0xec   : > { %5845 = vmatmul.mubr.msk.bf16.gmra.mxu0 %vm496_vm2, %v481_v7 }
 0x174   : > { %v5830_v35 = vpop.f32.mrf.mxu0 }
 0x175   : > { %v7964_v36 = vadd.f32 %v5830_v35, %v7961_v34 }
 0x176   : > { %v586_v37 = vpop.f32.mrf.mxu0 }
 0x177   : > { %11806 = vst [vmem:[#allocation10_spill] sm:$0xff] %v7964_v36  ;;  %vm771_vm7 = vcmp.gt.f32.partialorder %v7964_v36, 0.0  ;;  %v803_v38 = vmul.f32 0.01, %v7964_v36  ;;  %v7969_v39 = vadd.f32 %v7961_v34, %v586_v37 }
 0x178   : > { %v5831_v40 = vpop.f32.mrf.mxu0 }
 0x179   : > { %11807 = vst [vmem:[#allocation11_spill] sm:$0xff] %v7969_v39  ;;  %v835_v41 = vsel %vm771_vm7, %v7964_v36, %v803_v38  ;;  %vm769_vm8 = vcmp.gt.f32.partialorder %v7969_v39, 0.0  ;;  %v801_v42 = vmul.f32 0.01, %v7969_v39  ;;  %v7975_v43 = vadd.f32 %v5831_v40, %v7961_v34 }
 0x17a   : > { %868 = vst.msk [vmem:[#allocation2 + $0x31] sm:$0xff] %vm713_vm3, %v835_v41  ;;  %v589_v44 = vpop.f32.mrf.mxu0 }
 0x17b   : > { %11808 = vst [vmem:[#allocation12_spill] sm:$0xff] %v7975_v43  ;;  %v833_v45 = vsel %vm769_vm8, %v7969_v39, %v801_v42  ;;  %vm772_vm9 = vcmp.gt.f32.partialorder %v7975_v43, 0.0  ;;  %v804_v46 = vmul.f32 0.01, %v7975_v43  ;;  %v7982_v47 = vadd.f32 %v7961_v34, %v589_v44 }
 0x17c   : > { %866 = vst.msk [vmem:[#allocation2 + $0x19] sm:$0xff] %vm713_vm3, %v833_v45 }
 0x17d   : > { %11809 = vst [vmem:[#allocation13_spill] sm:$0xff] %v7982_v47  ;;  %v836_v48 = vsel %vm772_vm9, %v7975_v43, %v804_v46  ;;  %vm770_vm10 = vcmp.gt.f32.partialorder %v7982_v47, 0.0  ;;  %v802_v49 = vmul.f32 0.01, %v7982_v47 }
 0x17e   : > { %869 = vst.msk [vmem:[#allocation2 + $0x39] sm:$0xff] %vm713_vm3, %v836_v48 }
 0x17f   : > { %v834_v50 = vsel %vm770_vm10, %v7982_v47, %v802_v49 }
 0x180   : > { %867 = vst.msk [vmem:[#allocation2 + $0x21] sm:$0xff] %vm713_vm3, %v834_v50 }
 0x181   : > { %v7991_v51 = vld [vmem:[#allocation2 + $0x30] sm:$0xff] }
 0x182   : > { %v1011_v58 = vrot.slane %v7991_v51, 1  ;;  %v1092_v59 = vrot.slane %v7991_v51, 2 }
 0x183   : > { %v901_v24 = vld [vmem:[#allocation2 + $0x18] sm:$0xff] }
 0x184   : > { %v5834_v52 = vpop.f32.mrf.mxu0  ;;  %v5850_v53 = vpop.f32.mrf.mxu1  ;;  %v1006_v45 = vrot.slane %v901_v24, 1 }
 0x185   : > { %v7994_v54 = vadd.f32 %v5834_v52, %v7961_v34  ;;  %v7997_v55 = vadd.f32 %v5850_v53, %v7961_v34  ;;  %v7999_v56 = vld [vmem:[#allocation2 + $0x38] sm:$0xff]  ;;  %v8001_v57 = vld [vmem:[#allocation2 + $0x40] sm:$0x3] }
 0x186   : > { %v602_v60 = vpop.f32.mrf.mxu0  ;;  %v666_v61 = vpop.f32.mrf.mxu1  ;;  %v6121_v62 = vpack.i.bf16 %v7999_v56, %v7991_v51  ;;  %v1012_v63 = vrot.slane %v7999_v56, 1  ;;  %v1014_v0 = vrot.slane %v8001_v57, 1  ;;  %v1093_v9 = vrot.slane %v7999_v56, 2  ;;  %v7551_v43 = vld [vmem:[#allocation2 + $0x38] sm:$0xff] }
 0x187   : > { %11810 = vst [vmem:[#allocation14_spill] sm:$0xff] %v7994_v54  ;;  %11811 = vst [vmem:[#allocation15_spill] sm:$0xff] %v7997_v55  ;;  %vm775_vm11 = vcmp.gt.f32.partialorder %v7994_v54, 0.0  ;;  %v807_v1 = vmul.f32 0.01, %v7994_v54  ;;  %vm791_vm12 = vcmp.gt.f32.partialorder %v7997_v55, 0.0  ;;  %v8014_v3 = vadd.f32 %v7961_v34, %v602_v60 }
 0x188   : > { %v823_v2 = vmul.f32 0.01, %v7997_v55  ;;  %v8017_v4 = vadd.f32 %v7961_v34, %v666_v61  ;;  %v5851_v5 = vpop.f32.mrf.mxu1  ;;  %6122 = vrot.lane.b32.xlu0 %v6121_v62, %s11709_s24  ;;  %6117 = vrot.lane.b32.xlu1 %v6121_v62, %s11707_s14  ;;  %v5835_v6 = vpop.f32.mrf.mxu0  ;;  %v1013_v7 = vsel %vm1000_vm5, %v1011_v58, %v1012_v63  ;;  %v8031_v13 = vld [vmem:[#allocation2 + $0x20] sm:$0xff]  ;;  %v1015_v27 = vsel %vm1000_vm5, %v1012_v63, %v1014_v0  ;;  %v903_v29 = vld [vmem:[#allocation2 + $0x28] sm:$0x3] }
 0x189   : > { %11812 = vst [vmem:[#allocation16_spill] sm:$0xff] %v8014_v3  ;;  %v839_v8 = vsel %vm775_vm11, %v7994_v54, %v807_v1  ;;  %v8026_v11 = vadd.f32 %v5851_v5, %v7961_v34  ;;  %v8029_v12 = vadd.f32 %v5835_v6, %v7961_v34  ;;  %vm773_vm13 = vcmp.gt.f32.partialorder %v8014_v3, 0.0 }
 0x18a   : > { %11813 = vst [vmem:[#allocation17_spill] sm:$0xff] %v8017_v4  ;;  %v855_v10 = vsel %vm791_vm12, %v7997_v55, %v823_v2  ;;  %872 = vst.msk [vmem:[#allocation2 + $0x61] sm:$0xff] %vm713_vm3, %v839_v8  ;;  %v805_v14 = vmul.f32 0.01, %v8014_v3  ;;  %vm789_vm14 = vcmp.gt.f32.partialorder %v8017_v4, 0.0  ;;  %v605_v16 = vpop.f32.mrf.mxu0  ;;  %v669_v17 = vpop.f32.mrf.mxu1  ;;  %v6126_v28 = vpack.i.bf16 %v8031_v13, %v901_v24 }
 0x18b   : > { %11814 = vst [vmem:[#allocation18_spill] sm:$0xff] %v8026_v11  ;;  %11815 = vst [vmem:[#allocation19_spill] sm:$0xff] %v8029_v12  ;;  %v821_v15 = vmul.f32 0.01, %v8017_v4  ;;  %vm792_vm15 = vcmp.gt.f32.partialorder %v8026_v11, 0.0  ;;  %vm776_vm2 = vcmp.gt.f32.partialorder %v8029_v12, 0.0  ;;  %v8046_v22 = vadd.f32 %v7961_v34, %v605_v16 }
 0x18c   : > { %888 = vst.msk [vmem:[#allocation2 + $0x121] sm:$0xff] %vm713_vm3, %v855_v10  ;;  %v824_v18 = vmul.f32 0.01, %v8026_v11  ;;  %v808_v19 = vmul.f32 0.01, %v8029_v12  ;;  %v837_v20 = vsel %vm773_vm13, %v8014_v3, %v805_v14  ;;  %v8049_v23 = vadd.f32 %v7961_v34, %v669_v17  ;;  %6127 = vrot.lane.b32.xlu0 %v6126_v28, %s11707_s14 }
 0x18d   : > { %v853_v21 = vsel %vm789_vm14, %v8017_v4, %v821_v15  ;;  %11816 = vst [vmem:[#allocation20_spill] sm:$0xff] %v8046_v22  ;;  %870 = vst.msk [vmem:[#allocation2 + $0x49] sm:$0xff] %vm713_vm3, %v837_v20  ;;  %vm774_vm4 = vcmp.gt.f32.partialorder %v8046_v22, 0.0  ;;  %v806_v30 = vmul.f32 0.01, %v8046_v22  ;;  %v6131_v32 = vpack.i.bf16 %v1015_v27, %v1013_v7 }
 0x18e   : > { %11817 = vst [vmem:[#allocation21_spill] sm:$0xff] %v8049_v23  ;;  %886 = vst.msk [vmem:[#allocation2 + $0x109] sm:$0xff] %vm713_vm3, %v853_v21  ;;  %v856_v25 = vsel %vm792_vm15, %v8026_v11, %v824_v18  ;;  %v840_v26 = vsel %vm776_vm2, %v8029_v12, %v808_v19  ;;  %vm790_vm7 = vcmp.gt.f32.partialorder %v8049_v23, 0.0  ;;  %v822_v31 = vmul.f32 0.01, %v8049_v23 }
 0x18f   : > { %889 = vst.msk [vmem:[#allocation2 + $0x129] sm:$0xff] %vm713_vm3, %v856_v25  ;;  %873 = vst.msk [vmem:[#allocation2 + $0x69] sm:$0xff] %vm713_vm3, %v840_v26  ;;  %v1095_v33 = vrot.slane %v8001_v57, 2  ;;  %v838_v35 = vsel %vm774_vm4, %v8046_v22, %v806_v30  ;;  %v1094_v38 = vsel %vm1081_vm6, %v1092_v59, %v1093_v9  ;;  %6132 = vrot.lane.b32.xlu1 %v6131_v32, %s11711_s25  ;;  %v1007_v41 = vrot.slane %v8031_v13, 1 }
 0x190   : > { %v854_v37 = vsel %vm790_vm7, %v8049_v23, %v822_v31  ;;  %871 = vst.msk [vmem:[#allocation2 + $0x51] sm:$0xff] %vm713_vm3, %v838_v35  ;;  %v1009_v42 = vrot.slane %v903_v29, 1  ;;  %6152 = vrot.lane.b32.xlu0 %v6131_v32, %s11761_s30  ;;  %v1088_v51 = vrot.slane %v8031_v13, 2  ;;  %v1090_v52 = vrot.slane %v903_v29, 2  ;;  %v7538_v23 = vld [vmem:[%s11838_s3 + $0x8] sm:$0xff]  }
 0x191   : > { %887 = vst.msk [vmem:[#allocation2 + $0x111] sm:$0xff] %vm713_vm3, %v854_v37  ;;  %v1096_v40 = vsel %vm1081_vm6, %v1093_v9, %v1095_v33  ;;  %v1008_v48 = vsel %vm1000_vm5, %v1006_v45, %v1007_v41  ;;  %v1087_v59 = vrot.slane %v901_v24, 2  ;;  %v8110_v14 = vld [vmem:[#allocation2 + $0x60] sm:$0xff] }
 0x192   : > { %v6136_v44 = vpack.i.bf16 %v1096_v40, %v1094_v38  ;;  %v1010_v49 = vsel %vm1000_vm5, %v1007_v41, %v1009_v42  ;;  %v1091_v1 = vsel %vm1081_vm6, %v1088_v51, %v1090_v52  ;;  %v1021_v21 = vrot.slane %v8110_v14, 1 }
 0x193   : > { %v6171_v58 = vpack.i.bf16 %v1010_v49, %v1008_v48  ;;  %v1089_v0 = vsel %vm1081_vm6, %v1087_v59, %v1088_v51  ;;  %v8132_v29 = vld [vmem:[#allocation2 + $0x120] sm:$0xff]  ;;  %v1102_v33 = vrot.slane %v8110_v14, 2 }
 0x194   : > { %v5838_v46 = vpop.f32.mrf.mxu0  ;;  %6137 = vrot.lane.b32.xlu1 %v6136_v44, %s11713_s29  ;;  %6157 = vrot.lane.b32.xlu0 %v6136_v44, %s11759_s15  ;;  %v5854_v5 = vpop.f32.mrf.mxu1  ;;  %v6176_v8 = vpack.i.bf16 %v1091_v1, %v1089_v0  ;;  %v8124_v24 = vld [vmem:[#allocation2 + $0x48] sm:$0xff] }
 0x195   : > { %v8078_v50 = vadd.f32 %v5838_v46, %v7961_v34  ;;  %v8115_v16 = vadd.f32 %v5854_v5, %v7961_v34 }
 0x196   : > { %v618_v53 = vpop.f32.mrf.mxu0  ;;  %v8112_v15 = vld [vmem:[#allocation2 + $0x68] sm:$0xff]  ;;  %v682_v17 = vpop.f32.mrf.mxu1  ;;  %v912_v19 = vld [vmem:[#allocation2 + $0x70] sm:$0x3] }
 0x197   : > { %11818 = vst [vmem:[#allocation22_spill] sm:$0xff] %v8078_v50  ;;  %vm779_vm8 = vcmp.gt.f32.partialorder %v8078_v50, 0.0  ;;  %v811_v56 = vmul.f32 0.01, %v8078_v50  ;;  %v8085_v57 = vadd.f32 %v7961_v34, %v618_v53  ;;  %11822 = vst [vmem:[#allocation26_spill] sm:$0xff] %v8115_v16  ;;  %v6186_v20 = vpack.i.bf16 %v8112_v15, %v8110_v14  ;;  %v8126_v25 = vld [vmem:[#allocation2 + $0x50] sm:$0xff] }
 0x198   : > { %v5839_v60 = vpop.f32.mrf.mxu0  ;;  %6142 = vrot.lane.b32.xlu1 %v6131_v32, %s11765_s16  ;;  %6172 = vrot.lane.b32.xlu0 %v6171_v58, %s11765_s16  ;;  %v1022_v26 = vrot.slane %v8112_v15, 1  ;;  %vm795_vm12 = vcmp.gt.f32.partialorder %v8115_v16, 0.0  ;;  %v827_v27 = vmul.f32 0.01, %v8115_v16  ;;  %v5855_v28 = vpop.f32.mrf.mxu1  ;;  %v8134_v30 = vld [vmem:[#allocation2 + $0x128] sm:$0xff]  ;;  %v1024_v31 = vrot.slane %v912_v19, 1 }
 0x199   : > { %11819 = vst [vmem:[#allocation23_spill] sm:$0xff] %v8085_v57  ;;  %v843_v61 = vsel %vm779_vm8, %v8078_v50, %v811_v56  ;;  %vm777_vm9 = vcmp.gt.f32.partialorder %v8085_v57, 0.0  ;;  %v809_v62 = vmul.f32 0.01, %v8085_v57  ;;  %v8092_v63 = vadd.f32 %v5839_v60, %v7961_v34 }
 0x19a   : > { %876 = vst.msk [vmem:[#allocation2 + $0x91] sm:$0xff] %vm713_vm3, %v843_v61  ;;  %v621_v2 = vpop.f32.mrf.mxu0  ;;  %v859_v35 = vsel %vm795_vm12, %v8115_v16, %v827_v27  ;;  %v6191_v38 = vpack.i.bf16 %v8126_v25, %v8124_v24  ;;  %v8146_v40 = vadd.f32 %v7961_v34, %v682_v17  ;;  %v8149_v41 = vadd.f32 %v5855_v28, %v7961_v34  ;;  %v8206_v27 = vld [vmem:[#allocation2 + $0x130] sm:$0x3] }
 0x19b   : > { %11820 = vst [vmem:[#allocation24_spill] sm:$0xff] %v8092_v63  ;;  %v841_v6 = vsel %vm777_vm9, %v8085_v57, %v809_v62  ;;  %vm780_vm10 = vcmp.gt.f32.partialorder %v8092_v63, 0.0  ;;  %v812_v7 = vmul.f32 0.01, %v8092_v63  ;;  %v8102_v9 = vadd.f32 %v7961_v34, %v621_v2  ;;  %892 = vst.msk [vmem:[#allocation2 + $0x151] sm:$0xff] %vm713_vm3, %v859_v35 }
 0x19c   : > { %874 = vst.msk [vmem:[#allocation2 + $0x79] sm:$0xff] %vm713_vm3, %v841_v6  ;;  %6147 = vrot.lane.b32.xlu1 %v6136_v44, %s11763_s12  ;;  %6177 = vrot.lane.b32.xlu0 %v6176_v8, %s11763_s12  ;;  %11824 = vst [vmem:[#allocation28_spill] sm:$0xff] %v8146_v40  ;;  %v6206_v44 = vpack.i.bf16 %v8134_v30, %v8132_v29  ;;  %v1023_v45 = vsel %vm1000_vm5, %v1021_v21, %v1022_v26  ;;  %v1103_v46 = vrot.slane %v8112_v15, 2 }
 0x19d   : > { %11821 = vst [vmem:[#allocation25_spill] sm:$0xff] %v8102_v9  ;;  %v844_v10 = vsel %vm780_vm10, %v8092_v63, %v812_v7  ;;  %vm778_vm11 = vcmp.gt.f32.partialorder %v8102_v9, 0.0  ;;  %v810_v13 = vmul.f32 0.01, %v8102_v9  ;;  %11825 = vst [vmem:[#allocation29_spill] sm:$0xff] %v8149_v41  ;;  %v1105_v48 = vrot.slane %v912_v19, 2 }
 0x19e   : > { %877 = vst.msk [vmem:[#allocation2 + $0x99] sm:$0xff] %vm713_vm3, %v844_v10  ;;  %v1025_v52 = vsel %vm1000_vm5, %v1022_v26, %v1024_v31  ;;  %vm793_vm14 = vcmp.gt.f32.partialorder %v8146_v40, 0.0  ;;  %v825_v56 = vmul.f32 0.01, %v8146_v40  ;;  %vm796_vm15 = vcmp.gt.f32.partialorder %v8149_v41, 0.0 }
 0x19f   : > { %v842_v18 = vsel %vm778_vm11, %v8102_v9, %v810_v13  ;;  %v1104_v10 = vsel %vm1081_vm6, %v1102_v33, %v1103_v46  ;;  %v1106_v13 = vsel %vm1081_vm6, %v1103_v46, %v1105_v48  ;;  %v1143_v33 = vrot.slane %v8134_v30, 2  ;;  %v8223_v46 = vld [vmem:[#allocation2 + $0x108] sm:$0xff]  ;;  %v8225_v48 = vld [vmem:[#allocation2 + $0x110] sm:$0xff] }
 0x1a0   : > { %875 = vst.msk [vmem:[#allocation2 + $0x81] sm:$0xff] %vm713_vm3, %v842_v18  ;;  %6162 = vrot.lane.b32.xlu1 %v6171_v58, %s11711_s25  ;;  %6187 = vrot.lane.b32.xlu0 %v6186_v20, %s11709_s24  ;;  %v828_v58 = vmul.f32 0.01, %v8149_v41  ;;  %v857_v0 = vsel %vm793_vm14, %v8146_v40, %v825_v56  ;;  %v685_v18 = vpop.f32.mrf.mxu1  ;;  %v8209_v31 = vpack.i.bf16 %v1106_v13, %v1104_v10  ;;  %v1016_v10 = vrot.slane %v8124_v24, 1 }
 0x1a1   : > { %890 = vst.msk [vmem:[#allocation2 + $0x139] sm:$0xff] %vm713_vm3, %v857_v0  ;;  %v8214_v35 = vadd.f32 %v7961_v34, %v685_v18  ;;  %v1017_v13 = vrot.slane %v8126_v25, 1  ;;  %v1097_v18 = vrot.slane %v8124_v24, 2 }
 0x1a2   : > { %v860_v1 = vsel %vm796_vm15, %v8149_v41, %v828_v58 }
 0x1a3   : > { %893 = vst.msk [vmem:[#allocation2 + $0x159] sm:$0xff] %vm713_vm3, %v860_v1  ;;  %11831 = vst [vmem:[#allocation35_spill] sm:$0xff] %v8214_v35  ;;  %vm794_vm10 = vcmp.gt.f32.partialorder %v8214_v35, 0.0 }
 0x1a4   : > { %v5842_v32 = vpop.f32.mrf.mxu0  ;;  %6167 = vrot.lane.b32.xlu1 %v6176_v8, %s11713_s29  ;;  %6192 = vrot.lane.b32.xlu0 %v6191_v38, %s11707_s14  ;;  %v8186_v8 = vpack.i.bf16 %v1025_v52, %v1023_v45  ;;  %v1145_v52 = vrot.slane %v8206_v27, 2 }
 0x1a5   : > { %v8140_v37 = vadd.f32 %v5842_v32, %v7961_v34  ;;  %v1142_v32 = vrot.slane %v8132_v29, 2 }
 0x1a6   : > { %v634_v42 = vpop.f32.mrf.mxu0 }
 0x1a7   : > { %11823 = vst [vmem:[#allocation27_spill] sm:$0xff] %v8140_v37  ;;  %vm783_vm13 = vcmp.gt.f32.partialorder %v8140_v37, 0.0  ;;  %v815_v49 = vmul.f32 0.01, %v8140_v37  ;;  %v8159_v51 = vadd.f32 %v7961_v34, %v634_v42 }
 0x1a8   : > { %v5843_v53 = vpop.f32.mrf.mxu0  ;;  %6182 = vrot.lane.b32.xlu1 %v6186_v20, %s11707_s14  ;;  %6207 = vrot.lane.b32.xlu0 %v6206_v44, %s11709_s24 }
 0x1a9   : > { %11826 = vst [vmem:[#allocation30_spill] sm:$0xff] %v8159_v51  ;;  %v847_v59 = vsel %vm783_vm13, %v8140_v37, %v815_v49  ;;  %vm781_vm2 = vcmp.gt.f32.partialorder %v8159_v51, 0.0  ;;  %v813_v60 = vmul.f32 0.01, %v8159_v51  ;;  %v8171_v61 = vadd.f32 %v5843_v53, %v7961_v34 }
 0x1aa   : > { %880 = vst.msk [vmem:[#allocation2 + $0xc1] sm:$0xff] %vm713_vm3, %v847_v59  ;;  %v637_v62 = vpop.f32.mrf.mxu0  ;;  %v909_v59 = vld [vmem:[#allocation2 + $0x58] sm:$0x3] }
 0x1ab   : > { %11827 = vst [vmem:[#allocation31_spill] sm:$0xff] %v8171_v61  ;;  %v845_v2 = vsel %vm781_vm2, %v8159_v51, %v813_v60  ;;  %vm784_vm4 = vcmp.gt.f32.partialorder %v8171_v61, 0.0  ;;  %v816_v5 = vmul.f32 0.01, %v8171_v61  ;;  %v8181_v6 = vadd.f32 %v7961_v34, %v637_v62 }
 0x1ac   : > { %878 = vst.msk [vmem:[#allocation2 + $0xa9] sm:$0xff] %vm713_vm3, %v845_v2  ;;  %v5846_v7 = vpop.f32.mrf.mxu0  ;;  %6197 = vrot.lane.b32.xlu1 %v6206_v44, %s11707_s14  ;;  %6232 = vrot.lane.b32.xlu0 %v8186_v8, %s11761_s30  ;;  %v6241_v60 = vpack.i.bf16 %v8225_v48, %v8223_v46  ;;  %v1144_v2 = vsel %vm1081_vm6, %v1142_v32, %v1143_v33 }
 0x1ad   : > { %11828 = vst [vmem:[#allocation32_spill] sm:$0xff] %v8181_v6  ;;  %v848_v14 = vsel %vm784_vm4, %v8171_v61, %v816_v5  ;;  %vm782_vm7 = vcmp.gt.f32.partialorder %v8181_v6, 0.0  ;;  %v814_v15 = vmul.f32 0.01, %v8181_v6  ;;  %v8195_v17 = vadd.f32 %v5846_v7, %v7961_v34  ;;  %v5858_v5 = vpop.f32.mrf.mxu1 }
 0x1ae   : > { %881 = vst.msk [vmem:[#allocation2 + $0xc9] sm:$0xff] %vm713_vm3, %v848_v14  ;;  %v650_v19 = vpop.f32.mrf.mxu0  ;;  %v1146_v7 = vsel %vm1081_vm6, %v1143_v33, %v1145_v52  ;;  %v1019_v14 = vrot.slane %v909_v59, 1  ;;  %v1018_v32 = vsel %vm1000_vm5, %v1016_v10, %v1017_v13  ;;  %vm1988_vm4 = vcmask 64512  }
 0x1af   : > { %11829 = vst [vmem:[#allocation33_spill] sm:$0xff] %v8195_v17  ;;  %v846_v20 = vsel %vm782_vm7, %v8181_v6, %v814_v15  ;;  %vm787_vm8 = vcmp.gt.f32.partialorder %v8195_v17, 0.0  ;;  %v819_v21 = vmul.f32 0.01, %v8195_v17  ;;  %v8204_v26 = vadd.f32 %v7961_v34, %v650_v19 }
 0x1b0   : > { %879 = vst.msk [vmem:[#allocation2 + $0xb1] sm:$0xff] %vm713_vm3, %v846_v20  ;;  %v5847_v28 = vpop.f32.mrf.mxu0  ;;  %6202 = vrot.lane.b32.xlu1 %v6191_v38, %s11709_s24  ;;  %v826_v38 = vmul.f32 0.01, %v8214_v35  ;;  %6237 = vrot.lane.b32.xlu0 %v8209_v31, %s11759_s15  ;;  %v1098_v19 = vrot.slane %v8126_v25, 2  ;;  %v1100_v20 = vrot.slane %v909_v59, 2  ;;  %v1020_v33 = vsel %vm1000_vm5, %v1017_v13, %v1019_v14 }
 0x1b1   : > { %11830 = vst [vmem:[#allocation34_spill] sm:$0xff] %v8204_v26  ;;  %v851_v42 = vsel %vm787_vm8, %v8195_v17, %v819_v21  ;;  %vm785_vm9 = vcmp.gt.f32.partialorder %v8204_v26, 0.0  ;;  %v817_v44 = vmul.f32 0.01, %v8204_v26  ;;  %v8221_v45 = vadd.f32 %v5847_v28, %v7961_v34  ;;  %v698_v28 = vpop.f32.mrf.mxu1 }
 0x1b2   : > { %884 = vst.msk [vmem:[#allocation2 + $0xf1] sm:$0xff] %vm713_vm3, %v851_v42  ;;  %v653_v49 = vpop.f32.mrf.mxu0  ;;  %v858_v62 = vsel %vm794_vm10, %v8214_v35, %v826_v38  ;;  %v8261_v21 = vpack.i.bf16 %v1146_v7, %v1144_v2  ;;  %v1099_v24 = vsel %vm1081_vm6, %v1097_v18, %v1098_v19  ;;  %v1101_v25 = vsel %vm1081_vm6, %v1098_v19, %v1100_v20 }
 0x1b3   : > { %11832 = vst [vmem:[#allocation36_spill] sm:$0xff] %v8221_v45  ;;  %v849_v53 = vsel %vm785_vm9, %v8204_v26, %v817_v44  ;;  %vm788_vm11 = vcmp.gt.f32.partialorder %v8221_v45, 0.0  ;;  %v820_v56 = vmul.f32 0.01, %v8221_v45  ;;  %v8237_v58 = vadd.f32 %v7961_v34, %v653_v49  ;;  %891 = vst.msk [vmem:[#allocation2 + $0x141] sm:$0xff] %vm713_vm3, %v858_v62  ;;  %v5859_v38 = vpop.f32.mrf.mxu1 }
 0x1b4   : > { %882 = vst.msk [vmem:[#allocation2 + $0xd9] sm:$0xff] %vm713_vm3, %v849_v53  ;;  %6212 = vrot.lane.b32.xlu1 %v8186_v8, %s11711_s25  ;;  %6242 = vrot.lane.b32.xlu0 %v6241_v60, %s11707_s14  ;;  %v1061_v42 = vrot.slane %v8132_v29, 1  ;;  %v1062_v44 = vrot.slane %v8134_v30, 1  ;;  %v1064_v49 = vrot.slane %v8206_v27, 1  ;;  %v8274_v52 = vpack.i.bf16 %v1020_v33, %v1018_v32 }
 0x1b5   : > { %11833 = vst [vmem:[#allocation37_spill] sm:$0xff] %v8237_v58  ;;  %v852_v0 = vsel %vm788_vm11, %v8221_v45, %v820_v56  ;;  %vm786_vm12 = vcmp.gt.f32.partialorder %v8237_v58, 0.0  ;;  %v818_v1 = vmul.f32 0.01, %v8237_v58  ;;  %v8278_v53 = vpack.i.bf16 %v1101_v25, %v1099_v24  ;;  %v933_v56 = vld [vmem:[#allocation2 + $0x118] sm:$0x3]  ;;  %v701_v18 = vpop.f32.mrf.mxu1 }
 0x1b6   : > { %885 = vst.msk [vmem:[#allocation2 + $0xf9] sm:$0xff] %vm713_vm3, %v852_v0  ;;  %v8281_v59 = vadd.f32 %v5858_v5, %v7961_v34  ;;  %v1063_v29 = vsel %vm1000_vm5, %v1061_v42, %v1062_v44  ;;  %v1065_v30 = vsel %vm1000_vm5, %v1062_v44, %v1064_v49  ;;  %v8286_v27 = vadd.f32 %v7961_v34, %v698_v28  ;;  %v917_v42 = vld [vmem:[#allocation2 + $0x98] sm:$0xff]  ;;  %v8332_v44 = vld [vmem:[%s11838_s3 + $0x10] ss:$0 sps:$4 sm:$0x33]  }
 0x1b7   : > { %v850_v15 = vsel %vm786_vm12, %v8237_v58, %v818_v1  ;;  %v1056_v62 = vrot.slane %v8223_v46, 1  ;;  %v1057_v0 = vrot.slane %v8225_v48, 1  ;;  %v1059_v2 = vrot.slane %v933_v56, 1  ;;  %5952 = vmatprep.subr.msk.bf16.mxu1 %vm546_vm1, %v8332_v44  ;;  %v921_v45 = vld [vmem:[#allocation2 + $0xb8] sm:$0x3]  ;;  %v8448_v37 = vld [vmem:[#allocation2 + $0xb0] sm:$0xff] }
 0x1b8   : > { %883 = vst.msk [vmem:[#allocation2 + $0xe1] sm:$0xff] %vm713_vm3, %v850_v15  ;;  %6217 = vrot.lane.b32.xlu1 %v8209_v31, %s11713_s29  ;;  %6267 = vrot.lane.b32.xlu0 %v8261_v21, %s11713_s29  ;;  %11834 = vst [vmem:[#allocation38_spill] sm:$0xff] %v8281_v59  ;;  %vm799_vm13 = vcmp.gt.f32.partialorder %v8281_v59, 0.0  ;;  %v831_v1 = vmul.f32 0.01, %v8281_v59  ;;  %vm797_vm14 = vcmp.gt.f32.partialorder %v8286_v27, 0.0  ;;  %v6296_v13 = vpack.i.bf16 %v1065_v30, %v1063_v29 }
 0x1b9   : > { %11835 = vst [vmem:[#allocation39_spill] sm:$0xff] %v8286_v27  ;;  %v829_v5 = vmul.f32 0.01, %v8286_v27  ;;  %v1058_v14 = vsel %vm1000_vm5, %v1056_v62, %v1057_v0  ;;  %v1060_v19 = vsel %vm1000_vm5, %v1057_v0, %v1059_v2  ;;  %v1137_v20 = vrot.slane %v8223_v46, 2  ;;  %v8346_v29 = vld [vmem:[#allocation2 + $0x80] sm:$0xff] }
 0x1ba   : > { %v1138_v28 = vrot.slane %v8225_v48, 2  ;;  %v1140_v32 = vrot.slane %v933_v56, 2  ;;  %v8320_v33 = vpack.i.bf16 %v1060_v19, %v1058_v14  ;;  %v916_v48 = vld [vmem:[#allocation2 + $0x90] sm:$0xff]  ;;  %v8344_v56 = vld [vmem:[#allocation2 + $0x78] sm:$0xff]  ;;  %v918_v30 = vld [vmem:[#allocation2 + $0xa0] sm:$0x3] }
 0x1bb   : > { %v861_v10 = vsel %vm797_vm14, %v8286_v27, %v829_v5  ;;  %v8350_v62 = vld [vmem:[#allocation2 + $0x160] sm:$0x3]  ;;  %v8356_v0 = vpack.i.bf16 %v8346_v29, %v8344_v56  ;;  %v1032_v2 = vrot.slane %v917_v42, 1  ;;  %v8358_v5 = vld [vmem:[#allocation2 + $0x150] sm:$0xff]  ;;  %v1113_v14 = vrot.slane %v917_v42, 2 }
 0x1bc   : > { %6222 = vrot.lane.b32.xlu1 %v8186_v8, %s11765_s16  ;;  %6272 = vrot.lane.b32.xlu0 %v8274_v52, %s11765_s16  ;;  %v8289_v8 = vadd.f32 %v5859_v38, %v7961_v34  ;;  %894 = vst.msk [vmem:[#allocation2 + $0x169] sm:$0xff] %vm713_vm3, %v861_v10  ;;  %v1139_v24 = vsel %vm1081_vm6, %v1137_v20, %v1138_v28  ;;  %v1112_v10 = vrot.slane %v916_v48, 2  ;;  %v1155_v20 = vrot.slane %v8350_v62, 2 }
 0x1bd   : > { %v1141_v25 = vsel %vm1081_vm6, %v1138_v28, %v1140_v32  ;;  %v8342_v38 = vpack.i.bf16 %v917_v42, %v916_v48  ;;  %v8382_v42 = vld [vmem:[#allocation2 + $0x140] sm:$0xff]  ;;  %vm2021_vm7 = vcmask 97280   ;;  %vm2054_vm8 = vcmask 130048  }
 0x1be   : > { %11836 = vst [vmem:[#allocation40_spill] sm:$0xff] %v8289_v8  ;;  %vm800_vm15 = vcmp.gt.f32.partialorder %v8289_v8, 0.0  ;;  %v832_v7 = vmul.f32 0.01, %v8289_v8  ;;  %v8335_v49 = vpack.i.bf16 %v1141_v25, %v1139_v24  ;;  %v1114_v25 = vsel %vm1081_vm6, %v1112_v10, %v1113_v14  ;;  %v8390_v10 = vld [vmem:[#allocation2 + $0xf8] sm:$0xff] }
 0x1bf   : > { %v1052_v41 = vrot.slane %v8390_v10, 1  ;;  %v1133_v40 = vrot.slane %v8390_v10, 2  ;;  %v1148_v11 = vrot.slane %v8382_v42, 2  ;;  %vm2087_vm9 = vcmask 162816  }
 0x1c0   : > { %6227 = vrot.lane.b32.xlu1 %v8209_v31, %s11763_s12  ;;  %6282 = vrot.lane.b32.xlu0 %v8278_v53, %s11763_s12  ;;  %v863_v31 = vsel %vm799_vm13, %v8281_v59, %v831_v1  ;;  %v864_v15 = vsel %vm800_vm15, %v8289_v8, %v832_v7  ;;  %v1031_v1 = vrot.slane %v916_v48, 1  ;;  %v1034_v7 = vrot.slane %v918_v30, 1  ;;  %v8380_v48 = vld [vmem:[#allocation2 + $0x138] sm:$0xff] }
 0x1c1   : > { %896 = vst.msk [vmem:[#allocation2 + $0x181] sm:$0xff] %vm713_vm3, %v863_v31  ;;  %897 = vst.msk [vmem:[#allocation2 + $0x189] sm:$0xff] %vm713_vm3, %v864_v15  ;;  %v8360_v31 = vld [vmem:[#allocation2 + $0x158] sm:$0xff]  ;;  %v1115_v15 = vrot.slane %v918_v30, 2  ;;  %v8403_v8 = vpack.i.bf16 %v8382_v42, %v8380_v48  ;;  %vm2120_vm10 = vcmask 195584   ;;  %vm2153_vm11 = vcmask 228352  }
 0x1c2   : > { %v1153_v19 = vrot.slane %v8360_v31, 2  ;;  %v8370_v28 = vpack.i.bf16 %v8360_v31, %v8358_v5  ;;  %v1033_v32 = vsel %vm1000_vm5, %v1031_v1, %v1032_v2  ;;  %v1035_v24 = vsel %vm1000_vm5, %v1032_v2, %v1034_v7  ;;  %v8388_v7 = vld [vmem:[#allocation2 + $0xf0] sm:$0xff] }
 0x1c3   : > { %v1026_v1 = vrot.slane %v8344_v56, 1  ;;  %v1027_v2 = vrot.slane %v8346_v29, 1  ;;  %v1132_v55 = vrot.slane %v8388_v7, 2  ;;  %v8474_v9 = vld [vmem:[#allocation2 + $0x168] sm:$0xff]  ;;  %vm2186_vm12 = vcmask 261120  }
 0x1c4   : > { %6247 = vrot.lane.b32.xlu1 %v6241_v60, %s11709_s24  ;;  %6297 = vrot.lane.b32.xlu0 %v6296_v13, %s11761_s30  ;;  %v8316_v60 = vadd.f32 %v7961_v34, %v701_v18  ;;  %v1152_v18 = vrot.slane %v8358_v5, 2  ;;  %v1156_v30 = vsel %vm1081_vm6, %v1153_v19, %v1155_v20  ;;  %v927_v20 = vld [vmem:[#allocation2 + $0xe8] sm:$0x3]  ;;  %vm2262_vm13 = vcmask 293888  }
 0x1c5   : > { %v1049_v35 = vrot.slane %v927_v20, 1  ;;  %v1134_v61 = vsel %vm1081_vm6, %v1132_v55, %v1133_v40  ;;  %v7539_v55 = vld [vmem:[%s11838_s3] sm:$0xff]  }
 0x1c6   : > { %11837 = vst [vmem:[#allocation41_spill] sm:$0xff] %v8316_v60  ;;  %vm798_vm2 = vcmp.gt.f32.partialorder %v8316_v60, 0.0  ;;  %v830_v46 = vmul.f32 0.01, %v8316_v60 }
 0x1c8   : > { %6252 = vrot.lane.b32.xlu1 %v8274_v52, %s11711_s25  ;;  %6317 = vrot.lane.b32.xlu0 %v8320_v33, %s11765_s16  ;;  %v862_v34 = vsel %vm798_vm2, %v8316_v60, %v830_v46  ;;  %v8376_v46 = vld [vmem:[#allocation2 + $0x88] sm:$0x3] }
 0x1c9   : > { %895 = vst.msk [vmem:[#allocation2 + $0x171] sm:$0xff] %vm713_vm3, %v862_v34  ;;  %v1154_v34 = vsel %vm1081_vm6, %v1152_v18, %v1153_v19  ;;  %v1029_v60 = vrot.slane %v8376_v46, 1  ;;  %v8399_v18 = vld [vmem:[#allocation2 + $0xe0] sm:$0xff] }
 0x1ca   : > { %v930_v19 = vld [vmem:[#allocation2 + $0x100] sm:$0x3]  ;;  %v8405_v27 = vpack.i.bf16 %v1156_v30, %v1154_v34  ;;  %v8419_v34 = vld [vmem:[#allocation2 + $0x148] sm:$0x3]  ;;  %v1047_v59 = vrot.slane %v8399_v18, 1 }
 0x1cb   : > { %v1054_v30 = vrot.slane %v930_v19, 1  ;;  %v1135_v16 = vrot.slane %v930_v19, 2  ;;  %v1150_v58 = vrot.slane %v8419_v34, 2 }
 0x1cc   : > { %6257 = vrot.lane.b32.xlu1 %v6296_v13, %s11711_s25  ;;  %6322 = vrot.lane.b32.xlu0 %v8335_v49, %s11763_s12 }
 0x1cd   : > { %v1055_v17 = vsel %vm1000_vm5, %v1052_v41, %v1054_v30  ;;  %v1136_v51 = vsel %vm1081_vm6, %v1133_v40, %v1135_v16  ;;  %v1030_v16 = vsel %vm1000_vm5, %v1027_v2, %v1029_v60  ;;  %v1039_v30 = vrot.slane %v921_v45, 1 }
 0x1d0   : > { %6262 = vrot.lane.b32.xlu1 %v8278_v53, %s11713_s29  ;;  %6337 = vrot.lane.b32.xlu0 %v8342_v38, %s11709_s24 }
 0x1d4   : > { %6277 = vrot.lane.b32.xlu1 %v6296_v13, %s11765_s16  ;;  %6342 = vrot.lane.b32.xlu0 %v8356_v0, %s11707_s14  ;;  %v1116_v13 = vsel %vm1081_vm6, %v1113_v14, %v1115_v15  ;;  %v8394_v14 = vpack.i.bf16 %v1035_v24, %v1033_v32  ;;  %v8412_v32 = vsel %vm1000_vm5, %v1026_v1, %v1027_v2  ;;  %v1147_v24 = vrot.slane %v8380_v48, 2 }
 0x1d5   : > { %v8396_v15 = vpack.i.bf16 %v1116_v13, %v1114_v25  ;;  %v8415_v25 = vld [vmem:[#allocation2 + $0xd8] sm:$0xff]  ;;  %v1051_v13 = vrot.slane %v8388_v7, 1  ;;  %v1130_v1 = vrot.slane %v927_v20, 2  ;;  %v2312_v20 = vsel %vm546_vm1, %v8332_v44, 0 }
 0x1d6   : > { %v1046_v4 = vrot.slane %v8415_v25, 1  ;;  %v1127_v19 = vrot.slane %v8415_v25, 2  ;;  %5861 = vmatpush3.bf16.msra.mxu1 %v2312_v20  ;;  %v1050_v44 = vsel %vm1000_vm5, %v1047_v59, %v1049_v35  ;;  %v1149_v35 = vsel %vm1081_vm6, %v1147_v24, %v1148_v11  ;;  %v945_v20 = vld [vmem:[#allocation2 + $0x178] sm:$0x3]  ;;  %v8476_v24 = vld [vmem:[#allocation2 + $0x170] sm:$0xff] }
 0x1d7   : > { %v1053_v26 = vsel %vm1000_vm5, %v1051_v13, %v1052_v41  ;;  %v8446_v13 = vld [vmem:[#allocation2 + $0xa8] sm:$0xff]  ;;  %5862 = vmatprep.subr.bf16.mxu1 %v7538_v23 }
 0x1d8   : > { %6287 = vrot.lane.b32.xlu1 %v8261_v21, %s11763_s12  ;;  %6357 = vrot.lane.b32.xlu0 %v8370_v28, %s11709_s24  ;;  %v1048_v6 = vsel %vm1000_vm5, %v1046_v4, %v1047_v59  ;;  %v1036_v40 = vrot.slane %v8446_v13, 1  ;;  %v1151_v59 = vsel %vm1081_vm6, %v1148_v11, %v1150_v58  ;;  %v1117_v2 = vrot.slane %v8446_v13, 2 }
 0x1da   : > { %5863 = vmatpush3.bf16.msra.mxu1 %v7538_v23  ;;  %v1118_v23 = vrot.slane %v8448_v37, 2 }
 0x1db   : > { %5864 = vmatprep.subr.bf16.mxu1 %v7539_v55 }
 0x1dc   : > { %6292 = vrot.lane.b32.xlu1 %v8274_v52, %s11761_s30  ;;  %6382 = vrot.lane.b32.xlu0 %v8394_v14, %s11761_s30  ;;  %v1128_v52 = vrot.slane %v8399_v18, 2 }
 0x1de   : > { %v1129_v41 = vsel %vm1081_vm6, %v1127_v19, %v1128_v52  ;;  %v1131_v4 = vsel %vm1081_vm6, %v1128_v52, %v1130_v1  ;;  %v8463_v52 = vpack.i.bf16 %v1055_v17, %v1053_v26  ;;  %v8465_v1 = vpack.i.bf16 %v1136_v51, %v1134_v61  ;;  %5865 = vmatpush3.bf16.msra.mxu1 %v7539_v55 }
 0x1df   : > { %v8467_v19 = vpack.i.bf16 %v1050_v44, %v1048_v6  ;;  %v8469_v60 = vpack.i.bf16 %v1131_v4, %v1129_v41  ;;  %v8481_v61 = vpack.i.bf16 %v1151_v59, %v1149_v35  ;;  %v1120_v6 = vrot.slane %v921_v45, 2  ;;  %v8496_v45 = vpop.permute.xlu1 %6102 }
 0x1e0   : > { %6302 = vrot.lane.b32.xlu1 %v8278_v53, %s11759_s15  ;;  %6387 = vrot.lane.b32.xlu0 %v8396_v15, %s11759_s15  ;;  %v1110_v53 = vrot.slane %v8376_v46, 2  ;;  %v1037_v46 = vrot.slane %v8448_v37, 1  ;;  %v1076_v17 = vrot.slane %v8474_v9, 1  ;;  %v1077_v26 = vrot.slane %v8476_v24, 1  ;;  %11839 = vst [vmem:[#allocation42_spill] sm:$0xff] %v8496_v45 }
 0x1e1   : > { %v1079_v44 = vrot.slane %v945_v20, 1  ;;  %v1157_v41 = vrot.slane %v8474_v9, 2  ;;  %v1158_v4 = vrot.slane %v8476_v24, 2  ;;  %v11841_v35 = vrot.slane %v8344_v56, 2 }
 0x1e2   : > { %v1038_v11 = vsel %vm1000_vm5, %v1036_v40, %v1037_v46  ;;  %v1040_v51 = vsel %vm1000_vm5, %v1037_v46, %v1039_v30  ;;  %v1160_v40 = vrot.slane %v945_v20, 2  ;;  %v8494_v46 = vpack.i.bf16 %v1030_v16, %v8412_v32 }
 0x1e3   : > { %v8487_v58 = vpack.i.bf16 %v1040_v51, %v1038_v11  ;;  %v11840_v30 = vrot.slane %v8346_v29, 2  ;;  %v1071_v55 = vrot.slane %v8358_v5, 1  ;;  %v1072_v20 = vrot.slane %v8360_v31, 1 }
 0x1e4   : > { %6307 = vrot.lane.b32.xlu1 %v8320_v33, %s11711_s25  ;;  %6392 = vrot.lane.b32.xlu0 %v8403_v8, %s11707_s14  ;;  %v1074_v32 = vrot.slane %v8350_v62, 1  ;;  %v1119_v16 = vsel %vm1081_vm6, %v1117_v2, %v1118_v23  ;;  %v1121_v63 = vsel %vm1081_vm6, %v1118_v23, %v1120_v6  ;;  %v1078_v56 = vsel %vm1000_vm5, %v1076_v17, %v1077_v26  ;;  %v8529_v2 = vpop.permute.xlu1 %6107 }
 0x1e5   : > { %v1109_v59 = vsel %vm1081_vm6, %v11841_v35, %v11840_v30  ;;  %v11842_v11 = vmov %v11840_v30  ;;  %v1080_v30 = vsel %vm1000_vm5, %v1077_v26, %v1079_v44  ;;  %v1159_v29 = vsel %vm1081_vm6, %v1157_v41, %v1158_v4 }
 0x1e6   : > { %v1111_v51 = vsel %vm1081_vm6, %v11842_v11, %v1110_v53  ;;  %v1161_v53 = vsel %vm1081_vm6, %v1158_v4, %v1160_v40  ;;  %v8517_v5 = vpack.i.bf16 %v1121_v63, %v1119_v16  ;;  %v1073_v23 = vsel %vm1000_vm5, %v1071_v55, %v1072_v20  ;;  %v6098_v4 = vpop.permute.xlu0 %6097  ;;  %v923_v40 = vld [vmem:[#allocation2 + $0xc8] sm:$0xff]  ;;  %v924_v11 = vld [vmem:[#allocation2 + $0xd0] sm:$0x3]  ;;  %v8574_v16 = vld [vmem:[#allocation2 + $0x180] sm:$0xff] }
 0x1e7   : > { %v8523_v62 = vpack.i.bf16 %v1161_v53, %v1159_v29  ;;  %v8527_v31 = vpack.i.bf16 %v1111_v51, %v1109_v59  ;;  %v1075_v6 = vsel %vm1000_vm5, %v1072_v20, %v1074_v32  ;;  %v1066_v63 = vrot.slane %v8380_v48, 1 }
 0x1e8   : > { %6312 = vrot.lane.b32.xlu1 %v8335_v49, %s11713_s29  ;;  %6417 = vrot.lane.b32.xlu0 %v8405_v27, %s11713_s29  ;;  %v1067_v17 = vrot.slane %v8382_v42, 1  ;;  %v1069_v26 = vrot.slane %v8419_v34, 1  ;;  %v8546_v48 = vpop.permute.xlu1 %6112  ;;  %v922_v34 = vld [vmem:[#allocation2 + $0xc0] sm:$0xff]  ;;  %v8572_v55 = vpack.i.bf16 %v8448_v37, %v8446_v13  ;;  %v1042_v32 = vrot.slane %v923_v40, 1 }
 0x1e9   : > { %11843 = vst [vmem:[#allocation43_spill] sm:$0xff] %v8546_v48  ;;  %v8562_v59 = vpack.i.bf16 %v923_v40, %v922_v34  ;;  %v1041_v20 = vrot.slane %v922_v34, 1 }
 0x1ea   : > { %v1068_v44 = vsel %vm1000_vm5, %v1066_v63, %v1067_v17  ;;  %v1070_v41 = vsel %vm1000_vm5, %v1067_v17, %v1069_v26  ;;  %v1123_v63 = vrot.slane %v923_v40, 2  ;;  %v1125_v17 = vrot.slane %v924_v11, 2 }
 0x1eb   : > { %v8550_v42 = vpack.i.bf16 %v1070_v41, %v1068_v44  ;;  %v1043_v13 = vsel %vm1000_vm5, %v1041_v20, %v1042_v32  ;;  %v6100_v26 = vunpack.i.h.bf16 %v6098_v4  ;;  %v6110_v20 = vunpack.i.h.bf16 %v8529_v2 }
 0x1ec   : > { %6327 = vrot.lane.b32.xlu1 %v8320_v33, %s11761_s30  ;;  %6422 = vrot.lane.b32.xlu0 %v8494_v46, %s11765_s16  ;;  %v8521_v33 = vpack.i.bf16 %v1080_v30, %v1078_v56  ;;  %v8576_v56 = vld [vmem:[#allocation2 + $0x188] sm:$0xff]  ;;  %v1044_v30 = vrot.slane %v924_v11, 1 }
 0x1ed   : > { %v8588_v37 = vpack.i.bf16 %v8576_v56, %v8574_v16  ;;  %v7546_v11 = vld [vmem:[#allocation2 + $0x8] sm:$0xff] }
 0x1f0   : > { %6332 = vrot.lane.b32.xlu1 %v8342_v38, %s11707_s14  ;;  %6432 = vrot.lane.b32.xlu0 %v8527_v31, %s11763_s12  ;;  %v8540_v38 = vpack.i.bf16 %v1075_v6, %v1073_v23  ;;  %v1045_v23 = vsel %vm1000_vm5, %v1042_v32, %v1044_v30  ;;  %v1122_v6 = vrot.slane %v922_v34, 2  ;;  %v6109_v34 = vunpack.i.l.bf16 %v8529_v2  ;;  %v7547_v32 = vld [vmem:[#allocation2] sm:$0xff] }
 0x1f1   : > { %v8600_v57 = vpack.i.bf16 %v1045_v23, %v1043_v13 }
 0x1f2   : > { %v1124_v40 = vsel %vm1081_vm6, %v1122_v6, %v1123_v63 }
 0x1f4   : > { %6347 = vrot.lane.b32.xlu1 %v8370_v28, %s11707_s14  ;;  %6447 = vrot.lane.b32.xlu0 %v8540_v38, %s11761_s30 }
 0x1f8   : > { %6352 = vrot.lane.b32.xlu1 %v8356_v0, %s11709_s24  ;;  %6467 = vrot.lane.b32.xlu0 %v8550_v42, %s11765_s16 }
 0x1fa   : > { %v8554_v28 = vpop.permute.xlu0 %6122  ;;  %v8558_v35 = vpop.permute.xlu1 %6117 }
 0x1fc   : > { %6362 = vrot.lane.b32.xlu1 %v8394_v14, %s11711_s25  ;;  %6472 = vrot.lane.b32.xlu0 %v8481_v61, %s11763_s12 }
 0x1fe   : > { %v6128_v0 = vpop.permute.xlu0 %6127 }
 0x1ff   : > { %v6130_v23 = vunpack.i.h.bf16 %v6128_v0  ;;  %v6129_v50 = vunpack.i.l.bf16 %v6128_v0  ;;  %v8622_v0 = vpack.i.bf16 %v8476_v24, %v8474_v9 }
 0x200   : > { %6367 = vrot.lane.b32.xlu1 %v8396_v15, %s11713_s29  ;;  %6487 = vrot.lane.b32.xlu0 %v8562_v59, %s11709_s24 }
 0x201   : > { %v8566_v51 = vpop.permute.xlu1 %6132 }
 0x202   : > { %v8580_v29 = vpop.permute.xlu0 %6152 }
 0x204   : > { %6372 = vrot.lane.b32.xlu1 %v8394_v14, %s11765_s16  ;;  %6492 = vrot.lane.b32.xlu0 %v8572_v55, %s11707_s14  ;;  %v6099_v14 = vunpack.i.l.bf16 %v6098_v4  ;;  %v1126_v4 = vsel %vm1081_vm6, %v1123_v63, %v1125_v17 }
 0x205   : > { %v8614_v63 = vpack.i.bf16 %v1126_v4, %v1124_v40 }
 0x206   : > { %v8582_v53 = vpop.permute.xlu1 %6137  ;;  %v8594_v44 = vpop.permute.xlu0 %6157  ;;  %v1956_v30 = vsel %vm713_vm3, %v7547_v32, %v6099_v14 }
 0x207   : > { %v1989_v17 = vsel %vm1988_vm4, %v1956_v30, %v6109_v34  ;;  %v6125_v34 = vunpack.i.h.bf16 %v8554_v28 }
 0x208   : > { %6377 = vrot.lane.b32.xlu1 %v8396_v15, %s11763_s12  ;;  %6507 = vrot.lane.b32.xlu0 %v8588_v37, %s11709_s24  ;;  %v1957_v15 = vsel %vm713_vm3, %v7546_v11, %v6100_v26  ;;  %v2022_v40 = vsel %vm2021_vm7, %v1989_v17, %v6129_v50  ;;  %v6155_v50 = vunpack.i.h.bf16 %v8580_v29  ;;  %v6160_v17 = vunpack.i.h.bf16 %v8594_v44 }
 0x209   : > { %v1990_v26 = vsel %vm1988_vm4, %v1957_v15, %v6110_v20  ;;  %v6124_v20 = vunpack.i.l.bf16 %v8554_v28 }
 0x20a   : > { %v8596_v41 = vpop.permute.xlu1 %6142  ;;  %v6173_v13 = vpop.permute.xlu0 %6172  ;;  %v2023_v14 = vsel %vm2021_vm7, %v1990_v26, %v6130_v23  ;;  %v6159_v26 = vunpack.i.l.bf16 %v8594_v44 }
 0x20b   : > { %v6175_v2 = vunpack.i.h.bf16 %v6173_v13  ;;  %v6174_v6 = vunpack.i.l.bf16 %v6173_v13  ;;  %v6154_v13 = vunpack.i.l.bf16 %v8580_v29 }
 0x20c   : > { %6397 = vrot.lane.b32.xlu1 %v8403_v8, %s11709_s24  ;;  %6532 = vrot.lane.b32.xlu0 %v8600_v57, %s11761_s30 }
 0x20d   : > { %v2056_v15 = vsel %vm2054_vm8, %v2023_v14, %v6175_v2  ;;  %v2055_v32 = vsel %vm2054_vm8, %v2022_v40, %v6174_v6  ;;  %v8644_v6 = vld [vmem:[#allocation2 + $0x190] sm:$0x3]  ;;  %v1165_v40 = vrot.slane %v8574_v16, 1 }
 0x20e   : > { %v8610_v22 = vpop.permute.xlu1 %6147  ;;  %v6178_v8 = vpop.permute.xlu0 %6177  ;;  %v1168_v44 = vrot.slane %v8644_v6, 1 }
 0x20f   : > { %v6180_v4 = vunpack.i.h.bf16 %v6178_v8  ;;  %v6179_v11 = vunpack.i.l.bf16 %v6178_v8 }
 0x210   : > { %6402 = vrot.lane.b32.xlu1 %v8494_v46, %s11711_s25  ;;  %6537 = vrot.lane.b32.xlu0 %v8614_v63, %s11759_s15 }
 0x211   : > { %v2088_v9 = vsel %vm2087_vm9, %v2055_v32, %v6179_v11  ;;  %v2089_v24 = vsel %vm2087_vm9, %v2056_v15, %v6180_v4 }
 0x212   : > { %v8630_v30 = vpop.permute.xlu1 %6162  ;;  %v2121_v28 = vsel %vm2120_vm10, %v2088_v9, %v6124_v20  ;;  %v2122_v23 = vsel %vm2120_vm10, %v2089_v24, %v6125_v34  ;;  %v8642_v2 = vpop.permute.xlu0 %6187  ;;  %v1166_v34 = vrot.slane %v8576_v56, 1 }
 0x213   : > { %v2154_v29 = vsel %vm2153_vm11, %v2121_v28, %v6154_v13  ;;  %v2155_v14 = vsel %vm2153_vm11, %v2122_v23, %v6155_v50  ;;  %v6165_v12 = vunpack.i.h.bf16 %v8630_v30  ;;  %v6164_v3 = vunpack.i.l.bf16 %v8630_v30 }
 0x214   : > { %6407 = vrot.lane.b32.xlu1 %v8540_v38, %s11711_s25  ;;  %6542 = vrot.lane.b32.xlu0 %v8622_v0, %s11707_s14  ;;  %v2187_v4 = vsel %vm2186_vm12, %v2154_v29, %v6159_v26  ;;  %v2188_v11 = vsel %vm2186_vm12, %v2155_v14, %v6160_v17  ;;  %v1167_v9 = vsel %vm1000_vm5, %v1165_v40, %v1166_v34  ;;  %v7548_v29 = vld [vmem:[#allocation2 + $0x1a0] sm:$0xff]  ;;  %v7549_v40 = vld [vmem:[#allocation2 + $0x198] sm:$0xff] }
 0x215   : > { %v2219_v20 = vpack.c.bf16 %v2188_v11, %v2187_v4  ;;  %v1169_v24 = vsel %vm1000_vm5, %v1166_v34, %v1168_v44  ;;  %v1184_v14 = vrot.slane %v7548_v29, 2  ;;  %v1183_v4 = vrot.slane %v7549_v40, 2 }
 0x216   : > { %v8648_v8 = vpop.permute.xlu1 %6167  ;;  %v8661_v15 = vpop.permute.xlu0 %6192  ;;  %v8676_v13 = vpack.i.bf16 %v1169_v24, %v1167_v9  ;;  %v8706_v44 = vpack.i.bf16 %v8390_v10, %v8388_v7  ;;  %v8722_v24 = vpack.i.bf16 %v8399_v18, %v8415_v25  ;;  %v6134_v7 = vunpack.i.l.bf16 %v8566_v51 }
 0x217   : > { %5866 = vmatprep.mubr.msk.bf16.mxu1 %vm2262_vm13, %v2219_v20  ;;  %v8713_v20 = vsel %vm1081_vm6, %v1183_v4, %v1184_v14  ;;  %v1170_v4 = vrot.slane %v8574_v16, 2  ;;  %v6139_v16 = vunpack.i.l.bf16 %v8582_v53  ;;  %v6194_v48 = vunpack.i.l.bf16 %v8661_v15 }
 0x218   : > { %6412 = vrot.lane.b32.xlu1 %v8527_v31, %s11713_s29  ;;  %6562 = vrot.lane.b32.xlu0 %v8487_v58, %s11765_s16 }
 0x21a   : > { %v8663_v32 = vpop.permute.xlu1 %6182  ;;  %v8678_v28 = vpop.permute.xlu0 %6207 }
 0x21c   : > { %6427 = vrot.lane.b32.xlu1 %v8540_v38, %s11765_s16  ;;  %6572 = vrot.lane.b32.xlu0 %v8517_v5, %s11763_s12 }
 0x21e   : > { %v8672_v50 = vpop.permute.xlu1 %6197  ;;  %v8688_v38 = vpop.permute.xlu0 %6232 }
 0x220   : > { %6437 = vrot.lane.b32.xlu1 %v8405_v27, %s11763_s12  ;;  %6587 = vrot.lane.b32.xlu0 %v8676_v13, %s11761_s30 }
 0x222   : > { %v8682_v23 = vpop.permute.xlu1 %6202  ;;  %v8700_v34 = vpop.permute.xlu0 %6237 }
 0x224   : > { %6442 = vrot.lane.b32.xlu1 %v8494_v46, %s11761_s30  ;;  %6607 = vrot.lane.b32.xlu0 %v8521_v33, %s11765_s16  ;;  %v7550_v46 = vld [vmem:[#allocation2 + $0x1a8] sm:$0x3] }
 0x225   : > { %v1186_v11 = vrot.slane %v7550_v46, 2  ;;  %v1173_v46 = vrot.slane %v8644_v6, 2  ;;  %v6169_v6 = vunpack.i.l.bf16 %v8648_v8 }
 0x226   : > { %v8690_v17 = vpop.permute.xlu1 %6212  ;;  %v8726_v10 = vpop.permute.xlu0 %6242 }
 0x227   : > { %v8716_v9 = vsel %vm1081_vm6, %v1184_v14, %v1186_v11  ;;  %11844 = vst [vmem:[#allocation44_spill] sm:$0xff] %v8726_v10  ;;  %v6135_v11 = vunpack.i.h.bf16 %v8566_v51  ;;  %v6195_v51 = vunpack.i.h.bf16 %v8661_v15  ;;  %v7554_v10 = vld [vmem:[#allocation2 + $0x18] sm:$0xff] }
 0x228   : > { %6452 = vrot.lane.b32.xlu1 %v8527_v31, %s11759_s15  ;;  %6612 = vrot.lane.b32.xlu0 %v8523_v62, %s11763_s12 }
 0x229   : > { %v1961_v39 = vsel %vm713_vm3, %v7551_v43, %v6135_v11 }
 0x22a   : > { %v8696_v26 = vpop.permute.xlu1 %6217  ;;  %v8738_v18 = vpop.permute.xlu0 %6267 }
 0x22b   : > { %11846 = vst [vmem:[#allocation46_spill] sm:$0xff] %v8738_v18  ;;  %v7553_v18 = vld [vmem:[#allocation2 + $0x20] sm:$0xff] }
 0x22c   : > { %6457 = vrot.lane.b32.xlu1 %v8550_v42, %s11711_s25  ;;  %6627 = vrot.lane.b32.xlu0 %v8706_v44, %s11709_s24  ;;  %v1959_v15 = vsel %vm713_vm3, %v7553_v18, %v6165_v12  ;;  %v6119_v12 = vunpack.i.l.bf16 %v8558_v35 }
 0x22e   : > { %v8708_v31 = vpop.permute.xlu1 %6222  ;;  %v6273_v40 = vpop.permute.xlu0 %6272 }
 0x230   : > { %6462 = vrot.lane.b32.xlu1 %v8481_v61, %s11713_s29  ;;  %6632 = vrot.lane.b32.xlu0 %v8722_v24, %s11707_s14 }
 0x232   : > { %v8728_v29 = vpop.permute.xlu1 %6227  ;;  %v6283_v54 = vpop.permute.xlu0 %6282 }
 0x234   : > { %6477 = vrot.lane.b32.xlu1 %v8550_v42, %s11761_s30  ;;  %6662 = vrot.lane.b32.xlu0 %v8463_v52, %s11761_s30 }
 0x236   : > { %v8734_v14 = vpop.permute.xlu1 %6247 }
 0x237   : > { %11845 = vst [vmem:[#allocation45_spill] sm:$0xff] %v8734_v14  ;;  %v6275_v14 = vunpack.i.h.bf16 %v6273_v40 }
 0x238   : > { %6482 = vrot.lane.b32.xlu1 %v8562_v59, %s11707_s14  ;;  %6677 = vrot.lane.b32.xlu0 %v8467_v19, %s11765_s16  ;;  %v1171_v59 = vrot.slane %v8576_v56, 2  ;;  %v6170_v56 = vunpack.i.h.bf16 %v8648_v8  ;;  %v6274_v8 = vunpack.i.l.bf16 %v6273_v40 }
 0x23a   : > { %v8742_v25 = vpop.permute.xlu1 %6252  ;;  %v1172_v47 = vsel %vm1081_vm6, %v1170_v4, %v1171_v59  ;;  %v1174_v30 = vsel %vm1081_vm6, %v1171_v59, %v1173_v46  ;;  %v1958_v4 = vsel %vm713_vm3, %v7554_v10, %v6164_v3  ;;  %v6285_v59 = vunpack.i.h.bf16 %v6283_v54 }
 0x23b   : > { %v6284_v46 = vunpack.i.l.bf16 %v6283_v54  ;;  %v1992_v40 = vsel %vm1988_vm4, %v1959_v15, %v6170_v56 }
 0x23c   : > { %6497 = vrot.lane.b32.xlu1 %v8588_v37, %s11707_s14  ;;  %6682 = vrot.lane.b32.xlu0 %v8469_v60, %s11763_s12 }
 0x23e   : > { %v8748_v42 = vpop.permute.xlu1 %6257 }
 0x23f   : > { %11847 = vst [vmem:[#allocation47_spill] sm:$0xff] %v8748_v42 }
 0x240   : > { %6502 = vrot.lane.b32.xlu1 %v8572_v55, %s11709_s24  ;;  %6697 = vrot.lane.b32.xlu0 %v8465_v1, %s11759_s15  ;;  %v6140_v55 = vunpack.i.h.bf16 %v8582_v53  ;;  %v7552_v53 = vld [vmem:[#allocation2 + $0x30] sm:$0xff] }
 0x241   : > { %v1960_v36 = vsel %vm713_vm3, %v7552_v53, %v6134_v7  ;;  %v1991_v7 = vsel %vm1988_vm4, %v1958_v4, %v6169_v6  ;;  %v6145_v6 = vunpack.i.h.bf16 %v8596_v41  ;;  %v6189_v53 = vunpack.i.l.bf16 %v8642_v2 }
 0x242   : > { %v8759_v37 = vpop.permute.xlu1 %6262  ;;  %v1993_v43 = vsel %vm1988_vm4, %v1960_v36, %v6139_v16  ;;  %v1994_v11 = vsel %vm1988_vm4, %v1961_v39, %v6140_v55  ;;  %v8795_v39 = vpop.permute.xlu0 %6297  ;;  %v6726_v55 = vpack.i.bf16 %v1174_v30, %v1172_v47  ;;  %v2024_v16 = vsel %vm2021_vm7, %v1991_v7, %v6119_v12 }
 0x243   : > { %v2027_v18 = vsel %vm2021_vm7, %v1994_v11, %v6195_v51  ;;  %v2026_v3 = vsel %vm2021_vm7, %v1993_v43, %v6194_v48  ;;  %v6190_v51 = vunpack.i.h.bf16 %v8642_v2  ;;  %v6234_v4 = vunpack.i.l.bf16 %v8688_v38 }
 0x244   : > { %6512 = vrot.lane.b32.xlu1 %v8600_v57, %s11711_s25  ;;  %6707 = vrot.lane.b32.xlu0 %v8261_v21, %s11759_s15  ;;  %v6120_v21 = vunpack.i.h.bf16 %v8558_v35  ;;  %v2059_v54 = vsel %vm2054_vm8, %v2026_v3, %v6274_v8  ;;  %v2060_v36 = vsel %vm2054_vm8, %v2027_v18, %v6275_v14  ;;  %v6144_v14 = vunpack.i.l.bf16 %v8596_v41 }
 0x245   : > { %v2092_v56 = vsel %vm2087_vm9, %v2059_v54, %v6284_v46  ;;  %v2093_v48 = vsel %vm2087_vm9, %v2060_v36, %v6285_v59  ;;  %v6235_v41 = vunpack.i.h.bf16 %v8688_v38  ;;  %v6205_v2 = vunpack.i.h.bf16 %v8682_v23 }
 0x246   : > { %v8777_v42 = vpop.permute.xlu1 %6277  ;;  %v2025_v35 = vsel %vm2021_vm7, %v1992_v40, %v6120_v21  ;;  %v2057_v47 = vsel %vm2054_vm8, %v2024_v16, %v6144_v14  ;;  %v2125_v30 = vsel %vm2120_vm10, %v2092_v56, %v6189_v53  ;;  %v2126_v8 = vsel %vm2120_vm10, %v2093_v48, %v6190_v51  ;;  %v8822_v43 = vpop.permute.xlu0 %6317 }
 0x247   : > { %v6204_v59 = vunpack.i.l.bf16 %v8682_v23  ;;  %v6149_v46 = vunpack.i.l.bf16 %v8610_v22  ;;  %v2158_v40 = vsel %vm2153_vm11, %v2125_v30, %v6234_v4  ;;  %v2159_v21 = vsel %vm2153_vm11, %v2126_v8, %v6235_v41 }
 0x248   : > { %6517 = vrot.lane.b32.xlu1 %v8614_v63, %s11713_s29  ;;  %6717 = vrot.lane.b32.xlu0 %v8405_v27, %s11759_s15  ;;  %v2058_v27 = vsel %vm2054_vm8, %v2025_v35, %v6145_v6  ;;  %v6240_v23 = vunpack.i.h.bf16 %v8700_v34  ;;  %v6239_v18 = vunpack.i.l.bf16 %v8700_v34 }
 0x249   : > { %v2090_v38 = vsel %vm2087_vm9, %v2057_v47, %v6149_v46 }
 0x24a   : > { %v8797_v10 = vpop.permute.xlu1 %6287  ;;  %v2123_v3 = vsel %vm2120_vm10, %v2090_v38, %v6204_v59  ;;  %v2191_v56 = vsel %vm2186_vm12, %v2158_v40, %v6239_v18  ;;  %v2192_v48 = vsel %vm2186_vm12, %v2159_v21, %v6240_v23  ;;  %v8842_v14 = vpop.permute.xlu0 %6322  ;;  %v6214_v38 = vunpack.i.l.bf16 %v8690_v17 }
 0x24b   : > { %v2221_v47 = vpack.c.bf16 %v2192_v48, %v2191_v56  ;;  %v6255_v23 = vunpack.i.h.bf16 %v8742_v25  ;;  %v6220_v18 = vunpack.i.h.bf16 %v8696_v26 }
 0x24c   : > { %6522 = vrot.lane.b32.xlu1 %v8600_v57, %s11765_s16  ;;  %6727 = vrot.lane.b32.xlu0 %v6726_v55, %s11759_s15  ;;  %v6150_v57 = vunpack.i.h.bf16 %v8610_v22 }
 0x24e   : > { %v6293_v15 = vpop.permute.xlu1 %6292  ;;  %v2091_v12 = vsel %vm2087_vm9, %v2058_v27, %v6150_v57  ;;  %v8852_v27 = vpop.permute.xlu0 %6337 }
 0x24f   : > { %v6295_v11 = vunpack.i.h.bf16 %v6293_v15  ;;  %v6294_v7 = vunpack.i.l.bf16 %v6293_v15  ;;  %v2124_v54 = vsel %vm2120_vm10, %v2091_v12, %v6205_v2 }
 0x250   : > { %6527 = vrot.lane.b32.xlu1 %v8614_v63, %s11763_s12 }
 0x251   : > { %v2156_v63 = vsel %vm2153_vm11, %v2123_v3, %v6294_v7  ;;  %v2157_v35 = vsel %vm2153_vm11, %v2124_v54, %v6295_v11  ;;  %v6265_v3 = vunpack.i.h.bf16 %v8759_v37  ;;  %v6264_v54 = vunpack.i.l.bf16 %v8759_v37 }
 0x252   : > { %v6303_v22 = vpop.permute.xlu1 %6302  ;;  %v8860_v8 = vpop.permute.xlu0 %6342 }
 0x253   : > { %v6305_v36 = vunpack.i.h.bf16 %v6303_v22  ;;  %v6304_v16 = vunpack.i.l.bf16 %v6303_v22  ;;  %v6219_v22 = vunpack.i.l.bf16 %v8696_v26 }
 0x254   : > { %6547 = vrot.lane.b32.xlu1 %v8622_v0, %s11709_s24 }
 0x255   : > { %v2189_v34 = vsel %vm2186_vm12, %v2156_v63, %v6304_v16  ;;  %v2190_v6 = vsel %vm2186_vm12, %v2157_v35, %v6305_v36  ;;  %v6344_v16 = vunpack.i.l.bf16 %v8860_v8  ;;  %v7555_v63 = vld [vmem:[#allocation2 + $0x68] sm:$0xff] }
 0x256   : > { %v2220_v51 = vpack.c.bf16 %v2190_v6, %v2189_v34  ;;  %v8844_v53 = vpop.permute.xlu1 %6307  ;;  %v8867_v4 = vpop.permute.xlu0 %6357  ;;  %v7557_v6 = vld [vmem:[#allocation2 + $0x50] sm:$0xff] }
 0x257   : > { %v1963_v37 = vsel %vm713_vm3, %v7557_v6, %v6255_v23  ;;  %v6184_v23 = vunpack.i.l.bf16 %v8663_v32 }
 0x258   : > { %6552 = vrot.lane.b32.xlu1 %v8487_v58, %s11711_s25  ;;  %5867 = vmatmul.mubr.msk.bf16.vlgmr.msra.gmra.mxu1 %vm2262_vm13, %v2220_v51  ;;  %v7558_v51 = vld [vmem:[#allocation2 + $0x48] sm:$0xff] }
 0x259   : > { %5870 = vmatprep.mubr.msk.bf16.mxu1 %vm2262_vm13, %v2221_v47 }
 0x25a   : > { %v8850_v0 = vpop.permute.xlu1 %6312  ;;  %v8875_v59 = vpop.permute.xlu0 %6382 }
 0x25c   : > { %6557 = vrot.lane.b32.xlu1 %v8517_v5, %s11713_s29 }
 0x25e   : > { %v8856_v30 = vpop.permute.xlu1 %6327  ;;  %v8883_v57 = vpop.permute.xlu0 %6387 }
 0x25f   : > { %11848 = vst [vmem:[#allocation48_spill] sm:$0xff] %v8856_v30 }
 0x260   : > { %6567 = vrot.lane.b32.xlu1 %v8676_v13, %s11765_s16 }
 0x262   : > { %v8862_v15 = vpop.permute.xlu1 %6332 }
 0x264   : > { %6577 = vrot.lane.b32.xlu1 %v6726_v55, %s11763_s12 }
 0x266   : > { %v8865_v41 = vpop.permute.xlu1 %6347 }
 0x267   : > { %11849 = vst [vmem:[#allocation49_spill] sm:$0xff] %v8865_v41 }
 0x268   : > { %6582 = vrot.lane.b32.xlu1 %v8487_v58, %s11761_s30 }
 0x26a   : > { %v8871_v2 = vpop.permute.xlu1 %6352 }
 0x26c   : > { %6592 = vrot.lane.b32.xlu1 %v8517_v5, %s11759_s15  ;;  %v8891_v5 = vpop.permute.xlu0 %6392 }
 0x26e   : > { %v8877_v13 = vpop.permute.xlu1 %6362 }
 0x270   : > { %6597 = vrot.lane.b32.xlu1 %v8521_v33, %s11711_s25  ;;  %v8899_v7 = vpop.permute.xlu0 %6417 }
 0x272   : > { %v8881_v55 = vpop.permute.xlu1 %6367 }
 0x274   : > { %6602 = vrot.lane.b32.xlu1 %v8523_v62, %s11713_s29 }
 0x276   : > { %v8887_v58 = vpop.permute.xlu1 %6372 }
 0x278   : > { %6617 = vrot.lane.b32.xlu1 %v8521_v33, %s11761_s30  ;;  %v6423_v33 = vpop.permute.xlu0 %6422 }
 0x279   : > { %v6425_v48 = vunpack.i.h.bf16 %v6423_v33  ;;  %v6424_v26 = vunpack.i.l.bf16 %v6423_v33  ;;  %v6185_v33 = vunpack.i.h.bf16 %v8663_v32 }
 0x27a   : > { %v8893_v46 = vpop.permute.xlu1 %6377 }
 0x27c   : > { %6622 = vrot.lane.b32.xlu1 %v8706_v44, %s11707_s14  ;;  %v6215_v44 = vunpack.i.h.bf16 %v8690_v17  ;;  %v6433_v36 = vpop.permute.xlu0 %6432  ;;  %v6345_v17 = vunpack.i.h.bf16 %v8860_v8 }
 0x27d   : > { %v6435_v47 = vunpack.i.h.bf16 %v6433_v36  ;;  %v6434_v41 = vunpack.i.l.bf16 %v6433_v36 }
 0x27e   : > { %v8897_v11 = vpop.permute.xlu1 %6397  ;;  %v1965_v35 = vsel %vm713_vm3, %v7555_v63, %v6215_v44 }
 0x27f   : > { %v1998_v30 = vsel %vm1988_vm4, %v1965_v35, %v6220_v18 }
 0x280   : > { %6637 = vrot.lane.b32.xlu1 %v8722_v24, %s11709_s24  ;;  %v6254_v24 = vunpack.i.l.bf16 %v8742_v25  ;;  %v7556_v25 = vld [vmem:[#allocation2 + $0x60] sm:$0xff]  ;;  %v8943_v18 = vpop.permute.xlu0 %6447 }
 0x281   : > { %v1964_v56 = vsel %vm713_vm3, %v7556_v25, %v6214_v38  ;;  %v1996_v38 = vsel %vm1988_vm4, %v1963_v37, %v6265_v3  ;;  %v6339_v25 = vunpack.i.l.bf16 %v8852_v27  ;;  %v6385_v37 = vunpack.i.h.bf16 %v8875_v59 }
 0x282   : > { %v8903_v40 = vpop.permute.xlu1 %6402  ;;  %v1997_v8 = vsel %vm1988_vm4, %v1964_v56, %v6219_v22 }
 0x283   : > { %v2030_v63 = vsel %vm2021_vm7, %v1997_v8, %v6344_v16  ;;  %v6225_v16 = vunpack.i.h.bf16 %v8708_v31 }
 0x284   : > { %6642 = vrot.lane.b32.xlu1 %v8463_v52, %s11711_s25  ;;  %v2063_v36 = vsel %vm2054_vm8, %v2030_v63, %v6424_v26  ;;  %v8967_v8 = vpop.permute.xlu0 %6467  ;;  %v6389_v63 = vunpack.i.l.bf16 %v8883_v57 }
 0x285   : > { %v2096_v35 = vsel %vm2087_vm9, %v2063_v36, %v6434_v41 }
 0x286   : > { %v8907_v21 = vpop.permute.xlu1 %6407  ;;  %v2129_v56 = vsel %vm2120_vm10, %v2096_v35, %v6339_v25 }
 0x288   : > { %6647 = vrot.lane.b32.xlu1 %v8465_v1, %s11713_s29  ;;  %v8987_v25 = vpop.permute.xlu0 %6472 }
 0x28a   : > { %v8913_v12 = vpop.permute.xlu1 %6412 }
 0x28c   : > { %6652 = vrot.lane.b32.xlu1 %v8463_v52, %s11765_s16  ;;  %v1962_v52 = vsel %vm713_vm3, %v7558_v51, %v6254_v24  ;;  %v2031_v24 = vsel %vm2021_vm7, %v1998_v30, %v6345_v17  ;;  %v6224_v30 = vunpack.i.l.bf16 %v8708_v31  ;;  %v6340_v17 = vunpack.i.h.bf16 %v8852_v27 }
 0x28d   : > { %v1995_v44 = vsel %vm1988_vm4, %v1962_v52, %v6264_v54  ;;  %v2064_v22 = vsel %vm2054_vm8, %v2031_v24, %v6425_v48  ;;  %v6384_v31 = vunpack.i.l.bf16 %v8875_v59  ;;  %v6355_v51 = vunpack.i.h.bf16 %v8871_v2 }
 0x28e   : > { %v8927_v34 = vpop.permute.xlu1 %6427  ;;  %v2028_v3 = vsel %vm2021_vm7, %v1995_v44, %v6184_v23  ;;  %v2097_v32 = vsel %vm2087_vm9, %v2064_v22, %v6435_v47  ;;  %v6354_v27 = vunpack.i.l.bf16 %v8871_v2  ;;  %v6230_v52 = vunpack.i.h.bf16 %v8728_v29 }
 0x28f   : > { %v2130_v48 = vsel %vm2120_vm10, %v2097_v32, %v6340_v17  ;;  %v2061_v26 = vsel %vm2054_vm8, %v2028_v3, %v6224_v30  ;;  %v6229_v47 = vunpack.i.l.bf16 %v8728_v29  ;;  %v6390_v59 = vunpack.i.h.bf16 %v8883_v57 }
 0x290   : > { %6657 = vrot.lane.b32.xlu1 %v8465_v1, %s11763_s12  ;;  %v2029_v1 = vsel %vm2021_vm7, %v1996_v38, %v6185_v33  ;;  %v2162_v33 = vsel %vm2153_vm11, %v2129_v56, %v6384_v31  ;;  %v2163_v23 = vsel %vm2153_vm11, %v2130_v48, %v6385_v37  ;;  %v2704_v37 = vld [vmem:[#allocation2] sm:$0xff]  ;;  %v2705_v31 = vld [vmem:[#allocation2 + $0x8] sm:$0xff] }
 0x291   : > { %v2062_v41 = vsel %vm2054_vm8, %v2029_v1, %v6225_v16  ;;  %v2094_v2 = vsel %vm2087_vm9, %v2061_v26, %v6229_v47  ;;  %v2195_v57 = vsel %vm2186_vm12, %v2162_v33, %v6389_v63  ;;  %v2196_v16 = vsel %vm2186_vm12, %v2163_v23, %v6390_v59 }
 0x292   : > { %v8945_v54 = vpop.permute.xlu1 %6437  ;;  %v2095_v24 = vsel %vm2087_vm9, %v2062_v41, %v6230_v52  ;;  %v2127_v36 = vsel %vm2120_vm10, %v2094_v2, %v6354_v27  ;;  %v2223_v26 = vpack.c.bf16 %v2196_v16, %v2195_v57  ;;  %v8997_v41 = vpop.permute.xlu0 %6487  ;;  %v2807_v27 = vrot.slane %v2705_v31, 1 }
 0x293   : > { %v2128_v22 = vsel %vm2120_vm10, %v2095_v24, %v6355_v51  ;;  %v2706_v51 = vld [vmem:[#allocation2 + $0x10] sm:$0x3]  ;;  %v2886_v33 = vrot.slane %v2704_v37, 2  ;;  %v2887_v23 = vrot.slane %v2705_v31, 2  ;;  %v2755_v24 = vld [vmem:[#allocation2 + $0x198] sm:$0xff] }
 0x294   : > { %6667 = vrot.lane.b32.xlu1 %v8467_v19, %s11711_s25 }
 0x295   : > { %v2888_v63 = vsel %vm1081_vm6, %v2886_v33, %v2887_v23  ;;  %v6370_v33 = vunpack.i.h.bf16 %v8881_v55 }
 0x296   : > { %v6443_v6 = vpop.permute.xlu1 %6442  ;;  %v9005_v52 = vpop.permute.xlu0 %6492 }
 0x297   : > { %v6445_v44 = vunpack.i.h.bf16 %v6443_v6  ;;  %v6444_v38 = vunpack.i.l.bf16 %v6443_v6 }
 0x298   : > { %6672 = vrot.lane.b32.xlu1 %v8469_v60, %s11713_s29 }
 0x299   : > { %v2160_v35 = vsel %vm2153_vm11, %v2127_v36, %v6444_v38  ;;  %v2161_v32 = vsel %vm2153_vm11, %v2128_v22, %v6445_v44  ;;  %v2809_v38 = vrot.slane %v2706_v51, 1 }
 0x29a   : > { %v6453_v29 = vpop.permute.xlu1 %6452 }
 0x29b   : > { %v6455_v3 = vunpack.i.h.bf16 %v6453_v29  ;;  %v6454_v1 = vunpack.i.l.bf16 %v6453_v29  ;;  %v2810_v59 = vsel %vm1000_vm5, %v2807_v27, %v2809_v38  ;;  %v2756_v29 = vld [vmem:[#allocation2 + $0x1a0] sm:$0xff]  ;;  %v6364_v38 = vunpack.i.l.bf16 %v8877_v13 }
 0x29c   : > { %6687 = vrot.lane.b32.xlu1 %v8467_v19, %s11761_s30 }
 0x29d   : > { %v2193_v30 = vsel %vm2186_vm12, %v2160_v35, %v6454_v1  ;;  %v2194_v17 = vsel %vm2186_vm12, %v2161_v32, %v6455_v3  ;;  %v9018_v3 = vpop.permute.xlu0 %6507  ;;  %v6746_v1 = vpack.i.bf16 %v2756_v29, %v2755_v24  ;;  %v6414_v24 = vunpack.i.l.bf16 %v8913_v12 }
 0x29e   : > { %v8989_v56 = vpop.permute.xlu1 %6457  ;;  %v2222_v48 = vpack.c.bf16 %v2194_v17, %v2193_v30  ;;  %v6335_v29 = vunpack.i.h.bf16 %v8862_v15 }
 0x2a0   : > { %6692 = vrot.lane.b32.xlu1 %v8469_v60, %s11759_s15  ;;  %5871 = vmatmul.mubr.msk.bf16.gmra.mxu1 %vm2262_vm13, %v2222_v48  ;;  %v2806_v60 = vrot.slane %v2704_v37, 1 }
 0x2a1   : > { %5874 = vmatprep.mubr.msk.bf16.mxu1 %vm2262_vm13, %v2223_v26  ;;  %v9028_v32 = vpop.permute.xlu0 %6532 }
 0x2a2   : > { %v8995_v19 = vpop.permute.xlu1 %6462  ;;  %v2808_v44 = vsel %vm1000_vm5, %v2806_v60, %v2807_v27 }
 0x2a4   : > { %6702 = vrot.lane.b32.xlu1 %v8335_v49, %s11759_s15  ;;  %v2889_v49 = vrot.slane %v2706_v51, 2 }
 0x2a5   : > { %v9034_v30 = vpop.permute.xlu0 %6537 }
 0x2a6   : > { %v9001_v6 = vpop.permute.xlu1 %6477  ;;  %v2890_v2 = vsel %vm1081_vm6, %v2887_v23, %v2889_v49  ;;  %v6369_v23 = vunpack.i.l.bf16 %v8881_v55  ;;  %v6405_v49 = vunpack.i.h.bf16 %v8903_v40  ;;  %v7559_v55 = vld [vmem:[#allocation2 + $0x98] sm:$0xff] }
 0x2a7   : > { %v6741_v22 = vpack.i.bf16 %v2890_v2, %v2888_v63  ;;  %v6495_v63 = vunpack.i.h.bf16 %v9005_v52  ;;  %v6415_v2 = vunpack.i.h.bf16 %v8913_v12 }
 0x2a8   : > { %6712 = vrot.lane.b32.xlu1 %v8481_v61, %s11759_s15  ;;  %v6736_v61 = vpack.i.bf16 %v2810_v59, %v2808_v44  ;;  %v6365_v44 = vunpack.i.h.bf16 %v8877_v13  ;;  %v6404_v59 = vunpack.i.l.bf16 %v8903_v40  ;;  %v6334_v13 = vunpack.i.l.bf16 %v8862_v15  ;;  %v7560_v40 = vld [vmem:[#allocation2 + $0x90] sm:$0xff]  ;;  %v7562_v15 = vld [vmem:[#allocation2 + $0x78] sm:$0xff] }
 0x2a9   : > { %v9038_v48 = vpop.permute.xlu0 %6542  ;;  %v1968_v27 = vsel %vm713_vm3, %v7560_v40, %v6364_v38 }
 0x2aa   : > { %v9007_v47 = vpop.permute.xlu1 %6482  ;;  %6737 = vrot.lane.b32.xlu0 %v6736_v61, %s11711_s25  ;;  %v6494_v61 = vunpack.i.l.bf16 %v9005_v52  ;;  %v1969_v60 = vsel %vm713_vm3, %v7559_v55, %v6365_v44  ;;  %v6380_v55 = vunpack.i.h.bf16 %v8893_v46 }
 0x2ab   : > { %v2002_v12 = vsel %vm1988_vm4, %v1969_v60, %v6370_v33  ;;  %v6489_v60 = vunpack.i.l.bf16 %v8997_v41 }
 0x2ac   : > { %6722 = vrot.lane.b32.xlu1 %v8523_v62, %s11759_s15  ;;  %v11851_v62 = vpack.i.bf16 %v8716_v9, %v8713_v20  ;;  %v2035_v44 = vsel %vm2021_vm7, %v2002_v12, %v6495_v63 }
 0x2ad   : > { %v6563_v26 = vpop.permute.xlu0 %6562 }
 0x2ae   : > { %v9015_v36 = vpop.permute.xlu1 %6497  ;;  %6742 = vrot.lane.b32.xlu0 %v6741_v22, %s11713_s29  ;;  %v6565_v22 = vunpack.i.h.bf16 %v6563_v26 }
 0x2af   : > { %11850 = vst [vmem:[#allocation50_spill] sm:$0xff] %v9015_v36  ;;  %v7561_v36 = vld [vmem:[#allocation2 + $0x80] sm:$0xff] }
 0x2b0   : > { %6732 = vrot.lane.b32.xlu1 %v11851_v62, %s11759_s15  ;;  %v6564_v62 = vunpack.i.l.bf16 %v6563_v26  ;;  %v1966_v26 = vsel %vm713_vm3, %v7562_v15, %v6404_v59 }
 0x2b1   : > { %v6573_v31 = vpop.permute.xlu0 %6572  ;;  %v1999_v38 = vsel %vm1988_vm4, %v1966_v26, %v6414_v24  ;;  %v6375_v24 = vunpack.i.h.bf16 %v8887_v58 }
 0x2b2   : > { %v9024_v35 = vpop.permute.xlu1 %6502  ;;  %v6575_v45 = vunpack.i.h.bf16 %v6573_v31  ;;  %v6574_v52 = vunpack.i.l.bf16 %v6573_v31 }
 0x2b3   : > { %v6504_v15 = vunpack.i.l.bf16 %v9024_v35 }
 0x2b4   : > { %6747 = vrot.lane.b32.xlu1 %v6746_v1, %s11709_s24 }
 0x2b6   : > { %v9030_v57 = vpop.permute.xlu1 %6512 }
 0x2ba   : > { %v9032_v16 = vpop.permute.xlu1 %6517 }
 0x2be   : > { %v9036_v17 = vpop.permute.xlu1 %6522 }
 0x2bf   : > { %11852 = vst [vmem:[#allocation51_spill] sm:$0xff] %v9036_v17  ;;  %v9070_v17 = vpop.permute.xlu0 %6587 }
 0x2c2   : > { %v9040_v20 = vpop.permute.xlu1 %6527 }
 0x2c3   : > { %11853 = vst [vmem:[#allocation52_spill] sm:$0xff] %v9040_v20  ;;  %v1967_v20 = vsel %vm713_vm3, %v7561_v36, %v6405_v49  ;;  %v2068_v36 = vsel %vm2054_vm8, %v2035_v44, %v6565_v22  ;;  %v6374_v22 = vunpack.i.l.bf16 %v8887_v58  ;;  %v9098_v12 = vpop.permute.xlu0 %6607  ;;  %v6539_v44 = vunpack.i.l.bf16 %v9034_v30 }
 0x2c4   : > { %v2000_v31 = vsel %vm1988_vm4, %v1967_v20, %v6415_v2  ;;  %v2101_v63 = vsel %vm2087_vm9, %v2068_v36, %v6575_v45  ;;  %v6200_v20 = vunpack.i.h.bf16 %v8672_v50  ;;  %v6379_v45 = vunpack.i.l.bf16 %v8893_v46 }
 0x2c5   : > { %v2033_v2 = vsel %vm2021_vm7, %v2000_v31, %v6335_v29  ;;  %v6505_v29 = vunpack.i.h.bf16 %v9024_v35  ;;  %v11856_v31 = vld [vmem:[#allocation44_spill] sm:$0xff] }
 0x2c6   : > { %v9042_v9 = vpop.permute.xlu1 %6547  ;;  %v2066_v26 = vsel %vm2054_vm8, %v2033_v2, %v6375_v24 }
 0x2c7   : > { %11854 = vst [vmem:[#allocation53_spill] sm:$0xff] %v9042_v9  ;;  %v2001_v9 = vsel %vm1988_vm4, %v1968_v27, %v6369_v23  ;;  %v6490_v27 = vunpack.i.h.bf16 %v8997_v41  ;;  %v2032_v41 = vsel %vm2021_vm7, %v1999_v38, %v6334_v13  ;;  %v2099_v2 = vsel %vm2087_vm9, %v2066_v26, %v6380_v55  ;;  %v11859_v26 = vld [vmem:[#allocation45_spill] sm:$0xff] }
 0x2c8   : > { %v2065_v58 = vsel %vm2054_vm8, %v2032_v41, %v6374_v22  ;;  %v2132_v22 = vsel %vm2120_vm10, %v2099_v2, %v6505_v29 }
 0x2c9   : > { %v2098_v41 = vsel %vm2087_vm9, %v2065_v58, %v6379_v45  ;;  %v11858_v45 = vld [vmem:[#allocation47_spill] sm:$0xff] }
 0x2ca   : > { %v9044_v37 = vpop.permute.xlu1 %6552  ;;  %v6260_v58 = vunpack.i.h.bf16 %v11858_v45  ;;  %v6259_v55 = vunpack.i.l.bf16 %v11858_v45  ;;  %v6395_v45 = vunpack.i.h.bf16 %v8891_v5 }
 0x2ce   : > { %v9046_v51 = vpop.permute.xlu1 %6557 }
 0x2d2   : > { %v9062_v1 = vpop.permute.xlu1 %6567 }
 0x2d3   : > { %11855 = vst [vmem:[#allocation54_spill] sm:$0xff] %v9062_v1  ;;  %v2034_v1 = vsel %vm2021_vm7, %v2001_v9, %v6494_v61  ;;  %v6199_v61 = vunpack.i.l.bf16 %v8672_v50  ;;  %v9116_v9 = vpop.permute.xlu0 %6612  ;;  %v6359_v50 = vunpack.i.l.bf16 %v8867_v4 }
 0x2d4   : > { %v2067_v33 = vsel %vm2054_vm8, %v2034_v1, %v6564_v62  ;;  %v6535_v62 = vunpack.i.h.bf16 %v9028_v32  ;;  %v6534_v1 = vunpack.i.l.bf16 %v9028_v32  ;;  %v6540_v32 = vunpack.i.h.bf16 %v9034_v30 }
 0x2d5   : > { %v2100_v59 = vsel %vm2087_vm9, %v2067_v33, %v6574_v52  ;;  %v2134_v52 = vsel %vm2120_vm10, %v2101_v63, %v6490_v27  ;;  %v6244_v27 = vunpack.i.l.bf16 %v11856_v31  ;;  %v2131_v30 = vsel %vm2120_vm10, %v2098_v41, %v6504_v15 }
 0x2d6   : > { %v9080_v23 = vpop.permute.xlu1 %6577  ;;  %v2133_v40 = vsel %vm2120_vm10, %v2100_v59, %v6489_v60  ;;  %v6245_v60 = vunpack.i.h.bf16 %v11856_v31  ;;  %v2167_v36 = vsel %vm2153_vm11, %v2134_v52, %v6535_v62  ;;  %v11857_v59 = vld [vmem:[#allocation46_spill] sm:$0xff]  ;;  %v6310_v41 = vunpack.i.h.bf16 %v8844_v53 }
 0x2d7   : > { %v2166_v33 = vsel %vm2153_vm11, %v2133_v40, %v6534_v1  ;;  %v6270_v35 = vunpack.i.h.bf16 %v11857_v59  ;;  %v6269_v63 = vunpack.i.l.bf16 %v11857_v59  ;;  %v2200_v52 = vsel %vm2186_vm12, %v2167_v36, %v6540_v32 }
 0x2d8   : > { %v2199_v40 = vsel %vm2186_vm12, %v2166_v33, %v6539_v44  ;;  %v6315_v32 = vunpack.i.h.bf16 %v8850_v0  ;;  %v6314_v33 = vunpack.i.l.bf16 %v8850_v0  ;;  %v6394_v0 = vunpack.i.l.bf16 %v8891_v5 }
 0x2d9   : > { %v2225_v36 = vpack.c.bf16 %v2200_v52, %v2199_v40  ;;  %v7565_v40 = vld [vmem:[#allocation2 + $0x110] sm:$0xff]  ;;  %v6469_v59 = vunpack.i.l.bf16 %v8967_v8  ;;  %v6279_v44 = vunpack.i.l.bf16 %v8777_v42 }
 0x2da   : > { %v6583_v13 = vpop.permute.xlu1 %6582  ;;  %v1979_v52 = vsel %vm713_vm3, %v7565_v40, %v6310_v41 }
 0x2db   : > { %v6585_v46 = vunpack.i.h.bf16 %v6583_v13  ;;  %v6584_v38 = vunpack.i.l.bf16 %v6583_v13  ;;  %v2012_v5 = vsel %vm1988_vm4, %v1979_v52, %v6315_v32 }
 0x2dc   : > { %v2045_v52 = vsel %vm2021_vm7, %v2012_v5, %v6200_v20  ;;  %v6410_v20 = vunpack.i.h.bf16 %v8907_v21 }
 0x2dd   : > { %v2164_v1 = vsel %vm2153_vm11, %v2131_v30, %v6584_v38  ;;  %v2165_v62 = vsel %vm2153_vm11, %v2132_v22, %v6585_v46  ;;  %v6309_v38 = vunpack.i.l.bf16 %v8844_v53  ;;  %v6320_v30 = vunpack.i.h.bf16 %v8822_v43  ;;  %v7563_v53 = vld [vmem:[#allocation2 + $0x128] sm:$0xff] }
 0x2de   : > { %v6593_v24 = vpop.permute.xlu1 %6592  ;;  %v6319_v22 = vunpack.i.l.bf16 %v8822_v43 }
 0x2df   : > { %v6595_v13 = vunpack.i.h.bf16 %v6593_v24  ;;  %v6594_v49 = vunpack.i.l.bf16 %v6593_v24  ;;  %v7570_v24 = vld [vmem:[#allocation2 + $0x138] sm:$0xff] }
 0x2e1   : > { %v2197_v15 = vsel %vm2186_vm12, %v2164_v1, %v6594_v49  ;;  %v2198_v29 = vsel %vm2186_vm12, %v2165_v62, %v6595_v13  ;;  %v1981_v13 = vsel %vm713_vm3, %v7563_v53, %v6260_v58  ;;  %v7564_v1 = vld [vmem:[#allocation2 + $0x120] sm:$0xff]  ;;  %v9148_v58 = vpop.permute.xlu0 %6627 }
 0x2e2   : > { %v9129_v2 = vpop.permute.xlu1 %6597  ;;  %v2224_v46 = vpack.c.bf16 %v2198_v29, %v2197_v15  ;;  %v1980_v62 = vsel %vm713_vm3, %v7564_v1, %v6259_v55  ;;  %v7566_v15 = vld [vmem:[#allocation2 + $0x108] sm:$0xff]  ;;  %v6474_v1 = vunpack.i.l.bf16 %v8987_v25  ;;  %v7569_v49 = vld [vmem:[#allocation2 + $0x140] sm:$0xff] }
 0x2e3   : > { %v1978_v29 = vsel %vm713_vm3, %v7566_v15, %v6309_v38  ;;  %v2013_v40 = vsel %vm1988_vm4, %v1980_v62, %v6269_v63  ;;  %v6280_v15 = vunpack.i.h.bf16 %v8777_v42  ;;  %v6290_v42 = vunpack.i.h.bf16 %v8797_v10 }
 0x2e4   : > { %5875 = vmatmul.mubr.msk.bf16.gmra.mxu1 %vm2262_vm13, %v2224_v46  ;;  %v6470_v46 = vunpack.i.h.bf16 %v8967_v8  ;;  %v2011_v55 = vsel %vm1988_vm4, %v1978_v29, %v6314_v33  ;;  %v2014_v8 = vsel %vm1988_vm4, %v1981_v13, %v6270_v35  ;;  %v2046_v33 = vsel %vm2021_vm7, %v2013_v40, %v6394_v0 }
 0x2e5   : > { %5878 = vmatprep.mubr.msk.bf16.mxu1 %vm2262_vm13, %v2225_v36  ;;  %v6475_v36 = vunpack.i.h.bf16 %v8987_v25  ;;  %v2047_v32 = vsel %vm2021_vm7, %v2014_v8, %v6395_v45  ;;  %v2044_v25 = vsel %vm2021_vm7, %v2011_v55, %v6199_v61  ;;  %v2079_v63 = vsel %vm2054_vm8, %v2046_v33, %v6469_v59  ;;  %v9182_v29 = vpop.permute.xlu0 %6632 }
 0x2e6   : > { %v9150_v53 = vpop.permute.xlu1 %6602  ;;  %v2080_v35 = vsel %vm2054_vm8, %v2047_v32, %v6470_v46  ;;  %v6289_v62 = vunpack.i.l.bf16 %v8797_v10  ;;  %v2112_v45 = vsel %vm2087_vm9, %v2079_v63, %v6474_v1  ;;  %v6360_v61 = vunpack.i.h.bf16 %v8867_v4 }
 0x2e7   : > { %v2113_v0 = vsel %vm2087_vm9, %v2080_v35, %v6475_v36  ;;  %v6409_v59 = vunpack.i.l.bf16 %v8907_v21  ;;  %v6420_v46 = vunpack.i.h.bf16 %v8899_v7  ;;  %v6419_v55 = vunpack.i.l.bf16 %v8899_v7  ;;  %v11860_v21 = vld [vmem:[#allocation48_spill] sm:$0xff] }
 0x2e8   : > { %v2077_v10 = vsel %vm2054_vm8, %v2044_v25, %v6279_v44  ;;  %v2078_v5 = vsel %vm2054_vm8, %v2045_v52, %v6280_v15  ;;  %v2145_v36 = vsel %vm2120_vm10, %v2112_v45, %v6359_v50  ;;  %v2146_v1 = vsel %vm2120_vm10, %v2113_v0, %v6360_v61  ;;  %v7567_v52 = vld [vmem:[#allocation2 + $0x158] sm:$0xff]  ;;  %v7568_v35 = vld [vmem:[#allocation2 + $0x150] sm:$0xff] }
 0x2e9   : > { %v6400_v4 = vunpack.i.h.bf16 %v8897_v11  ;;  %v6399_v40 = vunpack.i.l.bf16 %v8897_v11  ;;  %v6450_v7 = vunpack.i.h.bf16 %v8943_v18  ;;  %v6449_v44 = vunpack.i.l.bf16 %v8943_v18  ;;  %v11861_v45 = vld [vmem:[#allocation49_spill] sm:$0xff] }
 0x2ea   : > { %v9172_v13 = vpop.permute.xlu1 %6617  ;;  %v2110_v15 = vsel %vm2087_vm9, %v2077_v10, %v6289_v62  ;;  %v2111_v25 = vsel %vm2087_vm9, %v2078_v5, %v6290_v42  ;;  %v1985_v63 = vsel %vm713_vm3, %v7567_v52, %v6410_v20  ;;  %v1984_v11 = vsel %vm713_vm3, %v7568_v35, %v6409_v59  ;;  %v9218_v59 = vpop.permute.xlu0 %6662 }
 0x2eb   : > { %v6350_v0 = vunpack.i.h.bf16 %v11861_v45  ;;  %v6349_v61 = vunpack.i.l.bf16 %v11861_v45  ;;  %v9205_v50 = vsel %vm2153_vm11, %v2145_v36, %v6449_v44  ;;  %v9208_v33 = vsel %vm2153_vm11, %v2146_v1, %v6450_v7 }
 0x2ec   : > { %v6510_v18 = vunpack.i.h.bf16 %v9018_v3  ;;  %v6509_v42 = vunpack.i.l.bf16 %v9018_v3  ;;  %v9213_v62 = vsel %vm2120_vm10, %v2110_v15, %v6399_v40  ;;  %v9216_v20 = vsel %vm2120_vm10, %v2111_v25, %v6400_v4 }
 0x2ed   : > { %v6545_v5 = vunpack.i.h.bf16 %v9038_v48  ;;  %v6544_v36 = vunpack.i.l.bf16 %v9038_v48  ;;  %v2017_v1 = vsel %vm1988_vm4, %v1984_v11, %v6419_v55  ;;  %v2018_v7 = vsel %vm1988_vm4, %v1985_v63, %v6420_v46 }
 0x2ee   : > { %v9192_v8 = vpop.permute.xlu1 %6622  ;;  %v6610_v3 = vunpack.i.h.bf16 %v9098_v12  ;;  %v6609_v40 = vunpack.i.l.bf16 %v9098_v12  ;;  %v6460_v44 = vunpack.i.h.bf16 %v8989_v56  ;;  %v6459_v4 = vunpack.i.l.bf16 %v8989_v56  ;;  %v6678_v41 = vpop.permute.xlu0 %6677 }
 0x2ef   : > { %v6465_v15 = vunpack.i.h.bf16 %v8995_v19  ;;  %v6464_v25 = vunpack.i.l.bf16 %v8995_v19  ;;  %v6515_v52 = vunpack.i.h.bf16 %v9030_v57  ;;  %v6514_v48 = vunpack.i.l.bf16 %v9030_v57 }
 0x2f0   : > { %v6615_v55 = vunpack.i.h.bf16 %v9116_v9  ;;  %v6614_v46 = vunpack.i.l.bf16 %v9116_v9  ;;  %v6520_v63 = vunpack.i.h.bf16 %v9032_v16  ;;  %v6519_v12 = vunpack.i.l.bf16 %v9032_v16 }
 0x2f1   : > { %v2050_v56 = vsel %vm2021_vm7, %v2017_v1, %v6544_v36  ;;  %v2051_v11 = vsel %vm2021_vm7, %v2018_v7, %v6545_v5  ;;  %v6430_v19 = vunpack.i.h.bf16 %v8927_v34  ;;  %v6429_v45 = vunpack.i.l.bf16 %v8927_v34  ;;  %v7571_v5 = vld [vmem:[#allocation2 + $0xc8] sm:$0xff]  ;;  %v7572_v7 = vld [vmem:[#allocation2 + $0xc0] sm:$0xff] }
 0x2f2   : > { %v9220_v10 = vpop.permute.xlu1 %6637  ;;  %v2083_v57 = vsel %vm2054_vm8, %v2050_v56, %v6609_v40  ;;  %v2084_v32 = vsel %vm2054_vm8, %v2051_v11, %v6610_v3  ;;  %v1983_v9 = vsel %vm713_vm3, %v7569_v49, %v6460_v44  ;;  %v1982_v16 = vsel %vm713_vm3, %v7570_v24, %v6459_v4 }
 0x2f3   : > { %v2015_v38 = vsel %vm1988_vm4, %v1982_v16, %v6464_v25  ;;  %v2016_v36 = vsel %vm1988_vm4, %v1983_v9, %v6465_v15  ;;  %v1973_v1 = vsel %vm713_vm3, %v7571_v5, %v6515_v52  ;;  %v1972_v34 = vsel %vm713_vm3, %v7572_v7, %v6514_v48  ;;  %v6683_v5 = vpop.permute.xlu0 %6682 }
 0x2f4   : > { %v2116_v40 = vsel %vm2087_vm9, %v2083_v57, %v6614_v46  ;;  %v2117_v3 = vsel %vm2087_vm9, %v2084_v32, %v6615_v55  ;;  %v2005_v49 = vsel %vm1988_vm4, %v1972_v34, %v6519_v12  ;;  %v2006_v44 = vsel %vm1988_vm4, %v1973_v1, %v6520_v63 }
 0x2f5   : > { %v6440_v4 = vunpack.i.h.bf16 %v8945_v54  ;;  %v6439_v15 = vunpack.i.l.bf16 %v8945_v54  ;;  %v6635_v25 = vunpack.i.h.bf16 %v9182_v29  ;;  %v6634_v52 = vunpack.i.l.bf16 %v9182_v29 }
 0x2f6   : > { %v9238_v35 = vpop.permute.xlu1 %6642  ;;  %v6590_v48 = vunpack.i.h.bf16 %v9070_v17  ;;  %v6589_v46 = vunpack.i.l.bf16 %v9070_v17  ;;  %v2048_v32 = vsel %vm2021_vm7, %v2015_v38, %v6349_v61  ;;  %v2049_v55 = vsel %vm2021_vm7, %v2016_v36, %v6350_v0 }
 0x2f7   : > { %v9267_v63 = vsel %vm2120_vm10, %v2116_v40, %v6509_v42  ;;  %v9270_v12 = vsel %vm2120_vm10, %v2117_v3, %v6510_v18  ;;  %v2038_v56 = vsel %vm2021_vm7, %v2005_v49, %v6634_v52  ;;  %v2039_v11 = vsel %vm2021_vm7, %v2006_v44, %v6635_v25 }
 0x2f8   : > { %v6480_v29 = vunpack.i.h.bf16 %v9001_v6  ;;  %v6479_v57 = vunpack.i.l.bf16 %v9001_v6  ;;  %v6680_v9 = vunpack.i.h.bf16 %v6678_v41  ;;  %v6679_v16 = vunpack.i.l.bf16 %v6678_v41 }
 0x2f9   : > { %v6630_v0 = vunpack.i.h.bf16 %v9148_v58  ;;  %v6629_v61 = vunpack.i.l.bf16 %v9148_v58  ;;  %v9281_v18 = vsel %vm2054_vm8, %v2048_v32, %v6429_v45  ;;  %v9284_v42 = vsel %vm2054_vm8, %v2049_v55, %v6430_v19  ;;  %v7573_v55 = vld [vmem:[#allocation2 + $0xb0] sm:$0xff] }
 0x2fa   : > { %v9256_v24 = vpop.permute.xlu1 %6647  ;;  %v2071_v36 = vsel %vm2054_vm8, %v2038_v56, %v6679_v16  ;;  %v2072_v1 = vsel %vm2054_vm8, %v2039_v11, %v6680_v9  ;;  %v6555_v6 = vunpack.i.h.bf16 %v9044_v37  ;;  %v6554_v41 = vunpack.i.l.bf16 %v9044_v37  ;;  %v7574_v11 = vld [vmem:[#allocation2 + $0xa8] sm:$0xff] }
 0x2fb   : > { %v6685_v7 = vunpack.i.h.bf16 %v6683_v5  ;;  %v6684_v34 = vunpack.i.l.bf16 %v6683_v5  ;;  %v6560_v40 = vunpack.i.h.bf16 %v9046_v51  ;;  %v6559_v58 = vunpack.i.l.bf16 %v9046_v51 }
 0x2fc   : > { %v9294_v45 = vsel %vm2153_vm11, %v9213_v62, %v6479_v57  ;;  %v9298_v19 = vsel %vm2153_vm11, %v9216_v20, %v6480_v29  ;;  %v6645_v3 = vunpack.i.h.bf16 %v9238_v35  ;;  %v6644_v49 = vunpack.i.l.bf16 %v9238_v35  ;;  %v6698_v20 = vpop.permute.xlu0 %6697 }
 0x2fd   : > { %v2104_v37 = vsel %vm2087_vm9, %v2071_v36, %v6684_v34  ;;  %v2105_v25 = vsel %vm2087_vm9, %v2072_v1, %v6685_v7  ;;  %v6650_v51 = vunpack.i.h.bf16 %v9256_v24  ;;  %v6649_v52 = vunpack.i.l.bf16 %v9256_v24  ;;  %v7575_v24 = vld [vmem:[#allocation2 + $0xf8] sm:$0xff]  ;;  %v7576_v36 = vld [vmem:[#allocation2 + $0xf0] sm:$0xff] }
 0x2fe   : > { %v9276_v38 = vpop.permute.xlu1 %6652  ;;  %v6665_v62 = vunpack.i.h.bf16 %v9218_v59  ;;  %v6664_v32 = vunpack.i.l.bf16 %v9218_v59  ;;  %v1971_v56 = vsel %vm713_vm3, %v7573_v55, %v6555_v6  ;;  %v1970_v35 = vsel %vm713_vm3, %v7574_v11, %v6554_v41  ;;  %v11862_v11 = vld [vmem:[#allocation51_spill] sm:$0xff] }
 0x2ff   : > { %v6485_v29 = vunpack.i.h.bf16 %v9007_v47  ;;  %v6484_v57 = vunpack.i.l.bf16 %v9007_v47  ;;  %v2003_v9 = vsel %vm1988_vm4, %v1970_v35, %v6559_v58  ;;  %v2004_v16 = vsel %vm1988_vm4, %v1971_v56, %v6560_v40 }
 0x300   : > { %v1977_v5 = vsel %vm713_vm3, %v7575_v24, %v6645_v3  ;;  %v1976_v59 = vsel %vm713_vm3, %v7576_v36, %v6644_v49  ;;  %v2137_v6 = vsel %vm2120_vm10, %v2104_v37, %v6629_v61  ;;  %v2138_v7 = vsel %vm2120_vm10, %v2105_v25, %v6630_v0  ;;  %v11863_v37 = vld [vmem:[#allocation52_spill] sm:$0xff] }
 0x301   : > { %v6700_v41 = vunpack.i.h.bf16 %v6698_v20  ;;  %v6699_v34 = vunpack.i.l.bf16 %v6698_v20  ;;  %v2009_v55 = vsel %vm1988_vm4, %v1976_v59, %v6649_v52  ;;  %v2010_v47 = vsel %vm1988_vm4, %v1977_v5, %v6650_v51  ;;  %v7577_v5 = vld [vmem:[#allocation2 + $0xe0] sm:$0xff]  ;;  %v7578_v59 = vld [vmem:[#allocation2 + $0xd8] sm:$0xff] }
 0x302   : > { %v9302_v44 = vpop.permute.xlu1 %6657  ;;  %v2036_v58 = vsel %vm2021_vm7, %v2003_v9, %v6484_v57  ;;  %v2037_v40 = vsel %vm2021_vm7, %v2004_v16, %v6485_v29  ;;  %v6525_v35 = vunpack.i.h.bf16 %v11862_v11  ;;  %v6524_v49 = vunpack.i.l.bf16 %v11862_v11 }
 0x303   : > { %v2170_v61 = vsel %vm2153_vm11, %v2137_v6, %v6664_v32  ;;  %v2171_v0 = vsel %vm2153_vm11, %v2138_v7, %v6665_v62  ;;  %v6530_v25 = vunpack.i.h.bf16 %v11863_v37  ;;  %v6529_v52 = vunpack.i.l.bf16 %v11863_v37 }
 0x304   : > { %v2042_v51 = vsel %vm2021_vm7, %v2009_v55, %v6244_v27  ;;  %v2043_v20 = vsel %vm2021_vm7, %v2010_v47, %v6245_v60  ;;  %v2069_v57 = vsel %vm2054_vm8, %v2036_v58, %v6524_v49  ;;  %v2070_v9 = vsel %vm2054_vm8, %v2037_v40, %v6525_v35  ;;  %v6708_v40 = vpop.permute.xlu0 %6707 }
 0x305   : > { %v6625_v62 = vunpack.i.h.bf16 %v9192_v8  ;;  %v6624_v24 = vunpack.i.l.bf16 %v9192_v8  ;;  %v2075_v31 = vsel %vm2054_vm8, %v2042_v51, %v6319_v22  ;;  %v2076_v60 = vsel %vm2054_vm8, %v2043_v20, %v6320_v30 }
 0x306   : > { %v6668_v1 = vpop.permute.xlu1 %6667  ;;  %v6640_v8 = vunpack.i.h.bf16 %v9220_v10  ;;  %v6639_v7 = vunpack.i.l.bf16 %v9220_v10  ;;  %v6655_v22 = vunpack.i.h.bf16 %v9276_v38  ;;  %v6654_v43 = vunpack.i.l.bf16 %v9276_v38 }
 0x307   : > { %v6670_v56 = vunpack.i.h.bf16 %v6668_v1  ;;  %v6669_v3 = vunpack.i.l.bf16 %v6668_v1  ;;  %v2203_v30 = vsel %vm2186_vm12, %v2170_v61, %v6699_v34  ;;  %v11865_v10 = vunpack.i.h.bf16 %v8842_v14 }
 0x308   : > { %v2102_v51 = vsel %vm2087_vm9, %v2069_v57, %v6529_v52  ;;  %v2103_v20 = vsel %vm2087_vm9, %v2070_v9, %v6530_v25  ;;  %v11867_v25 = vunpack.i.h.bf16 %v8678_v28 }
 0x309   : > { %v1975_v36 = vsel %vm713_vm3, %v7577_v5, %v6670_v56  ;;  %v1974_v27 = vsel %vm713_vm3, %v7578_v59, %v6669_v3  ;;  %v2204_v56 = vsel %vm2186_vm12, %v2171_v0, %v6700_v41  ;;  %v11864_v3 = vunpack.i.l.bf16 %v8842_v14 }
 0x30a   : > { %v6673_v29 = vpop.permute.xlu1 %6672  ;;  %v2109_v35 = vsel %vm2087_vm9, %v2076_v60, %v11865_v10  ;;  %v2135_v41 = vsel %vm2120_vm10, %v2102_v51, %v6639_v7  ;;  %v2136_v61 = vsel %vm2120_vm10, %v2103_v20, %v6640_v8  ;;  %v6660_v0 = vunpack.i.h.bf16 %v9302_v44 }
 0x30b   : > { %v6675_v32 = vunpack.i.h.bf16 %v6673_v29  ;;  %v6674_v16 = vunpack.i.l.bf16 %v6673_v29  ;;  %v2108_v11 = vsel %vm2087_vm9, %v2075_v31, %v11864_v3  ;;  %v6659_v14 = vunpack.i.l.bf16 %v9302_v44  ;;  %v11868_v44 = vld [vmem:[#allocation50_spill] sm:$0xff]  ;;  %v6718_v31 = vpop.permute.xlu0 %6717 }
 0x30c   : > { %v2142_v57 = vsel %vm2120_vm10, %v2109_v35, %v11867_v25  ;;  %v6500_v59 = vunpack.i.h.bf16 %v11868_v44  ;;  %v2227_v7 = vpack.c.bf16 %v2204_v56, %v2203_v30  ;;  %v11873_v35 = vunpack.i.h.bf16 %v11859_v26 }
 0x30d   : > { %v2007_v1 = vsel %vm1988_vm4, %v1974_v27, %v6674_v16  ;;  %v2008_v6 = vsel %vm1988_vm4, %v1975_v36, %v6675_v32  ;;  %v6710_v27 = vunpack.i.h.bf16 %v6708_v40  ;;  %v6719_v30 = vunpack.i.l.bf16 %v6718_v31 }
 0x30e   : > { %v2040_v55 = vsel %vm2021_vm7, %v2007_v1, %v6624_v24  ;;  %v2041_v47 = vsel %vm2021_vm7, %v2008_v6, %v6625_v62  ;;  %v6688_v58 = vpop.permute.xlu1 %6687  ;;  %v11866_v62 = vunpack.i.l.bf16 %v8678_v28  ;;  %v9388_v28 = vld [vmem:[%s11869_s4] ss:$0 sm:$0xff]  ;;  %v6600_v56 = vunpack.i.h.bf16 %v9129_v2 }
 0x30f   : > { %v6690_v49 = vunpack.i.h.bf16 %v6688_v58  ;;  %v6689_v37 = vunpack.i.l.bf16 %v6688_v58  ;;  %v2073_v38 = vsel %vm2054_vm8, %v2040_v55, %v6654_v43  ;;  %v2074_v34 = vsel %vm2054_vm8, %v2041_v47, %v6655_v22 }
 0x310   : > { %v2141_v52 = vsel %vm2120_vm10, %v2108_v11, %v11866_v62  ;;  %v2106_v5 = vsel %vm2087_vm9, %v2073_v38, %v6659_v14  ;;  %v2107_v36 = vsel %vm2087_vm9, %v2074_v34, %v6660_v0  ;;  %v11870_v55 = vunpack.i.l.bf16 %v8795_v39 }
 0x311   : > { %v2168_v9 = vsel %vm2153_vm11, %v2135_v41, %v6689_v37  ;;  %v2169_v24 = vsel %vm2153_vm11, %v2136_v61, %v6690_v49  ;;  %v11871_v58 = vunpack.i.h.bf16 %v8795_v39  ;;  %v11872_v11 = vunpack.i.l.bf16 %v11859_v26 }
 0x312   : > { %v6693_v29 = vpop.permute.xlu1 %6692  ;;  %v2174_v47 = vsel %vm2153_vm11, %v2141_v52, %v11870_v55  ;;  %v2140_v49 = vsel %vm2120_vm10, %v2107_v36, %v11873_v35  ;;  %v6709_v37 = vunpack.i.l.bf16 %v6708_v40  ;;  %v6599_v51 = vunpack.i.l.bf16 %v9129_v2 }
 0x313   : > { %v6695_v32 = vunpack.i.h.bf16 %v6693_v29  ;;  %v6694_v16 = vunpack.i.l.bf16 %v6693_v29  ;;  %v2175_v22 = vsel %vm2153_vm11, %v2142_v57, %v11871_v58  ;;  %v2139_v10 = vsel %vm2120_vm10, %v2106_v5, %v11872_v11  ;;  %v7579_v57 = vld [vmem:[#allocation2 + $0x170] sm:$0xff] }
 0x314   : > { %v6499_v39 = vunpack.i.l.bf16 %v11868_v44  ;;  %v6605_v38 = vunpack.i.h.bf16 %v9150_v53  ;;  %v6604_v34 = vunpack.i.l.bf16 %v9150_v53  ;;  %v11874_v26 = vunpack.i.l.bf16 %v11860_v21 }
 0x315   : > { %v2201_v60 = vsel %vm2186_vm12, %v2168_v9, %v6694_v16  ;;  %v2202_v1 = vsel %vm2186_vm12, %v2169_v24, %v6695_v32  ;;  %v11875_v61 = vunpack.i.h.bf16 %v11860_v21  ;;  %v2207_v14 = vsel %vm2186_vm12, %v2174_v47, %v6709_v37  ;;  %v11876_v16 = vld [vmem:[#allocation10_spill] sm:$0xff]  ;;  %v7580_v24 = vld [vmem:[#allocation2 + $0x168] sm:$0xff] }
 0x316   : > { %v6703_v6 = vpop.permute.xlu1 %6702  ;;  %v2226_v8 = vpack.c.bf16 %v2202_v1, %v2201_v60  ;;  %v2172_v40 = vsel %vm2153_vm11, %v2139_v10, %v11874_v26  ;;  %v2208_v29 = vsel %vm2186_vm12, %v2175_v22, %v6710_v27  ;;  %v6720_v25 = vunpack.i.h.bf16 %v6718_v31 }
 0x317   : > { %v6705_v43 = vunpack.i.h.bf16 %v6703_v6  ;;  %v6704_v3 = vunpack.i.l.bf16 %v6703_v6  ;;  %v2173_v2 = vsel %vm2153_vm11, %v2140_v49, %v11875_v61  ;;  %v9426_v21 = vsel %vm2186_vm12, %v9205_v50, %v6719_v30  ;;  %v9434_v6 = vpop.permute.xlu0 %6727  ;;  %v11877_v50 = vld [vmem:[#allocation11_spill] sm:$0xff]  ;;  %v11878_v49 = vld [vmem:[#allocation12_spill] sm:$0xff] }
 0x318   : > { %v5868_v20 = vpop.f32.mrf.mxu1  ;;  %5879 = vmatmul.mubr.msk.bf16.gmra.mxu1 %vm2262_vm13, %v2226_v8  ;;  %v1987_v9 = vsel %vm713_vm3, %v7579_v57, %v6600_v56  ;;  %v1986_v5 = vsel %vm713_vm3, %v7580_v24, %v6599_v51  ;;  %v2229_v58 = vpack.c.bf16 %v2208_v29, %v2207_v14  ;;  %v2212_v10 = vsel %vm2186_vm12, %v9208_v33, %v6720_v25  ;;  %v11879_v56 = vld [vmem:[#allocation54_spill] sm:$0xff] }
 0x319   : > { %v2357_v41 = vadd.f32 %v5868_v20, %v9388_v28  ;;  %5882 = vmatprep.mubr.msk.bf16.mxu1 %vm2262_vm13, %v2227_v7  ;;  %v2205_v32 = vsel %vm2186_vm12, %v2172_v40, %v6704_v3  ;;  %v2206_v53 = vsel %vm2186_vm12, %v2173_v2, %v6705_v43  ;;  %v2019_v60 = vsel %vm1988_vm4, %v1986_v5, %v6604_v34  ;;  %v11881_v2 = vld [vmem:[#allocation53_spill] sm:$0xff] }
 0x31a   : > { %v2348_v0 = vpop.f32.mrf.mxu1  ;;  %v6713_v36 = vpop.permute.xlu1 %6712  ;;  %v2020_v1 = vsel %vm1988_vm4, %v1987_v9, %v6605_v38  ;;  %v2228_v47 = vpack.c.bf16 %v2206_v53, %v2205_v32  ;;  %v6730_v30 = vunpack.i.h.bf16 %v9434_v6  ;;  %v6569_v51 = vunpack.i.l.bf16 %v11879_v56  ;;  %v11880_v38 = vld [vmem:[#allocation13_spill] sm:$0xff] }
 0x31b   : > { %v9421_v62 = vadd.f32 %v2357_v41, %v11876_v16  ;;  %v2349_v52 = vadd.f32 %v9388_v28, %v2348_v0  ;;  %v6715_v43 = vunpack.i.h.bf16 %v6713_v36  ;;  %v6714_v3 = vunpack.i.l.bf16 %v6713_v36 }
 0x31c   : > { %v5869_v27 = vpop.f32.mrf.mxu1  ;;  %v2052_v20 = vsel %vm2021_vm7, %v2019_v60, %v6499_v39  ;;  %v2053_v33 = vsel %vm2021_vm7, %v2020_v1, %v6500_v59  ;;  %v6729_v59 = vunpack.i.l.bf16 %v9434_v6  ;;  %v6550_v0 = vunpack.i.h.bf16 %v11881_v2 }
 0x31d   : > { %vm2578_vm14 = vcmp.gt.f32.partialorder %v9421_v62, 0.0  ;;  %v2610_v31 = vmul.f32 0.01, %v9421_v62  ;;  %v9437_v8 = vadd.f32 %v2349_v52, %v11877_v50  ;;  %v2360_v7 = vadd.f32 %v5869_v27, %v9388_v28  ;;  %v11882_v27 = vld [vmem:[#allocation43_spill] sm:$0xff] }
 0x31e   : > { %v2351_v55 = vpop.f32.mrf.mxu1  ;;  %v2209_v40 = vsel %vm2186_vm12, %v9294_v45, %v6714_v3  ;;  %v2210_v39 = vsel %vm2186_vm12, %v9298_v19, %v6715_v43  ;;  %v6723_v61 = vpop.permute.xlu1 %6722  ;;  %v6570_v14 = vunpack.i.h.bf16 %v11879_v56  ;;  %v6549_v45 = vunpack.i.l.bf16 %v11881_v2 }
 0x31f   : > { %v2642_v22 = vsel %vm2578_vm14, %v9421_v62, %v2610_v31  ;;  %v2352_v11 = vadd.f32 %v9388_v28, %v2351_v55  ;;  %vm2576_vm15 = vcmp.gt.f32.partialorder %v9437_v8, 0.0  ;;  %v2608_v35 = vmul.f32 0.01, %v9437_v8 }
 0x320   : > { %2674 = vst.msk [vmem:[#allocation2 + $0x31] sm:$0xff] %vm713_vm3, %v2642_v22  ;;  %v9448_v37 = vadd.f32 %v2360_v7, %v11878_v49  ;;  %5883 = vmatmul.mubr.msk.bf16.gmra.mxu1 %vm2262_vm13, %v2228_v47  ;;  %v6579_v32 = vunpack.i.l.bf16 %v9080_v23  ;;  %v2085_v19 = vsel %vm2054_vm8, %v2052_v20, %v6569_v51  ;;  %v2086_v16 = vsel %vm2054_vm8, %v2053_v33, %v6570_v14  ;;  %v11883_v47 = vld [vmem:[#allocation42_spill] sm:$0xff] }
 0x321   : > { %v9455_v34 = vadd.f32 %v2352_v11, %v11880_v38  ;;  %5886 = vmatprep.mubr.msk.bf16.mxu1 %vm2262_vm13, %v2229_v58  ;;  %v2640_v41 = vsel %vm2576_vm15, %v9437_v8, %v2608_v35  ;;  %v6620_v52 = vunpack.i.h.bf16 %v9172_v13  ;;  %v6619_v25 = vunpack.i.l.bf16 %v9172_v13 }
 0x322   : > { %vm2579_vm2 = vcmp.gt.f32.partialorder %v9448_v37, 0.0  ;;  %v2611_v26 = vmul.f32 0.01, %v9448_v37  ;;  %2672 = vst.msk [vmem:[#allocation2 + $0x19] sm:$0xff] %vm713_vm3, %v2640_v41  ;;  %v2230_v57 = vpack.c.bf16 %v2210_v39, %v2209_v40  ;;  %v6580_v9 = vunpack.i.h.bf16 %v9080_v23  ;;  %v6733_v50 = vpop.permute.xlu1 %6732 }
 0x323   : > { %vm2577_vm14 = vcmp.gt.f32.partialorder %v9455_v34, 0.0  ;;  %v2609_v44 = vmul.f32 0.01, %v9455_v34  ;;  %v6725_v24 = vunpack.i.h.bf16 %v6723_v61  ;;  %v6724_v5 = vunpack.i.l.bf16 %v6723_v61 }
 0x324   : > { %v2643_v29 = vsel %vm2579_vm2, %v9448_v37, %v2611_v26  ;;  %v2231_v36 = vpack.c.bf16 %v2212_v10, %v9426_v21  ;;  %v6115_v60 = vunpack.i.h.bf16 %v11882_v27  ;;  %v2114_v1 = vsel %vm2087_vm9, %v9281_v18, %v6439_v15 }
 0x325   : > { %2675 = vst.msk [vmem:[#allocation2 + $0x39] sm:$0xff] %vm713_vm3, %v2643_v29  ;;  %v2641_v53 = vsel %vm2577_vm14, %v9455_v34, %v2609_v44  ;;  %v2115_v13 = vsel %vm2087_vm9, %v9284_v42, %v6440_v4  ;;  %v2118_v31 = vsel %vm2087_vm9, %v2085_v19, %v6579_v32  ;;  %v2182_v23 = vsel %vm2153_vm11, %v9267_v63, %v6589_v46 }
 0x326   : > { %2673 = vst.msk [vmem:[#allocation2 + $0x21] sm:$0xff] %vm713_vm3, %v2641_v53  ;;  %v2147_v21 = vsel %vm2120_vm10, %v2114_v1, %v6549_v45  ;;  %v2148_v6 = vsel %vm2120_vm10, %v2115_v13, %v6550_v0  ;;  %v2119_v15 = vsel %vm2087_vm9, %v2086_v16, %v6580_v9  ;;  %v2183_v4 = vsel %vm2153_vm11, %v9270_v12, %v6590_v48 }
 0x327   : > { %v9505_v54 = vld [vmem:[#allocation2 + $0x30] sm:$0xff]  ;;  %v2215_v18 = vsel %vm2186_vm12, %v2182_v23, %v6729_v59  ;;  %v2180_v46 = vsel %vm2153_vm11, %v2147_v21, %v6619_v25  ;;  %v2181_v63 = vsel %vm2153_vm11, %v2148_v6, %v6620_v52  ;;  %v2216_v42 = vsel %vm2186_vm12, %v2183_v4, %v6730_v30 }
 0x328   : > { %5887 = vmatmul.mubr.msk.bf16.gmra.mxu1 %vm2262_vm13, %v2230_v57  ;;  %v2213_v7 = vsel %vm2186_vm12, %v2180_v46, %v6724_v5  ;;  %v2214_v55 = vsel %vm2186_vm12, %v2181_v63, %v6725_v24  ;;  %v11884_v58 = vunpack.i.l.bf16 %v11883_v47  ;;  %v6735_v17 = vunpack.i.h.bf16 %v6733_v50  ;;  %v11887_v63 = vld [vmem:[#allocation16_spill] sm:$0xff] }
 0x329   : > { %5890 = vmatprep.mubr.msk.bf16.mxu1 %vm2262_vm13, %v2231_v36  ;;  %v6734_v43 = vunpack.i.l.bf16 %v6733_v50  ;;  %v11885_v48 = vunpack.i.h.bf16 %v11883_v47  ;;  %v2816_v10 = vrot.slane %v9505_v54, 1  ;;  %v6114_v56 = vunpack.i.l.bf16 %v11882_v27  ;;  %v9540_v2 = vld [vmem:[#allocation2 + $0x18] sm:$0xff]  ;;  %v11886_v50 = vld [vmem:[#allocation14_spill] sm:$0xff] }
 0x32a   : > { %v2151_v22 = vsel %vm2120_vm10, %v2118_v31, %v11884_v58  ;;  %v2232_v51 = vpack.c.bf16 %v2214_v55, %v2213_v7  ;;  %v2233_v41 = vpack.c.bf16 %v2216_v42, %v2215_v18  ;;  %v2896_v0 = vrot.slane %v9505_v54, 2 }
 0x32b   : > { %v2152_v12 = vsel %vm2120_vm10, %v2119_v15, %v11885_v48  ;;  %v2184_v61 = vsel %vm2153_vm11, %v2151_v22, %v6114_v56  ;;  %v2811_v52 = vrot.slane %v9540_v2, 1  ;;  %v2891_v27 = vrot.slane %v9540_v2, 2  ;;  %v11888_v22 = vld [vmem:[#allocation19_spill] sm:$0xff] }
 0x32c   : > { %v9523_v3 = vld [vmem:[#allocation2 + $0x38] sm:$0xff]  ;;  %v2712_v11 = vld [vmem:[#allocation2 + $0x40] sm:$0x3]  ;;  %v2185_v44 = vsel %vm2153_vm11, %v2152_v12, %v6115_v60  ;;  %v2217_v14 = vsel %vm2186_vm12, %v2184_v61, %v6734_v43 }
 0x32d   : > { %v6756_v35 = vpack.i.bf16 %v9523_v3, %v9505_v54  ;;  %v2817_v49 = vrot.slane %v9523_v3, 1  ;;  %v2819_v30 = vrot.slane %v2712_v11, 1  ;;  %v9530_v20 = vld [vmem:[#allocation2 + $0x20] sm:$0xff]  ;;  %v2897_v38 = vrot.slane %v9523_v3, 2  ;;  %v2709_v39 = vld [vmem:[#allocation2 + $0x28] sm:$0x3] }
 0x32e   : > { %v2899_v33 = vrot.slane %v2712_v11, 2  ;;  %v2218_v29 = vsel %vm2186_vm12, %v2185_v44, %v6735_v17  ;;  %v6761_v45 = vpack.i.bf16 %v9530_v20, %v9540_v2  ;;  %v2812_v53 = vrot.slane %v9530_v20, 1  ;;  %v11889_v11 = vld [vmem:[#allocation20_spill] sm:$0xff] }
 0x32f   : > { %6757 = vrot.lane.b32.xlu0 %v6756_v35, %s11709_s24  ;;  %6752 = vrot.lane.b32.xlu1 %v6756_v35, %s11707_s14  ;;  %v2818_v26 = vsel %vm1000_vm5, %v2816_v10, %v2817_v49  ;;  %v2820_v40 = vsel %vm1000_vm5, %v2817_v49, %v2819_v30  ;;  %v2898_v32 = vsel %vm1081_vm6, %v2896_v0, %v2897_v38  ;;  %v2814_v16 = vrot.slane %v2709_v39, 1 }
 0x330   : > { %5891 = vmatmul.mubr.msk.bf16.gmra.mxu1 %vm2262_vm13, %v2232_v51  ;;  %v6776_v59 = vpack.i.bf16 %v2820_v40, %v2818_v26  ;;  %v2900_v19 = vsel %vm1081_vm6, %v2897_v38, %v2899_v33  ;;  %v2234_v57 = vpack.c.bf16 %v2218_v29, %v2217_v14  ;;  %v2813_v9 = vsel %vm1000_vm5, %v2811_v52, %v2812_v53 }
 0x331   : > { %5894 = vmatprep.mubr.msk.bf16.mxu1 %vm2262_vm13, %v2233_v41  ;;  %v6781_v25 = vpack.i.bf16 %v2900_v19, %v2898_v32  ;;  %v2815_v24 = vsel %vm1000_vm5, %v2812_v53, %v2814_v16  ;;  %v2892_v5 = vrot.slane %v9530_v20, 2  ;;  %v2894_v36 = vrot.slane %v2709_v39, 2 }
 0x332   : > { %v6796_v60 = vpack.i.bf16 %v2815_v24, %v2813_v9 }
 0x333   : > { %6777 = vrot.lane.b32.xlu1 %v6776_v59, %s11765_s16  ;;  %6762 = vrot.lane.b32.xlu0 %v6761_v45, %s11707_s14  ;;  %v2893_v1 = vsel %vm1081_vm6, %v2891_v27, %v2892_v5  ;;  %v2895_v13 = vsel %vm1081_vm6, %v2892_v5, %v2894_v36 }
 0x334   : > { %v6801_v31 = vpack.i.bf16 %v2895_v13, %v2893_v1 }
 0x337   : > { %6782 = vrot.lane.b32.xlu1 %v6781_v25, %s11763_s12  ;;  %6767 = vrot.lane.b32.xlu0 %v6776_v59, %s11711_s25 }
 0x338   : > { %5895 = vmatmul.mubr.msk.bf16.gmra.mxu1 %vm2262_vm13, %v2234_v57 }
 0x33b   : > { %6772 = vrot.lane.b32.xlu0 %v6781_v25, %s11713_s29  ;;  %6797 = vrot.lane.b32.xlu1 %v6796_v60, %s11711_s25 }
 0x33f   : > { %6787 = vrot.lane.b32.xlu0 %v6776_v59, %s11761_s30  ;;  %6802 = vrot.lane.b32.xlu1 %v6801_v31, %s11713_s29 }
 0x343   : > { %6792 = vrot.lane.b32.xlu0 %v6781_v25, %s11759_s15 }
 0x347   : > { %6807 = vrot.lane.b32.xlu0 %v6796_v60, %s11765_s16 }
 0x34b   : > { %6812 = vrot.lane.b32.xlu0 %v6801_v31, %s11763_s12 }
 0x360   : > { %v5872_v23 = vpop.f32.mrf.mxu1 }
 0x361   : > { %v2373_v21 = vadd.f32 %v5872_v23, %v9388_v28 }
 0x362   : > { %v2364_v6 = vpop.f32.mrf.mxu1 }
 0x363   : > { %v9572_v15 = vadd.f32 %v2373_v21, %v11886_v50  ;;  %v2365_v4 = vadd.f32 %v9388_v28, %v2364_v6  ;;  %v7540_v21 = vld [vmem:[%s11653_s5 + $0x10] ss:$0 sps:$4 sm:$0x33]   ;;  %v7541_v6 = vld [vmem:[%s11653_s5 + $0x8] sm:$0xff]  }
 0x364   : > { %v5873_v18 = vpop.f32.mrf.mxu1  ;;  %v4108_v50 = vsel %vm546_vm1, %v7540_v21, 0  ;;  %5953 = vmatprep.subr.msk.bf16.mxu0 %vm546_vm1, %v7540_v21 }
 0x365   : > { %vm2582_vm15 = vcmp.gt.f32.partialorder %v9572_v15, 0.0  ;;  %v2614_v46 = vmul.f32 0.01, %v9572_v15  ;;  %v9578_v42 = vadd.f32 %v2365_v4, %v11887_v63  ;;  %v2376_v7 = vadd.f32 %v5873_v18, %v9388_v28  ;;  %5899 = vmatpush3.bf16.msra.mxu0 %v4108_v50  ;;  %v7542_v4 = vld [vmem:[%s11653_s5] sm:$0xff]   ;;  %v6738_v18 = vpop.permute.xlu0 %6737 }
 0x366   : > { %v2367_v55 = vpop.f32.mrf.mxu1  ;;  %5900 = vmatprep.subr.bf16.mxu0 %v7541_v6 }
 0x367   : > { %v2646_v47 = vsel %vm2582_vm15, %v9572_v15, %v2614_v46  ;;  %vm2580_vm2 = vcmp.gt.f32.partialorder %v9578_v42, 0.0  ;;  %v2612_v58 = vmul.f32 0.01, %v9578_v42  ;;  %v9585_v17 = vadd.f32 %v2376_v7, %v11888_v22  ;;  %v11890_v22 = vld [vmem:[#allocation22_spill] sm:$0xff] }
 0x368   : > { %2678 = vst.msk [vmem:[#allocation2 + $0x61] sm:$0xff] %vm713_vm3, %v2646_v47  ;;  %v2368_v43 = vadd.f32 %v9388_v28, %v2367_v55 }
 0x369   : > { %v2644_v48 = vsel %vm2580_vm2, %v9578_v42, %v2612_v58  ;;  %vm2583_vm14 = vcmp.gt.f32.partialorder %v9585_v17, 0.0  ;;  %v2615_v12 = vmul.f32 0.01, %v9585_v17  ;;  %5901 = vmatpush3.bf16.msra.mxu0 %v7541_v6  ;;  %v6743_v46 = vpop.permute.xlu0 %6742 }
 0x36a   : > { %2676 = vst.msk [vmem:[#allocation2 + $0x49] sm:$0xff] %vm713_vm3, %v2644_v48  ;;  %v9594_v10 = vadd.f32 %v2368_v43, %v11889_v11  ;;  %5902 = vmatprep.subr.bf16.mxu0 %v7542_v4 }
 0x36b   : > { %v2647_v35 = vsel %vm2583_vm14, %v9585_v17, %v2615_v12 }
 0x36c   : > { %2679 = vst.msk [vmem:[#allocation2 + $0x69] sm:$0xff] %vm713_vm3, %v2647_v35  ;;  %vm2581_vm15 = vcmp.gt.f32.partialorder %v9594_v10, 0.0  ;;  %v2613_v49 = vmul.f32 0.01, %v9594_v10  ;;  %v11891_v35 = vld [vmem:[#allocation23_spill] sm:$0xff] }
 0x36d   : > { %5903 = vmatpush3.bf16.msra.mxu0 %v7542_v4 }
 0x36e   : > { %v2645_v30 = vsel %vm2581_vm15, %v9594_v10, %v2613_v49 }
 0x36f   : > { %2677 = vst.msk [vmem:[#allocation2 + $0x51] sm:$0xff] %vm713_vm3, %v2645_v30  ;;  %v2716_v56 = vld [vmem:[#allocation2 + $0x60] sm:$0xff] }
 0x370   : > { %v2826_v61 = vrot.slane %v2716_v56, 1  ;;  %v2906_v32 = vrot.slane %v2716_v56, 2 }
 0x371   : > { %v2713_v39 = vld [vmem:[#allocation2 + $0x48] sm:$0xff] }
 0x372   : > { %v2821_v57 = vrot.slane %v2713_v39, 1  ;;  %v2901_v60 = vrot.slane %v2713_v39, 2 }
 0x373   : > { %v2717_v51 = vld [vmem:[#allocation2 + $0x68] sm:$0xff]  ;;  %v2718_v38 = vld [vmem:[#allocation2 + $0x70] sm:$0x3] }
 0x374   : > { %v6821_v33 = vpack.i.bf16 %v2717_v51, %v2716_v56  ;;  %v2827_v41 = vrot.slane %v2717_v51, 1  ;;  %v2829_v26 = vrot.slane %v2718_v38, 1  ;;  %v2907_v14 = vrot.slane %v2717_v51, 2 }
 0x375   : > { %v2909_v29 = vrot.slane %v2718_v38, 2 }
 0x376   : > { %6822 = vrot.lane.b32.xlu0 %v6821_v33, %s11709_s24  ;;  %6817 = vrot.lane.b32.xlu1 %v6821_v33, %s11707_s14  ;;  %v2714_v40 = vld [vmem:[#allocation2 + $0x50] sm:$0xff]  ;;  %v2828_v59 = vsel %vm1000_vm5, %v2826_v61, %v2827_v41  ;;  %v2830_v0 = vsel %vm1000_vm5, %v2827_v41, %v2829_v26  ;;  %v2715_v45 = vld [vmem:[#allocation2 + $0x58] sm:$0x3]  ;;  %v2908_v53 = vsel %vm1081_vm6, %v2906_v32, %v2907_v14 }
 0x377   : > { %v6831_v44 = vpack.i.bf16 %v2714_v40, %v2713_v39  ;;  %v6836_v19 = vpack.i.bf16 %v2830_v0, %v2828_v59  ;;  %v2910_v16 = vsel %vm1081_vm6, %v2907_v14, %v2909_v29  ;;  %v2822_v52 = vrot.slane %v2714_v40, 1  ;;  %v11892_v41 = vld [vmem:[#allocation24_spill] sm:$0xff]  ;;  %v11893_v59 = vld [vmem:[#allocation25_spill] sm:$0xff] }
 0x378   : > { %v2824_v25 = vrot.slane %v2715_v45, 1  ;;  %v6841_v9 = vpack.i.bf16 %v2910_v16, %v2908_v53  ;;  %v2902_v36 = vrot.slane %v2714_v40, 2  ;;  %v2904_v27 = vrot.slane %v2715_v45, 2 }
 0x379   : > { %v2823_v24 = vsel %vm1000_vm5, %v2821_v57, %v2822_v52  ;;  %v6740_v45 = vunpack.i.h.bf16 %v6738_v18  ;;  %v6745_v16 = vunpack.i.h.bf16 %v6743_v46  ;;  %v6744_v57 = vunpack.i.l.bf16 %v6743_v46 }
 0x37a   : > { %6832 = vrot.lane.b32.xlu0 %v6831_v44, %s11707_s14  ;;  %6827 = vrot.lane.b32.xlu1 %v6831_v44, %s11709_s24  ;;  %v2825_v5 = vsel %vm1000_vm5, %v2822_v52, %v2824_v25  ;;  %v2903_v13 = vsel %vm1081_vm6, %v2901_v60, %v2902_v36  ;;  %v2905_v31 = vsel %vm1081_vm6, %v2902_v36, %v2904_v27  ;;  %v7581_v52 = vld [vmem:[#allocation2 + $0x8] sm:$0xff]  ;;  %s11894_s24 = smov 24   ;;  %s11897_s14 = smov 8  }
 0x37b   : > { %v6866_v1 = vpack.i.bf16 %v2825_v5, %v2823_v24  ;;  %v6871_v23 = vpack.i.bf16 %v2905_v31, %v2903_v13  ;;  %v3761_v25 = vsel %vm713_vm3, %v7581_v52, %v6740_v45  ;;  %v7582_v24 = vld [vmem:[#allocation2] sm:$0xff] }
 0x37c   : > { %v3793_v13 = vsel %vm1988_vm4, %v3761_v25, %v6745_v16 }
 0x37e   : > { %6837 = vrot.lane.b32.xlu0 %v6836_v19, %s11711_s25  ;;  %6847 = vrot.lane.b32.xlu1 %v6836_v19, %s11765_s16 }
 0x382   : > { %6842 = vrot.lane.b32.xlu0 %v6841_v9, %s11713_s29  ;;  %6852 = vrot.lane.b32.xlu1 %v6841_v9, %s11763_s12 }
 0x386   : > { %6857 = vrot.lane.b32.xlu0 %v6836_v19, %s11761_s30  ;;  %6867 = vrot.lane.b32.xlu1 %v6866_v1, %s11711_s25  ;;  %v6739_v19 = vunpack.i.l.bf16 %v6738_v18  ;;  %s11895_s25 = smov 12  }
 0x388   : > { %v3760_v5 = vsel %vm713_vm3, %v7582_v24, %v6739_v19 }
 0x389   : > { %v3792_v21 = vsel %vm1988_vm4, %v3760_v5, %v6744_v57 }
 0x38a   : > { %6862 = vrot.lane.b32.xlu0 %v6841_v9, %s11759_s15  ;;  %6872 = vrot.lane.b32.xlu1 %v6871_v23, %s11713_s29  ;;  %s11896_s29 = smov 4  }
 0x38e   : > { %6887 = vrot.lane.b32.xlu0 %v6866_v1, %s11765_s16  ;;  %6877 = vrot.lane.b32.xlu1 %v6866_v1, %s11761_s30 }
 0x392   : > { %6892 = vrot.lane.b32.xlu0 %v6871_v23, %s11763_s12  ;;  %6882 = vrot.lane.b32.xlu1 %v6871_v23, %s11759_s15 }
 0x3a1   : > { %v9637_v63 = vpop.permute.xlu0 %6757 }
 0x3a2   : > { %v6760_v18 = vunpack.i.h.bf16 %v9637_v63  ;;  %v6759_v46 = vunpack.i.l.bf16 %v9637_v63 }
 0x3a4   : > { %v5876_v7 = vpop.f32.mrf.mxu1 }
 0x3a5   : > { %v2389_v55 = vadd.f32 %v5876_v7, %v9388_v28  ;;  %v6763_v47 = vpop.permute.xlu0 %6762 }
 0x3a6   : > { %v2380_v58 = vpop.f32.mrf.mxu1  ;;  %v6765_v36 = vunpack.i.h.bf16 %v6763_v47  ;;  %v6764_v31 = vunpack.i.l.bf16 %v6763_v47 }
 0x3a7   : > { %v9641_v43 = vadd.f32 %v2389_v55, %v11890_v22  ;;  %v2381_v48 = vadd.f32 %v9388_v28, %v2380_v58 }
 0x3a8   : > { %v5877_v12 = vpop.f32.mrf.mxu1  ;;  %v3825_v55 = vsel %vm2021_vm7, %v3793_v13, %v6765_v36 }
 0x3a9   : > { %vm2586_vm2 = vcmp.gt.f32.partialorder %v9641_v43, 0.0  ;;  %v2618_v11 = vmul.f32 0.01, %v9641_v43  ;;  %v9647_v49 = vadd.f32 %v2381_v48, %v11891_v35  ;;  %v2392_v30 = vadd.f32 %v5877_v12, %v9388_v28  ;;  %v9650_v56 = vpop.permute.xlu0 %6767 }
 0x3aa   : > { %v2383_v51 = vpop.f32.mrf.mxu1  ;;  %v3824_v12 = vsel %vm2021_vm7, %v3792_v21, %v6764_v31  ;;  %v9707_v21 = vpop.permute.xlu1 %6747 }
 0x3ab   : > { %v2650_v38 = vsel %vm2586_vm2, %v9641_v43, %v2618_v11  ;;  %vm2584_vm14 = vcmp.gt.f32.partialorder %v9647_v49, 0.0  ;;  %v2616_v33 = vmul.f32 0.01, %v9647_v49  ;;  %v9656_v26 = vadd.f32 %v2392_v30, %v11892_v41 }
 0x3ac   : > { %2682 = vst.msk [vmem:[#allocation2 + $0x91] sm:$0xff] %vm713_vm3, %v2650_v38  ;;  %v2384_v40 = vadd.f32 %v9388_v28, %v2383_v51 }
 0x3ad   : > { %v2648_v39 = vsel %vm2584_vm14, %v9647_v49, %v2616_v33  ;;  %vm2587_vm15 = vcmp.gt.f32.partialorder %v9656_v26, 0.0  ;;  %v2619_v61 = vmul.f32 0.01, %v9656_v26  ;;  %v9663_v44 = vpop.permute.xlu0 %6772 }
 0x3ae   : > { %2680 = vst.msk [vmem:[#allocation2 + $0x79] sm:$0xff] %vm713_vm3, %v2648_v39  ;;  %v9667_v0 = vadd.f32 %v2384_v40, %v11893_v59 }
 0x3af   : > { %v2651_v14 = vsel %vm2587_vm15, %v9656_v26, %v2619_v61 }
 0x3b0   : > { %2683 = vst.msk [vmem:[#allocation2 + $0x99] sm:$0xff] %vm713_vm3, %v2651_v14  ;;  %vm2585_vm2 = vcmp.gt.f32.partialorder %v9667_v0, 0.0  ;;  %v2617_v29 = vmul.f32 0.01, %v9667_v0 }
 0x3b1   : > { %v9673_v32 = vpop.permute.xlu0 %6787 }
 0x3b2   : > { %v2649_v53 = vsel %vm2585_vm2, %v9667_v0, %v2617_v29  ;;  %v6790_v11 = vunpack.i.h.bf16 %v9673_v32  ;;  %v6789_v41 = vunpack.i.l.bf16 %v9673_v32 }
 0x3b3   : > { %2681 = vst.msk [vmem:[#allocation2 + $0x81] sm:$0xff] %vm713_vm3, %v2649_v53  ;;  %v2722_v27 = vld [vmem:[#allocation2 + $0x90] sm:$0xff] }
 0x3b4   : > { %v2836_v48 = vrot.slane %v2722_v27, 1  ;;  %v2916_v61 = vrot.slane %v2722_v27, 2 }
 0x3b5   : > { %v6793_v9 = vpop.permute.xlu0 %6792  ;;  %v2719_v47 = vld [vmem:[#allocation2 + $0x78] sm:$0xff] }
 0x3b6   : > { %v6795_v59 = vunpack.i.h.bf16 %v6793_v9  ;;  %v6794_v14 = vunpack.i.l.bf16 %v6793_v9 }
 0x3b7   : > { %v2723_v60 = vld [vmem:[#allocation2 + $0x98] sm:$0xff]  ;;  %v2724_v1 = vld [vmem:[#allocation2 + $0xa0] sm:$0x3] }
 0x3b8   : > { %v6901_v23 = vpack.i.bf16 %v2723_v60, %v2722_v27  ;;  %v2837_v50 = vrot.slane %v2723_v60, 1  ;;  %v2839_v4 = vrot.slane %v2724_v1, 1  ;;  %v2917_v38 = vrot.slane %v2723_v60, 2 }
 0x3b9   : > { %v6808_v6 = vpop.permute.xlu0 %6807  ;;  %v2919_v33 = vrot.slane %v2724_v1, 2 }
 0x3ba   : > { %6902 = vrot.lane.b32.xlu0 %v6901_v23, %s11894_s24  ;;  %6897 = vrot.lane.b32.xlu1 %v6901_v23, %s11895_s25  ;;  %v2720_v7 = vld [vmem:[#allocation2 + $0x80] sm:$0xff]  ;;  %v6810_v58 = vunpack.i.h.bf16 %v6808_v6  ;;  %v6809_v22 = vunpack.i.l.bf16 %v6808_v6  ;;  %v2838_v51 = vsel %vm1000_vm5, %v2836_v48, %v2837_v50  ;;  %v2840_v63 = vsel %vm1000_vm5, %v2837_v50, %v2839_v4  ;;  %v2721_v19 = vld [vmem:[#allocation2 + $0x88] sm:$0x3]  ;;  %v9717_v48 = vpop.permute.xlu1 %6752 }
 0x3bb   : > { %v6911_v35 = vpack.i.bf16 %v2720_v7, %v2719_v47  ;;  %v6916_v52 = vpack.i.bf16 %v2840_v63, %v2838_v51  ;;  %v2918_v57 = vsel %vm1081_vm6, %v2916_v61, %v2917_v38  ;;  %v2920_v24 = vsel %vm1081_vm6, %v2917_v38, %v2919_v33  ;;  %v11898_v51 = vld [vmem:[#allocation27_spill] sm:$0xff] }
 0x3bc   : > { %v3857_v29 = vsel %vm2054_vm8, %v3825_v55, %v6810_v58  ;;  %v3856_v45 = vsel %vm2054_vm8, %v3824_v12, %v6809_v22  ;;  %v2832_v36 = vrot.slane %v2720_v7, 1  ;;  %v2834_v27 = vrot.slane %v2721_v19, 1 }
 0x3bd   : > { %v6813_v30 = vpop.permute.xlu0 %6812  ;;  %v6921_v31 = vpack.i.bf16 %v2920_v24, %v2918_v57  ;;  %v2831_v23 = vrot.slane %v2719_v47, 1  ;;  %v2912_v4 = vrot.slane %v2720_v7, 2  ;;  %v11904_v24 = vld [vmem:[#allocation32_spill] sm:$0xff] }
 0x3be   : > { %v6815_v40 = vunpack.i.h.bf16 %v6813_v30  ;;  %v6814_v39 = vunpack.i.l.bf16 %v6813_v30  ;;  %6912 = vrot.lane.b32.xlu0 %v6911_v35, %s11895_s25  ;;  %6907 = vrot.lane.b32.xlu1 %v6911_v35, %s11894_s24  ;;  %v2835_v50 = vsel %vm1000_vm5, %v2832_v36, %v2834_v27  ;;  %v9722_v7 = vpop.permute.xlu1 %6777 }
 0x3bf   : > { %v2833_v6 = vsel %vm1000_vm5, %v2831_v23, %v2832_v36 }
 0x3c0   : > { %v3888_v53 = vsel %vm2087_vm9, %v3856_v45, %v6814_v39  ;;  %v3889_v16 = vsel %vm2087_vm9, %v3857_v29, %v6815_v40  ;;  %v6946_v55 = vpack.i.bf16 %v2835_v50, %v2833_v6  ;;  %v11900_v39 = vld [vmem:[#allocation30_spill] sm:$0xff] }
 0x3c1   : > { %v3920_v32 = vsel %vm2120_vm10, %v3888_v53, %v6759_v46  ;;  %v3921_v25 = vsel %vm2120_vm10, %v3889_v16, %v6760_v18  ;;  %v2914_v18 = vrot.slane %v2721_v19, 2  ;;  %v2911_v46 = vrot.slane %v2719_v47, 2  ;;  %v11902_v19 = vld [vmem:[#allocation31_spill] sm:$0xff]  ;;  %v11908_v50 = vld [vmem:[#allocation34_spill] sm:$0xff] }
 0x3c2   : > { %6917 = vrot.lane.b32.xlu0 %v6916_v52, %s11896_s29  ;;  %6927 = vrot.lane.b32.xlu1 %v6916_v52, %s11765_s16  ;;  %v3952_v9 = vsel %vm2153_vm11, %v3920_v32, %v6789_v41  ;;  %v3953_v5 = vsel %vm2153_vm11, %v3921_v25, %v6790_v11  ;;  %v9727_v47 = vpop.permute.xlu1 %6782 }
 0x3c3   : > { %v3984_v60 = vsel %vm2186_vm12, %v3952_v9, %v6794_v14  ;;  %v3985_v1 = vsel %vm2186_vm12, %v3953_v5, %v6795_v59  ;;  %v2913_v58 = vsel %vm1081_vm6, %v2911_v46, %v2912_v4  ;;  %v2915_v22 = vsel %vm1081_vm6, %v2912_v4, %v2914_v18 }
 0x3c4   : > { %v4016_v13 = vpack.c.bf16 %v3985_v1, %v3984_v60  ;;  %v6951_v12 = vpack.i.bf16 %v2915_v22, %v2913_v58  ;;  %v11906_v60 = vld [vmem:[#allocation33_spill] sm:$0xff] }
 0x3c6   : > { %5904 = vmatprep.mubr.msk.bf16.mxu0 %vm2262_vm13, %v4016_v13  ;;  %6922 = vrot.lane.b32.xlu0 %v6921_v31, %s11897_s14  ;;  %v9735_v41 = vpop.permute.xlu1 %6797 }
 0x3c7   : > { %6932 = vrot.lane.b32.xlu1 %v6921_v31, %s11763_s12  ;;  %v6799_v46 = vunpack.i.l.bf16 %v9735_v41 }
 0x3ca   : > { %6937 = vrot.lane.b32.xlu0 %v6916_v52, %s11761_s30  ;;  %v9759_v36 = vpop.permute.xlu1 %6802 }
 0x3cb   : > { %6947 = vrot.lane.b32.xlu1 %v6946_v55, %s11896_s29 }
 0x3ce   : > { %6942 = vrot.lane.b32.xlu0 %v6921_v31, %s11759_s15 }
 0x3cf   : > { %6952 = vrot.lane.b32.xlu1 %v6951_v12, %s11897_s14 }
 0x3d2   : > { %6967 = vrot.lane.b32.xlu0 %v6946_v55, %s11765_s16 }
 0x3d3   : > { %6957 = vrot.lane.b32.xlu1 %v6946_v55, %s11761_s30  ;;  %v6804_v55 = vunpack.i.l.bf16 %v9759_v36 }
 0x3d6   : > { %6972 = vrot.lane.b32.xlu0 %v6951_v12, %s11763_s12 }
 0x3d7   : > { %6962 = vrot.lane.b32.xlu1 %v6951_v12, %s11759_s15 }
 0x3d8   : > { %v5880_v11 = vpop.f32.mrf.mxu1 }
 0x3d9   : > { %v2405_v35 = vadd.f32 %v5880_v11, %v9388_v28 }
 0x3da   : > { %v2396_v30 = vpop.f32.mrf.mxu1 }
 0x3db   : > { %v9732_v63 = vadd.f32 %v2405_v35, %v11898_v51  ;;  %v2397_v38 = vadd.f32 %v9388_v28, %v2396_v30  ;;  %v11910_v35 = vld [vmem:[#allocation36_spill] sm:$0xff]  ;;  %v6755_v51 = vunpack.i.h.bf16 %v9717_v48 }
 0x3dc   : > { %v5881_v33 = vpop.f32.mrf.mxu1 }
 0x3dd   : > { %11899 = vst [vmem:[#allocation44_spill] sm:$0xff] %v9732_v63  ;;  %vm2590_vm14 = vcmp.gt.f32.partialorder %v9732_v63, 0.0  ;;  %v2622_v40 = vmul.f32 0.01, %v9732_v63  ;;  %v9740_v61 = vadd.f32 %v2397_v38, %v11900_v39  ;;  %v2408_v59 = vadd.f32 %v5881_v33, %v9388_v28 }
 0x3de   : > { %v2399_v14 = vpop.f32.mrf.mxu1  ;;  %v6754_v38 = vunpack.i.l.bf16 %v9717_v48 }
 0x3df   : > { %11901 = vst [vmem:[#allocation46_spill] sm:$0xff] %v9740_v61  ;;  %v2654_v29 = vsel %vm2590_vm14, %v9732_v63, %v2622_v40  ;;  %vm2588_vm15 = vcmp.gt.f32.partialorder %v9740_v61, 0.0  ;;  %v2620_v45 = vmul.f32 0.01, %v9740_v61  ;;  %v9747_v53 = vadd.f32 %v2408_v59, %v11902_v19 }
 0x3e0   : > { %2686 = vst.msk [vmem:[#allocation2 + $0xc1] sm:$0xff] %vm713_vm3, %v2654_v29  ;;  %v2400_v16 = vadd.f32 %v9388_v28, %v2399_v14  ;;  %v5884_v52 = vpop.f32.mrf.mxu1  ;;  %v6800_v19 = vunpack.i.h.bf16 %v9735_v41 }
 0x3e1   : > { %11903 = vst [vmem:[#allocation47_spill] sm:$0xff] %v9747_v53  ;;  %v2652_v32 = vsel %vm2588_vm15, %v9740_v61, %v2620_v45  ;;  %vm2591_vm2 = vcmp.gt.f32.partialorder %v9747_v53, 0.0  ;;  %v2623_v25 = vmul.f32 0.01, %v9747_v53  ;;  %v2421_v57 = vadd.f32 %v5884_v52, %v9388_v28  ;;  %v7591_v61 = vld [vmem:[#allocation2 + $0x80] sm:$0xff] }
 0x3e2   : > { %2684 = vst.msk [vmem:[#allocation2 + $0xa9] sm:$0xff] %vm713_vm3, %v2652_v32  ;;  %v9757_v9 = vadd.f32 %v2400_v16, %v11904_v24  ;;  %v2412_v5 = vpop.f32.mrf.mxu1  ;;  %v3762_v16 = vsel %vm713_vm3, %v9540_v2, %v6799_v46  ;;  %v6805_v52 = vunpack.i.h.bf16 %v9759_v36  ;;  %v11912_v32 = vld [vmem:[#allocation37_spill] sm:$0xff] }
 0x3e3   : > { %v2655_v27 = vsel %vm2591_vm2, %v9747_v53, %v2623_v25  ;;  %v9763_v1 = vadd.f32 %v2421_v57, %v11906_v60  ;;  %v2413_v13 = vadd.f32 %v9388_v28, %v2412_v5  ;;  %v3794_v24 = vsel %vm1988_vm4, %v3762_v16, %v6804_v55 }
 0x3e4   : > { %11905 = vst [vmem:[#allocation45_spill] sm:$0xff] %v9757_v9  ;;  %2687 = vst.msk [vmem:[#allocation2 + $0xc9] sm:$0xff] %vm713_vm3, %v2655_v27  ;;  %vm2589_vm14 = vcmp.gt.f32.partialorder %v9757_v9, 0.0  ;;  %v2621_v31 = vmul.f32 0.01, %v9757_v9  ;;  %v5885_v23 = vpop.f32.mrf.mxu1  ;;  %v11914_v27 = vld [vmem:[#allocation15_spill] sm:$0xff]  ;;  %v3826_v16 = vsel %vm2021_vm7, %v3794_v24, %v6754_v38 }
 0x3e5   : > { %11907 = vst [vmem:[#allocation48_spill] sm:$0xff] %v9763_v1  ;;  %vm2594_vm15 = vcmp.gt.f32.partialorder %v9763_v1, 0.0  ;;  %v2626_v6 = vmul.f32 0.01, %v9763_v1  ;;  %v9772_v4 = vadd.f32 %v2413_v13, %v11908_v50  ;;  %v2424_v18 = vadd.f32 %v5885_v23, %v9388_v28  ;;  %v9866_v24 = vld [vmem:[%s11869_s4] ss:$0 sm:$0xff] }
 0x3e6   : > { %v2653_v58 = vsel %vm2589_vm14, %v9757_v9, %v2621_v31  ;;  %v2415_v22 = vpop.f32.mrf.mxu1 }
 0x3e7   : > { %11909 = vst [vmem:[#allocation49_spill] sm:$0xff] %v9772_v4  ;;  %2685 = vst.msk [vmem:[#allocation2 + $0xb1] sm:$0xff] %vm713_vm3, %v2653_v58  ;;  %v2658_v12 = vsel %vm2594_vm15, %v9763_v1, %v2626_v6  ;;  %vm2592_vm2 = vcmp.gt.f32.partialorder %v9772_v4, 0.0  ;;  %v2624_v11 = vmul.f32 0.01, %v9772_v4  ;;  %v9783_v30 = vadd.f32 %v2424_v18, %v11910_v35  ;;  %v9811_v13 = vld [vmem:[#allocation2 + $0xc0] sm:$0xff] }
 0x3e8   : > { %2690 = vst.msk [vmem:[#allocation2 + $0xf1] sm:$0xff] %vm713_vm3, %v2658_v12  ;;  %v2416_v33 = vadd.f32 %v9388_v28, %v2415_v22  ;;  %v5888_v40 = vpop.f32.mrf.mxu1  ;;  %v9789_v39 = vpop.permute.xlu0 %6822  ;;  %v11916_v18 = vld [vmem:[#allocation17_spill] sm:$0xff]  ;;  %v6770_v22 = vunpack.i.h.bf16 %v9650_v56  ;;  %v6769_v12 = vunpack.i.l.bf16 %v9650_v56 }
 0x3e9   : > { %11911 = vst [vmem:[#allocation51_spill] sm:$0xff] %v9783_v30  ;;  %v2656_v59 = vsel %vm2592_vm2, %v9772_v4, %v2624_v11  ;;  %vm2595_vm14 = vcmp.gt.f32.partialorder %v9783_v30, 0.0  ;;  %v2627_v14 = vmul.f32 0.01, %v9783_v30  ;;  %v2437_v29 = vadd.f32 %v5888_v40, %v9388_v28  ;;  %v9795_v45 = vpop.permute.xlu1 %6817  ;;  %v7590_v1 = vld [vmem:[#allocation2 + $0x78] sm:$0xff] }
 0x3ea   : > { %2688 = vst.msk [vmem:[#allocation2 + $0xd9] sm:$0xff] %vm713_vm3, %v2656_v59  ;;  %v9803_v25 = vadd.f32 %v2416_v33, %v11912_v32  ;;  %v2428_v57 = vpop.f32.mrf.mxu1  ;;  %v3763_v11 = vsel %vm713_vm3, %v9530_v20, %v6800_v19  ;;  %v6780_v20 = vunpack.i.h.bf16 %v9722_v7  ;;  %v3765_v38 = vsel %vm713_vm3, %v9523_v3, %v6770_v22 }
 0x3eb   : > { %v2659_v5 = vsel %vm2595_vm14, %v9783_v30, %v2627_v14  ;;  %v9808_v60 = vadd.f32 %v2437_v29, %v11914_v27  ;;  %v2429_v41 = vadd.f32 %v9388_v28, %v2428_v57  ;;  %v9813_v2 = vld [vmem:[#allocation2 + $0xc8] sm:$0xff]  ;;  %v11918_v14 = vld [vmem:[#allocation18_spill] sm:$0xff]  ;;  %v6779_v29 = vunpack.i.l.bf16 %v9722_v7 }
 0x3ec   : > { %11913 = vst [vmem:[#allocation52_spill] sm:$0xff] %v9803_v25  ;;  %2691 = vst.msk [vmem:[#allocation2 + $0xf9] sm:$0xff] %vm713_vm3, %v2659_v5  ;;  %vm2593_vm15 = vcmp.gt.f32.partialorder %v9803_v25, 0.0  ;;  %v2625_v36 = vmul.f32 0.01, %v9803_v25  ;;  %v5889_v31 = vpop.f32.mrf.mxu1  ;;  %v9818_v23 = vpop.permute.xlu0 %6832  ;;  %v6981_v6 = vpack.i.bf16 %v9813_v2, %v9811_v13  ;;  %v3795_v19 = vsel %vm1988_vm4, %v3763_v11, %v6805_v52  ;;  %v11922_v11 = vld [vmem:[#allocation26_spill] sm:$0xff] }
 0x3ed   : > { %11915 = vst [vmem:[#allocation50_spill] sm:$0xff] %v9808_v60  ;;  %vm2598_vm2 = vcmp.gt.f32.partialorder %v9808_v60, 0.0  ;;  %v2630_v50 = vmul.f32 0.01, %v9808_v60  ;;  %v9825_v46 = vadd.f32 %v2429_v41, %v11916_v18  ;;  %v2440_v55 = vadd.f32 %v5889_v31, %v9388_v28  ;;  %v9828_v58 = vpop.permute.xlu1 %6827 }
 0x3ee   : > { %v2657_v35 = vsel %vm2593_vm15, %v9803_v25, %v2625_v36  ;;  %v2431_v33 = vpop.f32.mrf.mxu1  ;;  %6982 = vrot.lane.b32.xlu0 %v6981_v6, %s11894_s24  ;;  %6977 = vrot.lane.b32.xlu1 %v6981_v6, %s11895_s25  ;;  %v6785_v7 = vunpack.i.h.bf16 %v9727_v47  ;;  %v3764_v52 = vsel %vm713_vm3, %v9505_v54, %v6769_v12  ;;  %v9869_v6 = vld [vmem:[#allocation2 + $0xb0] sm:$0xff]  ;;  %v6774_v18 = vunpack.i.l.bf16 %v9663_v44 }
 0x3ef   : > { %11917 = vst [vmem:[#allocation10_spill] sm:$0xff] %v9825_v46  ;;  %2689 = vst.msk [vmem:[#allocation2 + $0xe1] sm:$0xff] %vm713_vm3, %v2657_v35  ;;  %v2662_v40 = vsel %vm2598_vm2, %v9808_v60, %v2630_v50  ;;  %vm2596_vm14 = vcmp.gt.f32.partialorder %v9825_v46, 0.0  ;;  %v2628_v59 = vmul.f32 0.01, %v9825_v46  ;;  %v9842_v56 = vadd.f32 %v2440_v55, %v11918_v14  ;;  %v11920_v55 = vld [vmem:[#allocation21_spill] sm:$0xff] }
 0x3f0   : > { %2694 = vst.msk [vmem:[#allocation2 + $0x121] sm:$0xff] %vm713_vm3, %v2662_v40  ;;  %v5892_v32 = vpop.f32.mrf.mxu1  ;;  %v9849_v57 = vpop.permute.xlu0 %6837  ;;  %v2432_v41 = vadd.f32 %v9388_v28, %v2431_v33  ;;  %v6775_v50 = vunpack.i.h.bf16 %v9663_v44  ;;  %v3827_v22 = vsel %vm2021_vm7, %v3795_v19, %v6755_v51  ;;  %v3858_v12 = vsel %vm2054_vm8, %v3826_v16, %v6779_v29  ;;  %v9886_v40 = vld [vmem:[#allocation2 + $0xa8] sm:$0xff]  ;;  %v11924_v19 = vld [vmem:[#allocation28_spill] sm:$0xff] }
 0x3f1   : > { %11919 = vst [vmem:[#allocation11_spill] sm:$0xff] %v9842_v56  ;;  %v2660_v5 = vsel %vm2596_vm14, %v9825_v46, %v2628_v59  ;;  %vm2599_vm15 = vcmp.gt.f32.partialorder %v9842_v56, 0.0  ;;  %v2631_v27 = vmul.f32 0.01, %v9842_v56  ;;  %v9855_v36 = vpop.permute.xlu1 %6847  ;;  %v2453_v31 = vadd.f32 %v9866_v24, %v5892_v32 }
 0x3f2   : > { %2692 = vst.msk [vmem:[#allocation2 + $0x109] sm:$0xff] %vm713_vm3, %v2660_v5  ;;  %v2444_v28 = vpop.f32.mrf.mxu1  ;;  %v9875_v54 = vadd.f32 %v2432_v41, %v11920_v55  ;;  %v6991_v51 = vpack.i.bf16 %v9869_v6, %v9886_v40  ;;  %v9904_v41 = vsel %vm1988_vm4, %v3764_v52, %v6774_v18  ;;  %v2730_v52 = vld [vmem:[#allocation2 + $0xd0] sm:$0x3] }
 0x3f3   : > { %v2663_v3 = vsel %vm2599_vm15, %v9842_v56, %v2631_v27  ;;  %v9883_v35 = vadd.f32 %v2453_v31, %v11922_v11  ;;  %v2445_v33 = vadd.f32 %v9866_v24, %v2444_v28  ;;  %v6784_v27 = vunpack.i.l.bf16 %v9727_v47  ;;  %v11926_v47 = vld [vmem:[#allocation29_spill] sm:$0xff] }
 0x3f4   : > { %11921 = vst [vmem:[#allocation12_spill] sm:$0xff] %v9875_v54  ;;  %2695 = vst.msk [vmem:[#allocation2 + $0x129] sm:$0xff] %vm713_vm3, %v2663_v3  ;;  %v5893_v44 = vpop.f32.mrf.mxu1  ;;  %v9888_v59 = vpop.permute.xlu0 %6842  ;;  %vm2597_vm2 = vcmp.gt.f32.partialorder %v9875_v54, 0.0  ;;  %v2629_v48 = vmul.f32 0.01, %v9875_v54  ;;  %v3859_v31 = vsel %vm2054_vm8, %v3827_v22, %v6780_v20  ;;  %6992 = vrot.lane.b32.xlu0 %v6991_v51, %s11895_s25  ;;  %6987 = vrot.lane.b32.xlu1 %v6991_v51, %s11894_s24  ;;  %v2922_v56 = vrot.slane %v9869_v6, 2 }
 0x3f5   : > { %11923 = vst [vmem:[#allocation54_spill] sm:$0xff] %v9883_v35  ;;  %v9894_v14 = vpop.permute.xlu1 %6852  ;;  %vm2602_vm14 = vcmp.gt.f32.partialorder %v9883_v35, 0.0  ;;  %v2634_v29 = vmul.f32 0.01, %v9883_v35  ;;  %v9899_v16 = vadd.f32 %v2445_v33, %v11924_v19  ;;  %v2456_v32 = vadd.f32 %v9866_v24, %v5893_v44 }
 0x3f6   : > { %v2447_v5 = vpop.f32.mrf.mxu1  ;;  %v2661_v28 = vsel %vm2597_vm2, %v9875_v54, %v2629_v48  ;;  %v3797_v22 = vsel %vm1988_vm4, %v3765_v38, %v6775_v50  ;;  %v3890_v33 = vsel %vm2087_vm9, %v3858_v12, %v6784_v27  ;;  %v2846_v48 = vrot.slane %v9811_v13, 1  ;;  %v11928_v50 = vld [vmem:[#allocation35_spill] sm:$0xff] }
 0x3f7   : > { %11925 = vst [vmem:[#allocation13_spill] sm:$0xff] %v9899_v16  ;;  %2693 = vst.msk [vmem:[#allocation2 + $0x111] sm:$0xff] %vm713_vm3, %v2661_v28  ;;  %v2666_v3 = vsel %vm2602_vm14, %v9883_v35, %v2634_v29  ;;  %vm2600_vm15 = vcmp.gt.f32.partialorder %v9899_v16, 0.0  ;;  %v2632_v55 = vmul.f32 0.01, %v9899_v16  ;;  %v9915_v11 = vadd.f32 %v2456_v32, %v11926_v47 }
 0x3f8   : > { %v5896_v18 = vpop.f32.mrf.mxu1  ;;  %v9917_v20 = vpop.permute.xlu0 %6857  ;;  %2698 = vst.msk [vmem:[#allocation2 + $0x151] sm:$0xff] %vm713_vm3, %v2666_v3  ;;  %v2448_v44 = vadd.f32 %v9866_v24, %v2447_v5  ;;  %v2847_v32 = vrot.slane %v9813_v2, 1  ;;  %v3891_v38 = vsel %vm2087_vm9, %v3859_v31, %v6785_v7  ;;  %v2849_v5 = vrot.slane %v2730_v52, 1 }
 0x3f9   : > { %11927 = vst [vmem:[#allocation53_spill] sm:$0xff] %v9915_v11  ;;  %v9924_v51 = vpop.permute.xlu1 %6867  ;;  %v2664_v29 = vsel %vm2600_vm15, %v9899_v16, %v2632_v55  ;;  %vm2603_vm2 = vcmp.gt.f32.partialorder %v9915_v11, 0.0  ;;  %v2635_v19 = vmul.f32 0.01, %v9915_v11  ;;  %v2469_v27 = vadd.f32 %v9866_v24, %v5896_v18 }
 0x3fa   : > { %v2460_v28 = vpop.f32.mrf.mxu1  ;;  %2696 = vst.msk [vmem:[#allocation2 + $0x139] sm:$0xff] %vm713_vm3, %v2664_v29  ;;  %v9933_v12 = vadd.f32 %v2448_v44, %v11928_v50  ;;  %v2848_v47 = vsel %vm1000_vm5, %v2846_v48, %v2847_v32  ;;  %v2926_v16 = vrot.slane %v9811_v13, 2  ;;  %v2850_v31 = vsel %vm1000_vm5, %v2847_v32, %v2849_v5  ;;  %v11930_v44 = vld [vmem:[#allocation38_spill] sm:$0xff] }
 0x3fb   : > { %v2667_v55 = vsel %vm2603_vm2, %v9915_v11, %v2635_v19  ;;  %v9945_v29 = vadd.f32 %v2469_v27, %v11930_v44  ;;  %v6835_v48 = vunpack.i.h.bf16 %v9818_v23  ;;  %v6834_v13 = vunpack.i.l.bf16 %v9818_v23 }
 0x3fc   : > { %11929 = vst [vmem:[#allocation43_spill] sm:$0xff] %v9933_v12  ;;  %v5897_v35 = vpop.f32.mrf.mxu1  ;;  %2699 = vst.msk [vmem:[#allocation2 + $0x159] sm:$0xff] %vm713_vm3, %v2667_v55  ;;  %vm2601_vm14 = vcmp.gt.f32.partialorder %v9933_v12, 0.0  ;;  %v2633_v7 = vmul.f32 0.01, %v9933_v12  ;;  %v9947_v18 = vpop.permute.xlu0 %6862  ;;  %v6996_v19 = vpack.i.bf16 %v2850_v31, %v2848_v47  ;;  %v2461_v32 = vadd.f32 %v9866_v24, %v2460_v28  ;;  %v11932_v28 = vld [vmem:[#allocation39_spill] sm:$0xff] }
 0x3fd   : > { %11931 = vst [vmem:[#allocation42_spill] sm:$0xff] %v9945_v29  ;;  %v9949_v50 = vpop.permute.xlu1 %6872  ;;  %vm2606_vm15 = vcmp.gt.f32.partialorder %v9945_v29, 0.0  ;;  %v2638_v3 = vmul.f32 0.01, %v9945_v29  ;;  %v6830_v5 = vunpack.i.h.bf16 %v9828_v58  ;;  %v2927_v27 = vrot.slane %v9813_v2, 2 }
 0x3fe   : > { %v2665_v55 = vsel %vm2601_vm14, %v9933_v12, %v2633_v7  ;;  %6997 = vrot.lane.b32.xlu0 %v6996_v19, %s11896_s29  ;;  %7007 = vrot.lane.b32.xlu1 %v6996_v19, %s11765_s16  ;;  %v2929_v23 = vrot.slane %v2730_v52, 2  ;;  %v2472_v47 = vadd.f32 %v9866_v24, %v5897_v35  ;;  %v6829_v31 = vunpack.i.l.bf16 %v9828_v58  ;;  %v11934_v52 = vld [vmem:[#allocation40_spill] sm:$0xff]  ;;  %v2463_v35 = vpop.f32.mrf.mxu1 }
 0x3ff   : > { %2697 = vst.msk [vmem:[#allocation2 + $0x141] sm:$0xff] %vm713_vm3, %v2665_v55  ;;  %v2670_v44 = vsel %vm2606_vm15, %v9945_v29, %v2638_v3  ;;  %v9967_v12 = vadd.f32 %v2461_v32, %v11932_v28  ;;  %v3829_v55 = vsel %vm2021_vm7, %v3797_v22, %v6835_v48  ;;  %v2928_v11 = vsel %vm1081_vm6, %v2926_v16, %v2927_v27 }
 0x400   : > { %2702 = vst.msk [vmem:[#allocation2 + $0x181] sm:$0xff] %vm713_vm3, %v2670_v44  ;;  %v2930_v2 = vsel %vm1081_vm6, %v2927_v27, %v2929_v23  ;;  %v9974_v54 = vadd.f32 %v2472_v47, %v11934_v52  ;;  %v6888_v7 = vpop.permute.xlu0 %6887  ;;  %v3828_v22 = vsel %vm2021_vm7, %v9904_v41, %v6834_v13  ;;  %v3923_v48 = vsel %vm2120_vm10, %v3891_v38, %v6830_v5  ;;  %v2727_v27 = vld [vmem:[#allocation2 + $0xb8] sm:$0x3] }
 0x401   : > { %11933 = vst [vmem:[#allocation14_spill] sm:$0xff] %v9967_v12  ;;  %vm2604_vm2 = vcmp.gt.f32.partialorder %v9967_v12, 0.0  ;;  %v2636_v58 = vmul.f32 0.01, %v9967_v12  ;;  %v7001_v3 = vpack.i.bf16 %v2930_v2, %v2928_v11  ;;  %v6878_v32 = vpop.permute.xlu1 %6877  ;;  %v3922_v23 = vsel %vm2120_vm10, %v3890_v33, %v6829_v31  ;;  %v11936_v5 = vld [vmem:[#allocation41_spill] sm:$0xff] }
 0x402   : > { %11935 = vst [vmem:[#allocation16_spill] sm:$0xff] %v9974_v54  ;;  %vm2607_vm14 = vcmp.gt.f32.partialorder %v9974_v54, 0.0  ;;  %v2639_v16 = vmul.f32 0.01, %v9974_v54  ;;  %v6860_v47 = vunpack.i.h.bf16 %v9917_v20  ;;  %v2464_v11 = vadd.f32 %v9866_v24, %v2463_v35 }
 0x403   : > { %v2668_v44 = vsel %vm2604_vm2, %v9967_v12, %v2636_v58  ;;  %7002 = vrot.lane.b32.xlu0 %v7001_v3, %s11897_s14  ;;  %7012 = vrot.lane.b32.xlu1 %v7001_v3, %s11763_s12  ;;  %v6859_v41 = vunpack.i.l.bf16 %v9917_v20  ;;  %v2841_v13 = vrot.slane %v9886_v40, 1  ;;  %v2842_v33 = vrot.slane %v9869_v6, 1 }
 0x404   : > { %2700 = vst.msk [vmem:[#allocation2 + $0x169] sm:$0xff] %vm713_vm3, %v2668_v44  ;;  %v2671_v38 = vsel %vm2607_vm14, %v9974_v54, %v2639_v16  ;;  %v9996_v31 = vadd.f32 %v2464_v11, %v11936_v5  ;;  %v2844_v28 = vrot.slane %v2727_v27, 1  ;;  %v6890_v2 = vunpack.i.h.bf16 %v6888_v7 }
 0x405   : > { %2703 = vst.msk [vmem:[#allocation2 + $0x189] sm:$0xff] %vm713_vm3, %v2671_v38  ;;  %v6864_v52 = vunpack.i.l.bf16 %v9947_v18  ;;  %v2843_v24 = vsel %vm1000_vm5, %v2841_v13, %v2842_v33  ;;  %v6889_v20 = vunpack.i.l.bf16 %v6888_v7  ;;  %v6879_v35 = vunpack.i.l.bf16 %v6878_v32  ;;  %v6893_v38 = vpop.permute.xlu0 %6892  ;;  %v6883_v11 = vpop.permute.xlu1 %6882 }
 0x406   : > { %11937 = vst [vmem:[#allocation19_spill] sm:$0xff] %v9996_v31  ;;  %vm2605_vm15 = vcmp.gt.f32.partialorder %v9996_v31, 0.0  ;;  %v2637_v58 = vmul.f32 0.01, %v9996_v31  ;;  %v2845_v16 = vsel %vm1000_vm5, %v2842_v33, %v2844_v28  ;;  %v6880_v44 = vunpack.i.h.bf16 %v6878_v32 }
 0x407   : > { %7017 = vrot.lane.b32.xlu0 %v6996_v19, %s11761_s30  ;;  %v7026_v5 = vpack.i.bf16 %v2845_v16, %v2843_v24  ;;  %v3860_v54 = vsel %vm2054_vm8, %v3828_v22, %v6889_v20  ;;  %v3861_v12 = vsel %vm2054_vm8, %v3829_v55, %v6890_v2  ;;  %v3954_v13 = vsel %vm2153_vm11, %v3922_v23, %v6879_v35 }
 0x408   : > { %v2669_v7 = vsel %vm2605_vm15, %v9996_v31, %v2637_v58  ;;  %v2921_v29 = vrot.slane %v9886_v40, 2  ;;  %v2924_v19 = vrot.slane %v2727_v27, 2  ;;  %v6895_v32 = vunpack.i.h.bf16 %v6893_v38 }
 0x409   : > { %2701 = vst.msk [vmem:[#allocation2 + $0x171] sm:$0xff] %vm713_vm3, %v2669_v7  ;;  %7027 = vrot.lane.b32.xlu1 %v7026_v5, %s11896_s29  ;;  %v6894_v33 = vunpack.i.l.bf16 %v6893_v38  ;;  %v6885_v28 = vunpack.i.h.bf16 %v6883_v11  ;;  %v3955_v22 = vsel %vm2153_vm11, %v3923_v48, %v6880_v44  ;;  %v6884_v23 = vunpack.i.l.bf16 %v6883_v11  ;;  %v2735_v38 = vld [vmem:[#allocation2 + $0xf8] sm:$0xff] }
 0x40a   : > { %v2923_v55 = vsel %vm1081_vm6, %v2921_v29, %v2922_v56  ;;  %v2925_v2 = vsel %vm1081_vm6, %v2922_v56, %v2924_v19  ;;  %v3893_v6 = vsel %vm2087_vm9, %v3861_v12, %v6895_v32  ;;  %v11938_v27 = vunpack.i.l.bf16 %v9789_v39 }
 0x40b   : > { %7022 = vrot.lane.b32.xlu0 %v7001_v3, %s11759_s15  ;;  %v3892_v40 = vsel %vm2087_vm9, %v3860_v54, %v6894_v33  ;;  %v3987_v24 = vsel %vm2186_vm12, %v3955_v22, %v6885_v28  ;;  %v7031_v20 = vpack.i.bf16 %v2925_v2, %v2923_v55  ;;  %v11939_v48 = vunpack.i.h.bf16 %v9789_v39 }
 0x40c   : > { %v3924_v35 = vsel %vm2120_vm10, %v3892_v40, %v11938_v27  ;;  %v3986_v29 = vsel %vm2186_vm12, %v3954_v13, %v6884_v23  ;;  %v6865_v58 = vunpack.i.h.bf16 %v9947_v18  ;;  %v2736_v18 = vld [vmem:[#allocation2 + $0x100] sm:$0x3]  ;;  %v2937_v28 = vrot.slane %v2735_v38, 2 }
 0x40d   : > { %v3925_v3 = vsel %vm2120_vm10, %v3893_v6, %v11939_v48  ;;  %v4017_v56 = vpack.c.bf16 %v3987_v24, %v3986_v29  ;;  %v3956_v54 = vsel %vm2153_vm11, %v3924_v35, %v6859_v41  ;;  %7032 = vrot.lane.b32.xlu1 %v7031_v20, %s11897_s14  ;;  %v2734_v41 = vld [vmem:[#allocation2 + $0xf0] sm:$0xff]  ;;  %v10037_v13 = vld [vmem:[#allocation2 + $0xe0] sm:$0xff]  ;;  %v2859_v7 = vrot.slane %v2736_v18, 1  ;;  %v2733_v6 = vld [vmem:[#allocation2 + $0xe8] sm:$0x3] }
 0x40e   : > { %v3957_v12 = vsel %vm2153_vm11, %v3925_v3, %v6860_v47  ;;  %v3988_v16 = vsel %vm2186_vm12, %v3956_v54, %v6864_v52  ;;  %v7061_v11 = vpack.i.bf16 %v2735_v38, %v2734_v41  ;;  %v2857_v47 = vrot.slane %v2735_v38, 1  ;;  %v10041_v52 = vld [vmem:[#allocation2 + $0xd8] sm:$0xff] }
 0x40f   : > { %7047 = vrot.lane.b32.xlu0 %v7026_v5, %s11765_s16  ;;  %5905 = vmatmul.mubr.msk.bf16.vlgmr.msra.gmra.mxu0 %vm2262_vm13, %v4017_v56  ;;  %v3989_v39 = vsel %vm2186_vm12, %v3957_v12, %v6865_v58  ;;  %v2856_v19 = vrot.slane %v2734_v41, 1  ;;  %v2939_v22 = vrot.slane %v2736_v18, 2  ;;  %v2936_v55 = vrot.slane %v2734_v41, 2 }
 0x410   : > { %v4018_v44 = vpack.c.bf16 %v3989_v39, %v3988_v16  ;;  %v2860_v33 = vsel %vm1000_vm5, %v2857_v47, %v2859_v7  ;;  %v2854_v27 = vrot.slane %v2733_v6, 1  ;;  %v2851_v35 = vrot.slane %v10041_v52, 1 }
 0x411   : > { %7037 = vrot.lane.b32.xlu1 %v7026_v5, %s11761_s30  ;;  %v7071_v5 = vpack.i.bf16 %v10037_v13, %v10041_v52  ;;  %v2858_v32 = vsel %vm1000_vm5, %v2856_v19, %v2857_v47  ;;  %v2938_v2 = vsel %vm1081_vm6, %v2936_v55, %v2937_v28  ;;  %v2940_v40 = vsel %vm1081_vm6, %v2937_v28, %v2939_v22  ;;  %v7585_v28 = vld [vmem:[#allocation2 + $0x198] sm:$0xff]  ;;  %v10107_v47 = vld [vmem:[#allocation2 + $0x110] sm:$0xff] }
 0x412   : > { %5908 = vmatprep.mubr.msk.bf16.mxu0 %vm2262_vm13, %v4018_v44  ;;  %v7076_v23 = vpack.i.bf16 %v2860_v33, %v2858_v32  ;;  %v7081_v24 = vpack.i.bf16 %v2940_v40, %v2938_v2  ;;  %v2932_v29 = vrot.slane %v10037_v13, 2  ;;  %v2934_v58 = vrot.slane %v2733_v6, 2  ;;  %v10087_v2 = vld [vmem:[#allocation2 + $0x128] sm:$0xff]  ;;  %v7589_v33 = vld [vmem:[#allocation2 + $0x60] sm:$0xff] }
 0x413   : > { %7052 = vrot.lane.b32.xlu0 %v7031_v20, %s11763_s12  ;;  %v2931_v56 = vrot.slane %v10041_v52, 2  ;;  %v6870_v7 = vunpack.i.h.bf16 %v9924_v51  ;;  %v6869_v19 = vunpack.i.l.bf16 %v9924_v51  ;;  %v6874_v32 = vunpack.i.l.bf16 %v9949_v50 }
 0x414   : > { %v2935_v16 = vsel %vm1081_vm6, %v2932_v29, %v2934_v58  ;;  %v2982_v22 = vrot.slane %v7585_v28, 1  ;;  %v6840_v55 = vunpack.i.h.bf16 %v9849_v57  ;;  %v6820_v51 = vunpack.i.h.bf16 %v9795_v45 }
 0x415   : > { %7042 = vrot.lane.b32.xlu1 %v7031_v20, %s11759_s15  ;;  %v2852_v20 = vrot.slane %v10037_v13, 1  ;;  %v2933_v12 = vsel %vm1081_vm6, %v2931_v56, %v2932_v29  ;;  %v7587_v29 = vld [vmem:[#allocation2 + $0x48] sm:$0xff]  ;;  %v2740_v56 = vld [vmem:[#allocation2 + $0x120] sm:$0xff]  ;;  %vm4761_vm2 = vcmask 1042432   ;;  %vm4779_vm14 = vcmask 1043456  }
 0x416   : > { %v7111_v38 = vpack.i.bf16 %v2935_v16, %v2933_v12  ;;  %v3766_v58 = vsel %vm713_vm3, %v7587_v29, %v6869_v19  ;;  %v7588_v16 = vld [vmem:[#allocation2 + $0x68] sm:$0xff]  ;;  %v6849_v19 = vunpack.i.l.bf16 %v9855_v36  ;;  %vm4797_vm15 = vcmask 1044480  }
 0x417   : > { %7062 = vrot.lane.b32.xlu0 %v7061_v11, %s11894_s24  ;;  %v2853_v48 = vsel %vm1000_vm5, %v2851_v35, %v2852_v20  ;;  %v2855_v3 = vsel %vm1000_vm5, %v2852_v20, %v2854_v27  ;;  %v6845_v20 = vunpack.i.h.bf16 %v9888_v59  ;;  %v2742_v27 = vld [vmem:[#allocation2 + $0x130] sm:$0x3]  ;;  %v6850_v35 = vunpack.i.h.bf16 %v9855_v36 }
 0x418   : > { %v7106_v54 = vpack.i.bf16 %v2855_v3, %v2853_v48  ;;  %v7586_v48 = vld [vmem:[#allocation2 + $0x50] sm:$0xff]  ;;  %v3798_v12 = vsel %vm1988_vm4, %v3766_v58, %v6874_v32  ;;  %v2866_v58 = vrot.slane %v2740_v56, 1 }
 0x419   : > { %7057 = vrot.lane.b32.xlu1 %v7061_v11, %s11895_s25  ;;  %v10077_v11 = vld [vmem:[#allocation2 + $0x1a0] sm:$0xff]  ;;  %v3767_v3 = vsel %vm713_vm3, %v7586_v48, %v6870_v7  ;;  %v2867_v7 = vrot.slane %v10087_v2, 1  ;;  %v2869_v48 = vrot.slane %v2742_v27, 1 }
 0x41b   : > { %7072 = vrot.lane.b32.xlu0 %v7071_v5, %s11895_s25  ;;  %v2870_v46 = vsel %vm1000_vm5, %v2867_v7, %v2869_v48 }
 0x41d   : > { %7067 = vrot.lane.b32.xlu1 %v7071_v5, %s11894_s24  ;;  %v6875_v5 = vunpack.i.h.bf16 %v9949_v50  ;;  %v6844_v50 = vunpack.i.l.bf16 %v9888_v59 }
 0x41f   : > { %7077 = vrot.lane.b32.xlu0 %v7076_v23, %s11896_s29  ;;  %v3799_v59 = vsel %vm1988_vm4, %v3767_v3, %v6875_v5  ;;  %v6854_v3 = vunpack.i.l.bf16 %v9894_v14 }
 0x420   : > { %v3831_v36 = vsel %vm2021_vm7, %v3799_v59, %v6820_v51  ;;  %v11941_v59 = vrot.slane %v10077_v11, 2 }
 0x421   : > { %7087 = vrot.lane.b32.xlu1 %v7076_v23, %s11765_s16 }
 0x423   : > { %7082 = vrot.lane.b32.xlu0 %v7081_v24, %s11897_s14 }
 0x425   : > { %7092 = vrot.lane.b32.xlu1 %v7081_v24, %s11763_s12 }
 0x427   : > { %7097 = vrot.lane.b32.xlu0 %v7076_v23, %s11761_s30  ;;  %v6839_v23 = vunpack.i.l.bf16 %v9849_v57  ;;  %v6819_v57 = vunpack.i.l.bf16 %v9795_v45 }
 0x429   : > { %7107 = vrot.lane.b32.xlu1 %v7106_v54, %s11896_s29  ;;  %v3768_v45 = vsel %vm713_vm3, %v7589_v33, %v6839_v23  ;;  %v2757_v23 = vld [vmem:[#allocation2 + $0x1a8] sm:$0x3]  ;;  %v3830_v29 = vsel %vm2021_vm7, %v3798_v12, %v6819_v57 }
 0x42a   : > { %v10114_v32 = vsel %vm1988_vm4, %v3768_v45, %v6844_v50  ;;  %v2737_v50 = vld [vmem:[#allocation2 + $0x108] sm:$0xff]  ;;  %v2739_v45 = vld [vmem:[#allocation2 + $0x118] sm:$0x3]  ;;  %v2985_v51 = vrot.slane %v2757_v23, 1  ;;  %v3862_v12 = vsel %vm2054_vm8, %v3830_v29, %v6849_v19  ;;  %v2990_v48 = vrot.slane %v2757_v23, 2 }
 0x42b   : > { %7102 = vrot.lane.b32.xlu0 %v7081_v24, %s11759_s15  ;;  %v2987_v24 = vrot.slane %v7585_v28, 2  ;;  %v3769_v28 = vsel %vm713_vm3, %v7588_v16, %v6840_v55  ;;  %v6855_v55 = vunpack.i.h.bf16 %v9894_v14  ;;  %v2947_v16 = vrot.slane %v10087_v2, 2 }
 0x42c   : > { %v10065_v39 = vpop.permute.xlu0 %6902  ;;  %v10067_v44 = vpop.permute.xlu1 %6897  ;;  %v10117_v5 = vsel %vm1988_vm4, %v3769_v28, %v6845_v20  ;;  %v7151_v20 = vpack.i.bf16 %v10107_v47, %v2737_v50  ;;  %v2949_v28 = vrot.slane %v2742_v27, 2  ;;  %v11940_v14 = vrot.slane %v10077_v11, 1 }
 0x42d   : > { %7112 = vrot.lane.b32.xlu1 %v7111_v38, %s11897_s14  ;;  %v2861_v23 = vrot.slane %v2737_v50, 1 }
 0x42e   : > { %v10136_v57 = vsel %vm1000_vm5, %v2982_v22, %v11940_v14  ;;  %v2862_v22 = vrot.slane %v10107_v47, 1  ;;  %v2864_v14 = vrot.slane %v2739_v45, 1 }
 0x42f   : > { %7127 = vrot.lane.b32.xlu0 %v7106_v54, %s11765_s16 }
 0x430   : > { %v10071_v18 = vpop.permute.xlu0 %6912  ;;  %v10073_v41 = vpop.permute.xlu1 %6907 }
 0x431   : > { %7117 = vrot.lane.b32.xlu1 %v7106_v54, %s11761_s30  ;;  %v7141_v54 = vpack.i.bf16 %v10087_v2, %v2740_v56  ;;  %v3863_v2 = vsel %vm2054_vm8, %v3831_v36, %v6850_v35  ;;  %v11943_v36 = vmov %v11941_v59 }
 0x432   : > { %v10160_v25 = vsel %vm1081_vm6, %v11943_v36, %v2990_v48  ;;  %v2942_v48 = vrot.slane %v10107_v47, 2  ;;  %v6915_v36 = vunpack.i.h.bf16 %v10071_v18 }
 0x433   : > { %7132 = vrot.lane.b32.xlu0 %v7111_v38, %s11763_s12 }
 0x434   : > { %v10089_v40 = vpop.permute.xlu0 %6917  ;;  %v10091_v6 = vpop.permute.xlu1 %6927 }
 0x435   : > { %7122 = vrot.lane.b32.xlu1 %v7111_v38, %s11759_s15  ;;  %v2868_v38 = vsel %vm1000_vm5, %v2866_v58, %v2867_v7  ;;  %v10147_v7 = vsel %vm1081_vm6, %v2987_v24, %v11941_v59  ;;  %v2946_v58 = vrot.slane %v2740_v56, 2  ;;  %v2950_v56 = vsel %vm1081_vm6, %v2947_v16, %v2949_v28 }
 0x436   : > { %v7156_v35 = vpack.i.bf16 %v2870_v46, %v2868_v38  ;;  %v3894_v46 = vsel %vm2087_vm9, %v3862_v12, %v6854_v3  ;;  %v3895_v38 = vsel %vm2087_vm9, %v3863_v2, %v6855_v55  ;;  %v2865_v28 = vsel %vm1000_vm5, %v2862_v22, %v2864_v14 }
 0x437   : > { %7142 = vrot.lane.b32.xlu0 %v7141_v54, %s11894_s24  ;;  %v2948_v24 = vsel %vm1081_vm6, %v2946_v58, %v2947_v16  ;;  %v2944_v58 = vrot.slane %v2739_v45, 2  ;;  %v2863_v16 = vsel %vm1000_vm5, %v2861_v23, %v2862_v22  ;;  %v6914_v3 = vunpack.i.l.bf16 %v10071_v18 }
 0x438   : > { %v10110_v31 = vpop.permute.xlu0 %6922  ;;  %v7161_v12 = vpack.i.bf16 %v2950_v56, %v2948_v24  ;;  %v6910_v55 = vunpack.i.h.bf16 %v10073_v41  ;;  %v7186_v47 = vpack.i.bf16 %v2865_v28, %v2863_v16  ;;  %v6905_v14 = vunpack.i.h.bf16 %v10065_v39 }
 0x439   : > { %v10122_v33 = vpop.permute.xlu1 %6932  ;;  %7137 = vrot.lane.b32.xlu1 %v7141_v54, %s11895_s25  ;;  %v11942_v54 = vrot.slane %v10077_v11, 1  ;;  %v2945_v22 = vsel %vm1081_vm6, %v2942_v48, %v2944_v58  ;;  %v6904_v18 = vunpack.i.l.bf16 %v10065_v39  ;;  %v3833_v23 = vsel %vm2021_vm7, %v10117_v5, %v6915_v36 }
 0x43a   : > { %v3927_v28 = vsel %vm2120_vm10, %v3895_v38, %v6910_v55  ;;  %v6920_v4 = vunpack.i.h.bf16 %v10089_v40  ;;  %v6919_v53 = vunpack.i.l.bf16 %v10089_v40 }
 0x43b   : > { %7152 = vrot.lane.b32.xlu0 %v7151_v20, %s11895_s25  ;;  %v10153_v19 = vsel %vm1000_vm5, %v11942_v54, %v2985_v51  ;;  %v2941_v54 = vrot.slane %v2737_v50, 2 }
 0x43c   : > { %v10131_v60 = vpop.permute.xlu0 %6937 }
 0x43d   : > { %v10142_v27 = vpop.permute.xlu1 %6947  ;;  %7147 = vrot.lane.b32.xlu1 %v7151_v20, %s11894_s24  ;;  %v6909_v20 = vunpack.i.l.bf16 %v10073_v41  ;;  %v2943_v45 = vsel %vm1081_vm6, %v2941_v54, %v2942_v48  ;;  %v3832_v41 = vsel %vm2021_vm7, %v10114_v32, %v6914_v3  ;;  %v6940_v48 = vunpack.i.h.bf16 %v10131_v60 }
 0x43e   : > { %v6939_v58 = vunpack.i.l.bf16 %v10131_v60 }
 0x43f   : > { %7157 = vrot.lane.b32.xlu0 %v7156_v35, %s11896_s29  ;;  %v3926_v16 = vsel %vm2120_vm10, %v3894_v46, %v6909_v20 }
 0x440   : > { %v10164_v59 = vpop.permute.xlu0 %6942 }
 0x441   : > { %v10172_v11 = vpop.permute.xlu1 %6952  ;;  %7167 = vrot.lane.b32.xlu1 %v7156_v35, %s11765_s16  ;;  %v6945_v39 = vunpack.i.h.bf16 %v10164_v59  ;;  %v6944_v32 = vunpack.i.l.bf16 %v10164_v59 }
 0x443   : > { %7162 = vrot.lane.b32.xlu0 %v7161_v12, %s11897_s14 }
 0x444   : > { %v6968_v2 = vpop.permute.xlu0 %6967 }
 0x445   : > { %v6958_v50 = vpop.permute.xlu1 %6957  ;;  %v6970_v24 = vunpack.i.h.bf16 %v6968_v2  ;;  %v6969_v56 = vunpack.i.l.bf16 %v6968_v2  ;;  %7172 = vrot.lane.b32.xlu1 %v7161_v12, %s11763_s12 }
 0x446   : > { %v6960_v51 = vunpack.i.h.bf16 %v6958_v50  ;;  %v6959_v29 = vunpack.i.l.bf16 %v6958_v50 }
 0x447   : > { %7177 = vrot.lane.b32.xlu0 %v7156_v35, %s11761_s30  ;;  %v3864_v46 = vsel %vm2054_vm8, %v3832_v41, %v6969_v56  ;;  %v3865_v38 = vsel %vm2054_vm8, %v3833_v23, %v6970_v24 }
 0x448   : > { %v6973_v54 = vpop.permute.xlu0 %6972  ;;  %v3958_v60 = vsel %vm2153_vm11, %v3926_v16, %v6959_v29  ;;  %v3959_v2 = vsel %vm2153_vm11, %v3927_v28, %v6960_v51  ;;  %v2746_v16 = vld [vmem:[#allocation2 + $0x150] sm:$0xff] }
 0x449   : > { %v6975_v5 = vunpack.i.h.bf16 %v6973_v54  ;;  %v6974_v36 = vunpack.i.l.bf16 %v6973_v54  ;;  %v6963_v3 = vpop.permute.xlu1 %6962  ;;  %7187 = vrot.lane.b32.xlu1 %v7186_v47, %s11896_s29 }
 0x44a   : > { %v6965_v55 = vunpack.i.h.bf16 %v6963_v3  ;;  %v6964_v20 = vunpack.i.l.bf16 %v6963_v3 }
 0x44b   : > { %v3896_v50 = vsel %vm2087_vm9, %v3864_v46, %v6974_v36  ;;  %v3897_v35 = vsel %vm2087_vm9, %v3865_v38, %v6975_v5  ;;  %7182 = vrot.lane.b32.xlu0 %v7161_v12, %s11759_s15  ;;  %v2747_v12 = vld [vmem:[#allocation2 + $0x158] sm:$0xff]  ;;  %v2745_v38 = vld [vmem:[#allocation2 + $0x148] sm:$0x3] }
 0x44c   : > { %v3928_v30 = vsel %vm2120_vm10, %v3896_v50, %v6904_v18  ;;  %v3929_v59 = vsel %vm2120_vm10, %v3897_v35, %v6905_v14  ;;  %v3990_v54 = vsel %vm2186_vm12, %v3958_v60, %v6964_v20  ;;  %v3991_v56 = vsel %vm2186_vm12, %v3959_v2, %v6965_v55 }
 0x44d   : > { %v4019_v24 = vpack.c.bf16 %v3991_v56, %v3990_v54  ;;  %v3960_v29 = vsel %vm2153_vm11, %v3928_v30, %v6939_v58  ;;  %v3961_v51 = vsel %vm2153_vm11, %v3929_v59, %v6940_v48  ;;  %v7191_v18 = vpack.i.bf16 %v2945_v22, %v2943_v45  ;;  %v2748_v30 = vld [vmem:[#allocation2 + $0x160] sm:$0x3]  ;;  %v2743_v22 = vld [vmem:[#allocation2 + $0x138] sm:$0xff] }
 0x44e   : > { %v3992_v41 = vsel %vm2186_vm12, %v3960_v29, %v6944_v32  ;;  %v3993_v23 = vsel %vm2186_vm12, %v3961_v51, %v6945_v39  ;;  %v7221_v28 = vpack.i.bf16 %v2747_v12, %v2746_v16  ;;  %v2744_v48 = vld [vmem:[#allocation2 + $0x140] sm:$0xff]  ;;  %v2877_v58 = vrot.slane %v2747_v12, 1 }
 0x44f   : > { %5909 = vmatmul.mubr.msk.bf16.gmra.mxu0 %vm2262_vm13, %v4019_v24  ;;  %v4020_v14 = vpack.c.bf16 %v3993_v23, %v3992_v41  ;;  %7192 = vrot.lane.b32.xlu1 %v7191_v18, %s11897_s14  ;;  %v2879_v45 = vrot.slane %v2748_v30, 1  ;;  %v2876_v39 = vrot.slane %v2746_v16, 1  ;;  %v7231_v32 = vpack.i.bf16 %v2744_v48, %v2743_v22 }
 0x450   : > { %7207 = vrot.lane.b32.xlu0 %v7186_v47, %s11765_s16  ;;  %v2957_v3 = vrot.slane %v2747_v12, 2  ;;  %v2959_v46 = vrot.slane %v2748_v30, 2  ;;  %v2956_v55 = vrot.slane %v2746_v16, 2  ;;  %v2872_v2 = vrot.slane %v2744_v48, 1 }
 0x451   : > { %5912 = vmatprep.mubr.msk.bf16.mxu0 %vm2262_vm13, %v4020_v14  ;;  %v2878_v5 = vsel %vm1000_vm5, %v2876_v39, %v2877_v58  ;;  %v2880_v36 = vsel %vm1000_vm5, %v2877_v58, %v2879_v45  ;;  %v2874_v50 = vrot.slane %v2745_v38, 1  ;;  %v2871_v35 = vrot.slane %v2743_v22, 1  ;;  %v2753_v45 = vld [vmem:[#allocation2 + $0x188] sm:$0xff]  ;;  %v10257_v39 = vld [vmem:[#allocation2 + $0x170] sm:$0xff] }
 0x452   : > { %v2958_v20 = vsel %vm1081_vm6, %v2956_v55, %v2957_v3  ;;  %v2960_v60 = vsel %vm1081_vm6, %v2957_v3, %v2959_v46  ;;  %v2952_v51 = vrot.slane %v2744_v48, 2  ;;  %v2954_v41 = vrot.slane %v2745_v38, 2  ;;  %v2749_v46 = vld [vmem:[#allocation2 + $0x168] sm:$0xff] }
 0x453   : > { %7197 = vrot.lane.b32.xlu1 %v7186_v47, %s11761_s30  ;;  %v7236_v47 = vpack.i.bf16 %v2880_v36, %v2878_v5  ;;  %v7246_v56 = vpack.i.bf16 %v2960_v60, %v2958_v20  ;;  %v2873_v24 = vsel %vm1000_vm5, %v2871_v35, %v2872_v2  ;;  %v2875_v29 = vsel %vm1000_vm5, %v2872_v2, %v2874_v50  ;;  %v2752_v36 = vld [vmem:[#allocation2 + $0x180] sm:$0xff] }
 0x454   : > { %7212 = vrot.lane.b32.xlu0 %v7191_v18, %s11763_s12  ;;  %v2951_v23 = vrot.slane %v2743_v22, 2  ;;  %v2955_v12 = vsel %vm1081_vm6, %v2952_v51, %v2954_v41  ;;  %v2754_v22 = vld [vmem:[#allocation2 + $0x190] sm:$0x3]  ;;  %v6900_v5 = vunpack.i.h.bf16 %v10067_v44  ;;  %v7301_v3 = vpack.i.bf16 %v2753_v45, %v2752_v36 }
 0x455   : > { %v2970_v38 = vrot.slane %v2753_v45, 1  ;;  %v2972_v55 = vrot.slane %v2754_v22, 1  ;;  %v6899_v20 = vunpack.i.l.bf16 %v10067_v44  ;;  %v6949_v60 = vunpack.i.l.bf16 %v10142_v27 }
 0x456   : > { %v2953_v14 = vsel %vm1081_vm6, %v2951_v23, %v2952_v51  ;;  %v2882_v50 = vrot.slane %v10257_v39, 1  ;;  %v6955_v51 = vunpack.i.h.bf16 %v10172_v11  ;;  %v7311_v44 = vpack.i.bf16 %v10257_v39, %v2749_v46 }
 0x457   : > { %7202 = vrot.lane.b32.xlu1 %v7191_v18, %s11759_s15  ;;  %v7266_v18 = vpack.i.bf16 %v2875_v29, %v2873_v24  ;;  %v6954_v24 = vunpack.i.l.bf16 %v10172_v11  ;;  %v2969_v29 = vrot.slane %v2752_v36, 1  ;;  %v2881_v41 = vrot.slane %v2749_v46, 1 }
 0x458   : > { %7222 = vrot.lane.b32.xlu0 %v7221_v28, %s11894_s24 }
 0x459   : > { %v2883_v9 = vsel %vm1000_vm5, %v2881_v41, %v2882_v50 }
 0x45b   : > { %7217 = vrot.lane.b32.xlu1 %v7221_v28, %s11895_s25  ;;  %v7271_v28 = vpack.i.bf16 %v2955_v12, %v2953_v14  ;;  %v2973_v14 = vsel %vm1000_vm5, %v2970_v38, %v2972_v55  ;;  %v2975_v12 = vrot.slane %v2753_v45, 2  ;;  %v2974_v45 = vrot.slane %v2752_v36, 2 }
 0x45c   : > { %7232 = vrot.lane.b32.xlu0 %v7231_v32, %s11895_s25  ;;  %v2962_v55 = vrot.slane %v10257_v39, 2 }
 0x45f   : > { %7227 = vrot.lane.b32.xlu1 %v7231_v32, %s11894_s24  ;;  %v10259_v32 = vld [vmem:[#allocation2 + $0x178] sm:$0x3] }
 0x460   : > { %7237 = vrot.lane.b32.xlu0 %v7236_v47, %s11896_s29  ;;  %v10233_v59 = vpop.permute.xlu0 %6982  ;;  %v10235_v54 = vpop.permute.xlu1 %6977  ;;  %v2884_v35 = vrot.slane %v10259_v32, 1 }
 0x462   : > { %v2885_v11 = vsel %vm1000_vm5, %v2882_v50, %v2884_v35  ;;  %v6929_v35 = vunpack.i.l.bf16 %v10091_v6 }
 0x463   : > { %7242 = vrot.lane.b32.xlu1 %v7236_v47, %s11765_s16 }
 0x464   : > { %7252 = vrot.lane.b32.xlu0 %v7236_v47, %s11761_s30 }
 0x466   : > { %v10243_v30 = vpop.permute.xlu0 %6992  ;;  %v10245_v16 = vpop.permute.xlu1 %6987 }
 0x467   : > { %7247 = vrot.lane.b32.xlu1 %v7246_v56, %s11763_s12 }
 0x468   : > { %7257 = vrot.lane.b32.xlu0 %v7246_v56, %s11759_s15 }
 0x46b   : > { %7267 = vrot.lane.b32.xlu1 %v7266_v18, %s11896_s29 }
 0x46c   : > { %7262 = vrot.lane.b32.xlu0 %v7246_v56, %s11897_s14  ;;  %v6950_v56 = vunpack.i.h.bf16 %v10142_v27  ;;  %v2977_v27 = vrot.slane %v2754_v22, 2 }
 0x46e   : > { %v3771_v63 = vsel %vm713_vm3, %v7591_v61, %v6950_v56  ;;  %v2976_v61 = vsel %vm1081_vm6, %v2974_v45, %v2975_v12  ;;  %v2978_v50 = vsel %vm1081_vm6, %v2975_v12, %v2977_v27  ;;  %v2961_v56 = vrot.slane %v2749_v46, 2 }
 0x46f   : > { %7272 = vrot.lane.b32.xlu1 %v7271_v28, %s11897_s14  ;;  %v3803_v22 = vsel %vm1988_vm4, %v3771_v63, %v6955_v51  ;;  %v10301_v63 = vpack.i.bf16 %v2885_v11, %v2883_v9  ;;  %v7593_v51 = vld [vmem:[#allocation2 + $0x90] sm:$0xff]  ;;  %v6935_v46 = vunpack.i.h.bf16 %v10122_v33  ;;  %v6995_v27 = vunpack.i.h.bf16 %v10243_v30 }
 0x470   : > { %7287 = vrot.lane.b32.xlu0 %v7266_v18, %s11765_s16  ;;  %v10251_v48 = vpop.permute.xlu0 %6997  ;;  %v10253_v58 = vpop.permute.xlu1 %7007  ;;  %v3772_v41 = vsel %vm713_vm3, %v7593_v51, %v6919_v53  ;;  %v2963_v9 = vsel %vm1081_vm6, %v2961_v56, %v2962_v55  ;;  %v6989_v11 = vunpack.i.l.bf16 %v10245_v16 }
 0x473   : > { %7277 = vrot.lane.b32.xlu1 %v7266_v18, %s11761_s30  ;;  %v2971_v18 = vsel %vm1000_vm5, %v2969_v29, %v2970_v38 }
 0x474   : > { %7292 = vrot.lane.b32.xlu0 %v7271_v28, %s11763_s12 }
 0x475   : > { %v10262_v47 = vpop.permute.xlu0 %7002  ;;  %v10266_v2 = vpop.permute.xlu1 %7012 }
 0x477   : > { %7282 = vrot.lane.b32.xlu1 %v7271_v28, %s11759_s15  ;;  %v3770_v28 = vsel %vm713_vm3, %v7590_v1, %v6949_v60  ;;  %v7326_v1 = vpack.i.bf16 %v2973_v14, %v2971_v18  ;;  %v6930_v60 = vunpack.i.h.bf16 %v10091_v6  ;;  %v6924_v18 = vunpack.i.l.bf16 %v10110_v31 }
 0x478   : > { %7302 = vrot.lane.b32.xlu0 %v7301_v3, %s11894_s24  ;;  %v3802_v29 = vsel %vm1988_vm4, %v3770_v28, %v6954_v24  ;;  %v7592_v24 = vld [vmem:[#allocation2 + $0x98] sm:$0xff]  ;;  %v3835_v14 = vsel %vm2021_vm7, %v3803_v22, %v6900_v5  ;;  %v6925_v6 = vunpack.i.h.bf16 %v10110_v31 }
 0x479   : > { %v10276_v23 = vpop.permute.xlu0 %7017  ;;  %v3834_v36 = vsel %vm2021_vm7, %v3802_v29, %v6899_v20  ;;  %v3773_v39 = vsel %vm713_vm3, %v7592_v24, %v6920_v4  ;;  %v6994_v4 = vunpack.i.l.bf16 %v10243_v30  ;;  %v3867_v31 = vsel %vm2054_vm8, %v3835_v14, %v6930_v60 }
 0x47a   : > { %v3866_v20 = vsel %vm2054_vm8, %v3834_v36, %v6929_v35  ;;  %v3804_v28 = vsel %vm1988_vm4, %v3772_v41, %v6924_v18  ;;  %v3805_v22 = vsel %vm1988_vm4, %v3773_v39, %v6925_v6  ;;  %v6985_v60 = vunpack.i.h.bf16 %v10233_v59 }
 0x47b   : > { %7297 = vrot.lane.b32.xlu1 %v7301_v3, %s11895_s25  ;;  %v10290_v38 = vpop.permute.xlu1 %7027  ;;  %v2964_v3 = vrot.slane %v10259_v32, 2  ;;  %v7321_v32 = vpack.i.bf16 %v2978_v50, %v2976_v61  ;;  %v6984_v61 = vunpack.i.l.bf16 %v10233_v59  ;;  %v3836_v50 = vsel %vm2021_vm7, %v3804_v28, %v6994_v4 }
 0x47c   : > { %7312 = vrot.lane.b32.xlu0 %v7311_v44, %s11895_s25  ;;  %v3837_v36 = vsel %vm2021_vm7, %v3805_v22, %v6995_v27  ;;  %v7020_v14 = vunpack.i.h.bf16 %v10276_v23 }
 0x47d   : > { %v10294_v40 = vpop.permute.xlu0 %7022  ;;  %v2965_v5 = vsel %vm1081_vm6, %v2962_v55, %v2964_v3  ;;  %v6990_v55 = vunpack.i.h.bf16 %v10245_v16 }
 0x47e   : > { %v7361_v30 = vpack.i.bf16 %v2965_v5, %v2963_v9  ;;  %v7025_v4 = vunpack.i.h.bf16 %v10294_v40  ;;  %v7024_v27 = vunpack.i.l.bf16 %v10294_v40 }
 0x47f   : > { %7307 = vrot.lane.b32.xlu1 %v7311_v44, %s11894_s24  ;;  %v10314_v53 = vpop.permute.xlu1 %7032  ;;  %v6934_v44 = vunpack.i.l.bf16 %v10122_v33 }
 0x480   : > { %7327 = vrot.lane.b32.xlu0 %v7326_v1, %s11761_s30 }
 0x481   : > { %v7048_v12 = vpop.permute.xlu0 %7047  ;;  %v3898_v33 = vsel %vm2087_vm9, %v3866_v20, %v6934_v44 }
 0x482   : > { %v7050_v29 = vunpack.i.h.bf16 %v7048_v12  ;;  %v7049_v45 = vunpack.i.l.bf16 %v7048_v12  ;;  %v3930_v16 = vsel %vm2120_vm10, %v3898_v33, %v6989_v11 }
 0x483   : > { %7317 = vrot.lane.b32.xlu1 %v7326_v1, %s11765_s16  ;;  %v3899_v1 = vsel %vm2087_vm9, %v3867_v31, %v6935_v46  ;;  %v7038_v3 = vpop.permute.xlu1 %7037  ;;  %v7019_v46 = vunpack.i.l.bf16 %v10276_v23 }
 0x484   : > { %7357 = vrot.lane.b32.xlu0 %v10301_v63, %s11765_s16  ;;  %v7039_v56 = vunpack.i.l.bf16 %v7038_v3  ;;  %v3868_v51 = vsel %vm2054_vm8, %v3836_v50, %v7049_v45  ;;  %v3869_v41 = vsel %vm2054_vm8, %v3837_v36, %v7050_v29  ;;  %v7040_v18 = vunpack.i.h.bf16 %v7038_v3 }
 0x485   : > { %v7053_v35 = vpop.permute.xlu0 %7052  ;;  %v3931_v59 = vsel %vm2120_vm10, %v3899_v1, %v6990_v55 }
 0x486   : > { %v7055_v24 = vunpack.i.h.bf16 %v7053_v35  ;;  %v7054_v39 = vunpack.i.l.bf16 %v7053_v35  ;;  %v3962_v31 = vsel %vm2153_vm11, %v3930_v16, %v7039_v56  ;;  %v3963_v29 = vsel %vm2153_vm11, %v3931_v59, %v7040_v18  ;;  %v7595_v59 = vld [vmem:[#allocation2 + $0xa8] sm:$0xff] }
 0x487   : > { %7322 = vrot.lane.b32.xlu1 %v7321_v32, %s11763_s12  ;;  %v7043_v5 = vpop.permute.xlu1 %7042  ;;  %v7030_v56 = vunpack.i.h.bf16 %v10290_v38 }
 0x488   : > { %7362 = vrot.lane.b32.xlu0 %v7361_v30, %s11763_s12  ;;  %v3900_v6 = vsel %vm2087_vm9, %v3868_v51, %v7054_v39  ;;  %v3901_v9 = vsel %vm2087_vm9, %v3869_v41, %v7055_v24  ;;  %v7045_v28 = vunpack.i.h.bf16 %v7043_v5  ;;  %v7044_v11 = vunpack.i.l.bf16 %v7043_v5  ;;  %v7594_v41 = vld [vmem:[#allocation2 + $0xb0] sm:$0xff] }
 0x489   : > { %v3932_v20 = vsel %vm2120_vm10, %v3900_v6, %v6984_v61  ;;  %v3933_v12 = vsel %vm2120_vm10, %v3901_v9, %v6985_v60  ;;  %v10346_v44 = vpop.permute.xlu0 %7062  ;;  %v7029_v24 = vunpack.i.l.bf16 %v10290_v38  ;;  %v7034_v39 = vunpack.i.l.bf16 %v10314_v53 }
 0x48a   : > { %v3964_v23 = vsel %vm2153_vm11, %v3932_v20, %v7019_v46  ;;  %v3965_v45 = vsel %vm2153_vm11, %v3933_v12, %v7020_v14  ;;  %v3994_v22 = vsel %vm2186_vm12, %v3962_v31, %v7044_v11  ;;  %v3995_v55 = vsel %vm2186_vm12, %v3963_v29, %v7045_v28  ;;  %v7596_v28 = vld [vmem:[#allocation2 + $0xc8] sm:$0xff]  ;;  %v7597_v29 = vld [vmem:[#allocation2 + $0xc0] sm:$0xff] }
 0x48b   : > { %7332 = vrot.lane.b32.xlu1 %v10301_v63, %s11896_s29  ;;  %v3996_v40 = vsel %vm2186_vm12, %v3964_v23, %v7024_v27  ;;  %v3997_v33 = vsel %vm2186_vm12, %v3965_v45, %v7025_v4  ;;  %v10360_v60 = vpop.permute.xlu1 %7057  ;;  %v4021_v61 = vpack.c.bf16 %v3995_v55, %v3994_v22  ;;  %v3775_v18 = vsel %vm713_vm3, %v7594_v41, %v7030_v56 }
 0x48c   : > { %7367 = vrot.lane.b32.xlu0 %v7321_v32, %s11759_s15  ;;  %v4022_v1 = vpack.c.bf16 %v3997_v33, %v3996_v40  ;;  %v3774_v14 = vsel %vm713_vm3, %v7595_v59, %v7029_v24  ;;  %v11944_v38 = vpack.i.bf16 %v10153_v19, %v10136_v57  ;;  %v6979_v9 = vunpack.i.l.bf16 %v10235_v54 }
 0x48d   : > { %v10362_v50 = vpop.permute.xlu0 %7072  ;;  %5913 = vmatmul.mubr.msk.bf16.gmra.mxu0 %vm2262_vm13, %v4021_v61  ;;  %v7000_v46 = vunpack.i.h.bf16 %v10251_v48  ;;  %v6999_v4 = vunpack.i.l.bf16 %v10251_v48  ;;  %v11945_v19 = vpack.i.bf16 %v10160_v25, %v10147_v7  ;;  %v7010_v27 = vunpack.i.h.bf16 %v10253_v58 }
 0x48e   : > { %5916 = vmatprep.mubr.msk.bf16.mxu0 %vm2262_vm13, %v4022_v1  ;;  %v7005_v31 = vunpack.i.h.bf16 %v10262_v47  ;;  %v7004_v48 = vunpack.i.l.bf16 %v10262_v47  ;;  %v7075_v25 = vunpack.i.h.bf16 %v10362_v50  ;;  %v7074_v7 = vunpack.i.l.bf16 %v10362_v50 }
 0x48f   : > { %7337 = vrot.lane.b32.xlu1 %v10301_v63, %s11761_s30  ;;  %v10368_v32 = vpop.permute.xlu1 %7067  ;;  %v7035_v63 = vunpack.i.h.bf16 %v10314_v53  ;;  %v6980_v53 = vunpack.i.h.bf16 %v10235_v54  ;;  %v7009_v54 = vunpack.i.l.bf16 %v10253_v58  ;;  %v3777_v11 = vsel %vm713_vm3, %v7596_v28, %v7000_v46 }
 0x490   : > { %v3776_v23 = vsel %vm713_vm3, %v7597_v29, %v6999_v4  ;;  %v7015_v40 = vunpack.i.h.bf16 %v10266_v2  ;;  %v7014_v47 = vunpack.i.l.bf16 %v10266_v2  ;;  %v3809_v56 = vsel %vm1988_vm4, %v3777_v11, %v7005_v31 }
 0x491   : > { %v10370_v3 = vpop.permute.xlu0 %7077  ;;  %v3807_v6 = vsel %vm1988_vm4, %v3775_v18, %v7035_v63  ;;  %v3808_v1 = vsel %vm1988_vm4, %v3776_v23, %v7004_v48  ;;  %v7070_v24 = vunpack.i.h.bf16 %v10368_v32  ;;  %v7069_v63 = vunpack.i.l.bf16 %v10368_v32 }
 0x492   : > { %v3839_v57 = vsel %vm2021_vm7, %v3807_v6, %v6980_v53  ;;  %v7065_v50 = vunpack.i.h.bf16 %v10346_v44 }
 0x493   : > { %7342 = vrot.lane.b32.xlu1 %v7361_v30, %s11759_s15  ;;  %v10373_v35 = vpop.permute.xlu1 %7087  ;;  %v3871_v58 = vsel %vm2054_vm8, %v3839_v57, %v7010_v27 }
 0x494   : > { %v3903_v18 = vsel %vm2087_vm9, %v3871_v58, %v7015_v40 }
 0x495   : > { %v10375_v36 = vpop.permute.xlu0 %7082  ;;  %v3935_v4 = vsel %vm2120_vm10, %v3903_v18, %v7070_v24 }
 0x497   : > { %7347 = vrot.lane.b32.xlu1 %v7361_v30, %s11897_s14  ;;  %v10382_v16 = vpop.permute.xlu1 %7092  ;;  %v3806_v30 = vsel %vm1988_vm4, %v3774_v14, %v7034_v39  ;;  %v7064_v39 = vunpack.i.l.bf16 %v10346_v44  ;;  %v3840_v14 = vsel %vm2021_vm7, %v3808_v1, %v7074_v7 }
 0x498   : > { %v3838_v5 = vsel %vm2021_vm7, %v3806_v30, %v6979_v9 }
 0x499   : > { %v10384_v51 = vpop.permute.xlu0 %7097  ;;  %v3870_v55 = vsel %vm2054_vm8, %v3838_v5, %v7009_v54 }
 0x49a   : > { %v3902_v41 = vsel %vm2087_vm9, %v3870_v55, %v7014_v47  ;;  %v7099_v27 = vunpack.i.l.bf16 %v10384_v51 }
 0x49b   : > { %7352 = vrot.lane.b32.xlu1 %v11944_v38, %s11761_s30  ;;  %v10398_v20 = vpop.permute.xlu1 %7107  ;;  %v3841_v38 = vsel %vm2021_vm7, %v3809_v56, %v7075_v25  ;;  %v3934_v44 = vsel %vm2120_vm10, %v3902_v41, %v7069_v63 }
 0x49c   : > { %v7110_v41 = vunpack.i.h.bf16 %v10398_v20  ;;  %v7109_v18 = vunpack.i.l.bf16 %v10398_v20 }
 0x49d   : > { %v10400_v12 = vpop.permute.xlu0 %7102 }
 0x49e   : > { %v7105_v11 = vunpack.i.h.bf16 %v10400_v12  ;;  %v7104_v29 = vunpack.i.l.bf16 %v10400_v12  ;;  %v3778_v20 = vsel %vm713_vm3, %v10041_v52, %v7109_v18 }
 0x49f   : > { %7372 = vrot.lane.b32.xlu1 %v11945_v19, %s11759_s15  ;;  %v10414_v45 = vpop.permute.xlu1 %7112  ;;  %v7100_v19 = vunpack.i.h.bf16 %v10384_v51 }
 0x4a1   : > { %v7128_v22 = vpop.permute.xlu0 %7127 }
 0x4a2   : > { %v7130_v33 = vunpack.i.h.bf16 %v7128_v22  ;;  %v7129_v61 = vunpack.i.l.bf16 %v7128_v22 }
 0x4a3   : > { %v7118_v59 = vpop.permute.xlu1 %7117 }
 0x4a4   : > { %v3872_v53 = vsel %vm2054_vm8, %v3840_v14, %v7129_v61  ;;  %v3873_v32 = vsel %vm2054_vm8, %v3841_v38, %v7130_v33  ;;  %v7120_v9 = vunpack.i.h.bf16 %v7118_v59  ;;  %v7119_v46 = vunpack.i.l.bf16 %v7118_v59  ;;  %v10470_v59 = vld [vmem:[#allocation2] sm:$0xff] }
 0x4a5   : > { %v7133_v2 = vpop.permute.xlu0 %7132  ;;  %v7114_v14 = vunpack.i.l.bf16 %v10414_v45 }
 0x4a6   : > { %v7135_v30 = vunpack.i.h.bf16 %v7133_v2  ;;  %v7134_v6 = vunpack.i.l.bf16 %v7133_v2  ;;  %v3966_v25 = vsel %vm2153_vm11, %v3934_v44, %v7119_v46  ;;  %v3967_v7 = vsel %vm2153_vm11, %v3935_v4, %v7120_v9  ;;  %v10486_v44 = vld [vmem:[#allocation2 + $0x8] sm:$0xff] }
 0x4a7   : > { %v7123_v48 = vpop.permute.xlu1 %7122  ;;  %v7115_v2 = vunpack.i.h.bf16 %v10414_v45  ;;  %v3810_v9 = vsel %vm1988_vm4, %v3778_v20, %v7114_v14  ;;  %v4540_v45 = vrot.slane %v10470_v59, 3  ;;  %v7060_v4 = vunpack.i.h.bf16 %v10360_v60 }
 0x4a8   : > { %v3904_v5 = vsel %vm2087_vm9, %v3872_v53, %v7134_v6  ;;  %v3905_v57 = vsel %vm2087_vm9, %v3873_v32, %v7135_v30  ;;  %v7125_v23 = vunpack.i.h.bf16 %v7123_v48  ;;  %v7124_v22 = vunpack.i.l.bf16 %v7123_v48 }
 0x4a9   : > { %v3936_v54 = vsel %vm2120_vm10, %v3904_v5, %v7064_v39  ;;  %v3937_v31 = vsel %vm2120_vm10, %v3905_v57, %v7065_v50  ;;  %v10442_v28 = vpop.permute.xlu0 %7142  ;;  %v4472_v6 = vrot.slane %v10470_v59, 1  ;;  %v4506_v53 = vrot.slane %v10470_v59, 2 }
 0x4aa   : > { %v3968_v55 = vsel %vm2153_vm11, %v3936_v54, %v7099_v27  ;;  %v3969_v51 = vsel %vm2153_vm11, %v3937_v31, %v7100_v19  ;;  %v3998_v58 = vsel %vm2186_vm12, %v3966_v25, %v7124_v22  ;;  %v3999_v40 = vsel %vm2186_vm12, %v3967_v7, %v7125_v23  ;;  %v7598_v22 = vld [vmem:[#allocation2 + $0xf8] sm:$0xff]  ;;  %v7599_v7 = vld [vmem:[#allocation2 + $0xf0] sm:$0xff] }
 0x4ab   : > { %v4000_v47 = vsel %vm2186_vm12, %v3968_v55, %v7104_v29  ;;  %v4001_v33 = vsel %vm2186_vm12, %v3969_v51, %v7105_v11  ;;  %v4023_v61 = vpack.c.bf16 %v3999_v40, %v3998_v58  ;;  %v10454_v12 = vpop.permute.xlu1 %7137  ;;  %v3779_v32 = vsel %vm713_vm3, %v10037_v13, %v7110_v41 }
 0x4ac   : > { %v4024_v56 = vpack.c.bf16 %v4001_v33, %v4000_v47  ;;  %v3811_v46 = vsel %vm1988_vm4, %v3779_v32, %v7115_v2  ;;  %v7059_v5 = vunpack.i.l.bf16 %v10360_v60  ;;  %v7080_v57 = vunpack.i.h.bf16 %v10370_v3 }
 0x4ad   : > { %v10456_v1 = vpop.permute.xlu0 %7152  ;;  %5917 = vmatmul.mubr.msk.bf16.gmra.mxu0 %vm2262_vm13, %v4023_v61  ;;  %v7079_v19 = vunpack.i.l.bf16 %v10370_v3  ;;  %v4883_v52 = vsel %vm545_vm0, %v4472_v6, %v4506_v53  ;;  %v3843_v31 = vsel %vm2021_vm7, %v3811_v46, %v7060_v4  ;;  %v4625_v48 = vrot.slane %v10486_v44, 5 }
 0x4ae   : > { %5920 = vmatprep.mubr.msk.bf16.mxu0 %vm2262_vm13, %v4024_v56  ;;  %v3842_v54 = vsel %vm2021_vm7, %v3810_v9, %v7059_v5  ;;  %v4849_v60 = vrot.slane %v10470_v59, 4  ;;  %v7090_v11 = vunpack.i.h.bf16 %v10373_v35  ;;  %v7089_v3 = vunpack.i.l.bf16 %v10373_v35 }
 0x4af   : > { %v10460_v24 = vpop.permute.xlu1 %7147  ;;  %v7085_v29 = vunpack.i.h.bf16 %v10375_v36  ;;  %v7084_v23 = vunpack.i.l.bf16 %v10375_v36  ;;  %v3781_v25 = vsel %vm713_vm3, %v7598_v22, %v7080_v57  ;;  %v3780_v55 = vsel %vm713_vm3, %v7599_v7, %v7079_v19 }
 0x4b0   : > { %v4900_v40 = vsel %vm546_vm1, %v4883_v52, %v4540_v45  ;;  %v4727_v35 = vsel %vm545_vm0, %v10470_v59, %v4472_v6  ;;  %v7155_v47 = vunpack.i.h.bf16 %v10456_v1  ;;  %v7154_v36 = vunpack.i.l.bf16 %v10456_v1 }
 0x4b1   : > { %v10462_v63 = vpop.permute.xlu0 %7157  ;;  %v3874_v33 = vsel %vm2054_vm8, %v3842_v54, %v7089_v3  ;;  %v3875_v61 = vsel %vm2054_vm8, %v3843_v31, %v7090_v11  ;;  %v7095_v56 = vunpack.i.h.bf16 %v10382_v16  ;;  %v7094_v41 = vunpack.i.l.bf16 %v10382_v16 }
 0x4b2   : > { %v3812_v14 = vsel %vm1988_vm4, %v3780_v55, %v7084_v23  ;;  %v3813_v32 = vsel %vm1988_vm4, %v3781_v25, %v7085_v29  ;;  %v7150_v6 = vunpack.i.h.bf16 %v10460_v24  ;;  %v7149_v20 = vunpack.i.l.bf16 %v10460_v24 }
 0x4b3   : > { %v10464_v50 = vpop.permute.xlu1 %7167  ;;  %v7145_v1 = vunpack.i.h.bf16 %v10442_v28  ;;  %v7144_v9 = vunpack.i.l.bf16 %v10442_v28  ;;  %v3906_v46 = vsel %vm2087_vm9, %v3874_v33, %v7094_v41  ;;  %v3907_v4 = vsel %vm2087_vm9, %v3875_v61, %v7095_v56 }
 0x4b4   : > { %v3844_v57 = vsel %vm2021_vm7, %v3812_v14, %v7154_v36  ;;  %v3845_v19 = vsel %vm2021_vm7, %v3813_v32, %v7155_v47  ;;  %v3938_v28 = vsel %vm2120_vm10, %v3906_v46, %v7149_v20  ;;  %v3939_v29 = vsel %vm2120_vm10, %v3907_v4, %v7150_v6 }
 0x4b5   : > { %v10466_v39 = vpop.permute.xlu0 %7162 }
 0x4b7   : > { %v10474_v38 = vpop.permute.xlu1 %7172 }
 0x4b9   : > { %v10476_v30 = vpop.permute.xlu0 %7177 }
 0x4ba   : > { %v7180_v25 = vunpack.i.h.bf16 %v10476_v30  ;;  %v7179_v7 = vunpack.i.l.bf16 %v10476_v30 }
 0x4bb   : > { %v10493_v13 = vpop.permute.xlu1 %7187 }
 0x4bd   : > { %v10495_v27 = vpop.permute.xlu0 %7182 }
 0x4be   : > { %v7185_v33 = vunpack.i.h.bf16 %v10495_v27  ;;  %v7184_v61 = vunpack.i.l.bf16 %v10495_v27 }
 0x4c1   : > { %v10510_v51 = vpop.permute.xlu1 %7192 }
 0x4c2   : > { %v7208_v58 = vpop.permute.xlu0 %7207 }
 0x4c3   : > { %v7210_v18 = vunpack.i.h.bf16 %v7208_v58  ;;  %v7209_v2 = vunpack.i.l.bf16 %v7208_v58 }
 0x4c5   : > { %v7198_v5 = vpop.permute.xlu1 %7197  ;;  %v3876_v31 = vsel %vm2054_vm8, %v3844_v57, %v7209_v2  ;;  %v3877_v24 = vsel %vm2054_vm8, %v3845_v19, %v7210_v18  ;;  %v4744_v57 = vsel %vm546_vm1, %v4727_v35, %v4506_v53  ;;  %v4659_v19 = vrot.slane %v10486_v44, 6 }
 0x4c6   : > { %v7213_v16 = vpop.permute.xlu0 %7212  ;;  %v7200_v11 = vunpack.i.h.bf16 %v7198_v5  ;;  %v7199_v3 = vunpack.i.l.bf16 %v7198_v5  ;;  %v4917_v5 = vsel %vm4761_vm2, %v4900_v40, %v4849_v60  ;;  %v4762_v35 = vsel %vm4761_vm2, %v4744_v57, %v4540_v45 }
 0x4c7   : > { %v7215_v52 = vunpack.i.h.bf16 %v7213_v16  ;;  %v7214_v54 = vunpack.i.l.bf16 %v7213_v16  ;;  %v10565_v16 = vld [vmem:[%s11654_s6] ss:$0 sm:$0xff]  ;;  %v4934_v60 = vsel %vm4779_vm14, %v4917_v5, %v4625_v48  ;;  %v7195_v45 = vunpack.i.h.bf16 %v10510_v51 }
 0x4c8   : > { %v3970_v18 = vsel %vm2153_vm11, %v3938_v28, %v7199_v3  ;;  %v3971_v2 = vsel %vm2153_vm11, %v3939_v29, %v7200_v11  ;;  %v4693_v3 = vrot.slane %v10486_v44, 7  ;;  %v7194_v28 = vunpack.i.l.bf16 %v10510_v51 }
 0x4c9   : > { %v3908_v23 = vsel %vm2087_vm9, %v3876_v31, %v7214_v54  ;;  %v3909_v22 = vsel %vm2087_vm9, %v3877_v24, %v7215_v52  ;;  %v7203_v47 = vpop.permute.xlu1 %7202  ;;  %v4591_v54 = vrot.slane %v10486_v44, 4  ;;  %v7189_v24 = vunpack.i.l.bf16 %v10493_v13 }
 0x4ca   : > { %v3940_v55 = vsel %vm2120_vm10, %v3908_v23, %v7144_v9  ;;  %v3941_v58 = vsel %vm2120_vm10, %v3909_v22, %v7145_v1  ;;  %v10543_v36 = vpop.permute.xlu0 %7222  ;;  %v7205_v56 = vunpack.i.h.bf16 %v7203_v47  ;;  %v7204_v41 = vunpack.i.l.bf16 %v7203_v47 }
 0x4cb   : > { %v3972_v14 = vsel %vm2153_vm11, %v3940_v55, %v7179_v7  ;;  %v3973_v30 = vsel %vm2153_vm11, %v3941_v58, %v7180_v25  ;;  %v4951_v22 = vsel %vm4797_vm15, %v4934_v60, %v4659_v19  ;;  %v7190_v25 = vunpack.i.h.bf16 %v10493_v13 }
 0x4cc   : > { %v4002_v32 = vsel %vm2186_vm12, %v3970_v18, %v7204_v41  ;;  %v4003_v6 = vsel %vm2186_vm12, %v3971_v2, %v7205_v56  ;;  %v4004_v20 = vsel %vm2186_vm12, %v3972_v14, %v7184_v61  ;;  %v4005_v1 = vsel %vm2186_vm12, %v3973_v30, %v7185_v33  ;;  %v7600_v61 = vld [vmem:[#allocation2 + $0x108] sm:$0xff] }
 0x4cd   : > { %v4025_v9 = vpack.c.bf16 %v4003_v6, %v4002_v32  ;;  %v10555_v27 = vpop.permute.xlu1 %7217  ;;  %v4026_v4 = vpack.c.bf16 %v4005_v1, %v4004_v20  ;;  %v4780_v59 = vsel %vm4779_vm14, %v4762_v35, %v4591_v54  ;;  %v3782_v13 = vsel %vm713_vm3, %v7600_v61, %v7189_v24  ;;  %v7601_v20 = vld [vmem:[#allocation2 + $0x110] sm:$0xff] }
 0x4ce   : > { %v10557_v46 = vpop.permute.xlu0 %7232  ;;  %v4968_v41 = vsel %vm1081_vm6, %v4951_v22, %v4693_v3  ;;  %v3814_v51 = vsel %vm1988_vm4, %v3782_v13, %v7194_v28  ;;  %v4798_v14 = vsel %vm4797_vm15, %v4780_v59, %v4625_v48  ;;  %v7139_v30 = vunpack.i.l.bf16 %v10454_v12 }
 0x4cf   : > { %5921 = vmatmul.mubr.msk.bf16.gmra.mxu0 %vm2262_vm13, %v4025_v9  ;;  %v5906_v52 = vpop.f32.mrf.mxu0  ;;  %v7160_v32 = vunpack.i.h.bf16 %v10462_v63  ;;  %v7159_v6 = vunpack.i.l.bf16 %v10462_v63  ;;  %v3783_v1 = vsel %vm713_vm3, %v7601_v20, %v7190_v25  ;;  %v10622_v9 = vld [vmem:[#allocation2 + $0x10] sm:$0x3]  ;;  %v7165_v63 = vunpack.i.h.bf16 %v10466_v39 }
 0x4d0   : > { %5924 = vmatprep.mubr.msk.bf16.mxu0 %vm2262_vm13, %v4026_v4  ;;  %v4153_v53 = vadd.f32 %v5906_v52, %v10565_v16  ;;  %v3815_v4 = vsel %vm1988_vm4, %v3783_v1, %v7195_v45  ;;  %v7140_v52 = vunpack.i.h.bf16 %v10454_v12  ;;  %v7164_v54 = vunpack.i.l.bf16 %v10466_v39  ;;  %v7602_v12 = vld [vmem:[#allocation2 + $0x128] sm:$0xff] }
 0x4d1   : > { %v10577_v40 = vpop.permute.xlu1 %7227  ;;  %v4144_v11 = vpop.f32.mrf.mxu0  ;;  %v3846_v60 = vsel %vm2021_vm7, %v3814_v51, %v7139_v30  ;;  %v10643_v35 = vsel %vm1000_vm5, %v4968_v41, %v10486_v44  ;;  %v4815_v24 = vsel %vm1081_vm6, %v4798_v14, %v4659_v19  ;;  %v3785_v28 = vsel %vm713_vm3, %v7602_v12, %v7160_v32 }
 0x4d2   : > { %v10579_v31 = vpop.permute.xlu0 %7237  ;;  %v10589_v29 = vadd.f32 %v4153_v53, %v9421_v62  ;;  %v4145_v23 = vadd.f32 %v10565_v16, %v4144_v11  ;;  %v7169_v53 = vunpack.i.l.bf16 %v10464_v50  ;;  %v5019_v11 = vrot.slane %v10622_v9, 1 }
 0x4d3   : > { %v5907_v7 = vpop.f32.mrf.mxu0  ;;  %v7170_v22 = vunpack.i.h.bf16 %v10464_v50  ;;  %v3847_v25 = vsel %vm2021_vm7, %v3815_v4, %v7140_v52  ;;  %v7174_v41 = vunpack.i.l.bf16 %v10474_v38  ;;  %v10660_v50 = vsel %vm1000_vm5, %v4815_v24, %v4693_v3 }
 0x4d4   : > { %4374 = vst.msk [vmem:[#allocation2 + $0x31] sm:$0xff] %vm713_vm3, %v10589_v29  ;;  %v10603_v47 = vadd.f32 %v4145_v23, %v9437_v8  ;;  %v4156_v33 = vadd.f32 %v5907_v7, %v10565_v16  ;;  %v7603_v23 = vld [vmem:[#allocation2 + $0x120] sm:$0xff]  ;;  %v3878_v59 = vsel %vm2054_vm8, %v3846_v60, %v7169_v53  ;;  %v7175_v51 = vunpack.i.h.bf16 %v10474_v38 }
 0x4d5   : > { %v10596_v55 = vpop.permute.xlu1 %7242  ;;  %v4147_v56 = vpop.f32.mrf.mxu0  ;;  %v3784_v39 = vsel %vm713_vm3, %v7603_v23, %v7159_v6  ;;  %v3879_v14 = vsel %vm2054_vm8, %v3847_v25, %v7170_v22  ;;  %v7235_v32 = vunpack.i.h.bf16 %v10557_v46  ;;  %v7230_v6 = vunpack.i.h.bf16 %v10577_v40 }
 0x4d6   : > { %v10600_v58 = vpop.permute.xlu0 %7252  ;;  %4372 = vst.msk [vmem:[#allocation2 + $0x19] sm:$0xff] %vm713_vm3, %v10603_v47  ;;  %v10612_v18 = vadd.f32 %v4156_v33, %v9448_v37  ;;  %v4148_v2 = vadd.f32 %v10565_v16, %v4147_v56  ;;  %v3816_v13 = vsel %vm1988_vm4, %v3784_v39, %v7164_v54  ;;  %v3817_v56 = vsel %vm1988_vm4, %v3785_v28, %v7165_v63 }
 0x4d7   : > { %v7229_v20 = vunpack.i.l.bf16 %v10577_v40  ;;  %v3910_v1 = vsel %vm2087_vm9, %v3878_v59, %v7174_v41  ;;  %v7224_v53 = vunpack.i.l.bf16 %v10543_v36  ;;  %v3911_v40 = vsel %vm2087_vm9, %v3879_v14, %v7175_v51 }
 0x4d8   : > { %4375 = vst.msk [vmem:[#allocation2 + $0x39] sm:$0xff] %vm713_vm3, %v10612_v18  ;;  %v10632_v48 = vadd.f32 %v4148_v2, %v9455_v34  ;;  %v7234_v2 = vunpack.i.l.bf16 %v10557_v46  ;;  %v7225_v46 = vunpack.i.h.bf16 %v10543_v36  ;;  %v3849_v22 = vsel %vm2021_vm7, %v3817_v56, %v7235_v32 }
 0x4d9   : > { %v10625_v5 = vpop.permute.xlu1 %7247  ;;  %v3942_v25 = vsel %vm2120_vm10, %v3910_v1, %v7229_v20  ;;  %v7255_v36 = vunpack.i.h.bf16 %v10600_v58 }
 0x4da   : > { %v10629_v57 = vpop.permute.xlu0 %7257  ;;  %4373 = vst.msk [vmem:[#allocation2 + $0x21] sm:$0xff] %vm713_vm3, %v10632_v48  ;;  %v3848_v12 = vsel %vm2021_vm7, %v3816_v13, %v7234_v2 }
 0x4db   : > { %v4410_v7 = vld [vmem:[#allocation2 + $0x30] sm:$0xff] }
 0x4dc   : > { %v4474_v19 = vrot.slane %v4410_v7, 1  ;;  %v4508_v33 = vrot.slane %v4410_v7, 2  ;;  %v4542_v61 = vrot.slane %v4410_v7, 3  ;;  %v4851_v63 = vrot.slane %v4410_v7, 4 }
 0x4dd   : > { %v10652_v45 = vpop.permute.xlu1 %7267 }
 0x4de   : > { %v10654_v44 = vpop.permute.xlu0 %7262  ;;  %v4885_v30 = vsel %vm545_vm0, %v4474_v19, %v4508_v33  ;;  %v4729_v60 = vsel %vm545_vm0, %v4410_v7, %v4474_v19  ;;  %v3943_v7 = vsel %vm2120_vm10, %v3911_v40, %v7230_v6  ;;  %v7259_v40 = vunpack.i.l.bf16 %v10629_v57 }
 0x4df   : > { %v10670_v4 = vld [vmem:[#allocation2 + $0x38] sm:$0xff]  ;;  %v4902_v54 = vsel %vm546_vm1, %v4885_v30, %v4542_v61  ;;  %v4746_v59 = vsel %vm546_vm1, %v4729_v60, %v4508_v33  ;;  %v7269_v9 = vunpack.i.l.bf16 %v10652_v45 }
 0x4e0   : > { %v4627_v38 = vrot.slane %v10670_v4, 5  ;;  %v4661_v23 = vrot.slane %v10670_v4, 6  ;;  %v4919_v39 = vsel %vm4761_vm2, %v4902_v54, %v4851_v63  ;;  %v4695_v51 = vrot.slane %v10670_v4, 7 }
 0x4e1   : > { %v10672_v3 = vpop.permute.xlu1 %7272  ;;  %v4593_v2 = vrot.slane %v10670_v4, 4  ;;  %v4764_v1 = vsel %vm4761_vm2, %v4746_v59, %v4542_v61  ;;  %v7260_v63 = vunpack.i.h.bf16 %v10629_v57 }
 0x4e2   : > { %v7288_v52 = vpop.permute.xlu0 %7287  ;;  %v4936_v13 = vsel %vm4779_vm14, %v4919_v39, %v4627_v38 }
 0x4e3   : > { %v7289_v24 = vunpack.i.l.bf16 %v7288_v52  ;;  %v7290_v28 = vunpack.i.h.bf16 %v7288_v52  ;;  %v4953_v33 = vsel %vm4797_vm15, %v4936_v13, %v4661_v23  ;;  %v7254_v52 = vunpack.i.l.bf16 %v10600_v58 }
 0x4e5   : > { %v7278_v19 = vpop.permute.xlu1 %7277  ;;  %v3880_v14 = vsel %vm2054_vm8, %v3848_v12, %v7289_v24  ;;  %v3881_v20 = vsel %vm2054_vm8, %v3849_v22, %v7290_v28  ;;  %v4970_v22 = vsel %vm1081_vm6, %v4953_v33, %v4695_v51 }
 0x4e6   : > { %v7293_v41 = vpop.permute.xlu0 %7292  ;;  %v7279_v30 = vunpack.i.l.bf16 %v7278_v19  ;;  %v7280_v6 = vunpack.i.h.bf16 %v7278_v19  ;;  %v4782_v19 = vsel %vm4779_vm14, %v4764_v1, %v4593_v2  ;;  %v10710_v57 = vsel %vm1000_vm5, %v4970_v22, %v10670_v4 }
 0x4e7   : > { %v7295_v56 = vunpack.i.h.bf16 %v7293_v41  ;;  %v7294_v32 = vunpack.i.l.bf16 %v7293_v41  ;;  %v7274_v22 = vunpack.i.l.bf16 %v10672_v3 }
 0x4e8   : > { %v3974_v61 = vsel %vm2153_vm11, %v3942_v25, %v7279_v30  ;;  %v3975_v41 = vsel %vm2153_vm11, %v3943_v7, %v7280_v6  ;;  %v7376_v25 = vpack.i.bf16 %v10710_v57, %v10643_v35 }
 0x4e9   : > { %v3912_v54 = vsel %vm2087_vm9, %v3880_v14, %v7294_v32  ;;  %v3913_v60 = vsel %vm2087_vm9, %v3881_v20, %v7295_v56  ;;  %v7283_v28 = vpop.permute.xlu1 %7282  ;;  %v4800_v32 = vsel %vm4797_vm15, %v4782_v19, %v4627_v38  ;;  %v5018_v20 = vrot.slane %v10660_v50, 1  ;;  %v7605_v19 = vld [vmem:[#allocation2 + $0x150] sm:$0xff] }
 0x4ea   : > { %v3944_v24 = vsel %vm2120_vm10, %v3912_v54, %v7224_v53  ;;  %v3945_v12 = vsel %vm2120_vm10, %v3913_v60, %v7225_v46  ;;  %v10702_v39 = vpop.permute.xlu0 %7302  ;;  %v7285_v58 = vunpack.i.h.bf16 %v7283_v28  ;;  %v7284_v59 = vunpack.i.l.bf16 %v7283_v28  ;;  %7377 = vrot.lane.b32.xlu0 %v7376_v25, %s11896_s29 }
 0x4eb   : > { %v3976_v53 = vsel %vm2153_vm11, %v3944_v24, %v7254_v52  ;;  %v3977_v46 = vsel %vm2153_vm11, %v3945_v12, %v7255_v36  ;;  %v4412_v36 = vld [vmem:[#allocation2 + $0x40] sm:$0x3]  ;;  %v4817_v35 = vsel %vm1081_vm6, %v4800_v32, %v4661_v23  ;;  %v5020_v38 = vsel %vm1000_vm5, %v5018_v20, %v5019_v11 }
 0x4ec   : > { %v4006_v13 = vsel %vm2186_vm12, %v3974_v61, %v7284_v59  ;;  %v4007_v14 = vsel %vm2186_vm12, %v3975_v41, %v7285_v58  ;;  %v4008_v30 = vsel %vm2186_vm12, %v3976_v53, %v7259_v40  ;;  %v4009_v4 = vsel %vm2186_vm12, %v3977_v46, %v7260_v63  ;;  %v7606_v46 = vld [vmem:[#allocation2 + $0x140] sm:$0xff] }
 0x4ed   : > { %v4027_v2 = vpack.c.bf16 %v4007_v14, %v4006_v13  ;;  %v10719_v56 = vpop.permute.xlu1 %7297  ;;  %v4028_v6 = vpack.c.bf16 %v4009_v4, %v4008_v30  ;;  %v10728_v33 = vsel %vm1000_vm5, %v4817_v35, %v4695_v51  ;;  %v5022_v63 = vrot.slane %v4412_v36, 1  ;;  %v7607_v14 = vld [vmem:[#allocation2 + $0x138] sm:$0xff] }
 0x4ee   : > { %v7313_v7 = vpop.permute.xlu0 %7312  ;;  %v5021_v52 = vrot.slane %v10728_v33, 1  ;;  %v7240_v23 = vunpack.i.h.bf16 %v10579_v31  ;;  %v7239_v51 = vunpack.i.l.bf16 %v10579_v31  ;;  %v7270_v24 = vunpack.i.h.bf16 %v10652_v45  ;;  %v7604_v31 = vld [vmem:[#allocation2 + $0x158] sm:$0xff] }
 0x4ef   : > { %5925 = vmatmul.mubr.msk.bf16.gmra.mxu0 %vm2262_vm13, %v4027_v2  ;;  %v7275_v28 = vunpack.i.h.bf16 %v10672_v3  ;;  %v7265_v61 = vunpack.i.h.bf16 %v10654_v44  ;;  %v7264_v58 = vunpack.i.l.bf16 %v10654_v44  ;;  %v7315_v45 = vunpack.i.h.bf16 %v7313_v7 }
 0x4f0   : > { %5928 = vmatprep.mubr.msk.bf16.mxu0 %vm2262_vm13, %v4028_v6  ;;  %v10740_v60 = vsel %vm1000_vm5, %v5021_v52, %v5022_v63  ;;  %v3789_v59 = vsel %vm713_vm3, %v7604_v31, %v7240_v23  ;;  %v3788_v41 = vsel %vm713_vm3, %v7605_v19, %v7239_v51  ;;  %v7314_v53 = vunpack.i.l.bf16 %v7313_v7 }
 0x4f1   : > { %v10730_v1 = vpop.permute.xlu1 %7307  ;;  %v7381_v40 = vpack.i.bf16 %v10740_v60, %v5020_v38  ;;  %v3787_v13 = vsel %vm713_vm3, %v7606_v46, %v7270_v24  ;;  %v3786_v3 = vsel %vm713_vm3, %v7607_v14, %v7269_v9  ;;  %v7220_v6 = vunpack.i.h.bf16 %v10555_v27 }
 0x4f2   : > { %v10737_v54 = vpop.permute.xlu0 %7327  ;;  %v3818_v44 = vsel %vm1988_vm4, %v3786_v3, %v7274_v22  ;;  %v3819_v32 = vsel %vm1988_vm4, %v3787_v13, %v7275_v28  ;;  %v7219_v7 = vunpack.i.l.bf16 %v10555_v27  ;;  %v3820_v35 = vsel %vm1988_vm4, %v3788_v41, %v7264_v58 }
 0x4f3   : > { %7382 = vrot.lane.b32.xlu0 %v7381_v40, %s11897_s14  ;;  %v3821_v38 = vsel %vm1988_vm4, %v3789_v59, %v7265_v61  ;;  %v3852_v52 = vsel %vm2021_vm7, %v3820_v35, %v7314_v53  ;;  %v3851_v51 = vsel %vm2021_vm7, %v3819_v32, %v7220_v6  ;;  %v7244_v27 = vunpack.i.l.bf16 %v10596_v55 }
 0x4f4   : > { %v3853_v63 = vsel %vm2021_vm7, %v3821_v38, %v7315_v45  ;;  %v3850_v23 = vsel %vm2021_vm7, %v3818_v44, %v7219_v7  ;;  %v7305_v61 = vunpack.i.h.bf16 %v10702_v39  ;;  %v7304_v58 = vunpack.i.l.bf16 %v10702_v39 }
 0x4f5   : > { %v10747_v12 = vpop.permute.xlu1 %7317  ;;  %v3882_v31 = vsel %vm2054_vm8, %v3850_v23, %v7244_v27  ;;  %v7310_v41 = vunpack.i.h.bf16 %v10730_v1  ;;  %v7309_v45 = vunpack.i.l.bf16 %v10730_v1  ;;  %v7250_v13 = vunpack.i.h.bf16 %v10625_v5 }
 0x4f6   : > { %v7358_v11 = vpop.permute.xlu0 %7357  ;;  %v7249_v14 = vunpack.i.l.bf16 %v10625_v5  ;;  %v7330_v39 = vunpack.i.h.bf16 %v10737_v54  ;;  %v7329_v3 = vunpack.i.l.bf16 %v10737_v54  ;;  %v6750_v27 = vunpack.i.h.bf16 %v9707_v21 }
 0x4f7   : > { %v7360_v25 = vunpack.i.h.bf16 %v7358_v11  ;;  %v7359_v30 = vunpack.i.l.bf16 %v7358_v11  ;;  %v7245_v11 = vunpack.i.h.bf16 %v10596_v55 }
 0x4f8   : > { %v3914_v32 = vsel %vm2087_vm9, %v3882_v31, %v7249_v14 }
 0x4f9   : > { %v10758_v2 = vpop.permute.xlu1 %7322  ;;  %v3884_v40 = vsel %vm2054_vm8, %v3852_v52, %v7359_v30  ;;  %v3885_v24 = vsel %vm2054_vm8, %v3853_v63, %v7360_v25  ;;  %v3883_v59 = vsel %vm2054_vm8, %v3851_v51, %v7245_v11  ;;  %v3946_v6 = vsel %vm2120_vm10, %v3914_v32, %v7309_v45 }
 0x4fa   : > { %v7363_v4 = vpop.permute.xlu0 %7362  ;;  %v3915_v1 = vsel %vm2087_vm9, %v3883_v59, %v7250_v13  ;;  %v7300_v59 = vunpack.i.h.bf16 %v10719_v56  ;;  %v7320_v13 = vunpack.i.h.bf16 %v10747_v12 }
 0x4fb   : > { %v7365_v20 = vunpack.i.h.bf16 %v7363_v4  ;;  %v7364_v36 = vunpack.i.l.bf16 %v7363_v4  ;;  %v3947_v5 = vsel %vm2120_vm10, %v3915_v1, %v7310_v41  ;;  %v7608_v41 = vld [vmem:[#allocation2 + $0x170] sm:$0xff] }
 0x4fd   : > { %v7333_v9 = vpop.permute.xlu1 %7332  ;;  %v3916_v28 = vsel %vm2087_vm9, %v3884_v40, %v7364_v36  ;;  %v3917_v22 = vsel %vm2087_vm9, %v3885_v24, %v7365_v20 }
 0x4fe   : > { %v7368_v19 = vpop.permute.xlu0 %7367  ;;  %v3948_v53 = vsel %vm2120_vm10, %v3916_v28, %v7304_v58  ;;  %v3949_v55 = vsel %vm2120_vm10, %v3917_v22, %v7305_v61  ;;  %v7335_v35 = vunpack.i.h.bf16 %v7333_v9  ;;  %v7334_v38 = vunpack.i.l.bf16 %v7333_v9 }
 0x4ff   : > { %v7370_v25 = vunpack.i.h.bf16 %v7368_v19  ;;  %v7369_v30 = vunpack.i.l.bf16 %v7368_v19  ;;  %v3980_v20 = vsel %vm2153_vm11, %v3948_v53, %v7329_v3  ;;  %v3981_v36 = vsel %vm2153_vm11, %v3949_v55, %v7330_v39  ;;  %v7609_v53 = vld [vmem:[#allocation2 + $0x168] sm:$0xff] }
 0x500   : > { %v6749_v9 = vunpack.i.l.bf16 %v9707_v21  ;;  %v7299_v19 = vunpack.i.l.bf16 %v10719_v56  ;;  %v3791_v45 = vsel %vm713_vm3, %v7608_v41, %v7335_v35  ;;  %v3790_v55 = vsel %vm713_vm3, %v7609_v53, %v7334_v38 }
 0x501   : > { %v7338_v46 = vpop.permute.xlu1 %7337  ;;  %v4012_v63 = vsel %vm2186_vm12, %v3980_v20, %v7369_v30  ;;  %v4013_v23 = vsel %vm2186_vm12, %v3981_v36, %v7370_v25  ;;  %v7319_v21 = vunpack.i.l.bf16 %v10747_v12  ;;  %v7325_v56 = vunpack.i.h.bf16 %v10758_v2 }
 0x502   : > { %v7340_v4 = vunpack.i.h.bf16 %v7338_v46  ;;  %v7339_v44 = vunpack.i.l.bf16 %v7338_v46  ;;  %v4030_v61 = vpack.c.bf16 %v4013_v23, %v4012_v63  ;;  %v10807_v46 = vld [vmem:[#allocation2 + $0x18] sm:$0xff]  ;;  %v7324_v3 = vunpack.i.l.bf16 %v10758_v2 }
 0x503   : > { %v4473_v20 = vrot.slane %v10807_v46, 1 }
 0x504   : > { %v3978_v51 = vsel %vm2153_vm11, %v3946_v6, %v7339_v44  ;;  %v3979_v40 = vsel %vm2153_vm11, %v3947_v5, %v7340_v4 }
 0x505   : > { %v7343_v7 = vpop.permute.xlu1 %7342 }
 0x506   : > { %v7345_v54 = vunpack.i.h.bf16 %v7343_v7  ;;  %v7344_v52 = vunpack.i.l.bf16 %v7343_v7 }
 0x508   : > { %v4010_v24 = vsel %vm2186_vm12, %v3978_v51, %v7344_v52  ;;  %v4011_v11 = vsel %vm2186_vm12, %v3979_v40, %v7345_v54  ;;  %v4507_v51 = vrot.slane %v10807_v46, 2 }
 0x509   : > { %v4029_v28 = vpack.c.bf16 %v4011_v11, %v4010_v24  ;;  %v7348_v22 = vpop.permute.xlu1 %7347 }
 0x50a   : > { %v7350_v58 = vunpack.i.h.bf16 %v7348_v22  ;;  %v7349_v31 = vunpack.i.l.bf16 %v7348_v22 }
 0x50b   : > { %5929 = vmatmul.mubr.msk.bf16.gmra.mxu0 %vm2262_vm13, %v4029_v28 }
 0x50c   : > { %v3822_v14 = vsel %vm1988_vm4, %v3790_v55, %v7349_v31  ;;  %v3823_v39 = vsel %vm1988_vm4, %v3791_v45, %v7350_v58  ;;  %5932 = vmatprep.mubr.msk.bf16.mxu0 %vm2262_vm13, %v4030_v61  ;;  %v4728_v61 = vsel %vm545_vm0, %v10807_v46, %v4473_v20  ;;  %v10849_v45 = vld [vmem:[#allocation2 + $0x20] sm:$0xff] }
 0x50d   : > { %v3854_v25 = vsel %vm2021_vm7, %v3822_v14, %v7299_v19  ;;  %v3855_v30 = vsel %vm2021_vm7, %v3823_v39, %v7300_v59  ;;  %v7353_v4 = vpop.permute.xlu1 %7352  ;;  %v4745_v55 = vsel %vm546_vm1, %v4728_v61, %v4507_v51 }
 0x50e   : > { %v3886_v32 = vsel %vm2054_vm8, %v3854_v25, %v7319_v21  ;;  %v3887_v12 = vsel %vm2054_vm8, %v3855_v30, %v7320_v13  ;;  %v7355_v1 = vunpack.i.h.bf16 %v7353_v4  ;;  %v7354_v36 = vunpack.i.l.bf16 %v7353_v4 }
 0x50f   : > { %v5910_v44 = vpop.f32.mrf.mxu0  ;;  %v3918_v6 = vsel %vm2087_vm9, %v3886_v32, %v7324_v3  ;;  %v3919_v5 = vsel %vm2087_vm9, %v3887_v12, %v7325_v56  ;;  %v4541_v13 = vrot.slane %v10807_v46, 3  ;;  %v4592_v21 = vrot.slane %v10849_v45, 4 }
 0x510   : > { %v4169_v2 = vadd.f32 %v5910_v44, %v10565_v16  ;;  %v3950_v35 = vsel %vm2120_vm10, %v3918_v6, %v6749_v9  ;;  %v3951_v38 = vsel %vm2120_vm10, %v3919_v5, %v6750_v27  ;;  %v4884_v56 = vsel %vm545_vm0, %v4473_v20, %v4507_v51 }
 0x511   : > { %v4160_v7 = vpop.f32.mrf.mxu0  ;;  %v7373_v52 = vpop.permute.xlu1 %7372  ;;  %v3982_v22 = vsel %vm2153_vm11, %v3950_v35, %v7354_v36  ;;  %v3983_v27 = vsel %vm2153_vm11, %v3951_v38, %v7355_v1  ;;  %v4763_v14 = vsel %vm4761_vm2, %v4745_v55, %v4541_v13  ;;  %v4626_v44 = vrot.slane %v10849_v45, 5 }
 0x512   : > { %v4161_v54 = vadd.f32 %v10565_v16, %v4160_v7  ;;  %v10828_v63 = vadd.f32 %v4169_v2, %v9572_v15  ;;  %v7375_v40 = vunpack.i.h.bf16 %v7373_v52  ;;  %v7374_v24 = vunpack.i.l.bf16 %v7373_v52 }
 0x513   : > { %v5911_v23 = vpop.f32.mrf.mxu0  ;;  %v4781_v1 = vsel %vm4779_vm14, %v4763_v14, %v4592_v21  ;;  %v4850_v36 = vrot.slane %v10807_v46, 4  ;;  %v4901_v20 = vsel %vm546_vm1, %v4884_v56, %v4541_v13 }
 0x514   : > { %11946 = vst [vmem:[#allocation20_spill] sm:$0xff] %v10828_v63  ;;  %v10832_v11 = vadd.f32 %v4161_v54, %v9578_v42  ;;  %v4172_v28 = vadd.f32 %v5911_v23, %v10565_v16  ;;  %4378 = vst.msk [vmem:[#allocation2 + $0x61] sm:$0xff] %vm713_vm3, %v10828_v63  ;;  %v4014_v58 = vsel %vm2186_vm12, %v3982_v22, %v7374_v24 }
 0x515   : > { %v4163_v9 = vpop.f32.mrf.mxu0  ;;  %v4015_v31 = vsel %vm2186_vm12, %v3983_v27, %v7375_v40 }
 0x516   : > { %11947 = vst [vmem:[#allocation22_spill] sm:$0xff] %v10832_v11  ;;  %4376 = vst.msk [vmem:[#allocation2 + $0x49] sm:$0xff] %vm713_vm3, %v10832_v11  ;;  %v10846_v59 = vadd.f32 %v4172_v28, %v9585_v17  ;;  %v4164_v19 = vadd.f32 %v10565_v16, %v4163_v9  ;;  %v4031_v41 = vpack.c.bf16 %v4015_v31, %v4014_v58 }
 0x518   : > { %11948 = vst [vmem:[#allocation23_spill] sm:$0xff] %v10846_v59  ;;  %4379 = vst.msk [vmem:[#allocation2 + $0x69] sm:$0xff] %vm713_vm3, %v10846_v59  ;;  %v10854_v53 = vadd.f32 %v4164_v19, %v9594_v10  ;;  %5933 = vmatmul.mubr.msk.bf16.gmra.mxu0 %vm2262_vm13, %v4031_v41 }
 0x51a   : > { %11949 = vst [vmem:[#allocation24_spill] sm:$0xff] %v10854_v53  ;;  %4377 = vst.msk [vmem:[#allocation2 + $0x51] sm:$0xff] %vm713_vm3, %v10854_v53 }
 0x51b   : > { %v4416_v39 = vld [vmem:[#allocation2 + $0x60] sm:$0xff] }
 0x51c   : > { %v4476_v3 = vrot.slane %v4416_v39, 1  ;;  %v4510_v25 = vrot.slane %v4416_v39, 2  ;;  %v4544_v30 = vrot.slane %v4416_v39, 3  ;;  %v4853_v2 = vrot.slane %v4416_v39, 4 }
 0x51d   : > { %v4413_v4 = vld [vmem:[#allocation2 + $0x48] sm:$0xff] }
 0x51e   : > { %v4475_v32 = vrot.slane %v4413_v4, 1  ;;  %v4509_v12 = vrot.slane %v4413_v4, 2  ;;  %v4731_v5 = vsel %vm545_vm0, %v4416_v39, %v4476_v3  ;;  %v4887_v7 = vsel %vm545_vm0, %v4476_v3, %v4510_v25 }
 0x51f   : > { %v4417_v6 = vld [vmem:[#allocation2 + $0x68] sm:$0xff]  ;;  %v4543_v52 = vrot.slane %v4413_v4, 3  ;;  %v4748_v23 = vsel %vm546_vm1, %v4731_v5, %v4510_v25  ;;  %v4904_v51 = vsel %vm546_vm1, %v4887_v7, %v4544_v30  ;;  %v4852_v9 = vrot.slane %v4413_v4, 4 }
 0x520   : > { %v4595_v35 = vrot.slane %v4417_v6, 4  ;;  %v4629_v38 = vrot.slane %v4417_v6, 5  ;;  %v4663_v54 = vrot.slane %v4417_v6, 6  ;;  %v4730_v24 = vsel %vm545_vm0, %v4413_v4, %v4475_v32 }
 0x521   : > { %v4414_v40 = vld [vmem:[#allocation2 + $0x50] sm:$0xff]  ;;  %v4886_v46 = vsel %vm545_vm0, %v4475_v32, %v4509_v12  ;;  %v4766_v28 = vsel %vm4761_vm2, %v4748_v23, %v4544_v30  ;;  %v4921_v22 = vsel %vm4761_vm2, %v4904_v51, %v4853_v2  ;;  %v4697_v61 = vrot.slane %v4417_v6, 7 }
 0x522   : > { %v4594_v27 = vrot.slane %v4414_v40, 4  ;;  %v4784_v58 = vsel %vm4779_vm14, %v4766_v28, %v4595_v35  ;;  %v4938_v31 = vsel %vm4779_vm14, %v4921_v22, %v4629_v38  ;;  %v4628_v19 = vrot.slane %v4414_v40, 5 }
 0x523   : > { %v4802_v41 = vsel %vm4797_vm15, %v4784_v58, %v4629_v38  ;;  %v4955_v55 = vsel %vm4797_vm15, %v4938_v31, %v4663_v54  ;;  %v4747_v13 = vsel %vm546_vm1, %v4730_v24, %v4509_v12  ;;  %v4903_v21 = vsel %vm546_vm1, %v4886_v46, %v4543_v52 }
 0x524   : > { %v4819_v14 = vsel %vm1081_vm6, %v4802_v41, %v4663_v54  ;;  %v4972_v39 = vsel %vm1081_vm6, %v4955_v55, %v4697_v61  ;;  %v4765_v56 = vsel %vm4761_vm2, %v4747_v13, %v4543_v52  ;;  %v4920_v3 = vsel %vm4761_vm2, %v4903_v21, %v4852_v9  ;;  %v4409_v13 = vld [vmem:[#allocation2 + $0x28] sm:$0x3] }
 0x525   : > { %v10887_v25 = vsel %vm1000_vm5, %v4819_v14, %v4697_v61  ;;  %v4662_v30 = vrot.slane %v4414_v40, 6  ;;  %v4783_v4 = vsel %vm4779_vm14, %v4765_v56, %v4594_v27  ;;  %v4918_v32 = vsel %vm4761_vm2, %v4901_v20, %v4850_v36  ;;  %v4418_v27 = vld [vmem:[#allocation2 + $0x70] sm:$0x3] }
 0x526   : > { %v7386_v12 = vpack.i.bf16 %v10887_v25, %v10728_v33  ;;  %v4801_v5 = vsel %vm4797_vm15, %v4783_v4, %v4628_v19  ;;  %v4937_v2 = vsel %vm4779_vm14, %v4920_v3, %v4628_v19  ;;  %v10896_v7 = vsel %vm1000_vm5, %v4972_v39, %v4417_v6  ;;  %v4415_v19 = vld [vmem:[#allocation2 + $0x58] sm:$0x3] }
 0x527   : > { %v4660_v35 = vrot.slane %v10849_v45, 6  ;;  %v4799_v38 = vsel %vm4797_vm15, %v4781_v1, %v4626_v44  ;;  %v4818_v54 = vsel %vm1081_vm6, %v4801_v5, %v4662_v30  ;;  %v4935_v36 = vsel %vm4779_vm14, %v4918_v32, %v4626_v44 }
 0x528   : > { %7387 = vrot.lane.b32.xlu0 %v7386_v12, %s11894_s24  ;;  %v4696_v20 = vrot.slane %v4414_v40, 7  ;;  %v4954_v52 = vsel %vm4797_vm15, %v4937_v2, %v4662_v30  ;;  %v7391_v23 = vpack.i.bf16 %v10896_v7, %v10710_v57  ;;  %v4694_v6 = vrot.slane %v10849_v45, 7 }
 0x529   : > { %v4816_v51 = vsel %vm1081_vm6, %v4799_v38, %v4660_v35  ;;  %v4952_v1 = vsel %vm4797_vm15, %v4935_v36, %v4660_v35  ;;  %v5024_v57 = vrot.slane %v10887_v25, 1  ;;  %v5025_v58 = vrot.slane %v4418_v27, 1 }
 0x52a   : > { %v4835_v24 = vsel %vm1000_vm5, %v4818_v54, %v4696_v20  ;;  %v4971_v46 = vsel %vm1081_vm6, %v4954_v52, %v4696_v20  ;;  %v4833_v44 = vsel %vm1000_vm5, %v4816_v51, %v4694_v6  ;;  %v4969_v22 = vsel %vm1081_vm6, %v4952_v1, %v4694_v6 }
 0x52b   : > { %v7396_v28 = vpack.i.bf16 %v4835_v24, %v4833_v44  ;;  %v4988_v9 = vsel %vm1000_vm5, %v4971_v46, %v4414_v40  ;;  %v4986_v61 = vsel %vm1000_vm5, %v4969_v22, %v10849_v45  ;;  %v5061_v41 = vrot.slane %v4835_v24, 1 }
 0x52c   : > { %7392 = vrot.lane.b32.xlu0 %v7391_v23, %s11761_s30  ;;  %v7401_v31 = vpack.i.bf16 %v4988_v9, %v4986_v61  ;;  %v5026_v55 = vsel %vm1000_vm5, %v5024_v57, %v5025_v58  ;;  %v5058_v21 = vrot.slane %v4833_v44, 1  ;;  %v5062_v14 = vrot.slane %v4415_v19, 1 }
 0x52d   : > { %v7406_v39 = vpack.i.bf16 %v5026_v55, %v10740_v60  ;;  %v5059_v56 = vrot.slane %v4409_v13, 1 }
 0x52e   : > { %v5063_v40 = vsel %vm1000_vm5, %v5061_v41, %v5062_v14 }
 0x52f   : > { %v5060_v45 = vsel %vm1000_vm5, %v5058_v21, %v5059_v56 }
 0x530   : > { %7397 = vrot.lane.b32.xlu0 %v7396_v28, %s11895_s25  ;;  %v7411_v3 = vpack.i.bf16 %v5063_v40, %v5060_v45 }
 0x534   : > { %7402 = vrot.lane.b32.xlu0 %v7401_v31, %s11765_s16  ;;  %s11983_s16 = smov 28  }
 0x538   : > { %7407 = vrot.lane.b32.xlu0 %v7406_v39, %s11759_s15 }
 0x53c   : > { %7412 = vrot.lane.b32.xlu0 %v7411_v3, %s11763_s12  ;;  %s11996_s12 = smov 32  }
 0x54d   : > { %v5914_v30 = vpop.f32.mrf.mxu0 }
 0x54e   : > { %v4185_v4 = vadd.f32 %v5914_v30, %v10565_v16 }
 0x54f   : > { %v4176_v32 = vpop.f32.mrf.mxu0 }
 0x550   : > { %v10928_v12 = vadd.f32 %v4185_v4, %v9641_v43  ;;  %v4177_v5 = vadd.f32 %v10565_v16, %v4176_v32 }
 0x551   : > { %v5915_v60 = vpop.f32.mrf.mxu0 }
 0x552   : > { %11950 = vst [vmem:[#allocation25_spill] sm:$0xff] %v10928_v12  ;;  %4382 = vst.msk [vmem:[#allocation2 + $0x91] sm:$0xff] %vm713_vm3, %v10928_v12  ;;  %v10934_v2 = vadd.f32 %v4177_v5, %v9647_v49  ;;  %v4188_v35 = vadd.f32 %v5915_v60, %v10565_v16 }
 0x553   : > { %v4179_v38 = vpop.f32.mrf.mxu0 }
 0x554   : > { %11951 = vst [vmem:[#allocation27_spill] sm:$0xff] %v10934_v2  ;;  %4380 = vst.msk [vmem:[#allocation2 + $0x79] sm:$0xff] %vm713_vm3, %v10934_v2  ;;  %v10940_v54 = vadd.f32 %v4188_v35, %v9656_v26  ;;  %v4180_v36 = vadd.f32 %v10565_v16, %v4179_v38 }
 0x556   : > { %11952 = vst [vmem:[#allocation30_spill] sm:$0xff] %v10940_v54  ;;  %4383 = vst.msk [vmem:[#allocation2 + $0x99] sm:$0xff] %vm713_vm3, %v10940_v54  ;;  %v10946_v20 = vadd.f32 %v4180_v36, %v9667_v0  ;;  %v11954_v36 = vld [vmem:[#allocation44_spill] sm:$0xff] }
 0x558   : > { %11953 = vst [vmem:[#allocation31_spill] sm:$0xff] %v10946_v20  ;;  %4381 = vst.msk [vmem:[#allocation2 + $0x81] sm:$0xff] %vm713_vm3, %v10946_v20 }
 0x559   : > { %v4422_v52 = vld [vmem:[#allocation2 + $0x90] sm:$0xff] }
 0x55a   : > { %v4478_v23 = vrot.slane %v4422_v52, 1  ;;  %v4512_v51 = vrot.slane %v4422_v52, 2  ;;  %v4546_v6 = vrot.slane %v4422_v52, 3  ;;  %v4855_v24 = vrot.slane %v4422_v52, 4 }
 0x55b   : > { %v4419_v35 = vld [vmem:[#allocation2 + $0x78] sm:$0xff] }
 0x55c   : > { %v4889_v1 = vsel %vm545_vm0, %v4478_v23, %v4512_v51  ;;  %v4733_v46 = vsel %vm545_vm0, %v4422_v52, %v4478_v23 }
 0x55d   : > { %v4423_v44 = vld [vmem:[#allocation2 + $0x98] sm:$0xff]  ;;  %v4906_v28 = vsel %vm546_vm1, %v4889_v1, %v4546_v6  ;;  %v4750_v22 = vsel %vm546_vm1, %v4733_v46, %v4512_v51  ;;  %v4424_v14 = vld [vmem:[#allocation2 + $0xa0] sm:$0x3]  ;;  %v4477_v51 = vrot.slane %v4419_v35, 1  ;;  %v4511_v46 = vrot.slane %v4419_v35, 2 }
 0x55e   : > { %v4631_v27 = vrot.slane %v4423_v44, 5  ;;  %v4665_v57 = vrot.slane %v4423_v44, 6  ;;  %v4923_v9 = vsel %vm4761_vm2, %v4906_v28, %v4855_v24  ;;  %v4597_v61 = vrot.slane %v4423_v44, 4  ;;  %v11956_v24 = vld [vmem:[#allocation46_spill] sm:$0xff]  ;;  %v11958_v28 = vld [vmem:[#allocation47_spill] sm:$0xff] }
 0x55f   : > { %v4768_v58 = vsel %vm4761_vm2, %v4750_v22, %v4546_v6  ;;  %v4699_v31 = vrot.slane %v4423_v44, 7  ;;  %v5028_v4 = vrot.slane %v4424_v14, 1 }
 0x560   : > { %v4940_v19 = vsel %vm4779_vm14, %v4923_v9, %v4631_v27  ;;  %v4786_v13 = vsel %vm4779_vm14, %v4768_v58, %v4597_v61  ;;  %v4545_v9 = vrot.slane %v4419_v35, 3  ;;  %v11960_v61 = vld [vmem:[#allocation45_spill] sm:$0xff] }
 0x561   : > { %v4957_v41 = vsel %vm4797_vm15, %v4940_v19, %v4665_v57  ;;  %v4804_v39 = vsel %vm4797_vm15, %v4786_v13, %v4631_v27  ;;  %v4888_v19 = vsel %vm545_vm0, %v4477_v51, %v4511_v46 }
 0x562   : > { %v4974_v21 = vsel %vm1081_vm6, %v4957_v41, %v4699_v31  ;;  %v4821_v40 = vsel %vm1081_vm6, %v4804_v39, %v4665_v57  ;;  %v4732_v57 = vsel %vm545_vm0, %v4419_v35, %v4477_v51  ;;  %v4905_v14 = vsel %vm546_vm1, %v4888_v19, %v4545_v9 }
 0x563   : > { %v10962_v56 = vsel %vm1000_vm5, %v4974_v21, %v4423_v44  ;;  %v10968_v3 = vsel %vm1000_vm5, %v4821_v40, %v4699_v31  ;;  %v11000_v31 = vld [vmem:[#allocation2 + $0x80] sm:$0xff]  ;;  %v4749_v41 = vsel %vm546_vm1, %v4732_v57, %v4511_v46  ;;  %v4854_v21 = vrot.slane %v4419_v35, 4 }
 0x564   : > { %v7416_v45 = vpack.i.bf16 %v10962_v56, %v10896_v7  ;;  %v5027_v30 = vrot.slane %v10968_v3, 1 }
 0x565   : > { %v4922_v51 = vsel %vm4761_vm2, %v4905_v14, %v4854_v21 }
 0x566   : > { %7417 = vrot.lane.b32.xlu1 %v7416_v45, %s11896_s29  ;;  %v10973_v32 = vsel %vm1000_vm5, %v5027_v30, %v5028_v4  ;;  %v4767_v30 = vsel %vm4761_vm2, %v4749_v41, %v4545_v9 }
 0x567   : > { %v7421_v5 = vpack.i.bf16 %v10973_v32, %v5026_v55 }
 0x56a   : > { %7422 = vrot.lane.b32.xlu1 %v7421_v5, %s11897_s14  ;;  %v4630_v5 = vrot.slane %v11000_v31, 5 }
 0x56d   : > { %v5918_v60 = vpop.f32.mrf.mxu0 }
 0x56e   : > { %v4201_v38 = vadd.f32 %v5918_v60, %v10565_v16  ;;  %v4664_v60 = vrot.slane %v11000_v31, 6 }
 0x56f   : > { %v4192_v7 = vpop.f32.mrf.mxu0 }
 0x570   : > { %v10979_v52 = vadd.f32 %v4201_v38, %v11954_v36  ;;  %v4193_v23 = vadd.f32 %v10565_v16, %v4192_v7 }
 0x571   : > { %v5919_v6 = vpop.f32.mrf.mxu0 }
 0x572   : > { %11955 = vst [vmem:[#allocation32_spill] sm:$0xff] %v10979_v52  ;;  %4386 = vst.msk [vmem:[#allocation2 + $0xc1] sm:$0xff] %vm713_vm3, %v10979_v52  ;;  %v10985_v1 = vadd.f32 %v4193_v23, %v11956_v24  ;;  %v4204_v55 = vadd.f32 %v5919_v6, %v10565_v16 }
 0x573   : > { %v4195_v44 = vpop.f32.mrf.mxu0 }
 0x574   : > { %11957 = vst [vmem:[#allocation33_spill] sm:$0xff] %v10985_v1  ;;  %4384 = vst.msk [vmem:[#allocation2 + $0xa9] sm:$0xff] %vm713_vm3, %v10985_v1  ;;  %v10991_v22 = vadd.f32 %v4204_v55, %v11958_v28  ;;  %v4196_v27 = vadd.f32 %v10565_v16, %v4195_v44  ;;  %v4596_v16 = vrot.slane %v11000_v31, 4 }
 0x576   : > { %11959 = vst [vmem:[#allocation34_spill] sm:$0xff] %v10991_v22  ;;  %4387 = vst.msk [vmem:[#allocation2 + $0xc9] sm:$0xff] %vm713_vm3, %v10991_v22  ;;  %v10998_v58 = vadd.f32 %v4196_v27, %v11960_v61  ;;  %v4785_v44 = vsel %vm4779_vm14, %v4767_v30, %v4596_v16 }
 0x578   : > { %11961 = vst [vmem:[#allocation36_spill] sm:$0xff] %v10998_v58  ;;  %4385 = vst.msk [vmem:[#allocation2 + $0xb1] sm:$0xff] %vm713_vm3, %v10998_v58 }
 0x579   : > { %v4428_v13 = vld [vmem:[#allocation2 + $0xc0] sm:$0xff] }
 0x57a   : > { %v4480_v39 = vrot.slane %v4428_v13, 1  ;;  %v4514_v40 = vrot.slane %v4428_v13, 2  ;;  %v4548_v45 = vrot.slane %v4428_v13, 3  ;;  %v4857_v55 = vrot.slane %v4428_v13, 4 }
 0x57b   : > { %v4425_v4 = vld [vmem:[#allocation2 + $0xa8] sm:$0xff] }
 0x57c   : > { %v4735_v38 = vsel %vm545_vm0, %v4428_v13, %v4480_v39  ;;  %v4891_v7 = vsel %vm545_vm0, %v4480_v39, %v4514_v40  ;;  %v4479_v23 = vrot.slane %v4425_v4, 1  ;;  %v4513_v19 = vrot.slane %v4425_v4, 2 }
 0x57d   : > { %v4429_v35 = vld [vmem:[#allocation2 + $0xc8] sm:$0xff]  ;;  %v4752_v6 = vsel %vm546_vm1, %v4735_v38, %v4514_v40  ;;  %v4908_v46 = vsel %vm546_vm1, %v4891_v7, %v4548_v45  ;;  %v4547_v52 = vrot.slane %v4425_v4, 3  ;;  %v4430_v30 = vld [vmem:[#allocation2 + $0xd0] sm:$0x3]  ;;  %v4856_v1 = vrot.slane %v4425_v4, 4 }
 0x57e   : > { %v4599_v27 = vrot.slane %v4429_v35, 4  ;;  %v4633_v57 = vrot.slane %v4429_v35, 5  ;;  %v4667_v9 = vrot.slane %v4429_v35, 6  ;;  %v4770_v41 = vsel %vm4761_vm2, %v4752_v6, %v4548_v45 }
 0x57f   : > { %v4925_v22 = vsel %vm4761_vm2, %v4908_v46, %v4857_v55  ;;  %v4426_v39 = vld [vmem:[#allocation2 + $0xb0] sm:$0xff]  ;;  %v4734_v21 = vsel %vm545_vm0, %v4425_v4, %v4479_v23  ;;  %v4701_v14 = vrot.slane %v4429_v35, 7  ;;  %v4890_v46 = vsel %vm545_vm0, %v4479_v23, %v4513_v19 }
 0x580   : > { %v4788_v40 = vsel %vm4779_vm14, %v4770_v41, %v4599_v27  ;;  %v4942_v13 = vsel %vm4779_vm14, %v4925_v22, %v4633_v57  ;;  %v4598_v38 = vrot.slane %v4426_v39, 4  ;;  %v4632_v58 = vrot.slane %v4426_v39, 5 }
 0x581   : > { %v4806_v16 = vsel %vm4797_vm15, %v4788_v40, %v4633_v57  ;;  %v4959_v7 = vsel %vm4797_vm15, %v4942_v13, %v4667_v9  ;;  %v4751_v55 = vsel %vm546_vm1, %v4734_v21, %v4513_v19  ;;  %v4666_v22 = vrot.slane %v4426_v39, 6 }
 0x582   : > { %v4823_v45 = vsel %vm1081_vm6, %v4806_v16, %v4667_v9  ;;  %v4976_v6 = vsel %vm1081_vm6, %v4959_v7, %v4701_v14  ;;  %v4769_v41 = vsel %vm4761_vm2, %v4751_v55, %v4547_v52  ;;  %v4907_v57 = vsel %vm546_vm1, %v4890_v46, %v4547_v52 }
 0x583   : > { %v11029_v27 = vsel %vm1000_vm5, %v4823_v45, %v4701_v14  ;;  %v5031_v9 = vrot.slane %v4430_v30, 1  ;;  %v4787_v13 = vsel %vm4779_vm14, %v4769_v41, %v4598_v38  ;;  %v11038_v21 = vsel %vm1000_vm5, %v4976_v6, %v4429_v35  ;;  %v4427_v41 = vld [vmem:[#allocation2 + $0xb8] sm:$0x3] }
 0x584   : > { %11962 = vst [vmem:[#allocation37_spill] sm:$0xff] %v11029_v27  ;;  %v7426_v40 = vpack.i.bf16 %v11029_v27, %v10968_v3  ;;  %v5030_v4 = vrot.slane %v11029_v27, 1  ;;  %v4803_v23 = vsel %vm4797_vm15, %v4785_v44, %v4630_v5  ;;  %v4805_v19 = vsel %vm4797_vm15, %v4787_v13, %v4632_v58 }
 0x585   : > { %v4924_v14 = vsel %vm4761_vm2, %v4907_v57, %v4856_v1  ;;  %v4822_v16 = vsel %vm1081_vm6, %v4805_v19, %v4666_v22  ;;  %v4939_v30 = vsel %vm4779_vm14, %v4922_v51, %v4630_v5  ;;  %v4700_v7 = vrot.slane %v4426_v39, 7  ;;  %v7543_v1 = vld [vmem:[%s11655_s7 + $0x10] ss:$0 sps:$4 sm:$0x33]   ;;  %v11069_v57 = vpop.permute.xlu0 %7377 }
 0x586   : > { %7427 = vrot.lane.b32.xlu1 %v7426_v40, %s11894_s24  ;;  %v11045_v52 = vsel %vm1000_vm5, %v5030_v4, %v5031_v9  ;;  %v4941_v38 = vsel %vm4779_vm14, %v4924_v14, %v4632_v58  ;;  %v7431_v45 = vpack.i.bf16 %v11038_v21, %v10962_v56  ;;  %v4820_v6 = vsel %vm1081_vm6, %v4803_v23, %v4664_v60  ;;  %v11075_v9 = vld [vmem:[%s11654_s6] ss:$0 sm:$0xff]  ;;  %v4421_v23 = vld [vmem:[#allocation2 + $0x88] sm:$0x3] }
 0x587   : > { %v7446_v35 = vpack.i.bf16 %v11045_v52, %v10973_v32  ;;  %v4958_v44 = vsel %vm4797_vm15, %v4941_v38, %v4666_v22  ;;  %v4698_v5 = vrot.slane %v11000_v31, 7  ;;  %v4839_v58 = vsel %vm1000_vm5, %v4822_v16, %v4700_v7  ;;  %5954 = vmatprep.subr.msk.bf16.mxu1 %vm546_vm1, %v7543_v1  ;;  %v7545_v38 = vld [vmem:[%s11655_s7] sm:$0xff]  }
 0x588   : > { %v4956_v32 = vsel %vm4797_vm15, %v4939_v30, %v4664_v60  ;;  %v5404_v51 = vsel %vm546_vm1, %v7543_v1, 0  ;;  %v4975_v55 = vsel %vm1081_vm6, %v4958_v44, %v4700_v7  ;;  %v5067_v4 = vrot.slane %v4839_v58, 1 }
 0x589   : > { %7447 = vrot.lane.b32.xlu0 %v7446_v35, %s11759_s15  ;;  %5937 = vmatpush3.bf16.msra.mxu1 %v5404_v51  ;;  %v4837_v56 = vsel %vm1000_vm5, %v4820_v6, %v4698_v5  ;;  %v4973_v22 = vsel %vm1081_vm6, %v4956_v32, %v4698_v5  ;;  %v4992_v60 = vsel %vm1000_vm5, %v4975_v55, %v4426_v39  ;;  %v5068_v30 = vrot.slane %v4427_v41, 1  ;;  %v7544_v39 = vld [vmem:[%s11655_s7 + $0x8] sm:$0xff]   ;;  %v11963_v35 = vld [vmem:[#allocation48_spill] sm:$0xff]  ;;  %v11099_v51 = vpop.permute.xlu0 %7382  ;;  %s11972_s15 = smov 20  }
 0x58a   : > { %7432 = vrot.lane.b32.xlu1 %v7431_v45, %s11761_s30  ;;  %v7436_v46 = vpack.i.bf16 %v4839_v58, %v4837_v56  ;;  %v5064_v19 = vrot.slane %v4837_v56, 1  ;;  %v4990_v16 = vsel %vm1000_vm5, %v4973_v22, %v11000_v31  ;;  %v5065_v6 = vrot.slane %v4421_v23, 1  ;;  %5938 = vmatprep.subr.bf16.mxu1 %v7544_v39  ;;  %v11965_v31 = vld [vmem:[#allocation49_spill] sm:$0xff]  ;;  %s11967_s30 = smov 16  }
 0x58b   : > { %v7441_v1 = vpack.i.bf16 %v4992_v60, %v4990_v16  ;;  %v5069_v5 = vsel %vm1000_vm5, %v5067_v4, %v5068_v30  ;;  %v11970_v4 = vld [vmem:[#allocation52_spill] sm:$0xff] }
 0x58c   : > { %v5066_v56 = vsel %vm1000_vm5, %v5064_v19, %v5065_v6 }
 0x58d   : > { %5939 = vmatpush3.bf16.msra.mxu1 %v7544_v39 }
 0x58e   : > { %7437 = vrot.lane.b32.xlu1 %v7436_v46, %s11895_s25  ;;  %5940 = vmatprep.subr.bf16.mxu1 %v7545_v38  ;;  %v11968_v46 = vld [vmem:[#allocation51_spill] sm:$0xff] }
 0x58f   : > { %v5922_v40 = vpop.f32.mrf.mxu0 }
 0x590   : > { %v4217_v13 = vadd.f32 %v11075_v9, %v5922_v40  ;;  %v7451_v40 = vpack.i.bf16 %v5069_v5, %v5066_v56 }
 0x591   : > { %v4208_v14 = vpop.f32.mrf.mxu0  ;;  %5941 = vmatpush3.bf16.msra.mxu1 %v7545_v38 }
 0x592   : > { %v11088_v7 = vadd.f32 %v4217_v13, %v11963_v35  ;;  %v4209_v44 = vadd.f32 %v11075_v9, %v4208_v14  ;;  %7442 = vrot.lane.b32.xlu1 %v7441_v1, %s11967_s30 }
 0x593   : > { %v5923_v45 = vpop.f32.mrf.mxu0 }
 0x594   : > { %11964 = vst [vmem:[#allocation15_spill] sm:$0xff] %v11088_v7  ;;  %4390 = vst.msk [vmem:[#allocation2 + $0xf1] sm:$0xff] %vm713_vm3, %v11088_v7  ;;  %v11095_v58 = vadd.f32 %v4209_v44, %v11965_v31  ;;  %v4220_v32 = vadd.f32 %v11075_v9, %v5923_v45 }
 0x595   : > { %v4211_v55 = vpop.f32.mrf.mxu0 }
 0x596   : > { %11966 = vst [vmem:[#allocation17_spill] sm:$0xff] %v11095_v58  ;;  %4388 = vst.msk [vmem:[#allocation2 + $0xd9] sm:$0xff] %vm713_vm3, %v11095_v58  ;;  %v11105_v22 = vadd.f32 %v4220_v32, %v11968_v46  ;;  %v4212_v41 = vadd.f32 %v11075_v9, %v4211_v55  ;;  %7452 = vrot.lane.b32.xlu1 %v7451_v40, %s11972_s15  ;;  %v11974_v58 = vld [vmem:[#allocation50_spill] sm:$0xff] }
 0x598   : > { %11969 = vst [vmem:[#allocation18_spill] sm:$0xff] %v11105_v22  ;;  %4391 = vst.msk [vmem:[#allocation2 + $0xf9] sm:$0xff] %vm713_vm3, %v11105_v22  ;;  %v11111_v60 = vadd.f32 %v4212_v41, %v11970_v4 }
 0x59a   : > { %11971 = vst [vmem:[#allocation21_spill] sm:$0xff] %v11111_v60  ;;  %v11114_v13 = vpop.permute.xlu0 %7387  ;;  %4389 = vst.msk [vmem:[#allocation2 + $0xe1] sm:$0xff] %vm713_vm3, %v11111_v60 }
 0x59b   : > { %v4434_v23 = vld [vmem:[#allocation2 + $0xf0] sm:$0xff] }
 0x59c   : > { %v4482_v19 = vrot.slane %v4434_v23, 1  ;;  %v4516_v14 = vrot.slane %v4434_v23, 2  ;;  %v4550_v16 = vrot.slane %v4434_v23, 3  ;;  %v4859_v39 = vrot.slane %v4434_v23, 4 }
 0x59e   : > { %v11118_v30 = vpop.permute.xlu0 %7392  ;;  %v4893_v44 = vsel %vm545_vm0, %v4482_v19, %v4516_v14  ;;  %v4737_v1 = vsel %vm545_vm0, %v4434_v23, %v4482_v19 }
 0x59f   : > { %v4435_v45 = vld [vmem:[#allocation2 + $0xf8] sm:$0xff]  ;;  %v4910_v6 = vsel %vm546_vm1, %v4893_v44, %v4550_v16  ;;  %v4754_v38 = vsel %vm546_vm1, %v4737_v1, %v4516_v14  ;;  %v4436_v44 = vld [vmem:[#allocation2 + $0x100] sm:$0x3] }
 0x5a0   : > { %v4635_v5 = vrot.slane %v4435_v45, 5  ;;  %v4669_v32 = vrot.slane %v4435_v45, 6  ;;  %v4927_v55 = vsel %vm4761_vm2, %v4910_v6, %v4859_v39  ;;  %v4601_v56 = vrot.slane %v4435_v45, 4 }
 0x5a1   : > { %v4772_v41 = vsel %vm4761_vm2, %v4754_v38, %v4550_v16  ;;  %v4703_v22 = vrot.slane %v4435_v45, 7 }
 0x5a2   : > { %v7398_v40 = vpop.permute.xlu0 %7397  ;;  %v4944_v7 = vsel %vm4779_vm14, %v4927_v55, %v4635_v5  ;;  %v4790_v23 = vsel %vm4779_vm14, %v4772_v41, %v4601_v56  ;;  %v5034_v55 = vrot.slane %v4436_v44, 1  ;;  %v7379_v56 = vunpack.i.l.bf16 %v11069_v57 }
 0x5a3   : > { %v4961_v60 = vsel %vm4797_vm15, %v4944_v7, %v4669_v32  ;;  %v4808_v14 = vsel %vm4797_vm15, %v4790_v23, %v4635_v5  ;;  %v7384_v5 = vunpack.i.l.bf16 %v11099_v51  ;;  %v7400_v41 = vunpack.i.h.bf16 %v7398_v40 }
 0x5a4   : > { %v4978_v19 = vsel %vm1081_vm6, %v4961_v60, %v4703_v22  ;;  %v4825_v39 = vsel %vm1081_vm6, %v4808_v14, %v4669_v32  ;;  %v7380_v60 = vunpack.i.h.bf16 %v11069_v57  ;;  %v7399_v23 = vunpack.i.l.bf16 %v7398_v40  ;;  %v11160_v40 = vld [vmem:[#allocation2 + $0xd8] sm:$0xff] }
 0x5a5   : > { %v11132_v1 = vsel %vm1000_vm5, %v4978_v19, %v4435_v45  ;;  %v11138_v38 = vsel %vm1000_vm5, %v4825_v39, %v4703_v22  ;;  %v7385_v45 = vunpack.i.h.bf16 %v11099_v51  ;;  %v5296_v57 = vsel %vm713_vm3, %v10660_v50, %v7379_v56 }
 0x5a6   : > { %v7403_v6 = vpop.permute.xlu0 %7402  ;;  %v7456_v16 = vpack.i.bf16 %v11132_v1, %v11038_v21  ;;  %11973 = vst [vmem:[#allocation26_spill] sm:$0xff] %v11138_v38  ;;  %v5033_v7 = vrot.slane %v11138_v38, 1  ;;  %v5297_v14 = vsel %vm713_vm3, %v10728_v33, %v7380_v60  ;;  %v5304_v39 = vsel %vm1988_vm4, %v5296_v57, %v7384_v5 }
 0x5a7   : > { %v7405_v19 = vunpack.i.h.bf16 %v7403_v6  ;;  %v7404_v44 = vunpack.i.l.bf16 %v7403_v6  ;;  %v5305_v51 = vsel %vm1988_vm4, %v5297_v14, %v7385_v45  ;;  %v5312_v50 = vsel %vm2021_vm7, %v5304_v39, %v7399_v23 }
 0x5a8   : > { %7457 = vrot.lane.b32.xlu1 %v7456_v16, %s11896_s29  ;;  %v11147_v32 = vsel %vm1000_vm5, %v5033_v7, %v5034_v55  ;;  %v7390_v16 = vunpack.i.h.bf16 %v11114_v13  ;;  %v5313_v6 = vsel %vm2021_vm7, %v5305_v51, %v7400_v41  ;;  %v7395_v33 = vunpack.i.h.bf16 %v11118_v30 }
 0x5a9   : > { %v7461_v22 = vpack.i.bf16 %v11147_v32, %v11045_v52  ;;  %v7389_v52 = vunpack.i.l.bf16 %v11114_v13  ;;  %v7394_v60 = vunpack.i.l.bf16 %v11118_v30  ;;  %v5320_v5 = vsel %vm2054_vm8, %v5312_v50, %v7404_v44 }
 0x5aa   : > { %v7408_v21 = vpop.permute.xlu0 %7407  ;;  %v4481_v41 = vrot.slane %v11160_v40, 1 }
 0x5ab   : > { %7462 = vrot.lane.b32.xlu0 %v7461_v22, %s11897_s14  ;;  %v5321_v22 = vsel %vm2054_vm8, %v5313_v6, %v7405_v19  ;;  %v7410_v51 = vunpack.i.h.bf16 %v7408_v21  ;;  %v7409_v39 = vunpack.i.l.bf16 %v7408_v21  ;;  %v4515_v21 = vrot.slane %v11160_v40, 2 }
 0x5ae   : > { %v7413_v7 = vpop.permute.xlu0 %7412 }
 0x5af   : > { %v7415_v55 = vunpack.i.h.bf16 %v7413_v7  ;;  %v7414_v56 = vunpack.i.l.bf16 %v7413_v7  ;;  %v5926_v45 = vpop.f32.mrf.mxu0 }
 0x5b0   : > { %v4233_v13 = vadd.f32 %v11075_v9, %v5926_v45 }
 0x5b1   : > { %v5329_v57 = vsel %vm2087_vm9, %v5321_v22, %v7415_v55  ;;  %v5328_v14 = vsel %vm2087_vm9, %v5320_v5, %v7414_v56  ;;  %v4224_v23 = vpop.f32.mrf.mxu0  ;;  %v11978_v22 = vld [vmem:[#allocation11_spill] sm:$0xff] }
 0x5b2   : > { %v5337_v7 = vsel %vm2120_vm10, %v5329_v57, %v7390_v16  ;;  %v5336_v30 = vsel %vm2120_vm10, %v5328_v14, %v7389_v52  ;;  %v11175_v54 = vadd.f32 %v4233_v13, %v11974_v58  ;;  %v4225_v19 = vadd.f32 %v11075_v9, %v4224_v23  ;;  %v11976_v16 = vld [vmem:[#allocation10_spill] sm:$0xff] }
 0x5b3   : > { %v5344_v44 = vsel %vm2153_vm11, %v5336_v30, %v7394_v60  ;;  %v5345_v6 = vsel %vm2153_vm11, %v5337_v7, %v7395_v33  ;;  %v5927_v50 = vpop.f32.mrf.mxu0  ;;  %v4736_v60 = vsel %vm545_vm0, %v11160_v40, %v4481_v41  ;;  %v11198_v14 = vld [vmem:[#allocation2 + $0xe0] sm:$0xff]  ;;  %v4549_v7 = vrot.slane %v11160_v40, 3 }
 0x5b4   : > { %11975 = vst [vmem:[#allocation28_spill] sm:$0xff] %v11175_v54  ;;  %v5352_v55 = vsel %vm2186_vm12, %v5344_v44, %v7409_v39  ;;  %v5353_v56 = vsel %vm2186_vm12, %v5345_v6, %v7410_v51  ;;  %4394 = vst.msk [vmem:[#allocation2 + $0x121] sm:$0xff] %vm713_vm3, %v11175_v54  ;;  %v11186_v52 = vadd.f32 %v4225_v19, %v11976_v16  ;;  %v11980_v51 = vld [vmem:[#allocation12_spill] sm:$0xff]  ;;  %v4600_v30 = vrot.slane %v11198_v14, 4 }
 0x5b5   : > { %v4236_v45 = vadd.f32 %v11075_v9, %v5927_v50  ;;  %v5360_v5 = vpack.c.bf16 %v5353_v56, %v5352_v55  ;;  %v4227_v33 = vpop.f32.mrf.mxu0  ;;  %v4753_v23 = vsel %vm546_vm1, %v4736_v60, %v4515_v21  ;;  %v4892_v19 = vsel %vm545_vm0, %v4481_v41, %v4515_v21 }
 0x5b6   : > { %11977 = vst [vmem:[#allocation29_spill] sm:$0xff] %v11186_v52  ;;  %4392 = vst.msk [vmem:[#allocation2 + $0x109] sm:$0xff] %vm713_vm3, %v11186_v52  ;;  %v4228_v57 = vadd.f32 %v11075_v9, %v4227_v33  ;;  %v4771_v44 = vsel %vm4761_vm2, %v4753_v23, %v4549_v7  ;;  %v4634_v60 = vrot.slane %v11198_v14, 5 }
 0x5b7   : > { %v11194_v13 = vadd.f32 %v4236_v45, %v11978_v22  ;;  %5942 = vmatprep.mubr.msk.bf16.mxu1 %vm2262_vm13, %v5360_v5  ;;  %v4909_v45 = vsel %vm546_vm1, %v4892_v19, %v4549_v7  ;;  %v4789_v33 = vsel %vm4779_vm14, %v4771_v44, %v4600_v30 }
 0x5b8   : > { %v11204_v39 = vadd.f32 %v4228_v57, %v11980_v51  ;;  %v4858_v57 = vrot.slane %v11160_v40, 4 }
 0x5b9   : > { %11979 = vst [vmem:[#allocation35_spill] sm:$0xff] %v11194_v13  ;;  %4395 = vst.msk [vmem:[#allocation2 + $0x129] sm:$0xff] %vm713_vm3, %v11194_v13 }
 0x5ba   : > { %11981 = vst [vmem:[#allocation38_spill] sm:$0xff] %v11204_v39  ;;  %4393 = vst.msk [vmem:[#allocation2 + $0x111] sm:$0xff] %vm713_vm3, %v11204_v39  ;;  %v4926_v7 = vsel %vm4761_vm2, %v4909_v45, %v4858_v57 }
 0x5bb   : > { %v4440_v6 = vld [vmem:[#allocation2 + $0x120] sm:$0xff] }
 0x5bc   : > { %v4484_v50 = vrot.slane %v4440_v6, 1  ;;  %v4518_v55 = vrot.slane %v4440_v6, 2  ;;  %v4552_v56 = vrot.slane %v4440_v6, 3  ;;  %v4861_v52 = vrot.slane %v4440_v6, 4 }
 0x5bd   : > { %v4437_v5 = vld [vmem:[#allocation2 + $0x108] sm:$0xff] }
 0x5be   : > { %v4739_v41 = vsel %vm545_vm0, %v4440_v6, %v4484_v50  ;;  %v4895_v21 = vsel %vm545_vm0, %v4484_v50, %v4518_v55  ;;  %v4483_v13 = vrot.slane %v4437_v5, 1  ;;  %v4517_v54 = vrot.slane %v4437_v5, 2 }
 0x5bf   : > { %v4756_v39 = vsel %vm546_vm1, %v4739_v41, %v4518_v55  ;;  %v4912_v12 = vsel %vm546_vm1, %v4895_v21, %v4552_v56  ;;  %v4551_v30 = vrot.slane %v4437_v5, 3  ;;  %v4860_v11 = vrot.slane %v4437_v5, 4 }
 0x5c0   : > { %v4441_v23 = vld [vmem:[#allocation2 + $0x128] sm:$0xff]  ;;  %v4774_v40 = vsel %vm4761_vm2, %v4756_v39, %v4552_v56  ;;  %v4929_v44 = vsel %vm4761_vm2, %v4912_v12, %v4861_v52  ;;  %v4738_v50 = vsel %vm545_vm0, %v4437_v5, %v4483_v13  ;;  %v4894_v63 = vsel %vm545_vm0, %v4483_v13, %v4517_v54 }
 0x5c1   : > { %v4603_v19 = vrot.slane %v4441_v23, 4  ;;  %v4637_v20 = vrot.slane %v4441_v23, 5  ;;  %v4671_v2 = vrot.slane %v4441_v23, 6  ;;  %v4438_v59 = vld [vmem:[#allocation2 + $0x110] sm:$0xff]  ;;  %v4705_v53 = vrot.slane %v4441_v23, 7 }
 0x5c2   : > { %v4602_v41 = vrot.slane %v4438_v59, 4  ;;  %v4636_v21 = vrot.slane %v4438_v59, 5  ;;  %v4755_v52 = vsel %vm546_vm1, %v4738_v50, %v4517_v54  ;;  %v4911_v13 = vsel %vm546_vm1, %v4894_v63, %v4551_v30 }
 0x5c3   : > { %v4792_v6 = vsel %vm4779_vm14, %v4774_v40, %v4603_v19  ;;  %v4946_v55 = vsel %vm4779_vm14, %v4929_v44, %v4637_v20  ;;  %v4670_v19 = vrot.slane %v4438_v59, 6  ;;  %v4773_v40 = vsel %vm4761_vm2, %v4755_v52, %v4551_v30  ;;  %v11984_v52 = vld [vmem:[#allocation54_spill] sm:$0xff] }
 0x5c4   : > { %v4810_v45 = vsel %vm4797_vm15, %v4792_v6, %v4637_v20  ;;  %v4963_v57 = vsel %vm4797_vm15, %v4946_v55, %v4671_v2  ;;  %v4928_v20 = vsel %vm4761_vm2, %v4911_v13, %v4860_v11  ;;  %v4668_v5 = vrot.slane %v11198_v14, 6 }
 0x5c5   : > { %v4827_v39 = vsel %vm1081_vm6, %v4810_v45, %v4671_v2  ;;  %v4980_v12 = vsel %vm1081_vm6, %v4963_v57, %v4705_v53  ;;  %v4791_v2 = vsel %vm4779_vm14, %v4773_v40, %v4602_v41  ;;  %v4807_v63 = vsel %vm4797_vm15, %v4789_v33, %v4634_v60 }
 0x5c6   : > { %v11234_v56 = vsel %vm1000_vm5, %v4827_v39, %v4705_v53  ;;  %v11243_v6 = vsel %vm1000_vm5, %v4980_v12, %v4441_v23  ;;  %v4809_v53 = vsel %vm4797_vm15, %v4791_v2, %v4636_v21  ;;  %v4945_v54 = vsel %vm4779_vm14, %v4928_v20, %v4636_v21  ;;  %v4439_v20 = vld [vmem:[#allocation2 + $0x118] sm:$0x3] }
 0x5c7   : > { %11982 = vst [vmem:[#allocation39_spill] sm:$0xff] %v11234_v56  ;;  %v7466_v44 = vpack.i.bf16 %v11234_v56, %v11138_v38  ;;  %v4826_v11 = vsel %vm1081_vm6, %v4809_v53, %v4670_v19  ;;  %v4943_v30 = vsel %vm4779_vm14, %v4926_v7, %v4634_v60  ;;  %v4704_v50 = vrot.slane %v4438_v59, 7 }
 0x5c8   : > { %v4962_v55 = vsel %vm4797_vm15, %v4945_v54, %v4670_v19  ;;  %v7471_v41 = vpack.i.bf16 %v11243_v6, %v11132_v1  ;;  %v4824_v23 = vsel %vm1081_vm6, %v4807_v63, %v4668_v5  ;;  %v4702_v33 = vrot.slane %v11198_v14, 7  ;;  %v11986_v63 = vld [vmem:[#allocation13_spill] sm:$0xff] }
 0x5c9   : > { %7467 = vrot.lane.b32.xlu0 %v7466_v44, %s11894_s24  ;;  %v4843_v57 = vsel %vm1000_vm5, %v4826_v11, %v4704_v50  ;;  %v4960_v21 = vsel %vm4797_vm15, %v4943_v30, %v4668_v5  ;;  %v4979_v60 = vsel %vm1081_vm6, %v4962_v55, %v4704_v50  ;;  %v4433_v11 = vld [vmem:[#allocation2 + $0xe8] sm:$0x3] }
 0x5ca   : > { %v4841_v12 = vsel %vm1000_vm5, %v4824_v23, %v4702_v33  ;;  %v4977_v40 = vsel %vm1081_vm6, %v4960_v21, %v4702_v33  ;;  %v5073_v5 = vrot.slane %v4843_v57, 1  ;;  %v4996_v2 = vsel %vm1000_vm5, %v4979_v60, %v4438_v59  ;;  %v4442_v23 = vld [vmem:[#allocation2 + $0x130] sm:$0x3] }
 0x5cb   : > { %v5930_v45 = vpop.f32.mrf.mxu0  ;;  %v7476_v19 = vpack.i.bf16 %v4843_v57, %v4841_v12  ;;  %v5070_v30 = vrot.slane %v4841_v12, 1  ;;  %v4994_v55 = vsel %vm1000_vm5, %v4977_v40, %v11198_v14  ;;  %v5036_v59 = vrot.slane %v11234_v56, 1  ;;  %v11990_v14 = vld [vmem:[#allocation43_spill] sm:$0xff] }
 0x5cc   : > { %v4249_v39 = vadd.f32 %v11075_v9, %v5930_v45  ;;  %v11988_v45 = vld [vmem:[#allocation53_spill] sm:$0xff]  ;;  %v7481_v21 = vpack.i.bf16 %v4996_v2, %v4994_v55  ;;  %v5037_v12 = vrot.slane %v4442_v23, 1  ;;  %v11992_v55 = vld [vmem:[#allocation42_spill] sm:$0xff] }
 0x5cd   : > { %7472 = vrot.lane.b32.xlu0 %v7471_v41, %s11983_s16  ;;  %v4240_v7 = vpop.f32.mrf.mxu0  ;;  %v5074_v41 = vrot.slane %v4439_v20, 1 }
 0x5ce   : > { %v11263_v1 = vadd.f32 %v4249_v39, %v11984_v52  ;;  %v4241_v13 = vadd.f32 %v11075_v9, %v4240_v7  ;;  %v5071_v39 = vrot.slane %v4433_v11, 1  ;;  %v11295_v40 = vsel %vm1000_vm5, %v5036_v59, %v5037_v12 }
 0x5cf   : > { %v5931_v44 = vpop.f32.mrf.mxu0  ;;  %v5075_v60 = vsel %vm1000_vm5, %v5073_v5, %v5074_v41 }
 0x5d0   : > { %11985 = vst [vmem:[#allocation40_spill] sm:$0xff] %v11263_v1  ;;  %4398 = vst.msk [vmem:[#allocation2 + $0x151] sm:$0xff] %vm713_vm3, %v11263_v1  ;;  %v11271_v53 = vadd.f32 %v4241_v13, %v11986_v63  ;;  %v4252_v54 = vadd.f32 %v11075_v9, %v5931_v44  ;;  %v5072_v13 = vsel %vm1000_vm5, %v5070_v30, %v5071_v39  ;;  %v11999_v1 = vld [vmem:[#allocation19_spill] sm:$0xff] }
 0x5d1   : > { %7477 = vrot.lane.b32.xlu0 %v7476_v19, %s11895_s25  ;;  %v4243_v50 = vpop.f32.mrf.mxu0  ;;  %v7486_v19 = vpack.i.bf16 %v5075_v60, %v5072_v13  ;;  %v7491_v30 = vpack.i.bf16 %v11295_v40, %v11147_v32  ;;  %v11994_v32 = vld [vmem:[#allocation14_spill] sm:$0xff] }
 0x5d2   : > { %11987 = vst [vmem:[#allocation41_spill] sm:$0xff] %v11271_v53  ;;  %4396 = vst.msk [vmem:[#allocation2 + $0x139] sm:$0xff] %vm713_vm3, %v11271_v53  ;;  %v11281_v33 = vadd.f32 %v4252_v54, %v11988_v45  ;;  %v4244_v57 = vadd.f32 %v11075_v9, %v4243_v50 }
 0x5d4   : > { %11989 = vst [vmem:[#allocation44_spill] sm:$0xff] %v11281_v33  ;;  %4399 = vst.msk [vmem:[#allocation2 + $0x159] sm:$0xff] %vm713_vm3, %v11281_v33  ;;  %v11288_v7 = vadd.f32 %v4244_v57, %v11990_v14 }
 0x5d5   : > { %7482 = vrot.lane.b32.xlu0 %v7481_v21, %s11967_s30 }
 0x5d6   : > { %11991 = vst [vmem:[#allocation46_spill] sm:$0xff] %v11288_v7  ;;  %4397 = vst.msk [vmem:[#allocation2 + $0x141] sm:$0xff] %vm713_vm3, %v11288_v7 }
 0x5d7   : > { %v4446_v44 = vld [vmem:[#allocation2 + $0x150] sm:$0xff] }
 0x5d8   : > { %v5934_v20 = vpop.f32.mrf.mxu0  ;;  %v4486_v2 = vrot.slane %v4446_v44, 1  ;;  %v4520_v54 = vrot.slane %v4446_v44, 2  ;;  %v4554_v11 = vrot.slane %v4446_v44, 3  ;;  %v4863_v60 = vrot.slane %v4446_v44, 4 }
 0x5d9   : > { %v4265_v5 = vadd.f32 %v11075_v9, %v5934_v20  ;;  %7487 = vrot.lane.b32.xlu0 %v7486_v19, %s11972_s15  ;;  %v11333_v7 = vld [vmem:[#allocation2 + $0x138] sm:$0xff] }
 0x5da   : > { %v4256_v50 = vpop.f32.mrf.mxu0  ;;  %v4897_v59 = vsel %vm545_vm0, %v4486_v2, %v4520_v54  ;;  %v4741_v57 = vsel %vm545_vm0, %v4446_v44, %v4486_v2 }
 0x5db   : > { %v11302_v41 = vadd.f32 %v4265_v5, %v11992_v55  ;;  %v4257_v23 = vadd.f32 %v11075_v9, %v4256_v50  ;;  %v4447_v39 = vld [vmem:[#allocation2 + $0x158] sm:$0xff]  ;;  %v4914_v12 = vsel %vm546_vm1, %v4897_v59, %v4554_v11  ;;  %v4758_v13 = vsel %vm546_vm1, %v4741_v57, %v4520_v54  ;;  %v11997_v54 = vld [vmem:[#allocation16_spill] sm:$0xff] }
 0x5dc   : > { %v5935_v21 = vpop.f32.mrf.mxu0  ;;  %v4639_v5 = vrot.slane %v4447_v39, 5  ;;  %v4673_v50 = vrot.slane %v4447_v39, 6  ;;  %v4707_v33 = vrot.slane %v4447_v39, 7  ;;  %v4931_v44 = vsel %vm4761_vm2, %v4914_v12, %v4863_v60 }
 0x5dd   : > { %11993 = vst [vmem:[#allocation47_spill] sm:$0xff] %v11302_v41  ;;  %4402 = vst.msk [vmem:[#allocation2 + $0x181] sm:$0xff] %vm713_vm3, %v11302_v41  ;;  %v11312_v19 = vadd.f32 %v4257_v23, %v11994_v32  ;;  %v4268_v20 = vadd.f32 %v11075_v9, %v5935_v21  ;;  %7492 = vrot.lane.b32.xlu0 %v7491_v30, %s11996_s12  ;;  %v4605_v41 = vrot.slane %v4447_v39, 4 }
 0x5de   : > { %v4259_v2 = vpop.f32.mrf.mxu0  ;;  %v4948_v23 = vsel %vm4779_vm14, %v4931_v44, %v4639_v5  ;;  %v4776_v30 = vsel %vm4761_vm2, %v4758_v13, %v4554_v11  ;;  %v11344_v44 = vld [vmem:[#allocation2 + $0x140] sm:$0xff] }
 0x5df   : > { %11995 = vst [vmem:[#allocation45_spill] sm:$0xff] %v11312_v19  ;;  %4400 = vst.msk [vmem:[#allocation2 + $0x169] sm:$0xff] %vm713_vm3, %v11312_v19  ;;  %v11320_v59 = vadd.f32 %v4268_v20, %v11997_v54  ;;  %v4260_v57 = vadd.f32 %v11075_v9, %v4259_v2  ;;  %v4965_v21 = vsel %vm4797_vm15, %v4948_v23, %v4673_v50  ;;  %v4448_v19 = vld [vmem:[#allocation2 + $0x160] sm:$0x3] }
 0x5e0   : > { %v4982_v12 = vsel %vm1081_vm6, %v4965_v21, %v4707_v33  ;;  %v4794_v20 = vsel %vm4779_vm14, %v4776_v30, %v4605_v41  ;;  %v5040_v41 = vrot.slane %v4448_v19, 1 }
 0x5e1   : > { %11998 = vst [vmem:[#allocation48_spill] sm:$0xff] %v11320_v59  ;;  %4403 = vst.msk [vmem:[#allocation2 + $0x189] sm:$0xff] %vm713_vm3, %v11320_v59  ;;  %v11329_v60 = vadd.f32 %v4260_v57, %v11999_v1  ;;  %v11336_v9 = vsel %vm1000_vm5, %v4982_v12, %v4447_v39  ;;  %v4812_v2 = vsel %vm4797_vm15, %v4794_v20, %v4639_v5  ;;  %v4485_v39 = vrot.slane %v11333_v7, 1 }
 0x5e2   : > { %v7496_v11 = vpack.i.bf16 %v11336_v9, %v11243_v6  ;;  %v4829_v13 = vsel %vm1081_vm6, %v4812_v2, %v4673_v50  ;;  %v4519_v6 = vrot.slane %v11333_v7, 2  ;;  %v4553_v50 = vrot.slane %v11333_v7, 3 }
 0x5e3   : > { %12000 = vst [vmem:[#allocation49_spill] sm:$0xff] %v11329_v60  ;;  %4401 = vst.msk [vmem:[#allocation2 + $0x171] sm:$0xff] %vm713_vm3, %v11329_v60  ;;  %v11347_v57 = vsel %vm1000_vm5, %v4829_v13, %v4707_v33  ;;  %v4604_v2 = vrot.slane %v11344_v44, 4  ;;  %v4638_v33 = vrot.slane %v11344_v44, 5 }
 0x5e4   : > { %v4452_v23 = vld [vmem:[#allocation2 + $0x180] sm:$0xff]  ;;  %7497 = vrot.lane.b32.xlu1 %v7496_v11, %s11896_s29  ;;  %v5039_v5 = vrot.slane %v11347_v57, 1 }
 0x5e5   : > { %v4488_v21 = vrot.slane %v4452_v23, 1  ;;  %v4522_v30 = vrot.slane %v4452_v23, 2  ;;  %v4556_v12 = vrot.slane %v4452_v23, 3  ;;  %v4865_v54 = vrot.slane %v4452_v23, 4 }
 0x5e6   : > { %v4449_v20 = vld [vmem:[#allocation2 + $0x168] sm:$0xff]  ;;  %v11357_v19 = vsel %vm1000_vm5, %v5039_v5, %v5040_v41 }
 0x5e7   : > { %v4743_v13 = vsel %vm545_vm0, %v4452_v23, %v4488_v21  ;;  %v4899_v11 = vsel %vm545_vm0, %v4488_v21, %v4522_v30  ;;  %v4487_v59 = vrot.slane %v4449_v20, 1  ;;  %v7501_v60 = vpack.i.bf16 %v11357_v19, %v11295_v40 }
 0x5e8   : > { %v4453_v53 = vld [vmem:[#allocation2 + $0x188] sm:$0xff]  ;;  %v4760_v56 = vsel %vm546_vm1, %v4743_v13, %v4522_v30  ;;  %v4916_v55 = vsel %vm546_vm1, %v4899_v11, %v4556_v12  ;;  %v4521_v52 = vrot.slane %v4449_v20, 2  ;;  %v4740_v40 = vsel %vm545_vm0, %v11333_v7, %v4485_v39 }
 0x5e9   : > { %v4607_v1 = vrot.slane %v4453_v53, 4  ;;  %v4641_v32 = vrot.slane %v4453_v53, 5  ;;  %v4675_v45 = vrot.slane %v4453_v53, 6  ;;  %7502 = vrot.lane.b32.xlu1 %v7501_v60, %s11897_s14  ;;  %v4778_v41 = vsel %vm4761_vm2, %v4760_v56, %v4556_v12 }
 0x5ea   : > { %v4933_v5 = vsel %vm4761_vm2, %v4916_v55, %v4865_v54  ;;  %v4450_v21 = vld [vmem:[#allocation2 + $0x170] sm:$0xff]  ;;  %v4742_v14 = vsel %vm545_vm0, %v4449_v20, %v4487_v59  ;;  %v4709_v30 = vrot.slane %v4453_v53, 7  ;;  %v4555_v11 = vrot.slane %v4449_v20, 3 }
 0x5eb   : > { %v4796_v23 = vsel %vm4779_vm14, %v4778_v41, %v4607_v1  ;;  %v4950_v13 = vsel %vm4779_vm14, %v4933_v5, %v4641_v32  ;;  %v4606_v22 = vrot.slane %v4450_v21, 4  ;;  %v4640_v56 = vrot.slane %v4450_v21, 5 }
 0x5ec   : > { %v4814_v63 = vsel %vm4797_vm15, %v4796_v23, %v4641_v32  ;;  %v4967_v60 = vsel %vm4797_vm15, %v4950_v13, %v4675_v45  ;;  %v4757_v12 = vsel %vm546_vm1, %v4740_v40, %v4519_v6  ;;  %v4759_v27 = vsel %vm546_vm1, %v4742_v14, %v4521_v52 }
 0x5ed   : > { %v4831_v55 = vsel %vm1081_vm6, %v4814_v63, %v4675_v45  ;;  %v4984_v54 = vsel %vm1081_vm6, %v4967_v60, %v4709_v30  ;;  %v4775_v1 = vsel %vm4761_vm2, %v4757_v12, %v4553_v50  ;;  %v4777_v41 = vsel %vm4761_vm2, %v4759_v27, %v4555_v11 }
 0x5ee   : > { %v4848_v38 = vsel %vm1000_vm5, %v4831_v55, %v4709_v30  ;;  %v4672_v5 = vrot.slane %v11344_v44, 6  ;;  %v4674_v23 = vrot.slane %v4450_v21, 6  ;;  %v4793_v13 = vsel %vm4779_vm14, %v4775_v1, %v4604_v2  ;;  %v11389_v30 = vpop.permute.xlu1 %7417 }
 0x5ef   : > { %v7506_v32 = vpack.i.bf16 %v4848_v38, %v11347_v57  ;;  %v5001_v63 = vsel %vm1000_vm5, %v4984_v54, %v4453_v53  ;;  %v4795_v45 = vsel %vm4779_vm14, %v4777_v41, %v4606_v22  ;;  %v4811_v40 = vsel %vm4797_vm15, %v4793_v13, %v4638_v33 }
 0x5f0   : > { %v4862_v14 = vrot.slane %v11333_v7, 4  ;;  %v4813_v27 = vsel %vm4797_vm15, %v4795_v45, %v4640_v56  ;;  %v4864_v60 = vrot.slane %v4449_v20, 4  ;;  %v4896_v55 = vsel %vm545_vm0, %v4485_v39, %v4519_v6 }
 0x5f1   : > { %7507 = vrot.lane.b32.xlu1 %v7506_v32, %s11894_s24  ;;  %v4898_v12 = vsel %vm545_vm0, %v4487_v59, %v4521_v52  ;;  %v4708_v2 = vrot.slane %v4450_v21, 7  ;;  %v4830_v53 = vsel %vm1081_vm6, %v4813_v27, %v4674_v23  ;;  %v4913_v22 = vsel %vm546_vm1, %v4896_v55, %v4553_v50  ;;  %s11794_s24 = sand.u32 1, %s7719_s18  }
 0x5f2   : > { %v4915_v54 = vsel %vm546_vm1, %v4898_v12, %v4555_v11  ;;  %v7511_v7 = vpack.i.bf16 %v5001_v63, %v11336_v9  ;;  %v4828_v1 = vsel %vm1081_vm6, %v4811_v40, %v4672_v5  ;;  %v4930_v41 = vsel %vm4761_vm2, %v4913_v22, %v4862_v14  ;;  %v7423_v13 = vpop.permute.xlu1 %7422  ;;  %v4451_v40 = vld [vmem:[#allocation2 + $0x178] sm:$0x3]  ;;  %v4454_v12 = vld [vmem:[#allocation2 + $0x190] sm:$0x3] }
 0x5f3   : > { %v4932_v32 = vsel %vm4761_vm2, %v4915_v54, %v4864_v60  ;;  %v4706_v20 = vrot.slane %v11344_v44, 7  ;;  %v4847_v39 = vsel %vm1000_vm5, %v4830_v53, %v4708_v2  ;;  %v4947_v52 = vsel %vm4779_vm14, %v4930_v41, %v4638_v33 }
 0x5f4   : > { %v4949_v59 = vsel %vm4779_vm14, %v4932_v32, %v4640_v56  ;;  %v4964_v6 = vsel %vm4797_vm15, %v4947_v52, %v4672_v5  ;;  %v5079_v14 = vrot.slane %v4847_v39, 1  ;;  %v4445_v56 = vld [vmem:[#allocation2 + $0x148] sm:$0x3]  ;;  %v5085_v54 = vrot.slane %v4454_v12, 1 }
 0x5f5   : > { %7512 = vrot.lane.b32.xlu1 %v7511_v7, %s11983_s16  ;;  %v4966_v9 = vsel %vm4797_vm15, %v4949_v59, %v4674_v23  ;;  %v4845_v50 = vsel %vm1000_vm5, %v4828_v1, %v4706_v20  ;;  %v4981_v45 = vsel %vm1081_vm6, %v4964_v6, %v4706_v20  ;;  %v5080_v23 = vrot.slane %v4451_v40, 1 }
 0x5f6   : > { %v4983_v11 = vsel %vm1081_vm6, %v4966_v9, %v4708_v2  ;;  %v7516_v63 = vpack.i.bf16 %v4847_v39, %v4845_v50  ;;  %v5076_v27 = vrot.slane %v4845_v50, 1  ;;  %v4998_v5 = vsel %vm1000_vm5, %v4981_v45, %v11344_v44 }
 0x5f7   : > { %v5000_v33 = vsel %vm1000_vm5, %v4983_v11, %v4450_v21  ;;  %v5084_v2 = vrot.slane %v4848_v38, 1  ;;  %v5077_v53 = vrot.slane %v4445_v56, 1  ;;  %v5081_v22 = vsel %vm1000_vm5, %v5079_v14, %v5080_v23 }
 0x5f8   : > { %v7428_v60 = vpop.permute.xlu1 %7427  ;;  %v7521_v55 = vpack.i.bf16 %v5000_v33, %v4998_v5  ;;  %v7420_v41 = vunpack.i.h.bf16 %v11389_v30  ;;  %v7419_v32 = vunpack.i.l.bf16 %v11389_v30  ;;  %v7425_v20 = vunpack.i.h.bf16 %v7423_v13 }
 0x5f9   : > { %7517 = vrot.lane.b32.xlu1 %v7516_v63, %s11895_s25  ;;  %v5078_v21 = vsel %vm1000_vm5, %v5076_v27, %v5077_v53  ;;  %v5086_v44 = vsel %vm1000_vm5, %v5084_v2, %v5085_v54  ;;  %v7424_v39 = vunpack.i.l.bf16 %v7423_v13  ;;  %v7430_v14 = vunpack.i.h.bf16 %v7428_v60  ;;  %s11549_s25 = sshll.u32 %s11794_s24, 3 }
 0x5fa   : > { %v7526_v1 = vpack.i.bf16 %v5081_v22, %v5078_v21  ;;  %v7531_v38 = vpack.i.bf16 %v5086_v44, %v11357_v19  ;;  %v5299_v19 = vsel %vm713_vm3, %v10968_v3, %v7420_v41  ;;  %v7429_v33 = vunpack.i.l.bf16 %v7428_v60  ;;  %s11795_s29 = scalar_lea.vmem [#allocation3], %s11549_s25  ;;  %s390_s13 = scalar_lea.vmem [#allocation5], %s11549_s25 }
 0x5fb   : > { %2507 = vxpose.xlu0.b32.start [1/16] (narrow) %v9437_v8, 8  ;;  %v5307_v50 = vsel %vm1988_vm4, %v5299_v19, %v7425_v20  ;;  %v7448_v13 = vpop.permute.xlu0 %7447  ;;  %s5544_s16 = sshll.u32 %s390_s13, 4  ;;  %s5545_s16 = int_to_ptr.vmem [resolvable:$true] %s5544_s16 }
 0x5fc   : > { %v7433_v7 = vpop.permute.xlu1 %7432  ;;  %p7618_p0 = scmp.lt.s32.totalorder %s5545_s16, %s7616_s1 }
 0x5fd   : > { %7522 = vrot.lane.b32.xlu1 %v7521_v55, %s11967_s30  ;;  %v7435_v56 = vunpack.i.h.bf16 %v7433_v7  ;;  %v7434_v27 = vunpack.i.l.bf16 %v7433_v7  ;;  %v7449_v55 = vunpack.i.l.bf16 %v7448_v13  ;;  %v12004_v7 = vld [vmem:[#allocation22_spill] sm:$0xff]  ;;  %s5510_s30 = sand.u32 1, %s7823_s21  }
 0x5fe   : > { %s11572_s24 = scalar_lea.sflag [#allocation6], %s5510_s30 }
 0x5ff   : > { %2508 = vxpose.xlu0.b32.cont [2/16] (narrow) %v9455_v34, 8 }
 0x600   : > { %v7438_v8 = vpop.permute.xlu1 %7437 }
 0x601   : > { %7527 = vrot.lane.b32.xlu1 %v7526_v1, %s11972_s15  ;;  %v7440_v34 = vunpack.i.h.bf16 %v7438_v8  ;;  %v7439_v59 = vunpack.i.l.bf16 %v7438_v8  ;;  %s11566_s15 = sshll.u32 %s7823_s21, 7 }
 0x602   : > { %s5542_s22 = scalar_lea.hbm %s11658_s10, %s11566_s15 }
 0x603   : > { %2509 = vxpose.xlu0.b32.cont [3/16] (narrow) %v9421_v62, 8  ;;  %v5298_v62 = vsel %vm713_vm3, %v10887_v25, %v7419_v32 }
 0x604   : > { %v7443_v52 = vpop.permute.xlu1 %7442  ;;  %v5306_v11 = vsel %vm1988_vm4, %v5298_v62, %v7424_v39 }
 0x605   : > { %7532 = vrot.lane.b32.xlu1 %v7531_v38, %s11996_s12  ;;  %v7445_v6 = vunpack.i.h.bf16 %v7443_v52  ;;  %v7444_v9 = vunpack.i.l.bf16 %v7443_v52  ;;  %v5314_v63 = vsel %vm2021_vm7, %v5306_v11, %v7439_v59 }
 0x607   : > { %2510 = vxpose.xlu0.b32.cont [4/16] (narrow) %v9448_v37, 8  ;;  %v5315_v37 = vsel %vm2021_vm7, %v5307_v50, %v7440_v34  ;;  %v5322_v25 = vsel %vm2054_vm8, %v5314_v63, %v7444_v9  ;;  %v12005_v9 = vld [vmem:[#allocation13_spill] sm:$0xff]  ;;  %v12006_v50 = vld [vmem:[#allocation24_spill] sm:$0xff] }
 0x608   : > { %v7453_v30 = vpop.permute.xlu1 %7452  ;;  %v5323_v3 = vsel %vm2054_vm8, %v5315_v37, %v7445_v6 }
 0x609   : > { %v7455_v45 = vunpack.i.h.bf16 %v7453_v30  ;;  %v7454_v40 = vunpack.i.l.bf16 %v7453_v30 }
 0x60b   : > { %2511 = vxpose.xlu0.b32.cont [5/16] (narrow) %v9578_v42, 8  ;;  %v5331_v5 = vsel %vm2087_vm9, %v5323_v3, %v7455_v45  ;;  %v5330_v23 = vsel %vm2087_vm9, %v5322_v25, %v7454_v40  ;;  %v7450_v42 = vunpack.i.h.bf16 %v7448_v13  ;;  %v12008_v25 = vld [vmem:[#allocation20_spill] sm:$0xff]  ;;  %v12009_v3 = vld [vmem:[#allocation54_spill] sm:$0xff] }
 0x60c   : > { %v5339_v12 = vsel %vm2120_vm10, %v5331_v5, %v7430_v14  ;;  %v5338_v2 = vsel %vm2120_vm10, %v5330_v23, %v7429_v33  ;;  %v12007_v14 = vld [vmem:[#allocation43_spill] sm:$0xff]  ;;  %v12011_v5 = vld [vmem:[#allocation53_spill] sm:$0xff] }
 0x60d   : > { %v5347_v60 = vsel %vm2153_vm11, %v5339_v12, %v7435_v56  ;;  %v5346_v53 = vsel %vm2153_vm11, %v5338_v2, %v7434_v27  ;;  %v12010_v56 = vld [vmem:[#allocation23_spill] sm:$0xff] }
 0x60e   : > { %v5354_v22 = vsel %vm2186_vm12, %v5346_v53, %v7449_v55  ;;  %v5355_v21 = vsel %vm2186_vm12, %v5347_v60, %v7450_v42  ;;  %v12012_v23 = vld [vmem:[#allocation27_spill] sm:$0xff]  ;;  %v12013_v42 = vld [vmem:[#allocation14_spill] sm:$0xff]  ;;  %v12016_v53 = vld [vmem:[#allocation25_spill] sm:$0xff] }
 0x60f   : > { %2512 = vxpose.xlu0.b32.cont [6/16] (narrow) %v9594_v10, 8  ;;  %v5361_v54 = vpack.c.bf16 %v5355_v21, %v5354_v22  ;;  %v12014_v12 = vld [vmem:[#allocation31_spill] sm:$0xff]  ;;  %v12017_v22 = vld [vmem:[#allocation42_spill] sm:$0xff] }
 0x610   : > { %v12015_v2 = vld [vmem:[#allocation19_spill] sm:$0xff] }
 0x611   : > { %5943 = vmatmul.mubr.msk.bf16.vlgmr.msra.gmra.mxu1 %vm2262_vm13, %v5361_v54  ;;  %v12018_v54 = vld [vmem:[#allocation30_spill] sm:$0xff] }
 0x613   : > { %2513 = vxpose.xlu0.b32.cont [7/16] (narrow) %v9572_v15, 8 }
 0x617   : > { %2514 = vxpose.xlu0.b32.cont [8/16] (narrow) %v9585_v17, 8 }
 0x61b   : > { %2515 = vxpose.xlu0.b32.cont [9/16] (narrow) %v9647_v49, 8 }
 0x61d   : > { %v7463_v15 = vpop.permute.xlu0 %7462 }
 0x61f   : > { %2516 = vxpose.xlu0.b32.cont [10/16] (narrow) %v9667_v0, 8 }
 0x623   : > { %2517 = vxpose.xlu0.b32.cont [11/16] (narrow) %v9641_v43, 8  ;;  %v7458_v43 = vpop.permute.xlu1 %7457 }
 0x624   : > { %v7459_v0 = vunpack.i.l.bf16 %v7458_v43 }
 0x627   : > { %2518 = vxpose.xlu0.b32.cont [12/16] (narrow) %v9656_v26, 8  ;;  %v7460_v26 = vunpack.i.h.bf16 %v7458_v43 }
 0x62b   : > { %2519 = vxpose.xlu0.b32.cont [13/16] (narrow) %v11956_v24, 8  ;;  %v7464_v24 = vunpack.i.l.bf16 %v7463_v15 }
 0x62e   : > { %2539 = vxpose.xlu1.b32.start [1/16] (narrow) %v11965_v31, 8  ;;  %v12001_v31 = vld [vmem:[#allocation26_spill] sm:$0xff] }
 0x62f   : > { %2520 = vxpose.xlu0.b32.cont [14/16] (narrow) %v11960_v61, 8 }
 0x632   : > { %2540 = vxpose.xlu1.b32.cont [2/16] (narrow) %v11970_v4, 8  ;;  %v12002_v4 = vld [vmem:[#allocation37_spill] sm:$0xff] }
 0x633   : > { %2521 = vxpose.xlu0.b32.cont [15/16] (narrow) %v11954_v36, 8  ;;  %v7465_v36 = vunpack.i.h.bf16 %v7463_v15  ;;  %v12019_v15 = vld [vmem:[#allocation16_spill] sm:$0xff] }
 0x636   : > { %2541 = vxpose.xlu1.b32.cont [3/16] (narrow) %v11963_v35, 8 }
 0x637   : > { %2522 = vxpose.xlu0.b32.end [16/16] (narrow) %v11958_v28, 8 }
 0x63a   : > { %2542 = vxpose.xlu1.b32.cont [4/16] (narrow) %v11968_v46, 8  ;;  %v5301_v46 = vsel %vm713_vm3, %v12001_v31, %v7460_v26  ;;  %v12021_v26 = vld [vmem:[#allocation17_spill] sm:$0xff] }
 0x63b   : > { %4303 = vxpose.xlu0.b32.start [1/16] (narrow) %v10603_v47, 8  ;;  %v7468_v17 = vpop.permute.xlu0 %7467 }
 0x63c   : > { %v7470_v41 = vunpack.i.h.bf16 %v7468_v17  ;;  %v7469_v32 = vunpack.i.l.bf16 %v7468_v17 }
 0x63e   : > { %2543 = vxpose.xlu1.b32.cont [5/16] (narrow) %v11976_v16, 8  ;;  %v12003_v16 = vld [vmem:[#allocation11_spill] sm:$0xff] }
 0x63f   : > { %4304 = vxpose.xlu0.b32.cont [2/16] (narrow) %v10632_v48, 8  ;;  %v7473_v10 = vpop.permute.xlu0 %7472 }
 0x640   : > { %v7475_v52 = vunpack.i.h.bf16 %v7473_v10  ;;  %v7474_v34 = vunpack.i.l.bf16 %v7473_v10  ;;  %v12020_v10 = vld [vmem:[#allocation33_spill] sm:$0xff] }
 0x642   : > { %2544 = vxpose.xlu1.b32.cont [6/16] (narrow) %v11980_v51, 8  ;;  %v5309_v51 = vsel %vm1988_vm4, %v5301_v46, %v7465_v36  ;;  %v12023_v46 = vld [vmem:[#allocation39_spill] sm:$0xff] }
 0x643   : > { %4305 = vxpose.xlu0.b32.cont [3/16] (narrow) %v10589_v29, 8  ;;  %v7478_v49 = vpop.permute.xlu0 %7477  ;;  %v5300_v29 = vsel %vm713_vm3, %v12002_v4, %v7459_v0 }
 0x644   : > { %v7480_v28 = vunpack.i.h.bf16 %v7478_v49  ;;  %v7479_v61 = vunpack.i.l.bf16 %v7478_v49 }
 0x646   : > { %2545 = vxpose.xlu1.b32.cont [7/16] (narrow) %v11974_v58, 8  ;;  %v5308_v58 = vsel %vm1988_vm4, %v5300_v29, %v7464_v24  ;;  %v5317_v44 = vsel %vm2021_vm7, %v5309_v51, %v7480_v28  ;;  %v12024_v29 = vld [vmem:[#allocation21_spill] sm:$0xff] }
 0x647   : > { %4306 = vxpose.xlu0.b32.cont [4/16] (narrow) %v10612_v18, 8  ;;  %v7483_v47 = vpop.permute.xlu0 %7482  ;;  %v5316_v1 = vsel %vm2021_vm7, %v5308_v58, %v7479_v61 }
 0x648   : > { %v7485_v35 = vunpack.i.h.bf16 %v7483_v47  ;;  %v7484_v48 = vunpack.i.l.bf16 %v7483_v47  ;;  %v12022_v47 = vld [vmem:[#allocation36_spill] sm:$0xff] }
 0x64a   : > { %2546 = vxpose.xlu1.b32.cont [8/16] (narrow) %v12003_v16, 8  ;;  %v5324_v20 = vsel %vm2054_vm8, %v5316_v1, %v7484_v48  ;;  %v5325_v39 = vsel %vm2054_vm8, %v5317_v44, %v7485_v35 }
 0x64b   : > { %4307 = vxpose.xlu0.b32.cont [5/16] (narrow) %v12004_v7, 8  ;;  %v7488_v18 = vpop.permute.xlu0 %7487  ;;  %v12025_v7 = vld [vmem:[#allocation32_spill] sm:$0xff] }
 0x64c   : > { %v7490_v8 = vunpack.i.h.bf16 %v7488_v18  ;;  %v7489_v38 = vunpack.i.l.bf16 %v7488_v18 }
 0x64e   : > { %v5332_v59 = vsel %vm2087_vm9, %v5324_v20, %v7489_v38  ;;  %v5333_v6 = vsel %vm2087_vm9, %v5325_v39, %v7490_v8  ;;  %2547 = vxpose.xlu1.b32.cont [9/16] (narrow) %v12005_v9, 8 }
 0x64f   : > { %v5340_v62 = vsel %vm2120_vm10, %v5332_v59, %v7469_v32  ;;  %v5341_v19 = vsel %vm2120_vm10, %v5333_v6, %v7470_v41  ;;  %4308 = vxpose.xlu0.b32.cont [6/16] (narrow) %v12006_v50, 8  ;;  %v7493_v11 = vpop.permute.xlu0 %7492  ;;  %v12026_v59 = vld [vmem:[#allocation15_spill] sm:$0xff] }
 0x650   : > { %v7495_v30 = vunpack.i.h.bf16 %v7493_v11  ;;  %v7494_v13 = vunpack.i.l.bf16 %v7493_v11  ;;  %v5348_v37 = vsel %vm2153_vm11, %v5340_v62, %v7474_v34  ;;  %v5349_v63 = vsel %vm2153_vm11, %v5341_v19, %v7475_v52  ;;  %v12027_v19 = vld [vmem:[#allocation34_spill] sm:$0xff] }
 0x652   : > { %v5356_v45 = vsel %vm2186_vm12, %v5348_v37, %v7494_v13  ;;  %v5357_v40 = vsel %vm2186_vm12, %v5349_v63, %v7495_v30  ;;  %2548 = vxpose.xlu1.b32.cont [10/16] (narrow) %v12007_v14, 8  ;;  %v12029_v14 = vld [vmem:[#allocation29_spill] sm:$0xff] }
 0x653   : > { %v5362_v33 = vpack.c.bf16 %v5357_v40, %v5356_v45  ;;  %4309 = vxpose.xlu0.b32.cont [7/16] (narrow) %v12008_v25, 8  ;;  %v12028_v45 = vld [vmem:[#allocation18_spill] sm:$0xff]  ;;  %v12031_v25 = vld [vmem:[#allocation28_spill] sm:$0xff] }
 0x655   : > { %5946 = vmatprep.mubr.msk.bf16.mxu1 %vm2262_vm13, %v5362_v33  ;;  %v12030_v33 = vld [vmem:[#allocation38_spill] sm:$0xff] }
 0x656   : > { %2549 = vxpose.xlu1.b32.cont [11/16] (narrow) %v12009_v3, 8  ;;  %v7498_v27 = vpop.permute.xlu1 %7497  ;;  %v12032_v3 = vld [vmem:[#allocation35_spill] sm:$0xff] }
 0x657   : > { %4310 = vxpose.xlu0.b32.cont [8/16] (narrow) %v12010_v56, 8  ;;  %v7500_v43 = vunpack.i.h.bf16 %v7498_v27  ;;  %v7499_v49 = vunpack.i.l.bf16 %v7498_v27  ;;  %v12033_v56 = vld [vmem:[#allocation41_spill] sm:$0xff]  ;;  %v12034_v27 = vld [vmem:[#allocation46_spill] sm:$0xff] }
 0x659   : > { %v5303_v31 = vsel %vm713_vm3, %v11347_v57, %v7500_v43  ;;  %v5302_v4 = vsel %vm713_vm3, %v12023_v46, %v7499_v49 }
 0x65a   : > { %2550 = vxpose.xlu1.b32.cont [12/16] (narrow) %v12011_v5, 8  ;;  %v12035_v5 = vld [vmem:[#allocation40_spill] sm:$0xff] }
 0x65b   : > { %4311 = vxpose.xlu0.b32.cont [9/16] (narrow) %v12012_v23, 8  ;;  %v7503_v55 = vpop.permute.xlu1 %7502  ;;  %v12036_v23 = vld [vmem:[#allocation44_spill] sm:$0xff] }
 0x65c   : > { %v7505_v0 = vunpack.i.h.bf16 %v7503_v55  ;;  %v7504_v36 = vunpack.i.l.bf16 %v7503_v55  ;;  %v12038_v55 = vld [vmem:[#allocation49_spill] sm:$0xff] }
 0x65e   : > { %2551 = vxpose.xlu1.b32.cont [13/16] (narrow) %v12013_v42, 8  ;;  %v5310_v16 = vsel %vm1988_vm4, %v5302_v4, %v7504_v36  ;;  %v5311_v51 = vsel %vm1988_vm4, %v5303_v31, %v7505_v0  ;;  %v12037_v42 = vld [vmem:[#allocation45_spill] sm:$0xff] }
 0x65f   : > { %4312 = vxpose.xlu0.b32.cont [10/16] (narrow) %v12014_v12, 8  ;;  %v12039_v12 = vld [vmem:[#allocation47_spill] sm:$0xff] }
 0x662   : > { %2552 = vxpose.xlu1.b32.cont [14/16] (narrow) %v12015_v2, 8  ;;  %v12040_v2 = vld [vmem:[#allocation48_spill] sm:$0xff] }
 0x663   : > { %v7508_v60 = vpop.permute.xlu1 %7507  ;;  %4313 = vxpose.xlu0.b32.cont [11/16] (narrow) %v12016_v53, 8 }
 0x664   : > { %v7510_v38 = vunpack.i.h.bf16 %v7508_v60  ;;  %v7509_v57 = vunpack.i.l.bf16 %v7508_v60 }
 0x666   : > { %2553 = vxpose.xlu1.b32.cont [15/16] (narrow) %v12017_v22, 8 }
 0x667   : > { %v7513_v21 = vpop.permute.xlu1 %7512  ;;  %4314 = vxpose.xlu0.b32.cont [12/16] (narrow) %v12018_v54, 8  ;;  %v11557_v54 = vld [vmem:[%s11656_s8] ss:$0 sm:$0xff] }
 0x668   : > { %v7515_v20 = vunpack.i.h.bf16 %v7513_v21  ;;  %v7514_v39 = vunpack.i.l.bf16 %v7513_v21 }
 0x66a   : > { %2554 = vxpose.xlu1.b32.end [16/16] (narrow) %v12019_v15, 8 }
 0x66b   : > { %v7518_v17 = vpop.permute.xlu1 %7517  ;;  %4315 = vxpose.xlu0.b32.cont [13/16] (narrow) %v12020_v10, 8 }
 0x66c   : > { %v7520_v28 = vunpack.i.h.bf16 %v7518_v17  ;;  %v7519_v61 = vunpack.i.l.bf16 %v7518_v17 }
 0x66e   : > { %4335 = vxpose.xlu1.b32.start [1/16] (narrow) %v12021_v26, 8  ;;  %v5318_v18 = vsel %vm2021_vm7, %v5310_v16, %v7519_v61  ;;  %v5319_v1 = vsel %vm2021_vm7, %v5311_v51, %v7520_v28 }
 0x66f   : > { %v7523_v24 = vpop.permute.xlu1 %7522  ;;  %4316 = vxpose.xlu0.b32.cont [14/16] (narrow) %v12022_v47, 8 }
 0x670   : > { %v7525_v35 = vunpack.i.h.bf16 %v7523_v24  ;;  %v7524_v48 = vunpack.i.l.bf16 %v7523_v24 }
 0x672   : > { %4336 = vxpose.xlu1.b32.cont [2/16] (narrow) %v12024_v29, 8  ;;  %v5326_v41 = vsel %vm2054_vm8, %v5318_v18, %v7524_v48  ;;  %v5327_v32 = vsel %vm2054_vm8, %v5319_v1, %v7525_v35 }
 0x673   : > { %v7528_v58 = vpop.permute.xlu1 %7527  ;;  %4317 = vxpose.xlu0.b32.cont [15/16] (narrow) %v12025_v7, 8 }
 0x674   : > { %v7530_v44 = vunpack.i.h.bf16 %v7528_v58  ;;  %v7529_v8 = vunpack.i.l.bf16 %v7528_v58 }
 0x676   : > { %v5334_v52 = vsel %vm2087_vm9, %v5326_v41, %v7529_v8  ;;  %v5335_v34 = vsel %vm2087_vm9, %v5327_v32, %v7530_v44  ;;  %4337 = vxpose.xlu1.b32.cont [3/16] (narrow) %v12026_v59, 8 }
 0x677   : > { %v5342_v6 = vsel %vm2120_vm10, %v5334_v52, %v7509_v57  ;;  %v5343_v9 = vsel %vm2120_vm10, %v5335_v34, %v7510_v38  ;;  %v7533_v62 = vpop.permute.xlu1 %7532  ;;  %4318 = vxpose.xlu0.b32.end [16/16] (narrow) %v12027_v19, 8  ;;  %v2523_v53 = vpop.trf.xlu0 }
 0x678   : > { %v7535_v50 = vunpack.i.h.bf16 %v7533_v62  ;;  %v7534_v11 = vunpack.i.l.bf16 %v7533_v62  ;;  %v5350_v30 = vsel %vm2153_vm11, %v5342_v6, %v7514_v39  ;;  %v5351_v13 = vsel %vm2153_vm11, %v5343_v9, %v7515_v20 }
 0x67a   : > { %v5358_v37 = vsel %vm2186_vm12, %v5350_v30, %v7534_v11  ;;  %v5359_v63 = vsel %vm2186_vm12, %v5351_v13, %v7535_v50  ;;  %4338 = vxpose.xlu1.b32.cont [4/16] (narrow) %v12028_v45, 8 }
 0x67b   : > { %v5363_v40 = vpack.c.bf16 %v5359_v63, %v5358_v37 }
 0x67d   : > { %5947 = vmatmul.mubr.msk.bf16.gmra.mxu1 %vm2262_vm13, %v5363_v40 }
 0x67e   : > { %4339 = vxpose.xlu1.b32.cont [5/16] (narrow) %v12029_v14, 8 }
 0x682   : > { %4340 = vxpose.xlu1.b32.cont [6/16] (narrow) %v12030_v33, 8 }
 0x686   : > { %4341 = vxpose.xlu1.b32.cont [7/16] (narrow) %v12031_v25, 8 }
 0x68a   : > { %4342 = vxpose.xlu1.b32.cont [8/16] (narrow) %v12032_v3, 8 }
 0x68e   : > { %4343 = vxpose.xlu1.b32.cont [9/16] (narrow) %v12033_v56, 8 }
 0x692   : > { %4344 = vxpose.xlu1.b32.cont [10/16] (narrow) %v12034_v27, 8 }
 0x696   : > { %4345 = vxpose.xlu1.b32.cont [11/16] (narrow) %v12035_v5, 8 }
 0x69a   : > { %4346 = vxpose.xlu1.b32.cont [12/16] (narrow) %v12036_v23, 8 }
 0x69e   : > { %4347 = vxpose.xlu1.b32.cont [13/16] (narrow) %v12037_v42, 8 }
 0x6a2   : > { %4348 = vxpose.xlu1.b32.cont [14/16] (narrow) %v12038_v55, 8 }
 0x6a6   : > { %4349 = vxpose.xlu1.b32.cont [15/16] (narrow) %v12039_v12, 8 }
 0x6aa   : > { %4350 = vxpose.xlu1.b32.end [16/16] (narrow) %v12040_v2, 8  ;;  %v2555_v60 = vpop.trf.xlu1 }
 0x6ab   : > { %v2573_v22 = vcombine.low %v2523_v53, %v2555_v60 }
 0x6ad   : > { %2575 = vst [vmem:[%s11795_s29] sm:$0xff] %v2573_v22  ;;  %s7611_s29 = scalar_lea.vmem %s5545_s16, 128 }
 0x6ae   : > { %p7612_p11 = scmp.ne.s32.totalorder %s5545_s16, %s7611_s29  ;;  %p7619_p1 = scmp.lt.s32.totalorder %s7617_s2, %s7611_s29 }
 0x6b0   : > { %p7613_p12 = pnand %p7612_p11, %p7842_p5  ;;  %p7620_p2 = por %p7619_p1, %p7618_p0 }
 0x6b2   : > { %p7614_p13 = pneg %p7613_p12 }
 0x6b4   : > { %p7621_p3 = pnand %p7620_p2, %p7614_p13 }
 0x6b7   : > { %v4319_v36 = vpop.trf.xlu0 }
 0x6d1   : > { %v5944_v21 = vpop.f32.mrf.mxu1 }
 0x6d2   : > { %v5449_v26 = vadd.f32 %v5944_v21, %v11557_v54 }
 0x6d3   : > { %v5440_v15 = vpop.f32.mrf.mxu1 }
 0x6d4   : > { %v5441_v17 = vadd.f32 %v11557_v54, %v5440_v15 }
 0x6d5   : > { %v5945_v10 = vpop.f32.mrf.mxu1 }
 0x6d6   : > { %5471 = vxpose.xlu0.b32.start [1/8] (short) (narrow) %v5441_v17, 8  ;;  %v5452_v0 = vadd.f32 %v5945_v10, %v11557_v54 }
 0x6d7   : > { %v5443_v43 = vpop.f32.mrf.mxu1 }
 0x6d8   : > { %v5444_v49 = vadd.f32 %v11557_v54, %v5443_v43 }
 0x6da   : > { %5472 = vxpose.xlu0.b32.cont [2/8] (short) (narrow) %v5444_v49, 8 }
 0x6de   : > { %5473 = vxpose.xlu0.b32.cont [3/8] (short) (narrow) %v5449_v26, 8 }
 0x6e2   : > { %5474 = vxpose.xlu0.b32.cont [4/8] (short) (narrow) %v5452_v0, 8 }
 0x6ea   : > { %v4351_v24 = vpop.trf.xlu1 }
 0x6eb   : > { %v4369_v47 = vcombine.low %v4319_v36, %v4351_v24 }
 0x6ed   : > { %4371 = vst [vmem:[%s390_s13] sm:$0xff] %v4369_v47 }
 0x6ee   : > { %7624 = shalt.err (!%p7621_p3)
}
 0x6ef   : > { %s7625_s21 = scalar_lea.hbm %s5542_s22, 128  ;;  %s7629_s12 = scalar_lea.hbm %s11658_s10, 256 }
 0x6f0   : > { %p7626_p4 = scmp.ne.s32.totalorder %s5542_s22, %s7625_s21  ;;  %p7630_p9 = scmp.lt.s32.totalorder %s5542_s22, %s11658_s10 }
 0x6f1   : > { %p7631_p10 = scmp.lt.s32.totalorder %s7629_s12, %s7625_s21 }
 0x6f2   : > { %p7627_p7 = pnand %p7626_p4, %p7842_p5 }
 0x6f3   : > { %p7632_p11 = por %p7631_p10, %p7630_p9 }
 0x6f4   : > { %p7628_p8 = pneg %p7627_p7 }
 0x6f6   : > { %p7633_p12 = pnand %p7632_p11, %p7628_p8 }
 0x6f8   : > { %7636 = shalt.err (!%p7633_p12)
}
 0x6f9   : > { %5956 = dma.vmem_to_hbm [thread:$0]  (%p7842_p5), %s5545_s16, 128, %s5542_s22, %s11572_s24  }
 0x6fa   : > { %s5528_s2 = scalar_lea.hbm %s11657_s9, %s11566_s15  ;;  %s12041_s29 = scalar_lea.vmem [#allocation3], %s11549_s25 }
 0x6fb   : > { %s5530_s13 = sshll.u32 %s12041_s29, 4  ;;  %s12042_s3 = sand.u32 1, %s7719_s18   ;;  %s5531_s13 = int_to_ptr.vmem [resolvable:$true] %s5530_s13 }
 0x6fc   : > { %s5506_s21 = scalar_lea.sflag [#allocation4], %s12042_s3  ;;  %s7637_s30 = scalar_lea.vmem %s5531_s13, 128 }
 0x6fd   : > { %p7638_p13 = scmp.ne.s32.totalorder %s5531_s13, %s7637_s30  ;;  %s7740_s12 = smov [#allocation3]  }
 0x6fe   : > { %s7641_s14 = sshll.u32 %s7740_s12, 4  ;;  %s7642_s14 = int_to_ptr.vmem [resolvable:$false] %s7641_s14 }
 0x6ff   : > { %p7639_p0 = pnand %p7638_p13, %p7842_p5  ;;  %s7643_s4 = scalar_lea.vmem %s7642_s14, 256 }
 0x700   : > { %p7644_p2 = scmp.lt.s32.totalorder %s5531_s13, %s7642_s14  ;;  %p7645_p3 = scmp.lt.s32.totalorder %s7643_s4, %s7637_s30 }
 0x701   : > { %p7640_p1 = pneg %p7639_p0 }
 0x702   : > { %p7646_p4 = por %p7645_p3, %p7644_p2 }
 0x704   : > { %p7647_p7 = pnand %p7646_p4, %p7640_p1 }
 0x706   : > { %7650 = shalt.err (!%p7647_p7)
}
 0x707   : > { %s7651_s16 = scalar_lea.hbm %s5528_s2, 128  ;;  %s7655_s1 = scalar_lea.hbm %s11657_s9, 256 }
 0x708   : > { %p7652_p8 = scmp.ne.s32.totalorder %s5528_s2, %s7651_s16  ;;  %p7656_p11 = scmp.lt.s32.totalorder %s5528_s2, %s11657_s9 }
 0x709   : > { %p7657_p12 = scmp.lt.s32.totalorder %s7655_s1, %s7651_s16 }
 0x70a   : > { %p7653_p9 = pnand %p7652_p8, %p7842_p5 }
 0x70b   : > { %p7658_p13 = por %p7657_p12, %p7656_p11 }
 0x70c   : > { %p7654_p10 = pneg %p7653_p9 }
 0x70e   : > { %p7659_p0 = pnand %p7658_p13, %p7654_p10 }
 0x710   : > { %7662 = shalt.err (!%p7659_p0)
}
 0x711   : > { %5955 = dma.vmem_to_hbm [thread:$0]  (%p7842_p5), %s5531_s13, 128, %s5528_s2, %s5506_s21   ;;  %vm5503_vm0 = vcmask 523264  }
 0x712   : > { %s397_s4 = scalar_lea.vmem [#allocation7], %s11549_s25  ;;  %s5555_s30 = scalar_lea.hbm %s11659_s11, %s11566_s15 }
 0x713   : > { %s5557_s2 = sshll.u32 %s397_s4, 4  ;;  %s7741_s14 = smov [#allocation7]   ;;  %s5558_s2 = int_to_ptr.vmem [resolvable:$true] %s5557_s2 }
 0x714   : > { %s7663_s12 = scalar_lea.vmem %s5558_s2, 128  ;;  %s7667_s16 = sshll.u32 %s7741_s14, 4  ;;  %s7668_s16 = int_to_ptr.vmem [resolvable:$false] %s7667_s16 }
 0x715   : > { %p7664_p1 = scmp.ne.s32.totalorder %s5558_s2, %s7663_s12  ;;  %s7669_s22 = scalar_lea.vmem %s7668_s16, 256 }
 0x716   : > { %p7670_p4 = scmp.lt.s32.totalorder %s5558_s2, %s7668_s16  ;;  %p7671_p7 = scmp.lt.s32.totalorder %s7669_s22, %s7663_s12 }
 0x717   : > { %p7665_p2 = pnand %p7664_p1, %p7842_p5 }
 0x718   : > { %p7672_p8 = por %p7671_p7, %p7670_p4 }
 0x719   : > { %p7666_p3 = pneg %p7665_p2 }
 0x71b   : > { %p7673_p9 = pnand %p7672_p8, %p7666_p3 }
 0x73d   : > { %v5948_v28 = vpop.f32.mrf.mxu1 }
 0x73e   : > { %v5465_v4 = vadd.f32 %v5948_v28, %v11557_v54 }
 0x73f   : > { %v5456_v61 = vpop.f32.mrf.mxu1 }
 0x740   : > { %v5457_v35 = vadd.f32 %v11557_v54, %v5456_v61 }
 0x741   : > { %v5949_v48 = vpop.f32.mrf.mxu1 }
 0x742   : > { %5475 = vxpose.xlu0.b32.cont [5/8] (short) (narrow) %v5457_v35, 8  ;;  %v5468_v29 = vadd.f32 %v5949_v48, %v11557_v54 }
 0x743   : > { %v5459_v31 = vpop.f32.mrf.mxu1 }
 0x744   : > { %v5460_v46 = vadd.f32 %v11557_v54, %v5459_v31 }
 0x746   : > { %5476 = vxpose.xlu0.b32.cont [6/8] (short) (narrow) %v5460_v46, 8 }
 0x74a   : > { %5477 = vxpose.xlu0.b32.cont [7/8] (short) (narrow) %v5465_v4, 8 }
 0x74e   : > { %5478 = vxpose.xlu0.b32.end [8/8] (short) (narrow) %v5468_v29, 8 }
 0x7ae   : > { %v5487_v16 = vpop.trf.xlu0 }
 0x7af   : > { %5504 = vst.msk [vmem:[%s397_s4] sm:$0xff] %vm5503_vm0, %v5487_v16 }
 0x7b0   : > { %7676 = shalt.err (!%p7673_p9)
}
 0x7b1   : > { %s7677_s25 = scalar_lea.hbm %s5555_s30, 128  ;;  %s7681_s1 = scalar_lea.hbm %s11659_s11, 256 }
 0x7b2   : > { %p7678_p10 = scmp.ne.s32.totalorder %s5555_s30, %s7677_s25  ;;  %p7682_p13 = scmp.lt.s32.totalorder %s5555_s30, %s11659_s11 }
 0x7b3   : > { %p7683_p0 = scmp.lt.s32.totalorder %s7681_s1, %s7677_s25 }
 0x7b4   : > { %p7679_p11 = pnand %p7678_p10, %p7842_p5 }
 0x7b5   : > { %p7684_p1 = por %p7683_p0, %p7682_p13 }
 0x7b6   : > { %p7680_p12 = pneg %p7679_p11 }
 0x7b8   : > { %p7685_p2 = pnand %p7684_p1, %p7680_p12 }
 0x7ba   : > { %7688 = shalt.err (!%p7685_p2)
}
 0x7bb   : > { %5957 = dma.vmem_to_hbm [thread:$0]  (%p7842_p5), %s5558_s2, 128, %s5555_s30, %s11572_s24  }
 0x7bc PF: > { %p5971_p3 = scmp.ge.s32.totalorder %s7727_s20, 2  ;;  %s5569_s4 = sand.u32 1, %s7715_s17  }
 0x7bd   : > { %s5570_s13 = scalar_lea.sflag [#allocation4], %s5569_s4 }
 0x7be   : > { %p5962_p4 = pnand %p5971_p3, %p7846_p6 }
 0x7c0   : > { %p5963_p7 = pneg %p5962_p4 }
 0x7c2   : > { %7706 = dma.done.wait (%p5963_p7), %s5570_s13, 128  }
 0x7c3   : > { %7708 = vsyncadd (%p5963_p7), %s5570_s13, 4294967168  ;;  %s12043_s21 = sadd.s32 4294967294, %s7727_s20  }
 0x7c4   : > { %s5578_s12 = sand.u32 1, %s12043_s21  }
 0x7c5   : > { %s5579_s14 = scalar_lea.sflag [#allocation6], %s5578_s12 }
 0x7c6   : > { %7710 = dma.done.wait (%p5963_p7), %s5579_s14, 256  }
 0x7c7   : > { %7712 = vsyncadd (%p5963_p7), %s5579_s14, 4294967040  ;;  %p25_p5 = scmp.ge.s32.totalorder %s7827_s23, 4   ;;  %s12044_s17 = smov %s7719_s18 }
 0x7c8   : > { %s12045_s18 = smov %s7723_s19  ;;  %s12046_s19 = smov %s7840_s26 }
 0x7c9   : > { %s12047_s20 = smov %s7827_s23  ;;  %27 = sbr.rel (!%p25_p5) target bundleno = 11 (0xb), region = 124 }
 0x7ce   :  { %5593 = vsyncpa [#allocation4], 1 }
 0x7cf   :  { %5595 = vsyncpa [#allocation4 + $0x1], 1 }
 0x7d0   :  { %5596 = vsyncpa [#allocation6], 1 }
 0x7d1   :  { %5598 = vsyncpa [#allocation6 + $0x1], 1 }

</bundles_post_ra>
